<compile_context>
chip_gen: v7x
topology: tpu7x:2x2x1
jax: 0.10.0
libtpu: 0.0.40
codegen_flags: <defaults>
</compile_context>

<pallas_src>
import jax
import jax.numpy as jnp
import numpy as np
from jax.experimental import pallas as pl
from jax.experimental.pallas import tpu as pltpu

EPS = 1e-5
HID = 128
N_ACTIONS = 6


def _round_up(x, m):
    return (x + m - 1) // m * m


# ----------------------------------------------------------------------------
# In-kernel building block: conv3x3 stride2 + bias + ReLU + (training) BN,
# on the (B*H, W*Cin) -> (B*Ho, Wo*Cout) "channel-on-lanes" slab layout.
# ----------------------------------------------------------------------------
def _conv_bn_relu_block(x, s_ref, kb_ref, bi_ref, g_ref, gamma_ref, beta_ref,
                        n_valid, pad):
    # Single fused selection matmul for all three kh taps (review item: fewer,
    # fatter MXU ops).  s is 0/1 so the bf16 storage is exact.
    s_all = s_ref[...].astype(jnp.float32)                  # (3*pad, B*H)
    rows_all = jnp.dot(s_all, x, preferred_element_type=jnp.float32)

    acc = None
    for kh in range(3):
        # Tile-aligned sublane slice (pad is a multiple of 8); padded rows are
        # dropped here, before bias/ReLU, so BN stats never see them.
        rows_kh = rows_all[kh * pad: kh * pad + n_valid, :]
        kb_kh = kb_ref[kh].astype(jnp.float32)              # (W*Cin, Wo*Cout)
        part = jnp.dot(rows_kh, kb_kh, preferred_element_type=jnp.float32)
        acc = part if acc is None else acc + part
    y = jnp.maximum(acc + bi_ref[...], 0.0)                 # (B*Ho, Wo*Cout) f32

    # One-pass BatchNorm (batch statistics, fresh torch module) -- the two
    # per-channel reductions share ONE 2-row matmul against G; the broadcast
    # back to the interleaved lane layout is a lane concatenation (no gt).
    cout = gamma_ref.shape[-1]
    wo = y.shape[1] // cout
    inv_count = 1.0 / float(n_valid * wo)
    sum1 = jnp.sum(y, axis=0, keepdims=True)                # (1, Wo*Cout)
    sum2 = jnp.sum(y * y, axis=0, keepdims=True)            # (1, Wo*Cout)
    red = jnp.dot(jnp.concatenate([sum1, sum2], axis=0),
                  g_ref[...].astype(jnp.float32),
                  preferred_element_type=jnp.float32)       # (2, Cout)
    mean = red[0:1, :] * inv_count
    var = red[1:2, :] * inv_count - mean * mean
    scale = gamma_ref[...] * jax.lax.rsqrt(var + EPS)       # (1, Cout)
    shift = beta_ref[...] - mean * scale
    scale_i = jnp.concatenate([scale] * wo, axis=1)         # (1, Wo*Cout)
    shift_i = jnp.concatenate([shift] * wo, axis=1)
    return y * scale_i + shift_i


# ----------------------------------------------------------------------------
# The fused forward kernel (single invocation, everything resident in VMEM).
# ----------------------------------------------------------------------------
def _fused_forward_kernel(
        x0_ref, h_ref, c_ref,
        sel0, kb0, bi0, g0, gm0, bt0,
        sel1, kb1_hbm, bi1, g1, gm1, bt1,
        sel2, kb2, bi2, g2, gm2, bt2,
        whcat_ref, mask_ref, rsum_ref, bh_ref,
        wg_ref, bg_ref, whead_ref, bhead_ref,
        out_ref,
        kb1_vmem, kb1_sem):
    B = h_ref.shape[0]
    H0 = x0_ref.shape[0] // B
    Ho0 = (H0 - 3) // 2 + 1
    Ho1 = (Ho0 - 3) // 2 + 1
    Ho2 = (Ho1 - 3) // 2 + 1

    # Overlap the largest weight's HBM->VMEM copy with all of layer 0.
    kb1_copy = pltpu.make_async_copy(kb1_hbm, kb1_vmem, kb1_sem)
    kb1_copy.start()

    # --- conv stack; activations never leave VMEM ---
    x = x0_ref[...]                                                   # (B*64, 64)
    x = _conv_bn_relu_block(x, sel0, kb0, bi0, g0, gm0, bt0,
                            n_valid=B * Ho0, pad=sel0.shape[0] // 3)  # (B*31, 31*32)
    kb1_copy.wait()
    x = _conv_bn_relu_block(x, sel1, kb1_vmem, bi1, g1, gm1, bt1,
                            n_valid=B * Ho1, pad=sel1.shape[0] // 3)  # (B*15, 15*32)
    x = _conv_bn_relu_block(x, sel2, kb2, bi2, g2, gm2, bt2,
                            n_valid=B * Ho2, pad=sel2.shape[0] // 3)  # (B*7, 7*8)

    # --- hid Linear (flatten folded into an ho-expanded weight + mask) ---
    z = jnp.dot(x, whcat_ref[...].astype(jnp.float32),
                preferred_element_type=jnp.float32)                   # (B*7, 7*128)
    z = z * mask_ref[...].astype(jnp.float32)
    n_blk = whcat_ref.shape[1] // HID                                 # = 7
    lat_rows = z[:, 0:HID]
    for hh in range(1, n_blk):
        lat_rows = lat_rows + z[:, hh * HID:(hh + 1) * HID]           # (B*7, 128)
    lat = jnp.dot(rsum_ref[...].astype(jnp.float32), lat_rows,
                  preferred_element_type=jnp.float32) + bh_ref[...]   # (B, 128)

    # --- LSTMCell: one fused K=256 gate matmul, PyTorch (i,f,g,o) order ---
    zc = jnp.concatenate([lat, h_ref[...]], axis=-1)                  # (B, 256)
    gates = jnp.dot(zc, wg_ref[...].astype(jnp.float32),
                    preferred_element_type=jnp.float32) + bg_ref[...]
    i_g = jax.nn.sigmoid(gates[:, 0 * HID:1 * HID])
    f_g = jax.nn.sigmoid(gates[:, 1 * HID:2 * HID])
    g_g = jnp.tanh(gates[:, 2 * HID:3 * HID])
    o_g = jax.nn.sigmoid(gates[:, 3 * HID:4 * HID])
    c_new = f_g * c_ref[...] + i_g * g_g
    h_new = o_g * jnp.tanh(c_new)

    # --- merged logits/value head + single lane-dense (B, 384) output slab ---
    head = jnp.dot(h_new, whead_ref[...].astype(jnp.float32),
                   preferred_element_type=jnp.float32) + bhead_ref[...]
    out_ref[...] = jnp.concatenate([h_new, c_new, head], axis=-1)


# ----------------------------------------------------------------------------
# One-time parameter preparation (banded conv weights, fused selections,
# flatten-folded hid weight, fused LSTM / head weights).  bf16 for big tensors.
# ----------------------------------------------------------------------------
def prepare_params(params, batch_size):
    B = batch_size
    prep = {}
    layer_cfg = [
        ("conv0_w", "conv0_b", "bn1_g", "bn1_b", 1, 64, 64, 32),
        ("conv1_w", "conv1_b", "bn2_g", "bn2_b", 32, 31, 31, 32),
        ("conv2_w", "conv2_b", "bn3_g", "bn3_b", 32, 15, 15, 8),
    ]
    for li, (wk, bk, gk, bek, Cin, H, W, Cout) in enumerate(layer_cfg):
        Ho = (H - 3) // 2 + 1
        Wo = (W - 3) // 2 + 1
        w = np.asarray(params[wk], np.float32)                # (Cout, Cin, 3, 3)

        # Banded weight: kb[kh, (2*wo+kw)*Cin + cin, wo*Cout + co] = w[co,cin,kh,kw]
        kb = np.zeros((3, W * Cin, Wo * Cout), np.float32)
        for kh in range(3):
            for kw in range(3):
                for wo in range(Wo):
                    wcol = 2 * wo + kw
                    kb[kh, wcol * Cin:(wcol + 1) * Cin,
                       wo * Cout:(wo + 1) * Cout] = w[:, :, kh, kw].T

        # Fused row-selection matrix: kh block padded to a multiple of 8 rows.
        pad = _round_up(B * Ho, 8)
        S = np.zeros((3 * pad, B * H), np.float32)
        for kh in range(3):
            for b in range(B):
                for ho in range(Ho):
                    S[kh * pad + b * Ho + ho, b * H + 2 * ho + kh] = 1.0

        G = np.tile(np.eye(Cout, dtype=np.float32), (Wo, 1))  # (Wo*Cout, Cout)
        bias_row = np.tile(np.asarray(params[bk], np.float32), Wo)[None, :]

        prep[f"kb{li}"] = jnp.asarray(kb, jnp.bfloat16)
        prep[f"s{li}"] = jnp.asarray(S, jnp.bfloat16)
        prep[f"bi{li}"] = jnp.asarray(bias_row)
        prep[f"g{li}"] = jnp.asarray(G, jnp.bfloat16)
        prep[f"gam{li}"] = jnp.asarray(np.asarray(params[gk], np.float32)[None, :])
        prep[f"bet{li}"] = jnp.asarray(np.asarray(params[bek], np.float32)[None, :])

    # hid Linear: torch flattens (C, H, W); re-layout to (ho, wo*8+co, k), then
    # expand the ho axis into 128-wide lane blocks (whcat[j, ho*128 + k]).
    hw = np.asarray(params["hid_w"], np.float32).reshape(HID, 8, 7, 7)   # (k,co,ho,wo)
    wh = np.transpose(hw, (2, 3, 1, 0)).reshape(7, 7 * 8, HID)           # (ho, j, k)
    whcat = np.transpose(wh, (1, 0, 2)).reshape(7 * 8, 7 * HID)          # (j, ho*128+k)
    prep["whcat"] = jnp.asarray(whcat, jnp.bfloat16)
    prep["bh"] = jnp.asarray(np.asarray(params["hid_b"], np.float32)[None, :])

    # Mask picking the matching ho block per (b, ho) row, and the per-batch
    # row-fold matrix.
    mask = np.zeros((B * 7, 7 * HID), np.float32)
    for b in range(B):
        for ho in range(7):
            mask[b * 7 + ho, ho * HID:(ho + 1) * HID] = 1.0
    prep["mask"] = jnp.asarray(mask, jnp.bfloat16)

    rsum = np.zeros((B, B * 7), np.float32)
    for b in range(B):
        rsum[b, b * 7:(b + 1) * 7] = 1.0
    prep["rsum"] = jnp.asarray(rsum, jnp.bfloat16)

    # LSTM: fuse input/hidden weights -> (256, 512); (i,f,g,o) order preserved.
    wg = np.concatenate([np.asarray(params["w_ih"], np.float32).T,
                         np.asarray(params["w_hh"], np.float32).T], axis=0)
    prep["wg"] = jnp.asarray(wg, jnp.bfloat16)
    prep["bg"] = jnp.asarray((np.asarray(params["b_ih"], np.float32)
                              + np.asarray(params["b_hh"], np.float32))[None, :])

    # Merged logits/value head, zero-padded to 128 output lanes.
    whead = np.zeros((HID, HID), np.float32)
    whead[:, :N_ACTIONS] = np.asarray(params["logits_w"], np.float32).T
    whead[:, N_ACTIONS:N_ACTIONS + 1] = np.asarray(params["value_w"], np.float32).T
    bhead = np.zeros((1, HID), np.float32)
    bhead[0, :N_ACTIONS] = np.asarray(params["logits_b"], np.float32)
    bhead[0, N_ACTIONS] = float(np.asarray(params["value_b"], np.float32)[0])
    prep["whead"] = jnp.asarray(whead, jnp.bfloat16)
    prep["bhead"] = jnp.asarray(bhead)
    return prep


# ----------------------------------------------------------------------------
# Forward pass: one no-grid pallas_call, single-buffered VMEM residency.
# ----------------------------------------------------------------------------
_WEIGHT_ORDER = ["s0", "kb0", "bi0", "g0", "gam0", "bet0",
                 "s1", "kb1", "bi1", "g1", "gam1", "bet1",
                 "s2", "kb2", "bi2", "g2", "gam2", "bet2",
                 "whcat", "mask", "rsum", "bh",
                 "wg", "bg", "whead", "bhead"]


def forward_pallas(prep, prev_memory_state, obs_t):
    h, c = prev_memory_state
    B, C, H, W = obs_t.shape
    # im_channels == 1, so NCHW -> (B*H, W*C) is a pure reshape (no transpose).
    x0 = obs_t.reshape(B * H, W * C)

    weights = [prep[n] for n in _WEIGHT_ORDER]
    args = (x0, h, c, *weights)

    vmem = pl.BlockSpec(memory_space=pltpu.MemorySpace.VMEM)
    hbm = pl.BlockSpec(memory_space=pl.ANY)      # kb1 stays in HBM; manual DMA
    in_specs = [vmem, vmem, vmem] + [hbm if n == "kb1" else vmem
                                     for n in _WEIGHT_ORDER]

    out = pl.pallas_call(
        _fused_forward_kernel,
        out_shape=jax.ShapeDtypeStruct((B, 3 * HID), jnp.float32),
        in_specs=in_specs,
        out_specs=vmem,
        scratch_shapes=[
            pltpu.VMEM(prep["kb1"].shape, prep["kb1"].dtype),   # kb1 landing buf
            pltpu.SemaphoreType.DMA(()),
        ],
        compiler_params=pltpu.CompilerParams(
            vmem_limit_bytes=32 * 1024 * 1024),
    )(*args)

    h_new = out[:, 0 * HID:1 * HID]
    c_new = out[:, 1 * HID:2 * HID]
    logits = out[:, 2 * HID:2 * HID + N_ACTIONS]
    value = out[:, 2 * HID + N_ACTIONS:2 * HID + N_ACTIONS + 1]
    return (h_new, c_new), (logits, value)


# ----------------------------------------------------------------------------
# Pure-JAX reference (straightforward im2col formulation) for correctness.
# ----------------------------------------------------------------------------
def _im2col_k3s2(x):
    B, C, H, W = x.shape
    Ho = (H - 3) // 2 + 1
    Wo = (W - 3) // 2 + 1
    cols = []
    for kh in range(3):
        for kw in range(3):
            cols.append(
                x[:, :, kh:kh + 2 * (Ho - 1) + 1:2, kw:kw + 2 * (Wo - 1) + 1:2])
    p = jnp.stack(cols, axis=0).reshape(3, 3, B, C, Ho, Wo)
    p = p.transpose(2, 4, 5, 3, 0, 1).reshape(B * Ho * Wo, C * 9)
    return p, Ho, Wo


def forward_ref(params, prev_memory_state, obs_t):
    hp = jax.lax.Precision.HIGHEST
    h, c = prev_memory_state
    B = obs_t.shape[0]
    x = obs_t
    for (wk, bk, gk, bek, cout) in (
        ("conv0_w", "conv0_b", "bn1_g", "bn1_b", 32),
        ("conv1_w", "conv1_b", "bn2_g", "bn2_b", 32),
        ("conv2_w", "conv2_b", "bn3_g", "bn3_b", 8),
    ):
        patches, Ho, Wo = _im2col_k3s2(x)
        y = jnp.dot(patches, params[wk].reshape(cout, -1).T,
                    precision=hp) + params[bk][None, :]
        y = jnp.maximum(y, 0.0)
        mean = jnp.mean(y, axis=0, keepdims=True)
        var = jnp.mean((y - mean) ** 2, axis=0, keepdims=True)
        y = (y - mean) / jnp.sqrt(var + EPS) * params[gk][None, :] \
            + params[bek][None, :]
        x = y.reshape(B, Ho, Wo, cout).transpose(0, 3, 1, 2)

    flat = x.reshape(B, -1)
    lat = jnp.dot(flat, params["hid_w"].T, precision=hp) + params["hid_b"]
    gates = (jnp.dot(lat, params["w_ih"].T, precision=hp) + params["b_ih"]
             + jnp.dot(h, params["w_hh"].T, precision=hp) + params["b_hh"])
    i_g = jax.nn.sigmoid(gates[:, 0 * HID:1 * HID])
    f_g = jax.nn.sigmoid(gates[:, 1 * HID:2 * HID])
    g_g = jnp.tanh(gates[:, 2 * HID:3 * HID])
    o_g = jax.nn.sigmoid(gates[:, 3 * HID:4 * HID])
    c_new = f_g * c + i_g * g_g
    h_new = o_g * jnp.tanh(c_new)
    logits = jnp.dot(h_new, params["logits_w"].T, precision=hp) + params["logits_b"]
    value = jnp.dot(h_new, params["value_w"].T, precision=hp) + params["value_b"]
    return (h_new, c_new), (logits, value)


# ----------------------------------------------------------------------------
# Deterministic parameter init (shapes from the torch module's __init__).
# ----------------------------------------------------------------------------
def init_params(key):
    ks = jax.random.split(key, 16)
    f32 = jnp.float32
    p = {
        "conv0_w": 0.2 * jax.random.normal(ks[0], (32, 1, 3, 3), f32),
        "conv0_b": 0.1 * jax.random.normal(ks[1], (32,), f32),
        "bn1_g": jnp.ones((32,), f32), "bn1_b": jnp.zeros((32,), f32),
        "conv1_w": 0.06 * jax.random.normal(ks[2], (32, 32, 3, 3), f32),
        "conv1_b": 0.1 * jax.random.normal(ks[3], (32,), f32),
        "bn2_g": jnp.ones((32,), f32), "bn2_b": jnp.zeros((32,), f32),
        "conv2_w": 0.06 * jax.random.normal(ks[4], (8, 32, 3, 3), f32),
        "conv2_b": 0.1 * jax.random.normal(ks[5], (8,), f32),
        "bn3_g": jnp.ones((8,), f32), "bn3_b": jnp.zeros((8,), f32),
        "hid_w": 0.05 * jax.random.normal(ks[6], (128, 392), f32),
        "hid_b": 0.05 * jax.random.normal(ks[7], (128,), f32),
        "w_ih": 0.08 * jax.random.normal(ks[8], (4 * 128, 128), f32),
        "w_hh": 0.08 * jax.random.normal(ks[9], (4 * 128, 128), f32),
        "b_ih": 0.05 * jax.random.normal(ks[10], (4 * 128,), f32),
        "b_hh": 0.05 * jax.random.normal(ks[11], (4 * 128,), f32),
        "logits_w": 0.08 * jax.random.normal(ks[12], (N_ACTIONS, 128), f32),
        "logits_b": 0.05 * jax.random.normal(ks[13], (N_ACTIONS,), f32),
        "value_w": 0.08 * jax.random.normal(ks[14], (1, 128), f32),
        "value_b": 0.05 * jax.random.normal(ks[15], (1,), f32),
    }
    return p


if __name__ == "__main__":
    key = jax.random.PRNGKey(0)
    pkey, okey, hkey, ckey = jax.random.split(key, 4)
    params = init_params(pkey)

    # 64x64 input -> 31 -> 15 -> 7 spatial, 8*7*7 = 392 flatten (matches hid).
    B = 2
    obs_t = jax.random.normal(okey, (B, 1, 64, 64), jnp.float32)
    h0 = 0.1 * jax.random.normal(hkey, (B, HID), jnp.float32)
    c0 = 0.1 * jax.random.normal(ckey, (B, HID), jnp.float32)

    prep = prepare_params(params, B)                 # one-time weight prep
    forward_jit = jax.jit(forward_pallas)

    (h_new, c_new), (logits, value) = forward_jit(prep, (h0, c0), obs_t)
    jax.block_until_ready((h_new, c_new, logits, value))

    (h_r, c_r), (l_r, v_r) = forward_ref(params, (h0, c0), obs_t)
    # Tolerance covers bf16 weight storage + default-precision MXU rounding.
    for got, ref in ((h_new, h_r), (c_new, c_r), (logits, l_r), (value, v_r)):
        assert got.shape == ref.shape
        err = float(jnp.max(jnp.abs(got - ref)))
        assert err < 2e-2, err

    print("KERNEL_OK")
</pallas_src>

<mosaic_0001>
module attributes {stable_mosaic.version = 11 : i64} {
  func.func @_fused_forward_kernel(%arg0: memref<128x64xf32, #tpu.memory_space<vmem>>, %arg1: memref<2x128xf32, #tpu.memory_space<vmem>>, %arg2: memref<2x128xf32, #tpu.memory_space<vmem>>, %arg3: memref<192x128xbf16, #tpu.memory_space<vmem>>, %arg4: memref<3x64x992xbf16, #tpu.memory_space<vmem>>, %arg5: memref<1x992xf32, #tpu.memory_space<vmem>>, %arg6: memref<992x32xbf16, #tpu.memory_space<vmem>>, %arg7: memref<1x32xf32, #tpu.memory_space<vmem>>, %arg8: memref<1x32xf32, #tpu.memory_space<vmem>>, %arg9: memref<96x62xbf16, #tpu.memory_space<vmem>>, %arg10: memref<3x992x480xbf16, #tpu.memory_space<any>>, %arg11: memref<1x480xf32, #tpu.memory_space<vmem>>, %arg12: memref<480x32xbf16, #tpu.memory_space<vmem>>, %arg13: memref<1x32xf32, #tpu.memory_space<vmem>>, %arg14: memref<1x32xf32, #tpu.memory_space<vmem>>, %arg15: memref<48x30xbf16, #tpu.memory_space<vmem>>, %arg16: memref<3x480x56xbf16, #tpu.memory_space<vmem>>, %arg17: memref<1x56xf32, #tpu.memory_space<vmem>>, %arg18: memref<56x8xbf16, #tpu.memory_space<vmem>>, %arg19: memref<1x8xf32, #tpu.memory_space<vmem>>, %arg20: memref<1x8xf32, #tpu.memory_space<vmem>>, %arg21: memref<56x896xbf16, #tpu.memory_space<vmem>>, %arg22: memref<14x896xbf16, #tpu.memory_space<vmem>>, %arg23: memref<2x14xbf16, #tpu.memory_space<vmem>>, %arg24: memref<1x128xf32, #tpu.memory_space<vmem>>, %arg25: memref<256x512xbf16, #tpu.memory_space<vmem>>, %arg26: memref<1x512xf32, #tpu.memory_space<vmem>>, %arg27: memref<128x128xbf16, #tpu.memory_space<vmem>>, %arg28: memref<1x128xf32, #tpu.memory_space<vmem>>, %arg29: memref<2x384xf32, #tpu.memory_space<vmem>>, %arg30: memref<3x992x480xbf16, #tpu.memory_space<vmem>>, %arg31: memref<!tpu.dma_semaphore, #tpu.memory_space<semaphore_mem>>) attributes {dimension_semantics = [], scalar_prefetch = 0 : i64, scratch_operands = 2 : i64, tpu.core_type = #tpu.core_type<tc>} {
    tpu.enqueue_dma source(%arg10 : memref<3x992x480xbf16, #tpu.memory_space<any>>) target(%arg30 : memref<3x992x480xbf16, #tpu.memory_space<vmem>>) target_semaphore(%arg31 : memref<!tpu.dma_semaphore, #tpu.memory_space<semaphore_mem>>)
    %c0 = arith.constant 0 : index
    %c0_0 = arith.constant 0 : index
    %0 = vector.load %arg0[%c0, %c0_0] : memref<128x64xf32, #tpu.memory_space<vmem>>, vector<128x64xf32>
    %c0_1 = arith.constant 0 : index
    %c0_2 = arith.constant 0 : index
    %1 = vector.load %arg3[%c0_1, %c0_2] : memref<192x128xbf16, #tpu.memory_space<vmem>>, vector<192x128xbf16>
    %2 = arith.extf %1 : vector<192x128xbf16> to vector<192x128xf32>
    %cst = arith.constant dense<0.000000e+00> : vector<192x64xf32>
    %3 = tpu.matmul %2, %0, %cst {dimension_numbers = #tpu.dot_dimension_numbers<[1], [0], [0], [1], [0, 0, 1, 1], [], []>} : vector<192x128xf32>, vector<128x64xf32>, vector<192x64xf32> -> vector<192x64xf32>
    %4 = vector.extract_strided_slice %3 {offsets = [0, 0], sizes = [62, 64], strides = [1, 1]} : vector<192x64xf32> to vector<62x64xf32>
    %c0_3 = arith.constant 0 : index
    %c0_4 = arith.constant 0 : index
    %c0_5 = arith.constant 0 : index
    %5 = vector.load %arg4[%c0_3, %c0_4, %c0_5] : memref<3x64x992xbf16, #tpu.memory_space<vmem>>, vector<1x64x992xbf16>
    %6 = vector.shape_cast %5 : vector<1x64x992xbf16> to vector<64x992xbf16>
    %7 = arith.extf %6 : vector<64x992xbf16> to vector<64x992xf32>
    %cst_6 = arith.constant dense<0.000000e+00> : vector<62x992xf32>
    %8 = tpu.matmul %4, %7, %cst_6 {dimension_numbers = #tpu.dot_dimension_numbers<[1], [0], [0], [1], [0, 0, 1, 1], [], []>} : vector<62x64xf32>, vector<64x992xf32>, vector<62x992xf32> -> vector<62x992xf32>
    %9 = vector.extract_strided_slice %3 {offsets = [64, 0], sizes = [62, 64], strides = [1, 1]} : vector<192x64xf32> to vector<62x64xf32>
    %c1 = arith.constant 1 : index
    %c0_7 = arith.constant 0 : index
    %c0_8 = arith.constant 0 : index
    %10 = vector.load %arg4[%c1, %c0_7, %c0_8] : memref<3x64x992xbf16, #tpu.memory_space<vmem>>, vector<1x64x992xbf16>
    %11 = vector.shape_cast %10 : vector<1x64x992xbf16> to vector<64x992xbf16>
    %12 = arith.extf %11 : vector<64x992xbf16> to vector<64x992xf32>
    %cst_9 = arith.constant dense<0.000000e+00> : vector<62x992xf32>
    %13 = tpu.matmul %9, %12, %cst_9 {dimension_numbers = #tpu.dot_dimension_numbers<[1], [0], [0], [1], [0, 0, 1, 1], [], []>} : vector<62x64xf32>, vector<64x992xf32>, vector<62x992xf32> -> vector<62x992xf32>
    %14 = arith.addf %8, %13 : vector<62x992xf32>
    %15 = vector.extract_strided_slice %3 {offsets = [128, 0], sizes = [62, 64], strides = [1, 1]} : vector<192x64xf32> to vector<62x64xf32>
    %c2 = arith.constant 2 : index
    %c0_10 = arith.constant 0 : index
    %c0_11 = arith.constant 0 : index
    %16 = vector.load %arg4[%c2, %c0_10, %c0_11] : memref<3x64x992xbf16, #tpu.memory_space<vmem>>, vector<1x64x992xbf16>
    %17 = vector.shape_cast %16 : vector<1x64x992xbf16> to vector<64x992xbf16>
    %18 = arith.extf %17 : vector<64x992xbf16> to vector<64x992xf32>
    %cst_12 = arith.constant dense<0.000000e+00> : vector<62x992xf32>
    %19 = tpu.matmul %15, %18, %cst_12 {dimension_numbers = #tpu.dot_dimension_numbers<[1], [0], [0], [1], [0, 0, 1, 1], [], []>} : vector<62x64xf32>, vector<64x992xf32>, vector<62x992xf32> -> vector<62x992xf32>
    %20 = arith.addf %14, %19 : vector<62x992xf32>
    %c0_13 = arith.constant 0 : index
    %c0_14 = arith.constant 0 : index
    %21 = vector.load %arg5[%c0_13, %c0_14] : memref<1x992xf32, #tpu.memory_space<vmem>>, vector<1x992xf32>
    %22 = vector.broadcast %21 : vector<1x992xf32> to vector<62x992xf32>
    %23 = arith.addf %20, %22 : vector<62x992xf32>
    %cst_15 = arith.constant 0.000000e+00 : f32
    %24 = vector.broadcast %cst_15 : f32 to vector<62x992xf32>
    %25 = arith.maximumf %23, %24 : vector<62x992xf32>
    %cst_16 = arith.constant dense<0.000000e+00> : vector<992xf32>
    %26 = vector.multi_reduction <add>, %25, %cst_16 [0] : vector<62x992xf32> to vector<992xf32>
    %27 = vector.shape_cast %26 : vector<992xf32> to vector<1x992xf32>
    %28 = arith.mulf %25, %25 : vector<62x992xf32>
    %cst_17 = arith.constant dense<0.000000e+00> : vector<992xf32>
    %29 = vector.multi_reduction <add>, %28, %cst_17 [0] : vector<62x992xf32> to vector<992xf32>
    %30 = vector.shape_cast %29 : vector<992xf32> to vector<1x992xf32>
    %31 = tpu.concatenate %27, %30 in 0 : vector<1x992xf32>, vector<1x992xf32> -> vector<2x992xf32>
    %c0_18 = arith.constant 0 : index
    %c0_19 = arith.constant 0 : index
    %32 = vector.load %arg6[%c0_18, %c0_19] : memref<992x32xbf16, #tpu.memory_space<vmem>>, vector<992x32xbf16>
    %33 = arith.extf %32 : vector<992x32xbf16> to vector<992x32xf32>
    %cst_20 = arith.constant dense<0.000000e+00> : vector<2x32xf32>
    %34 = tpu.matmul %31, %33, %cst_20 {dimension_numbers = #tpu.dot_dimension_numbers<[1], [0], [0], [1], [0, 0, 1, 1], [], []>} : vector<2x992xf32>, vector<992x32xf32>, vector<2x32xf32> -> vector<2x32xf32>
    %35 = vector.extract_strided_slice %34 {offsets = [0, 0], sizes = [1, 32], strides = [1, 1]} : vector<2x32xf32> to vector<1x32xf32>
    %cst_21 = arith.constant 5.20291389E-4 : f32
    %36 = vector.broadcast %cst_21 : f32 to vector<1x32xf32>
    %37 = arith.mulf %35, %36 : vector<1x32xf32>
    %38 = vector.extract_strided_slice %34 {offsets = [1, 0], sizes = [1, 32], strides = [1, 1]} : vector<2x32xf32> to vector<1x32xf32>
    %cst_22 = arith.constant 5.20291389E-4 : f32
    %39 = vector.broadcast %cst_22 : f32 to vector<1x32xf32>
    %40 = arith.mulf %38, %39 : vector<1x32xf32>
    %41 = arith.mulf %37, %37 : vector<1x32xf32>
    %42 = arith.subf %40, %41 : vector<1x32xf32>
    %c0_23 = arith.constant 0 : index
    %c0_24 = arith.constant 0 : index
    %43 = vector.load %arg7[%c0_23, %c0_24] : memref<1x32xf32, #tpu.memory_space<vmem>>, vector<1x32xf32>
    %cst_25 = arith.constant 9.99999974E-6 : f32
    %44 = vector.broadcast %cst_25 : f32 to vector<1x32xf32>
    %45 = arith.addf %42, %44 : vector<1x32xf32>
    %46 = math.rsqrt %45 : vector<1x32xf32>
    %47 = arith.mulf %43, %46 : vector<1x32xf32>
    %c0_26 = arith.constant 0 : index
    %c0_27 = arith.constant 0 : index
    %48 = vector.load %arg8[%c0_26, %c0_27] : memref<1x32xf32, #tpu.memory_space<vmem>>, vector<1x32xf32>
    %49 = arith.mulf %37, %47 : vector<1x32xf32>
    %50 = arith.subf %48, %49 : vector<1x32xf32>
    %51 = tpu.concatenate %47, %47, %47, %47, %47, %47, %47, %47, %47, %47, %47, %47, %47, %47, %47, %47 in 1 : vector<1x32xf32>, vector<1x32xf32>, vector<1x32xf32>, vector<1x32xf32>, vector<1x32xf32>, vector<1x32xf32>, vector<1x32xf32>, vector<1x32xf32>, vector<1x32xf32>, vector<1x32xf32>, vector<1x32xf32>, vector<1x32xf32>, vector<1x32xf32>, vector<1x32xf32>, vector<1x32xf32>, vector<1x32xf32> -> vector<1x512xf32>
    %52 = tpu.concatenate %47, %47, %47, %47, %47, %47, %47, %47, %47, %47, %47, %47, %47, %47, %47 in 1 : vector<1x32xf32>, vector<1x32xf32>, vector<1x32xf32>, vector<1x32xf32>, vector<1x32xf32>, vector<1x32xf32>, vector<1x32xf32>, vector<1x32xf32>, vector<1x32xf32>, vector<1x32xf32>, vector<1x32xf32>, vector<1x32xf32>, vector<1x32xf32>, vector<1x32xf32>, vector<1x32xf32> -> vector<1x480xf32>
    %53 = tpu.concatenate %51, %52 in 1 : vector<1x512xf32>, vector<1x480xf32> -> vector<1x992xf32>
    %54 = tpu.concatenate %50, %50, %50, %50, %50, %50, %50, %50, %50, %50, %50, %50, %50, %50, %50, %50 in 1 : vector<1x32xf32>, vector<1x32xf32>, vector<1x32xf32>, vector<1x32xf32>, vector<1x32xf32>, vector<1x32xf32>, vector<1x32xf32>, vector<1x32xf32>, vector<1x32xf32>, vector<1x32xf32>, vector<1x32xf32>, vector<1x32xf32>, vector<1x32xf32>, vector<1x32xf32>, vector<1x32xf32>, vector<1x32xf32> -> vector<1x512xf32>
    %55 = tpu.concatenate %50, %50, %50, %50, %50, %50, %50, %50, %50, %50, %50, %50, %50, %50, %50 in 1 : vector<1x32xf32>, vector<1x32xf32>, vector<1x32xf32>, vector<1x32xf32>, vector<1x32xf32>, vector<1x32xf32>, vector<1x32xf32>, vector<1x32xf32>, vector<1x32xf32>, vector<1x32xf32>, vector<1x32xf32>, vector<1x32xf32>, vector<1x32xf32>, vector<1x32xf32>, vector<1x32xf32> -> vector<1x480xf32>
    %56 = tpu.concatenate %54, %55 in 1 : vector<1x512xf32>, vector<1x480xf32> -> vector<1x992xf32>
    %57 = vector.broadcast %53 : vector<1x992xf32> to vector<62x992xf32>
    %58 = arith.mulf %25, %57 : vector<62x992xf32>
    %59 = vector.broadcast %56 : vector<1x992xf32> to vector<62x992xf32>
    %60 = arith.addf %58, %59 : vector<62x992xf32>
    tpu.wait_dma2 semaphore(%arg31 : memref<!tpu.dma_semaphore, #tpu.memory_space<semaphore_mem>>) src(%arg10 : memref<3x992x480xbf16, #tpu.memory_space<any>>) dst(%arg30 : memref<3x992x480xbf16, #tpu.memory_space<vmem>>)
    %c0_28 = arith.constant 0 : index
    %c0_29 = arith.constant 0 : index
    %61 = vector.load %arg9[%c0_28, %c0_29] : memref<96x62xbf16, #tpu.memory_space<vmem>>, vector<96x62xbf16>
    %62 = arith.extf %61 : vector<96x62xbf16> to vector<96x62xf32>
    %cst_30 = arith.constant dense<0.000000e+00> : vector<96x992xf32>
    %63 = tpu.matmul %62, %60, %cst_30 {dimension_numbers = #tpu.dot_dimension_numbers<[1], [0], [0], [1], [0, 0, 1, 1], [], []>} : vector<96x62xf32>, vector<62x992xf32>, vector<96x992xf32> -> vector<96x992xf32>
    %64 = vector.extract_strided_slice %63 {offsets = [0, 0], sizes = [30, 992], strides = [1, 1]} : vector<96x992xf32> to vector<30x992xf32>
    %c0_31 = arith.constant 0 : index
    %c0_32 = arith.constant 0 : index
    %c0_33 = arith.constant 0 : index
    %65 = vector.load %arg30[%c0_31, %c0_32, %c0_33] : memref<3x992x480xbf16, #tpu.memory_space<vmem>>, vector<1x992x480xbf16>
    %66 = vector.shape_cast %65 : vector<1x992x480xbf16> to vector<992x480xbf16>
    %67 = arith.extf %66 : vector<992x480xbf16> to vector<992x480xf32>
    %cst_34 = arith.constant dense<0.000000e+00> : vector<30x480xf32>
    %68 = tpu.matmul %64, %67, %cst_34 {dimension_numbers = #tpu.dot_dimension_numbers<[1], [0], [0], [1], [0, 0, 1, 1], [], []>} : vector<30x992xf32>, vector<992x480xf32>, vector<30x480xf32> -> vector<30x480xf32>
    %69 = vector.extract_strided_slice %63 {offsets = [32, 0], sizes = [30, 992], strides = [1, 1]} : vector<96x992xf32> to vector<30x992xf32>
    %c1_35 = arith.constant 1 : index
    %c0_36 = arith.constant 0 : index
    %c0_37 = arith.constant 0 : index
    %70 = vector.load %arg30[%c1_35, %c0_36, %c0_37] : memref<3x992x480xbf16, #tpu.memory_space<vmem>>, vector<1x992x480xbf16>
    %71 = vector.shape_cast %70 : vector<1x992x480xbf16> to vector<992x480xbf16>
    %72 = arith.extf %71 : vector<992x480xbf16> to vector<992x480xf32>
    %cst_38 = arith.constant dense<0.000000e+00> : vector<30x480xf32>
    %73 = tpu.matmul %69, %72, %cst_38 {dimension_numbers = #tpu.dot_dimension_numbers<[1], [0], [0], [1], [0, 0, 1, 1], [], []>} : vector<30x992xf32>, vector<992x480xf32>, vector<30x480xf32> -> vector<30x480xf32>
    %74 = arith.addf %68, %73 : vector<30x480xf32>
    %75 = vector.extract_strided_slice %63 {offsets = [64, 0], sizes = [30, 992], strides = [1, 1]} : vector<96x992xf32> to vector<30x992xf32>
    %c2_39 = arith.constant 2 : index
    %c0_40 = arith.constant 0 : index
    %c0_41 = arith.constant 0 : index
    %76 = vector.load %arg30[%c2_39, %c0_40, %c0_41] : memref<3x992x480xbf16, #tpu.memory_space<vmem>>, vector<1x992x480xbf16>
    %77 = vector.shape_cast %76 : vector<1x992x480xbf16> to vector<992x480xbf16>
    %78 = arith.extf %77 : vector<992x480xbf16> to vector<992x480xf32>
    %cst_42 = arith.constant dense<0.000000e+00> : vector<30x480xf32>
    %79 = tpu.matmul %75, %78, %cst_42 {dimension_numbers = #tpu.dot_dimension_numbers<[1], [0], [0], [1], [0, 0, 1, 1], [], []>} : vector<30x992xf32>, vector<992x480xf32>, vector<30x480xf32> -> vector<30x480xf32>
    %80 = arith.addf %74, %79 : vector<30x480xf32>
    %c0_43 = arith.constant 0 : index
    %c0_44 = arith.constant 0 : index
    %81 = vector.load %arg11[%c0_43, %c0_44] : memref<1x480xf32, #tpu.memory_space<vmem>>, vector<1x480xf32>
    %82 = vector.broadcast %81 : vector<1x480xf32> to vector<30x480xf32>
    %83 = arith.addf %80, %82 : vector<30x480xf32>
    %cst_45 = arith.constant 0.000000e+00 : f32
    %84 = vector.broadcast %cst_45 : f32 to vector<30x480xf32>
    %85 = arith.maximumf %83, %84 : vector<30x480xf32>
    %cst_46 = arith.constant dense<0.000000e+00> : vector<480xf32>
    %86 = vector.multi_reduction <add>, %85, %cst_46 [0] : vector<30x480xf32> to vector<480xf32>
    %87 = vector.shape_cast %86 : vector<480xf32> to vector<1x480xf32>
    %88 = arith.mulf %85, %85 : vector<30x480xf32>
    %cst_47 = arith.constant dense<0.000000e+00> : vector<480xf32>
    %89 = vector.multi_reduction <add>, %88, %cst_47 [0] : vector<30x480xf32> to vector<480xf32>
    %90 = vector.shape_cast %89 : vector<480xf32> to vector<1x480xf32>
    %91 = tpu.concatenate %87, %90 in 0 : vector<1x480xf32>, vector<1x480xf32> -> vector<2x480xf32>
    %c0_48 = arith.constant 0 : index
    %c0_49 = arith.constant 0 : index
    %92 = vector.load %arg12[%c0_48, %c0_49] : memref<480x32xbf16, #tpu.memory_space<vmem>>, vector<480x32xbf16>
    %93 = arith.extf %92 : vector<480x32xbf16> to vector<480x32xf32>
    %cst_50 = arith.constant dense<0.000000e+00> : vector<2x32xf32>
    %94 = tpu.matmul %91, %93, %cst_50 {dimension_numbers = #tpu.dot_dimension_numbers<[1], [0], [0], [1], [0, 0, 1, 1], [], []>} : vector<2x480xf32>, vector<480x32xf32>, vector<2x32xf32> -> vector<2x32xf32>
    %95 = vector.extract_strided_slice %94 {offsets = [0, 0], sizes = [1, 32], strides = [1, 1]} : vector<2x32xf32> to vector<1x32xf32>
    %cst_51 = arith.constant 0.00222222228 : f32
    %96 = vector.broadcast %cst_51 : f32 to vector<1x32xf32>
    %97 = arith.mulf %95, %96 : vector<1x32xf32>
    %98 = vector.extract_strided_slice %94 {offsets = [1, 0], sizes = [1, 32], strides = [1, 1]} : vector<2x32xf32> to vector<1x32xf32>
    %cst_52 = arith.constant 0.00222222228 : f32
    %99 = vector.broadcast %cst_52 : f32 to vector<1x32xf32>
    %100 = arith.mulf %98, %99 : vector<1x32xf32>
    %101 = arith.mulf %97, %97 : vector<1x32xf32>
    %102 = arith.subf %100, %101 : vector<1x32xf32>
    %c0_53 = arith.constant 0 : index
    %c0_54 = arith.constant 0 : index
    %103 = vector.load %arg13[%c0_53, %c0_54] : memref<1x32xf32, #tpu.memory_space<vmem>>, vector<1x32xf32>
    %cst_55 = arith.constant 9.99999974E-6 : f32
    %104 = vector.broadcast %cst_55 : f32 to vector<1x32xf32>
    %105 = arith.addf %102, %104 : vector<1x32xf32>
    %106 = math.rsqrt %105 : vector<1x32xf32>
    %107 = arith.mulf %103, %106 : vector<1x32xf32>
    %c0_56 = arith.constant 0 : index
    %c0_57 = arith.constant 0 : index
    %108 = vector.load %arg14[%c0_56, %c0_57] : memref<1x32xf32, #tpu.memory_space<vmem>>, vector<1x32xf32>
    %109 = arith.mulf %97, %107 : vector<1x32xf32>
    %110 = arith.subf %108, %109 : vector<1x32xf32>
    %111 = tpu.concatenate %107, %107, %107, %107, %107, %107, %107, %107, %107, %107, %107, %107, %107, %107, %107 in 1 : vector<1x32xf32>, vector<1x32xf32>, vector<1x32xf32>, vector<1x32xf32>, vector<1x32xf32>, vector<1x32xf32>, vector<1x32xf32>, vector<1x32xf32>, vector<1x32xf32>, vector<1x32xf32>, vector<1x32xf32>, vector<1x32xf32>, vector<1x32xf32>, vector<1x32xf32>, vector<1x32xf32> -> vector<1x480xf32>
    %112 = tpu.concatenate %110, %110, %110, %110, %110, %110, %110, %110, %110, %110, %110, %110, %110, %110, %110 in 1 : vector<1x32xf32>, vector<1x32xf32>, vector<1x32xf32>, vector<1x32xf32>, vector<1x32xf32>, vector<1x32xf32>, vector<1x32xf32>, vector<1x32xf32>, vector<1x32xf32>, vector<1x32xf32>, vector<1x32xf32>, vector<1x32xf32>, vector<1x32xf32>, vector<1x32xf32>, vector<1x32xf32> -> vector<1x480xf32>
    %113 = vector.broadcast %111 : vector<1x480xf32> to vector<30x480xf32>
    %114 = arith.mulf %85, %113 : vector<30x480xf32>
    %115 = vector.broadcast %112 : vector<1x480xf32> to vector<30x480xf32>
    %116 = arith.addf %114, %115 : vector<30x480xf32>
    %c0_58 = arith.constant 0 : index
    %c0_59 = arith.constant 0 : index
    %117 = vector.load %arg15[%c0_58, %c0_59] : memref<48x30xbf16, #tpu.memory_space<vmem>>, vector<48x30xbf16>
    %118 = arith.extf %117 : vector<48x30xbf16> to vector<48x30xf32>
    %cst_60 = arith.constant dense<0.000000e+00> : vector<48x480xf32>
    %119 = tpu.matmul %118, %116, %cst_60 {dimension_numbers = #tpu.dot_dimension_numbers<[1], [0], [0], [1], [0, 0, 1, 1], [], []>} : vector<48x30xf32>, vector<30x480xf32>, vector<48x480xf32> -> vector<48x480xf32>
    %120 = vector.extract_strided_slice %119 {offsets = [0, 0], sizes = [14, 480], strides = [1, 1]} : vector<48x480xf32> to vector<14x480xf32>
    %c0_61 = arith.constant 0 : index
    %c0_62 = arith.constant 0 : index
    %c0_63 = arith.constant 0 : index
    %121 = vector.load %arg16[%c0_61, %c0_62, %c0_63] : memref<3x480x56xbf16, #tpu.memory_space<vmem>>, vector<1x480x56xbf16>
    %122 = vector.shape_cast %121 : vector<1x480x56xbf16> to vector<480x56xbf16>
    %123 = arith.extf %122 : vector<480x56xbf16> to vector<480x56xf32>
    %cst_64 = arith.constant dense<0.000000e+00> : vector<14x56xf32>
    %124 = tpu.matmul %120, %123, %cst_64 {dimension_numbers = #tpu.dot_dimension_numbers<[1], [0], [0], [1], [0, 0, 1, 1], [], []>} : vector<14x480xf32>, vector<480x56xf32>, vector<14x56xf32> -> vector<14x56xf32>
    %125 = vector.extract_strided_slice %119 {offsets = [16, 0], sizes = [14, 480], strides = [1, 1]} : vector<48x480xf32> to vector<14x480xf32>
    %c1_65 = arith.constant 1 : index
    %c0_66 = arith.constant 0 : index
    %c0_67 = arith.constant 0 : index
    %126 = vector.load %arg16[%c1_65, %c0_66, %c0_67] : memref<3x480x56xbf16, #tpu.memory_space<vmem>>, vector<1x480x56xbf16>
    %127 = vector.shape_cast %126 : vector<1x480x56xbf16> to vector<480x56xbf16>
    %128 = arith.extf %127 : vector<480x56xbf16> to vector<480x56xf32>
    %cst_68 = arith.constant dense<0.000000e+00> : vector<14x56xf32>
    %129 = tpu.matmul %125, %128, %cst_68 {dimension_numbers = #tpu.dot_dimension_numbers<[1], [0], [0], [1], [0, 0, 1, 1], [], []>} : vector<14x480xf32>, vector<480x56xf32>, vector<14x56xf32> -> vector<14x56xf32>
    %130 = arith.addf %124, %129 : vector<14x56xf32>
    %131 = vector.extract_strided_slice %119 {offsets = [32, 0], sizes = [14, 480], strides = [1, 1]} : vector<48x480xf32> to vector<14x480xf32>
    %c2_69 = arith.constant 2 : index
    %c0_70 = arith.constant 0 : index
    %c0_71 = arith.constant 0 : index
    %132 = vector.load %arg16[%c2_69, %c0_70, %c0_71] : memref<3x480x56xbf16, #tpu.memory_space<vmem>>, vector<1x480x56xbf16>
    %133 = vector.shape_cast %132 : vector<1x480x56xbf16> to vector<480x56xbf16>
    %134 = arith.extf %133 : vector<480x56xbf16> to vector<480x56xf32>
    %cst_72 = arith.constant dense<0.000000e+00> : vector<14x56xf32>
    %135 = tpu.matmul %131, %134, %cst_72 {dimension_numbers = #tpu.dot_dimension_numbers<[1], [0], [0], [1], [0, 0, 1, 1], [], []>} : vector<14x480xf32>, vector<480x56xf32>, vector<14x56xf32> -> vector<14x56xf32>
    %136 = arith.addf %130, %135 : vector<14x56xf32>
    %c0_73 = arith.constant 0 : index
    %c0_74 = arith.constant 0 : index
    %137 = vector.load %arg17[%c0_73, %c0_74] : memref<1x56xf32, #tpu.memory_space<vmem>>, vector<1x56xf32>
    %138 = vector.broadcast %137 : vector<1x56xf32> to vector<14x56xf32>
    %139 = arith.addf %136, %138 : vector<14x56xf32>
    %cst_75 = arith.constant 0.000000e+00 : f32
    %140 = vector.broadcast %cst_75 : f32 to vector<14x56xf32>
    %141 = arith.maximumf %139, %140 : vector<14x56xf32>
    %cst_76 = arith.constant dense<0.000000e+00> : vector<56xf32>
    %142 = vector.multi_reduction <add>, %141, %cst_76 [0] : vector<14x56xf32> to vector<56xf32>
    %143 = vector.shape_cast %142 : vector<56xf32> to vector<1x56xf32>
    %144 = arith.mulf %141, %141 : vector<14x56xf32>
    %cst_77 = arith.constant dense<0.000000e+00> : vector<56xf32>
    %145 = vector.multi_reduction <add>, %144, %cst_77 [0] : vector<14x56xf32> to vector<56xf32>
    %146 = vector.shape_cast %145 : vector<56xf32> to vector<1x56xf32>
    %147 = tpu.concatenate %143, %146 in 0 : vector<1x56xf32>, vector<1x56xf32> -> vector<2x56xf32>
    %c0_78 = arith.constant 0 : index
    %c0_79 = arith.constant 0 : index
    %148 = vector.load %arg18[%c0_78, %c0_79] : memref<56x8xbf16, #tpu.memory_space<vmem>>, vector<56x8xbf16>
    %149 = arith.extf %148 : vector<56x8xbf16> to vector<56x8xf32>
    %cst_80 = arith.constant dense<0.000000e+00> : vector<2x8xf32>
    %150 = tpu.matmul %147, %149, %cst_80 {dimension_numbers = #tpu.dot_dimension_numbers<[1], [0], [0], [1], [0, 0, 1, 1], [], []>} : vector<2x56xf32>, vector<56x8xf32>, vector<2x8xf32> -> vector<2x8xf32>
    %151 = vector.extract_strided_slice %150 {offsets = [0, 0], sizes = [1, 8], strides = [1, 1]} : vector<2x8xf32> to vector<1x8xf32>
    %cst_81 = arith.constant 0.0102040814 : f32
    %152 = vector.broadcast %cst_81 : f32 to vector<1x8xf32>
    %153 = arith.mulf %151, %152 : vector<1x8xf32>
    %154 = vector.extract_strided_slice %150 {offsets = [1, 0], sizes = [1, 8], strides = [1, 1]} : vector<2x8xf32> to vector<1x8xf32>
    %cst_82 = arith.constant 0.0102040814 : f32
    %155 = vector.broadcast %cst_82 : f32 to vector<1x8xf32>
    %156 = arith.mulf %154, %155 : vector<1x8xf32>
    %157 = arith.mulf %153, %153 : vector<1x8xf32>
    %158 = arith.subf %156, %157 : vector<1x8xf32>
    %c0_83 = arith.constant 0 : index
    %c0_84 = arith.constant 0 : index
    %159 = vector.load %arg19[%c0_83, %c0_84] : memref<1x8xf32, #tpu.memory_space<vmem>>, vector<1x8xf32>
    %cst_85 = arith.constant 9.99999974E-6 : f32
    %160 = vector.broadcast %cst_85 : f32 to vector<1x8xf32>
    %161 = arith.addf %158, %160 : vector<1x8xf32>
    %162 = math.rsqrt %161 : vector<1x8xf32>
    %163 = arith.mulf %159, %162 : vector<1x8xf32>
    %c0_86 = arith.constant 0 : index
    %c0_87 = arith.constant 0 : index
    %164 = vector.load %arg20[%c0_86, %c0_87] : memref<1x8xf32, #tpu.memory_space<vmem>>, vector<1x8xf32>
    %165 = arith.mulf %153, %163 : vector<1x8xf32>
    %166 = arith.subf %164, %165 : vector<1x8xf32>
    %167 = tpu.concatenate %163, %163, %163, %163, %163, %163, %163 in 1 : vector<1x8xf32>, vector<1x8xf32>, vector<1x8xf32>, vector<1x8xf32>, vector<1x8xf32>, vector<1x8xf32>, vector<1x8xf32> -> vector<1x56xf32>
    %168 = tpu.concatenate %166, %166, %166, %166, %166, %166, %166 in 1 : vector<1x8xf32>, vector<1x8xf32>, vector<1x8xf32>, vector<1x8xf32>, vector<1x8xf32>, vector<1x8xf32>, vector<1x8xf32> -> vector<1x56xf32>
    %169 = vector.broadcast %167 : vector<1x56xf32> to vector<14x56xf32>
    %170 = arith.mulf %141, %169 : vector<14x56xf32>
    %171 = vector.broadcast %168 : vector<1x56xf32> to vector<14x56xf32>
    %172 = arith.addf %170, %171 : vector<14x56xf32>
    %c0_88 = arith.constant 0 : index
    %c0_89 = arith.constant 0 : index
    %173 = vector.load %arg21[%c0_88, %c0_89] : memref<56x896xbf16, #tpu.memory_space<vmem>>, vector<56x896xbf16>
    %174 = arith.extf %173 : vector<56x896xbf16> to vector<56x896xf32>
    %cst_90 = arith.constant dense<0.000000e+00> : vector<14x896xf32>
    %175 = tpu.matmul %172, %174, %cst_90 {dimension_numbers = #tpu.dot_dimension_numbers<[1], [0], [0], [1], [0, 0, 1, 1], [], []>} : vector<14x56xf32>, vector<56x896xf32>, vector<14x896xf32> -> vector<14x896xf32>
    %c0_91 = arith.constant 0 : index
    %c0_92 = arith.constant 0 : index
    %176 = vector.load %arg22[%c0_91, %c0_92] : memref<14x896xbf16, #tpu.memory_space<vmem>>, vector<14x896xbf16>
    %177 = arith.extf %176 : vector<14x896xbf16> to vector<14x896xf32>
    %178 = arith.mulf %175, %177 : vector<14x896xf32>
    %179 = vector.extract_strided_slice %178 {offsets = [0, 0], sizes = [14, 128], strides = [1, 1]} : vector<14x896xf32> to vector<14x128xf32>
    %180 = vector.extract_strided_slice %178 {offsets = [0, 128], sizes = [14, 128], strides = [1, 1]} : vector<14x896xf32> to vector<14x128xf32>
    %181 = arith.addf %179, %180 : vector<14x128xf32>
    %182 = vector.extract_strided_slice %178 {offsets = [0, 256], sizes = [14, 128], strides = [1, 1]} : vector<14x896xf32> to vector<14x128xf32>
    %183 = arith.addf %181, %182 : vector<14x128xf32>
    %184 = vector.extract_strided_slice %178 {offsets = [0, 384], sizes = [14, 128], strides = [1, 1]} : vector<14x896xf32> to vector<14x128xf32>
    %185 = arith.addf %183, %184 : vector<14x128xf32>
    %186 = vector.extract_strided_slice %178 {offsets = [0, 512], sizes = [14, 128], strides = [1, 1]} : vector<14x896xf32> to vector<14x128xf32>
    %187 = arith.addf %185, %186 : vector<14x128xf32>
    %188 = vector.extract_strided_slice %178 {offsets = [0, 640], sizes = [14, 128], strides = [1, 1]} : vector<14x896xf32> to vector<14x128xf32>
    %189 = arith.addf %187, %188 : vector<14x128xf32>
    %190 = vector.extract_strided_slice %178 {offsets = [0, 768], sizes = [14, 128], strides = [1, 1]} : vector<14x896xf32> to vector<14x128xf32>
    %191 = arith.addf %189, %190 : vector<14x128xf32>
    %c0_93 = arith.constant 0 : index
    %c0_94 = arith.constant 0 : index
    %192 = vector.load %arg23[%c0_93, %c0_94] : memref<2x14xbf16, #tpu.memory_space<vmem>>, vector<2x14xbf16>
    %193 = arith.extf %192 : vector<2x14xbf16> to vector<2x14xf32>
    %cst_95 = arith.constant dense<0.000000e+00> : vector<2x128xf32>
    %194 = tpu.matmul %193, %191, %cst_95 {dimension_numbers = #tpu.dot_dimension_numbers<[1], [0], [0], [1], [0, 0, 1, 1], [], []>} : vector<2x14xf32>, vector<14x128xf32>, vector<2x128xf32> -> vector<2x128xf32>
    %c0_96 = arith.constant 0 : index
    %c0_97 = arith.constant 0 : index
    %195 = vector.load %arg24[%c0_96, %c0_97] : memref<1x128xf32, #tpu.memory_space<vmem>>, vector<1x128xf32>
    %196 = vector.broadcast %195 : vector<1x128xf32> to vector<2x128xf32>
    %197 = arith.addf %194, %196 : vector<2x128xf32>
    %c0_98 = arith.constant 0 : index
    %c0_99 = arith.constant 0 : index
    %198 = vector.load %arg1[%c0_98, %c0_99] : memref<2x128xf32, #tpu.memory_space<vmem>>, vector<2x128xf32>
    %199 = tpu.concatenate %197, %198 in 1 : vector<2x128xf32>, vector<2x128xf32> -> vector<2x256xf32>
    %c0_100 = arith.constant 0 : index
    %c0_101 = arith.constant 0 : index
    %200 = vector.load %arg25[%c0_100, %c0_101] : memref<256x512xbf16, #tpu.memory_space<vmem>>, vector<256x512xbf16>
    %201 = arith.extf %200 : vector<256x512xbf16> to vector<256x512xf32>
    %cst_102 = arith.constant dense<0.000000e+00> : vector<2x512xf32>
    %202 = tpu.matmul %199, %201, %cst_102 {dimension_numbers = #tpu.dot_dimension_numbers<[1], [0], [0], [1], [0, 0, 1, 1], [], []>} : vector<2x256xf32>, vector<256x512xf32>, vector<2x512xf32> -> vector<2x512xf32>
    %c0_103 = arith.constant 0 : index
    %c0_104 = arith.constant 0 : index
    %203 = vector.load %arg26[%c0_103, %c0_104] : memref<1x512xf32, #tpu.memory_space<vmem>>, vector<1x512xf32>
    %204 = vector.broadcast %203 : vector<1x512xf32> to vector<2x512xf32>
    %205 = arith.addf %202, %204 : vector<2x512xf32>
    %206 = vector.extract_strided_slice %205 {offsets = [0, 0], sizes = [2, 128], strides = [1, 1]} : vector<2x512xf32> to vector<2x128xf32>
    %207 = arith.negf %206 : vector<2x128xf32>
    %208 = math.exp %207 : vector<2x128xf32>
    %cst_105 = arith.constant 1.000000e+00 : f32
    %209 = vector.broadcast %cst_105 : f32 to vector<2x128xf32>
    %210 = arith.addf %209, %208 : vector<2x128xf32>
    %211 = arith.divf %209, %210 : vector<2x128xf32>
    %212 = vector.extract_strided_slice %205 {offsets = [0, 128], sizes = [2, 128], strides = [1, 1]} : vector<2x512xf32> to vector<2x128xf32>
    %213 = arith.negf %212 : vector<2x128xf32>
    %214 = math.exp %213 : vector<2x128xf32>
    %cst_106 = arith.constant 1.000000e+00 : f32
    %215 = vector.broadcast %cst_106 : f32 to vector<2x128xf32>
    %216 = arith.addf %215, %214 : vector<2x128xf32>
    %217 = arith.divf %215, %216 : vector<2x128xf32>
    %218 = vector.extract_strided_slice %205 {offsets = [0, 256], sizes = [2, 128], strides = [1, 1]} : vector<2x512xf32> to vector<2x128xf32>
    %219 = math.tanh %218 : vector<2x128xf32>
    %220 = vector.extract_strided_slice %205 {offsets = [0, 384], sizes = [2, 128], strides = [1, 1]} : vector<2x512xf32> to vector<2x128xf32>
    %221 = arith.negf %220 : vector<2x128xf32>
    %222 = math.exp %221 : vector<2x128xf32>
    %cst_107 = arith.constant 1.000000e+00 : f32
    %223 = vector.broadcast %cst_107 : f32 to vector<2x128xf32>
    %224 = arith.addf %223, %222 : vector<2x128xf32>
    %225 = arith.divf %223, %224 : vector<2x128xf32>
    %c0_108 = arith.constant 0 : index
    %c0_109 = arith.constant 0 : index
    %226 = vector.load %arg2[%c0_108, %c0_109] : memref<2x128xf32, #tpu.memory_space<vmem>>, vector<2x128xf32>
    %227 = arith.mulf %217, %226 : vector<2x128xf32>
    %228 = arith.mulf %211, %219 : vector<2x128xf32>
    %229 = arith.addf %227, %228 : vector<2x128xf32>
    %230 = math.tanh %229 : vector<2x128xf32>
    %231 = arith.mulf %225, %230 : vector<2x128xf32>
    %c0_110 = arith.constant 0 : index
    %c0_111 = arith.constant 0 : index
    %232 = vector.load %arg27[%c0_110, %c0_111] : memref<128x128xbf16, #tpu.memory_space<vmem>>, vector<128x128xbf16>
    %233 = arith.extf %232 : vector<128x128xbf16> to vector<128x128xf32>
    %cst_112 = arith.constant dense<0.000000e+00> : vector<2x128xf32>
    %234 = tpu.matmul %231, %233, %cst_112 {dimension_numbers = #tpu.dot_dimension_numbers<[1], [0], [0], [1], [0, 0, 1, 1], [], []>} : vector<2x128xf32>, vector<128x128xf32>, vector<2x128xf32> -> vector<2x128xf32>
    %c0_113 = arith.constant 0 : index
    %c0_114 = arith.constant 0 : index
    %235 = vector.load %arg28[%c0_113, %c0_114] : memref<1x128xf32, #tpu.memory_space<vmem>>, vector<1x128xf32>
    %236 = vector.broadcast %235 : vector<1x128xf32> to vector<2x128xf32>
    %237 = arith.addf %234, %236 : vector<2x128xf32>
    %238 = tpu.concatenate %231, %229, %237 in 1 : vector<2x128xf32>, vector<2x128xf32>, vector<2x128xf32> -> vector<2x384xf32>
    %c0_115 = arith.constant 0 : index
    %c0_116 = arith.constant 0 : index
    %239 = vector.load %arg29[%c0_115, %c0_116] : memref<2x384xf32, #tpu.memory_space<vmem>>, vector<2x384xf32>
    tpu.vector_store %arg29[%c0_115, %c0_116], %238 {strides = array<i32>} : memref<2x384xf32, #tpu.memory_space<vmem>>, vector<2x384xf32>,
    return
  }
}

</mosaic_0001>

<bundles_post_ra>
// kernel: forward_pallas.1
= control target key start
LH: loop header
LB: loop body
LE: loop exit
PB: predicated region body
PF: predicated region fallthrough
CT: control target
= control target key end

     0   :  { %s22658_s6 = smov 1   ;;  %s22659_s10 = smov 2   ;;  %s26931_s0 = inlined_call_operand.smem [shape: u32[30], index: -1, kind: input, shape index: {}] }
   0x1   :  { %s22706_s5 = sld [smem:[%s26931_s0]]   ;;  %s22660_s14 = smov 3  }
   0x2   :  { %s22711_s9 = sld [smem:[%s26931_s0 + %s22658_s6]]   ;;  %s22661_s18 = smov 4  }
   0x3   :  { %s22716_s13 = sld [smem:[%s26931_s0 + %s22659_s10]]   ;;  %s22662_s22 = smov 5  }
   0x4   :  { %s22721_s17 = sld [smem:[%s26931_s0 + %s22660_s14]]   ;;  %s22663_s26 = smov 6  }
   0x5   :  { %s22726_s21 = sld [smem:[%s26931_s0 + %s22661_s18]]   ;;  %s22664_s30 = smov 7  }
   0x6   :  { %s22731_s25 = sld [smem:[%s26931_s0 + %s22662_s22]]   ;;  %s26932_s4 = smov 8  }
   0x7   :  { %s22736_s29 = sld [smem:[%s26931_s0 + %s22663_s26]]   ;;  %s22666_s10 = smov 9  }
   0x8   :  { %27021 = sst [smem:[#allocation6_spill]] %s22711_s9  ;;  %s22667_s15 = smov 10  }
   0x9   :  { %27022 = sst [smem:[#allocation7_spill]] %s22716_s13  ;;  %s22668_s20 = smov 11  }
   0xa   :  { %s22741_s3 = sld [smem:[%s26931_s0 + %s22664_s30]]   ;;  %s22669_s26 = smov 12  }
   0xb   :  { %s22747_s8 = sld [smem:[%s26931_s0 + %s26932_s4]]   ;;  %s22670_s1 = smov 13  }
   0xc   :  { %s22752_s14 = sld [smem:[%s26931_s0 + %s22666_s10]]   ;;  %s22671_s10 = smov 14  }
   0xd   :  { %s22757_s19 = sld [smem:[%s26931_s0 + %s22667_s15]]   ;;  %s22672_s16 = smov 15  }
   0xe   :  { %s22762_s24 = sld [smem:[%s26931_s0 + %s22668_s20]]   ;;  %s26934_s23 = smov 16  }
   0xf   :  { %s22767_s30 = sld [smem:[%s26931_s0 + %s22669_s26]]   ;;  %s22677_s26 = smov 20  }
  0x10   :  { %s22772_s7 = sld [smem:[%s26931_s0 + %s22670_s1]]   ;;  %s22674_s1 = smov 17  }
  0x11   :  { %s22777_s15 = sld [smem:[%s26931_s0 + %s22671_s10]]   ;;  %s22675_s10 = smov 18  }
  0x12   :  { %s22782_s22 = sld [smem:[%s26931_s0 + %s22672_s16]]   ;;  %s22676_s16 = smov 19  }
  0x13   :  { %s22788_s28 = sld [smem:[%s26931_s0 + %s26934_s23]]   ;;  %s22679_s4 = smov 22  }
  0x14   :  { %s22793_s11 = sld [smem:[%s26931_s0 + %s22674_s1]]   ;;  %s22678_s1 = smov 21  }
  0x15   :  { %s22798_s18 = sld [smem:[%s26931_s0 + %s22675_s10]]   ;;  %s22680_s13 = smov 23  }
  0x16   :  { %s22803_s9 = sld [smem:[%s26931_s0 + %s22676_s16]]   ;;  %s26940_s23 = smov 24  }
  0x17   :  { %s22829_s2 = sld [smem:[%s26931_s0 + %s26940_s23]]   ;;  %s22863_s12 = smov 0  }
  0x18   :  { %27023 = sst [smem:[#allocation8_spill]] %s22782_s22 }
  0x19   :  { %s22808_s22 = sld [smem:[%s26931_s0 + %s22677_s26]]   ;;  %s22685_s26 = smov 28  }
  0x1a   :  { %27024 = sst [smem:[#allocation9_spill]] %s22793_s11 }
  0x1b   :  { %27025 = sst [smem:[#allocation10_spill]] %s22798_s18 }
  0x1c   :  { %27026 = sst [smem:[#allocation11_spill]] %s22803_s9 }
  0x1d   :  { %s22813_s11 = sld [smem:[%s26931_s0 + %s22678_s1]]   ;;  %s22682_s1 = smov 25  }
  0x1e   :  { %s22818_s18 = sld [smem:[%s26931_s0 + %s22679_s4]]   ;;  %s22683_s4 = smov 26  }
  0x1f   :  { %27027 = sst [smem:[#allocation12_spill]] %s22808_s22  ;;  %s22686_s22 = smov 29  }
  0x20   :  { %s22823_s9 = sld [smem:[%s26931_s0 + %s22680_s13]]   ;;  %s22684_s13 = smov 27  }
  0x21   :  { %27031 = sst [smem:[#allocation16_spill]] %s22829_s2 }
  0x22   :  { %s22834_s10 = sld [smem:[%s26931_s0 + %s22682_s1]]  }
  0x23   :  { %27028 = sst [smem:[#allocation13_spill]] %s22813_s11 }
  0x24   :  { %27029 = sst [smem:[#allocation14_spill]] %s22818_s18  ;;  %s22856_s18 = smov [#allocation2]  }
  0x25   :  { %s22839_s16 = sld [smem:[%s26931_s0 + %s22683_s4]]   ;;  %s27033_s4 = smov %s22757_s19 }
  0x26   :  { %27030 = sst [smem:[#allocation15_spill]] %s22823_s9  ;;  %s22861_s9 = smov 0  }
  0x27   :  { %s22844_s11 = sld [smem:[%s26931_s0 + %s22684_s13]]  }
  0x28   :  { %27032 = sst [smem:[#allocation17_spill]] %s22834_s10 }
  0x29   :  { %s22849_s2 = sld [smem:[%s26931_s0 + %s22685_s26]]  }
  0x2a   :  { %s22854_s10 = sld [smem:[%s26931_s0 + %s22686_s22]]  }
  0x2b LB: > { %v140_v0 = vld [vmem:[%s22648_s4] sm:$0xf]  ;;  %v142_v1 = vld [vmem:[%s22648_s4 + $0x4] sm:$0xf]  ;;  %v144_v2 = vld [vmem:[%s22648_s4 + $0x8] sm:$0xf]  ;;  %s22656_s12 = sphi %s22863_s12, %s136_s12   ;;  %s22652_s9 = sphi %s22861_s9, %s27034_s9   ;;  %s22648_s4 = sphi %s27033_s4, %s1633_s4   ;;  %s22644_s18 = sphi %s22856_s18, %s1634_s18  }
  0x2c   : > { %141 = vst [vmem:[%s22644_s18] sm:$0xf] %v140_v0  ;;  %143 = vst [vmem:[%s22644_s18 + $0x8] sm:$0xf] %v142_v1  ;;  %v146_v3 = vld [vmem:[%s22648_s4 + $0xc] sm:$0xf]  ;;  %s1628_s0 = sadd.s32 1, %s22652_s9 }
  0x2d   : > { %145 = vst [vmem:[%s22644_s18 + $0x10] sm:$0xf] %v144_v2  ;;  %v148_v4 = vld [vmem:[%s22648_s4 + $0x20] sm:$0xf]  ;;  %v150_v5 = vld [vmem:[%s22648_s4 + $0x24] sm:$0xf] }
  0x2e   : > { %147 = vst [vmem:[%s22644_s18 + $0x18] sm:$0xf] %v146_v3  ;;  %149 = vst [vmem:[%s22644_s18 + $0x20] sm:$0xf] %v148_v4  ;;  %v152_v6 = vld [vmem:[%s22648_s4 + $0x28] sm:$0xf] }
  0x2f   : > { %151 = vst [vmem:[%s22644_s18 + $0x28] sm:$0xf] %v150_v5  ;;  %v154_v7 = vld [vmem:[%s22648_s4 + $0x2c] sm:$0xf]  ;;  %v156_v8 = vld [vmem:[%s22648_s4 + $0x40] sm:$0xf] }
  0x30   : > { %153 = vst [vmem:[%s22644_s18 + $0x30] sm:$0xf] %v152_v6  ;;  %155 = vst [vmem:[%s22644_s18 + $0x38] sm:$0xf] %v154_v7  ;;  %v158_v9 = vld [vmem:[%s22648_s4 + $0x44] sm:$0xf] }
  0x31   : > { %157 = vst [vmem:[%s22644_s18 + $0x40] sm:$0xf] %v156_v8  ;;  %v160_v10 = vld [vmem:[%s22648_s4 + $0x48] sm:$0xf]  ;;  %v162_v11 = vld [vmem:[%s22648_s4 + $0x4c] sm:$0xf] }
  0x32   : > { %159 = vst [vmem:[%s22644_s18 + $0x48] sm:$0xf] %v158_v9  ;;  %161 = vst [vmem:[%s22644_s18 + $0x50] sm:$0xf] %v160_v10  ;;  %v164_v12 = vld [vmem:[%s22648_s4 + $0x60] sm:$0xf] }
  0x33   : > { %163 = vst [vmem:[%s22644_s18 + $0x58] sm:$0xf] %v162_v11  ;;  %v166_v13 = vld [vmem:[%s22648_s4 + $0x64] sm:$0xf]  ;;  %v168_v14 = vld [vmem:[%s22648_s4 + $0x68] sm:$0xf] }
  0x34   : > { %165 = vst [vmem:[%s22644_s18 + $0x60] sm:$0xf] %v164_v12  ;;  %167 = vst [vmem:[%s22644_s18 + $0x68] sm:$0xf] %v166_v13  ;;  %v170_v15 = vld [vmem:[%s22648_s4 + $0x6c] sm:$0xf] }
  0x35   : > { %169 = vst [vmem:[%s22644_s18 + $0x70] sm:$0xf] %v168_v14  ;;  %v172_v16 = vld [vmem:[%s22648_s4 + $0x80] sm:$0xf]  ;;  %v174_v17 = vld [vmem:[%s22648_s4 + $0x84] sm:$0xf] }
  0x36   : > { %171 = vst [vmem:[%s22644_s18 + $0x78] sm:$0xf] %v170_v15  ;;  %173 = vst [vmem:[%s22644_s18 + $0x80] sm:$0xf] %v172_v16  ;;  %v176_v18 = vld [vmem:[%s22648_s4 + $0x88] sm:$0xf] }
  0x37   : > { %175 = vst [vmem:[%s22644_s18 + $0x88] sm:$0xf] %v174_v17  ;;  %v178_v19 = vld [vmem:[%s22648_s4 + $0x8c] sm:$0xf]  ;;  %v180_v20 = vld [vmem:[%s22648_s4 + $0xa0] sm:$0xf] }
  0x38   : > { %177 = vst [vmem:[%s22644_s18 + $0x90] sm:$0xf] %v176_v18  ;;  %179 = vst [vmem:[%s22644_s18 + $0x98] sm:$0xf] %v178_v19  ;;  %v182_v21 = vld [vmem:[%s22648_s4 + $0xa4] sm:$0xf] }
  0x39   : > { %181 = vst [vmem:[%s22644_s18 + $0xa0] sm:$0xf] %v180_v20  ;;  %v184_v22 = vld [vmem:[%s22648_s4 + $0xa8] sm:$0xf]  ;;  %v186_v23 = vld [vmem:[%s22648_s4 + $0xac] sm:$0xf] }
  0x3a   : > { %183 = vst [vmem:[%s22644_s18 + $0xa8] sm:$0xf] %v182_v21  ;;  %185 = vst [vmem:[%s22644_s18 + $0xb0] sm:$0xf] %v184_v22  ;;  %v188_v24 = vld [vmem:[%s22648_s4 + $0xc0] sm:$0xf] }
  0x3b   : > { %187 = vst [vmem:[%s22644_s18 + $0xb8] sm:$0xf] %v186_v23  ;;  %v190_v25 = vld [vmem:[%s22648_s4 + $0xc4] sm:$0xf]  ;;  %v192_v26 = vld [vmem:[%s22648_s4 + $0xc8] sm:$0xf] }
  0x3c   : > { %189 = vst [vmem:[%s22644_s18 + $0xc0] sm:$0xf] %v188_v24  ;;  %191 = vst [vmem:[%s22644_s18 + $0xc8] sm:$0xf] %v190_v25  ;;  %v194_v27 = vld [vmem:[%s22648_s4 + $0xcc] sm:$0xf] }
  0x3d   : > { %193 = vst [vmem:[%s22644_s18 + $0xd0] sm:$0xf] %v192_v26  ;;  %v196_v28 = vld [vmem:[%s22648_s4 + $0xe0] sm:$0xf]  ;;  %v198_v29 = vld [vmem:[%s22648_s4 + $0xe4] sm:$0xf] }
  0x3e   : > { %195 = vst [vmem:[%s22644_s18 + $0xd8] sm:$0xf] %v194_v27  ;;  %197 = vst [vmem:[%s22644_s18 + $0xe0] sm:$0xf] %v196_v28  ;;  %v200_v30 = vld [vmem:[%s22648_s4 + $0xe8] sm:$0xf] }
  0x3f   : > { %199 = vst [vmem:[%s22644_s18 + $0xe8] sm:$0xf] %v198_v29  ;;  %v202_v31 = vld [vmem:[%s22648_s4 + $0xec] sm:$0xf]  ;;  %v204_v32 = vld [vmem:[%s22648_s4 + $0x100] sm:$0xf] }
  0x40   : > { %201 = vst [vmem:[%s22644_s18 + $0xf0] sm:$0xf] %v200_v30  ;;  %203 = vst [vmem:[%s22644_s18 + $0xf8] sm:$0xf] %v202_v31  ;;  %v206_v33 = vld [vmem:[%s22648_s4 + $0x104] sm:$0xf] }
  0x41   : > { %205 = vst [vmem:[%s22644_s18 + $0x100] sm:$0xf] %v204_v32  ;;  %v208_v34 = vld [vmem:[%s22648_s4 + $0x108] sm:$0xf]  ;;  %v210_v35 = vld [vmem:[%s22648_s4 + $0x10c] sm:$0xf] }
  0x42   : > { %207 = vst [vmem:[%s22644_s18 + $0x108] sm:$0xf] %v206_v33  ;;  %209 = vst [vmem:[%s22644_s18 + $0x110] sm:$0xf] %v208_v34  ;;  %v212_v36 = vld [vmem:[%s22648_s4 + $0x120] sm:$0xf] }
  0x43   : > { %211 = vst [vmem:[%s22644_s18 + $0x118] sm:$0xf] %v210_v35  ;;  %v214_v37 = vld [vmem:[%s22648_s4 + $0x124] sm:$0xf]  ;;  %v216_v38 = vld [vmem:[%s22648_s4 + $0x128] sm:$0xf] }
  0x44   : > { %213 = vst [vmem:[%s22644_s18 + $0x120] sm:$0xf] %v212_v36  ;;  %215 = vst [vmem:[%s22644_s18 + $0x128] sm:$0xf] %v214_v37  ;;  %v218_v39 = vld [vmem:[%s22648_s4 + $0x12c] sm:$0xf] }
  0x45   : > { %217 = vst [vmem:[%s22644_s18 + $0x130] sm:$0xf] %v216_v38  ;;  %v220_v40 = vld [vmem:[%s22648_s4 + $0x140] sm:$0xf]  ;;  %v222_v41 = vld [vmem:[%s22648_s4 + $0x144] sm:$0xf] }
  0x46   : > { %219 = vst [vmem:[%s22644_s18 + $0x138] sm:$0xf] %v218_v39  ;;  %221 = vst [vmem:[%s22644_s18 + $0x140] sm:$0xf] %v220_v40  ;;  %v224_v42 = vld [vmem:[%s22648_s4 + $0x148] sm:$0xf] }
  0x47   : > { %223 = vst [vmem:[%s22644_s18 + $0x148] sm:$0xf] %v222_v41  ;;  %v226_v43 = vld [vmem:[%s22648_s4 + $0x14c] sm:$0xf]  ;;  %v228_v44 = vld [vmem:[%s22648_s4 + $0x160] sm:$0xf] }
  0x48   : > { %225 = vst [vmem:[%s22644_s18 + $0x150] sm:$0xf] %v224_v42  ;;  %227 = vst [vmem:[%s22644_s18 + $0x158] sm:$0xf] %v226_v43  ;;  %v230_v45 = vld [vmem:[%s22648_s4 + $0x164] sm:$0xf] }
  0x49   : > { %229 = vst [vmem:[%s22644_s18 + $0x160] sm:$0xf] %v228_v44  ;;  %v232_v46 = vld [vmem:[%s22648_s4 + $0x168] sm:$0xf]  ;;  %v234_v47 = vld [vmem:[%s22648_s4 + $0x16c] sm:$0xf] }
  0x4a   : > { %231 = vst [vmem:[%s22644_s18 + $0x168] sm:$0xf] %v230_v45  ;;  %233 = vst [vmem:[%s22644_s18 + $0x170] sm:$0xf] %v232_v46  ;;  %v236_v48 = vld [vmem:[%s22648_s4 + $0x180] sm:$0xf] }
  0x4b   : > { %235 = vst [vmem:[%s22644_s18 + $0x178] sm:$0xf] %v234_v47  ;;  %v238_v49 = vld [vmem:[%s22648_s4 + $0x184] sm:$0xf]  ;;  %v240_v50 = vld [vmem:[%s22648_s4 + $0x188] sm:$0xf] }
  0x4c   : > { %237 = vst [vmem:[%s22644_s18 + $0x180] sm:$0xf] %v236_v48  ;;  %239 = vst [vmem:[%s22644_s18 + $0x188] sm:$0xf] %v238_v49  ;;  %v242_v51 = vld [vmem:[%s22648_s4 + $0x18c] sm:$0xf] }
  0x4d   : > { %241 = vst [vmem:[%s22644_s18 + $0x190] sm:$0xf] %v240_v50  ;;  %v244_v52 = vld [vmem:[%s22648_s4 + $0x1a0] sm:$0xf]  ;;  %v246_v53 = vld [vmem:[%s22648_s4 + $0x1a4] sm:$0xf] }
  0x4e   : > { %243 = vst [vmem:[%s22644_s18 + $0x198] sm:$0xf] %v242_v51  ;;  %245 = vst [vmem:[%s22644_s18 + $0x1a0] sm:$0xf] %v244_v52  ;;  %v248_v54 = vld [vmem:[%s22648_s4 + $0x1a8] sm:$0xf] }
  0x4f   : > { %247 = vst [vmem:[%s22644_s18 + $0x1a8] sm:$0xf] %v246_v53  ;;  %v250_v55 = vld [vmem:[%s22648_s4 + $0x1ac] sm:$0xf]  ;;  %v252_v56 = vld [vmem:[%s22648_s4 + $0x1c0] sm:$0xf] }
  0x50   : > { %249 = vst [vmem:[%s22644_s18 + $0x1b0] sm:$0xf] %v248_v54  ;;  %251 = vst [vmem:[%s22644_s18 + $0x1b8] sm:$0xf] %v250_v55  ;;  %v254_v57 = vld [vmem:[%s22648_s4 + $0x1c4] sm:$0xf] }
  0x51   : > { %253 = vst [vmem:[%s22644_s18 + $0x1c0] sm:$0xf] %v252_v56  ;;  %v256_v58 = vld [vmem:[%s22648_s4 + $0x1c8] sm:$0xf]  ;;  %v258_v59 = vld [vmem:[%s22648_s4 + $0x1cc] sm:$0xf] }
  0x52   : > { %255 = vst [vmem:[%s22644_s18 + $0x1c8] sm:$0xf] %v254_v57  ;;  %257 = vst [vmem:[%s22644_s18 + $0x1d0] sm:$0xf] %v256_v58  ;;  %v260_v60 = vld [vmem:[%s22648_s4 + $0x1e0] sm:$0xf] }
  0x53   : > { %259 = vst [vmem:[%s22644_s18 + $0x1d8] sm:$0xf] %v258_v59  ;;  %v262_v61 = vld [vmem:[%s22648_s4 + $0x1e4] sm:$0xf]  ;;  %v264_v62 = vld [vmem:[%s22648_s4 + $0x1e8] sm:$0xf] }
  0x54   : > { %261 = vst [vmem:[%s22644_s18 + $0x1e0] sm:$0xf] %v260_v60  ;;  %263 = vst [vmem:[%s22644_s18 + $0x1e8] sm:$0xf] %v262_v61  ;;  %v266_v63 = vld [vmem:[%s22648_s4 + $0x1ec] sm:$0xf] }
  0x55   : > { %265 = vst [vmem:[%s22644_s18 + $0x1f0] sm:$0xf] %v264_v62  ;;  %v268_v0 = vld [vmem:[%s22648_s4 + $0x200] sm:$0xf]  ;;  %v270_v1 = vld [vmem:[%s22648_s4 + $0x204] sm:$0xf] }
  0x56   : > { %267 = vst [vmem:[%s22644_s18 + $0x1f8] sm:$0xf] %v266_v63  ;;  %269 = vst [vmem:[%s22644_s18 + $0x200] sm:$0xf] %v268_v0  ;;  %v272_v2 = vld [vmem:[%s22648_s4 + $0x208] sm:$0xf] }
  0x57   : > { %271 = vst [vmem:[%s22644_s18 + $0x208] sm:$0xf] %v270_v1  ;;  %v274_v3 = vld [vmem:[%s22648_s4 + $0x20c] sm:$0xf]  ;;  %v276_v4 = vld [vmem:[%s22648_s4 + $0x220] sm:$0xf] }
  0x58   : > { %273 = vst [vmem:[%s22644_s18 + $0x210] sm:$0xf] %v272_v2  ;;  %275 = vst [vmem:[%s22644_s18 + $0x218] sm:$0xf] %v274_v3  ;;  %v278_v5 = vld [vmem:[%s22648_s4 + $0x224] sm:$0xf] }
  0x59   : > { %277 = vst [vmem:[%s22644_s18 + $0x220] sm:$0xf] %v276_v4  ;;  %v280_v6 = vld [vmem:[%s22648_s4 + $0x228] sm:$0xf]  ;;  %v282_v7 = vld [vmem:[%s22648_s4 + $0x22c] sm:$0xf] }
  0x5a   : > { %279 = vst [vmem:[%s22644_s18 + $0x228] sm:$0xf] %v278_v5  ;;  %281 = vst [vmem:[%s22644_s18 + $0x230] sm:$0xf] %v280_v6  ;;  %v284_v8 = vld [vmem:[%s22648_s4 + $0x240] sm:$0xf] }
  0x5b   : > { %283 = vst [vmem:[%s22644_s18 + $0x238] sm:$0xf] %v282_v7  ;;  %v286_v9 = vld [vmem:[%s22648_s4 + $0x244] sm:$0xf]  ;;  %v288_v10 = vld [vmem:[%s22648_s4 + $0x248] sm:$0xf] }
  0x5c   : > { %285 = vst [vmem:[%s22644_s18 + $0x240] sm:$0xf] %v284_v8  ;;  %287 = vst [vmem:[%s22644_s18 + $0x248] sm:$0xf] %v286_v9  ;;  %v290_v11 = vld [vmem:[%s22648_s4 + $0x24c] sm:$0xf] }
  0x5d   : > { %289 = vst [vmem:[%s22644_s18 + $0x250] sm:$0xf] %v288_v10  ;;  %v292_v12 = vld [vmem:[%s22648_s4 + $0x260] sm:$0xf]  ;;  %v294_v13 = vld [vmem:[%s22648_s4 + $0x264] sm:$0xf] }
  0x5e   : > { %291 = vst [vmem:[%s22644_s18 + $0x258] sm:$0xf] %v290_v11  ;;  %293 = vst [vmem:[%s22644_s18 + $0x260] sm:$0xf] %v292_v12  ;;  %v296_v14 = vld [vmem:[%s22648_s4 + $0x268] sm:$0xf] }
  0x5f   : > { %295 = vst [vmem:[%s22644_s18 + $0x268] sm:$0xf] %v294_v13  ;;  %v298_v15 = vld [vmem:[%s22648_s4 + $0x26c] sm:$0xf]  ;;  %v300_v16 = vld [vmem:[%s22648_s4 + $0x280] sm:$0xf] }
  0x60   : > { %297 = vst [vmem:[%s22644_s18 + $0x270] sm:$0xf] %v296_v14  ;;  %299 = vst [vmem:[%s22644_s18 + $0x278] sm:$0xf] %v298_v15  ;;  %v302_v17 = vld [vmem:[%s22648_s4 + $0x284] sm:$0xf] }
  0x61   : > { %301 = vst [vmem:[%s22644_s18 + $0x280] sm:$0xf] %v300_v16  ;;  %v304_v18 = vld [vmem:[%s22648_s4 + $0x288] sm:$0xf]  ;;  %v306_v19 = vld [vmem:[%s22648_s4 + $0x28c] sm:$0xf] }
  0x62   : > { %303 = vst [vmem:[%s22644_s18 + $0x288] sm:$0xf] %v302_v17  ;;  %305 = vst [vmem:[%s22644_s18 + $0x290] sm:$0xf] %v304_v18  ;;  %v308_v20 = vld [vmem:[%s22648_s4 + $0x2a0] sm:$0xf] }
  0x63   : > { %307 = vst [vmem:[%s22644_s18 + $0x298] sm:$0xf] %v306_v19  ;;  %v310_v21 = vld [vmem:[%s22648_s4 + $0x2a4] sm:$0xf]  ;;  %v312_v22 = vld [vmem:[%s22648_s4 + $0x2a8] sm:$0xf] }
  0x64   : > { %309 = vst [vmem:[%s22644_s18 + $0x2a0] sm:$0xf] %v308_v20  ;;  %311 = vst [vmem:[%s22644_s18 + $0x2a8] sm:$0xf] %v310_v21  ;;  %v314_v23 = vld [vmem:[%s22648_s4 + $0x2ac] sm:$0xf] }
  0x65   : > { %313 = vst [vmem:[%s22644_s18 + $0x2b0] sm:$0xf] %v312_v22  ;;  %v316_v24 = vld [vmem:[%s22648_s4 + $0x2c0] sm:$0xf]  ;;  %v318_v25 = vld [vmem:[%s22648_s4 + $0x2c4] sm:$0xf] }
  0x66   : > { %315 = vst [vmem:[%s22644_s18 + $0x2b8] sm:$0xf] %v314_v23  ;;  %317 = vst [vmem:[%s22644_s18 + $0x2c0] sm:$0xf] %v316_v24  ;;  %v320_v26 = vld [vmem:[%s22648_s4 + $0x2c8] sm:$0xf] }
  0x67   : > { %319 = vst [vmem:[%s22644_s18 + $0x2c8] sm:$0xf] %v318_v25  ;;  %v322_v27 = vld [vmem:[%s22648_s4 + $0x2cc] sm:$0xf]  ;;  %v324_v28 = vld [vmem:[%s22648_s4 + $0x2e0] sm:$0xf] }
  0x68   : > { %321 = vst [vmem:[%s22644_s18 + $0x2d0] sm:$0xf] %v320_v26  ;;  %323 = vst [vmem:[%s22644_s18 + $0x2d8] sm:$0xf] %v322_v27  ;;  %v326_v29 = vld [vmem:[%s22648_s4 + $0x2e4] sm:$0xf] }
  0x69   : > { %325 = vst [vmem:[%s22644_s18 + $0x2e0] sm:$0xf] %v324_v28  ;;  %v328_v30 = vld [vmem:[%s22648_s4 + $0x2e8] sm:$0xf]  ;;  %v330_v31 = vld [vmem:[%s22648_s4 + $0x2ec] sm:$0xf] }
  0x6a   : > { %327 = vst [vmem:[%s22644_s18 + $0x2e8] sm:$0xf] %v326_v29  ;;  %329 = vst [vmem:[%s22644_s18 + $0x2f0] sm:$0xf] %v328_v30  ;;  %v332_v32 = vld [vmem:[%s22648_s4 + $0x300] sm:$0xf] }
  0x6b   : > { %331 = vst [vmem:[%s22644_s18 + $0x2f8] sm:$0xf] %v330_v31  ;;  %v334_v33 = vld [vmem:[%s22648_s4 + $0x304] sm:$0xf]  ;;  %v336_v34 = vld [vmem:[%s22648_s4 + $0x308] sm:$0xf] }
  0x6c   : > { %333 = vst [vmem:[%s22644_s18 + $0x300] sm:$0xf] %v332_v32  ;;  %335 = vst [vmem:[%s22644_s18 + $0x308] sm:$0xf] %v334_v33  ;;  %v338_v35 = vld [vmem:[%s22648_s4 + $0x30c] sm:$0xf] }
  0x6d   : > { %337 = vst [vmem:[%s22644_s18 + $0x310] sm:$0xf] %v336_v34  ;;  %v340_v36 = vld [vmem:[%s22648_s4 + $0x320] sm:$0xf]  ;;  %v342_v37 = vld [vmem:[%s22648_s4 + $0x324] sm:$0xf] }
  0x6e   : > { %339 = vst [vmem:[%s22644_s18 + $0x318] sm:$0xf] %v338_v35  ;;  %341 = vst [vmem:[%s22644_s18 + $0x320] sm:$0xf] %v340_v36  ;;  %v344_v38 = vld [vmem:[%s22648_s4 + $0x328] sm:$0xf] }
  0x6f   : > { %343 = vst [vmem:[%s22644_s18 + $0x328] sm:$0xf] %v342_v37  ;;  %v346_v39 = vld [vmem:[%s22648_s4 + $0x32c] sm:$0xf]  ;;  %v348_v40 = vld [vmem:[%s22648_s4 + $0x340] sm:$0xf] }
  0x70   : > { %345 = vst [vmem:[%s22644_s18 + $0x330] sm:$0xf] %v344_v38  ;;  %347 = vst [vmem:[%s22644_s18 + $0x338] sm:$0xf] %v346_v39  ;;  %v350_v41 = vld [vmem:[%s22648_s4 + $0x344] sm:$0xf] }
  0x71   : > { %349 = vst [vmem:[%s22644_s18 + $0x340] sm:$0xf] %v348_v40  ;;  %v352_v42 = vld [vmem:[%s22648_s4 + $0x348] sm:$0xf]  ;;  %v354_v43 = vld [vmem:[%s22648_s4 + $0x34c] sm:$0xf] }
  0x72   : > { %351 = vst [vmem:[%s22644_s18 + $0x348] sm:$0xf] %v350_v41  ;;  %353 = vst [vmem:[%s22644_s18 + $0x350] sm:$0xf] %v352_v42  ;;  %v356_v44 = vld [vmem:[%s22648_s4 + $0x360] sm:$0xf] }
  0x73   : > { %355 = vst [vmem:[%s22644_s18 + $0x358] sm:$0xf] %v354_v43  ;;  %v358_v45 = vld [vmem:[%s22648_s4 + $0x364] sm:$0xf]  ;;  %v360_v46 = vld [vmem:[%s22648_s4 + $0x368] sm:$0xf] }
  0x74   : > { %357 = vst [vmem:[%s22644_s18 + $0x360] sm:$0xf] %v356_v44  ;;  %359 = vst [vmem:[%s22644_s18 + $0x368] sm:$0xf] %v358_v45  ;;  %v362_v47 = vld [vmem:[%s22648_s4 + $0x36c] sm:$0xf] }
  0x75   : > { %361 = vst [vmem:[%s22644_s18 + $0x370] sm:$0xf] %v360_v46  ;;  %v364_v48 = vld [vmem:[%s22648_s4 + $0x380] sm:$0xf]  ;;  %v366_v49 = vld [vmem:[%s22648_s4 + $0x384] sm:$0xf] }
  0x76   : > { %363 = vst [vmem:[%s22644_s18 + $0x378] sm:$0xf] %v362_v47  ;;  %365 = vst [vmem:[%s22644_s18 + $0x380] sm:$0xf] %v364_v48  ;;  %v368_v50 = vld [vmem:[%s22648_s4 + $0x388] sm:$0xf] }
  0x77   : > { %367 = vst [vmem:[%s22644_s18 + $0x388] sm:$0xf] %v366_v49  ;;  %v370_v51 = vld [vmem:[%s22648_s4 + $0x38c] sm:$0xf]  ;;  %v372_v52 = vld [vmem:[%s22648_s4 + $0x3a0] sm:$0xf] }
  0x78   : > { %369 = vst [vmem:[%s22644_s18 + $0x390] sm:$0xf] %v368_v50  ;;  %371 = vst [vmem:[%s22644_s18 + $0x398] sm:$0xf] %v370_v51  ;;  %v374_v53 = vld [vmem:[%s22648_s4 + $0x3a4] sm:$0xf] }
  0x79   : > { %373 = vst [vmem:[%s22644_s18 + $0x3a0] sm:$0xf] %v372_v52  ;;  %v376_v54 = vld [vmem:[%s22648_s4 + $0x3a8] sm:$0xf]  ;;  %v378_v55 = vld [vmem:[%s22648_s4 + $0x3ac] sm:$0xf] }
  0x7a   : > { %375 = vst [vmem:[%s22644_s18 + $0x3a8] sm:$0xf] %v374_v53  ;;  %377 = vst [vmem:[%s22644_s18 + $0x3b0] sm:$0xf] %v376_v54  ;;  %v380_v56 = vld [vmem:[%s22648_s4 + $0x3c0] sm:$0xf] }
  0x7b   : > { %379 = vst [vmem:[%s22644_s18 + $0x3b8] sm:$0xf] %v378_v55  ;;  %v382_v57 = vld [vmem:[%s22648_s4 + $0x3c4] sm:$0xf]  ;;  %v384_v58 = vld [vmem:[%s22648_s4 + $0x3c8] sm:$0xf] }
  0x7c   : > { %381 = vst [vmem:[%s22644_s18 + $0x3c0] sm:$0xf] %v380_v56  ;;  %383 = vst [vmem:[%s22644_s18 + $0x3c8] sm:$0xf] %v382_v57  ;;  %v386_v59 = vld [vmem:[%s22648_s4 + $0x3cc] sm:$0xf] }
  0x7d   : > { %385 = vst [vmem:[%s22644_s18 + $0x3d0] sm:$0xf] %v384_v58  ;;  %v388_v60 = vld [vmem:[%s22648_s4 + $0x3e0] sm:$0xf]  ;;  %v390_v61 = vld [vmem:[%s22648_s4 + $0x3e4] sm:$0xf] }
  0x7e   : > { %387 = vst [vmem:[%s22644_s18 + $0x3d8] sm:$0xf] %v386_v59  ;;  %389 = vst [vmem:[%s22644_s18 + $0x3e0] sm:$0xf] %v388_v60  ;;  %v392_v62 = vld [vmem:[%s22648_s4 + $0x3e8] sm:$0xf] }
  0x7f   : > { %391 = vst [vmem:[%s22644_s18 + $0x3e8] sm:$0xf] %v390_v61  ;;  %v394_v63 = vld [vmem:[%s22648_s4 + $0x3ec] sm:$0xf]  ;;  %v396_v0 = vld [vmem:[%s22648_s4 + $0x400] sm:$0xf] }
  0x80   : > { %393 = vst [vmem:[%s22644_s18 + $0x3f0] sm:$0xf] %v392_v62  ;;  %395 = vst [vmem:[%s22644_s18 + $0x3f8] sm:$0xf] %v394_v63  ;;  %v398_v1 = vld [vmem:[%s22648_s4 + $0x404] sm:$0xf] }
  0x81   : > { %397 = vst [vmem:[%s22644_s18 + $0x400] sm:$0xf] %v396_v0  ;;  %v400_v2 = vld [vmem:[%s22648_s4 + $0x408] sm:$0xf]  ;;  %v402_v3 = vld [vmem:[%s22648_s4 + $0x40c] sm:$0xf] }
  0x82   : > { %399 = vst [vmem:[%s22644_s18 + $0x408] sm:$0xf] %v398_v1  ;;  %401 = vst [vmem:[%s22644_s18 + $0x410] sm:$0xf] %v400_v2  ;;  %v404_v4 = vld [vmem:[%s22648_s4 + $0x420] sm:$0xf] }
  0x83   : > { %403 = vst [vmem:[%s22644_s18 + $0x418] sm:$0xf] %v402_v3  ;;  %v406_v5 = vld [vmem:[%s22648_s4 + $0x424] sm:$0xf]  ;;  %v408_v6 = vld [vmem:[%s22648_s4 + $0x428] sm:$0xf] }
  0x84   : > { %405 = vst [vmem:[%s22644_s18 + $0x420] sm:$0xf] %v404_v4  ;;  %407 = vst [vmem:[%s22644_s18 + $0x428] sm:$0xf] %v406_v5  ;;  %v410_v7 = vld [vmem:[%s22648_s4 + $0x42c] sm:$0xf] }
  0x85   : > { %409 = vst [vmem:[%s22644_s18 + $0x430] sm:$0xf] %v408_v6  ;;  %v412_v8 = vld [vmem:[%s22648_s4 + $0x440] sm:$0xf]  ;;  %v414_v9 = vld [vmem:[%s22648_s4 + $0x444] sm:$0xf] }
  0x86   : > { %411 = vst [vmem:[%s22644_s18 + $0x438] sm:$0xf] %v410_v7  ;;  %413 = vst [vmem:[%s22644_s18 + $0x440] sm:$0xf] %v412_v8  ;;  %v416_v10 = vld [vmem:[%s22648_s4 + $0x448] sm:$0xf] }
  0x87   : > { %415 = vst [vmem:[%s22644_s18 + $0x448] sm:$0xf] %v414_v9  ;;  %v418_v11 = vld [vmem:[%s22648_s4 + $0x44c] sm:$0xf]  ;;  %v420_v12 = vld [vmem:[%s22648_s4 + $0x460] sm:$0xf] }
  0x88   : > { %417 = vst [vmem:[%s22644_s18 + $0x450] sm:$0xf] %v416_v10  ;;  %419 = vst [vmem:[%s22644_s18 + $0x458] sm:$0xf] %v418_v11  ;;  %v422_v13 = vld [vmem:[%s22648_s4 + $0x464] sm:$0xf] }
  0x89   : > { %421 = vst [vmem:[%s22644_s18 + $0x460] sm:$0xf] %v420_v12  ;;  %v424_v14 = vld [vmem:[%s22648_s4 + $0x468] sm:$0xf]  ;;  %v426_v15 = vld [vmem:[%s22648_s4 + $0x46c] sm:$0xf] }
  0x8a   : > { %423 = vst [vmem:[%s22644_s18 + $0x468] sm:$0xf] %v422_v13  ;;  %425 = vst [vmem:[%s22644_s18 + $0x470] sm:$0xf] %v424_v14  ;;  %v428_v16 = vld [vmem:[%s22648_s4 + $0x480] sm:$0xf] }
  0x8b   : > { %427 = vst [vmem:[%s22644_s18 + $0x478] sm:$0xf] %v426_v15  ;;  %v430_v17 = vld [vmem:[%s22648_s4 + $0x484] sm:$0xf]  ;;  %v432_v18 = vld [vmem:[%s22648_s4 + $0x488] sm:$0xf] }
  0x8c   : > { %429 = vst [vmem:[%s22644_s18 + $0x480] sm:$0xf] %v428_v16  ;;  %431 = vst [vmem:[%s22644_s18 + $0x488] sm:$0xf] %v430_v17  ;;  %v434_v19 = vld [vmem:[%s22648_s4 + $0x48c] sm:$0xf] }
  0x8d   : > { %433 = vst [vmem:[%s22644_s18 + $0x490] sm:$0xf] %v432_v18  ;;  %v436_v20 = vld [vmem:[%s22648_s4 + $0x4a0] sm:$0xf]  ;;  %v438_v21 = vld [vmem:[%s22648_s4 + $0x4a4] sm:$0xf] }
  0x8e   : > { %435 = vst [vmem:[%s22644_s18 + $0x498] sm:$0xf] %v434_v19  ;;  %437 = vst [vmem:[%s22644_s18 + $0x4a0] sm:$0xf] %v436_v20  ;;  %v440_v22 = vld [vmem:[%s22648_s4 + $0x4a8] sm:$0xf] }
  0x8f   : > { %439 = vst [vmem:[%s22644_s18 + $0x4a8] sm:$0xf] %v438_v21  ;;  %v442_v23 = vld [vmem:[%s22648_s4 + $0x4ac] sm:$0xf]  ;;  %v444_v24 = vld [vmem:[%s22648_s4 + $0x4c0] sm:$0xf] }
  0x90   : > { %441 = vst [vmem:[%s22644_s18 + $0x4b0] sm:$0xf] %v440_v22  ;;  %443 = vst [vmem:[%s22644_s18 + $0x4b8] sm:$0xf] %v442_v23  ;;  %v446_v25 = vld [vmem:[%s22648_s4 + $0x4c4] sm:$0xf] }
  0x91   : > { %445 = vst [vmem:[%s22644_s18 + $0x4c0] sm:$0xf] %v444_v24  ;;  %v448_v26 = vld [vmem:[%s22648_s4 + $0x4c8] sm:$0xf]  ;;  %v450_v27 = vld [vmem:[%s22648_s4 + $0x4cc] sm:$0xf] }
  0x92   : > { %447 = vst [vmem:[%s22644_s18 + $0x4c8] sm:$0xf] %v446_v25  ;;  %449 = vst [vmem:[%s22644_s18 + $0x4d0] sm:$0xf] %v448_v26  ;;  %v452_v28 = vld [vmem:[%s22648_s4 + $0x4e0] sm:$0xf] }
  0x93   : > { %451 = vst [vmem:[%s22644_s18 + $0x4d8] sm:$0xf] %v450_v27  ;;  %v454_v29 = vld [vmem:[%s22648_s4 + $0x4e4] sm:$0xf]  ;;  %v456_v30 = vld [vmem:[%s22648_s4 + $0x4e8] sm:$0xf] }
  0x94   : > { %453 = vst [vmem:[%s22644_s18 + $0x4e0] sm:$0xf] %v452_v28  ;;  %455 = vst [vmem:[%s22644_s18 + $0x4e8] sm:$0xf] %v454_v29  ;;  %v458_v31 = vld [vmem:[%s22648_s4 + $0x4ec] sm:$0xf] }
  0x95   : > { %457 = vst [vmem:[%s22644_s18 + $0x4f0] sm:$0xf] %v456_v30  ;;  %v460_v32 = vld [vmem:[%s22648_s4 + $0x500] sm:$0xf]  ;;  %v462_v33 = vld [vmem:[%s22648_s4 + $0x504] sm:$0xf] }
  0x96   : > { %459 = vst [vmem:[%s22644_s18 + $0x4f8] sm:$0xf] %v458_v31  ;;  %461 = vst [vmem:[%s22644_s18 + $0x500] sm:$0xf] %v460_v32  ;;  %v464_v34 = vld [vmem:[%s22648_s4 + $0x508] sm:$0xf] }
  0x97   : > { %463 = vst [vmem:[%s22644_s18 + $0x508] sm:$0xf] %v462_v33  ;;  %v466_v35 = vld [vmem:[%s22648_s4 + $0x50c] sm:$0xf]  ;;  %v468_v36 = vld [vmem:[%s22648_s4 + $0x520] sm:$0xf] }
  0x98   : > { %465 = vst [vmem:[%s22644_s18 + $0x510] sm:$0xf] %v464_v34  ;;  %467 = vst [vmem:[%s22644_s18 + $0x518] sm:$0xf] %v466_v35  ;;  %v470_v37 = vld [vmem:[%s22648_s4 + $0x524] sm:$0xf] }
  0x99   : > { %469 = vst [vmem:[%s22644_s18 + $0x520] sm:$0xf] %v468_v36  ;;  %v472_v38 = vld [vmem:[%s22648_s4 + $0x528] sm:$0xf]  ;;  %v474_v39 = vld [vmem:[%s22648_s4 + $0x52c] sm:$0xf] }
  0x9a   : > { %471 = vst [vmem:[%s22644_s18 + $0x528] sm:$0xf] %v470_v37  ;;  %473 = vst [vmem:[%s22644_s18 + $0x530] sm:$0xf] %v472_v38  ;;  %v476_v40 = vld [vmem:[%s22648_s4 + $0x540] sm:$0xf] }
  0x9b   : > { %475 = vst [vmem:[%s22644_s18 + $0x538] sm:$0xf] %v474_v39  ;;  %v478_v41 = vld [vmem:[%s22648_s4 + $0x544] sm:$0xf]  ;;  %v480_v42 = vld [vmem:[%s22648_s4 + $0x548] sm:$0xf] }
  0x9c   : > { %477 = vst [vmem:[%s22644_s18 + $0x540] sm:$0xf] %v476_v40  ;;  %479 = vst [vmem:[%s22644_s18 + $0x548] sm:$0xf] %v478_v41  ;;  %v482_v43 = vld [vmem:[%s22648_s4 + $0x54c] sm:$0xf] }
  0x9d   : > { %481 = vst [vmem:[%s22644_s18 + $0x550] sm:$0xf] %v480_v42  ;;  %v484_v44 = vld [vmem:[%s22648_s4 + $0x560] sm:$0xf]  ;;  %v486_v45 = vld [vmem:[%s22648_s4 + $0x564] sm:$0xf] }
  0x9e   : > { %483 = vst [vmem:[%s22644_s18 + $0x558] sm:$0xf] %v482_v43  ;;  %485 = vst [vmem:[%s22644_s18 + $0x560] sm:$0xf] %v484_v44  ;;  %v488_v46 = vld [vmem:[%s22648_s4 + $0x568] sm:$0xf] }
  0x9f   : > { %487 = vst [vmem:[%s22644_s18 + $0x568] sm:$0xf] %v486_v45  ;;  %v490_v47 = vld [vmem:[%s22648_s4 + $0x56c] sm:$0xf]  ;;  %v492_v48 = vld [vmem:[%s22648_s4 + $0x580] sm:$0xf] }
  0xa0   : > { %489 = vst [vmem:[%s22644_s18 + $0x570] sm:$0xf] %v488_v46  ;;  %491 = vst [vmem:[%s22644_s18 + $0x578] sm:$0xf] %v490_v47  ;;  %v494_v49 = vld [vmem:[%s22648_s4 + $0x584] sm:$0xf] }
  0xa1   : > { %493 = vst [vmem:[%s22644_s18 + $0x580] sm:$0xf] %v492_v48  ;;  %v496_v50 = vld [vmem:[%s22648_s4 + $0x588] sm:$0xf]  ;;  %v498_v51 = vld [vmem:[%s22648_s4 + $0x58c] sm:$0xf] }
  0xa2   : > { %495 = vst [vmem:[%s22644_s18 + $0x588] sm:$0xf] %v494_v49  ;;  %497 = vst [vmem:[%s22644_s18 + $0x590] sm:$0xf] %v496_v50  ;;  %v500_v52 = vld [vmem:[%s22648_s4 + $0x5a0] sm:$0xf] }
  0xa3   : > { %499 = vst [vmem:[%s22644_s18 + $0x598] sm:$0xf] %v498_v51  ;;  %v502_v53 = vld [vmem:[%s22648_s4 + $0x5a4] sm:$0xf]  ;;  %v504_v54 = vld [vmem:[%s22648_s4 + $0x5a8] sm:$0xf] }
  0xa4   : > { %501 = vst [vmem:[%s22644_s18 + $0x5a0] sm:$0xf] %v500_v52  ;;  %503 = vst [vmem:[%s22644_s18 + $0x5a8] sm:$0xf] %v502_v53  ;;  %v506_v55 = vld [vmem:[%s22648_s4 + $0x5ac] sm:$0xf] }
  0xa5   : > { %505 = vst [vmem:[%s22644_s18 + $0x5b0] sm:$0xf] %v504_v54  ;;  %v508_v56 = vld [vmem:[%s22648_s4 + $0x5c0] sm:$0xf]  ;;  %v510_v57 = vld [vmem:[%s22648_s4 + $0x5c4] sm:$0xf] }
  0xa6   : > { %507 = vst [vmem:[%s22644_s18 + $0x5b8] sm:$0xf] %v506_v55  ;;  %509 = vst [vmem:[%s22644_s18 + $0x5c0] sm:$0xf] %v508_v56  ;;  %v512_v58 = vld [vmem:[%s22648_s4 + $0x5c8] sm:$0xf] }
  0xa7   : > { %511 = vst [vmem:[%s22644_s18 + $0x5c8] sm:$0xf] %v510_v57  ;;  %v514_v59 = vld [vmem:[%s22648_s4 + $0x5cc] sm:$0xf]  ;;  %v516_v60 = vld [vmem:[%s22648_s4 + $0x5e0] sm:$0xf] }
  0xa8   : > { %513 = vst [vmem:[%s22644_s18 + $0x5d0] sm:$0xf] %v512_v58  ;;  %515 = vst [vmem:[%s22644_s18 + $0x5d8] sm:$0xf] %v514_v59  ;;  %v518_v61 = vld [vmem:[%s22648_s4 + $0x5e4] sm:$0xf] }
  0xa9   : > { %517 = vst [vmem:[%s22644_s18 + $0x5e0] sm:$0xf] %v516_v60  ;;  %v520_v62 = vld [vmem:[%s22648_s4 + $0x5e8] sm:$0xf]  ;;  %v522_v63 = vld [vmem:[%s22648_s4 + $0x5ec] sm:$0xf] }
  0xaa   : > { %519 = vst [vmem:[%s22644_s18 + $0x5e8] sm:$0xf] %v518_v61  ;;  %521 = vst [vmem:[%s22644_s18 + $0x5f0] sm:$0xf] %v520_v62  ;;  %v524_v0 = vld [vmem:[%s22648_s4 + $0x600] sm:$0xf] }
  0xab   : > { %523 = vst [vmem:[%s22644_s18 + $0x5f8] sm:$0xf] %v522_v63  ;;  %v526_v1 = vld [vmem:[%s22648_s4 + $0x604] sm:$0xf]  ;;  %v528_v2 = vld [vmem:[%s22648_s4 + $0x608] sm:$0xf] }
  0xac   : > { %525 = vst [vmem:[%s22644_s18 + $0x600] sm:$0xf] %v524_v0  ;;  %527 = vst [vmem:[%s22644_s18 + $0x608] sm:$0xf] %v526_v1  ;;  %v530_v3 = vld [vmem:[%s22648_s4 + $0x60c] sm:$0xf] }
  0xad   : > { %529 = vst [vmem:[%s22644_s18 + $0x610] sm:$0xf] %v528_v2  ;;  %v532_v4 = vld [vmem:[%s22648_s4 + $0x620] sm:$0xf]  ;;  %v534_v5 = vld [vmem:[%s22648_s4 + $0x624] sm:$0xf] }
  0xae   : > { %531 = vst [vmem:[%s22644_s18 + $0x618] sm:$0xf] %v530_v3  ;;  %533 = vst [vmem:[%s22644_s18 + $0x620] sm:$0xf] %v532_v4  ;;  %v536_v6 = vld [vmem:[%s22648_s4 + $0x628] sm:$0xf] }
  0xaf   : > { %535 = vst [vmem:[%s22644_s18 + $0x628] sm:$0xf] %v534_v5  ;;  %v538_v7 = vld [vmem:[%s22648_s4 + $0x62c] sm:$0xf]  ;;  %v540_v8 = vld [vmem:[%s22648_s4 + $0x640] sm:$0xf] }
  0xb0   : > { %537 = vst [vmem:[%s22644_s18 + $0x630] sm:$0xf] %v536_v6  ;;  %539 = vst [vmem:[%s22644_s18 + $0x638] sm:$0xf] %v538_v7  ;;  %v542_v9 = vld [vmem:[%s22648_s4 + $0x644] sm:$0xf] }
  0xb1   : > { %541 = vst [vmem:[%s22644_s18 + $0x640] sm:$0xf] %v540_v8  ;;  %v544_v10 = vld [vmem:[%s22648_s4 + $0x648] sm:$0xf]  ;;  %v546_v11 = vld [vmem:[%s22648_s4 + $0x64c] sm:$0xf] }
  0xb2   : > { %543 = vst [vmem:[%s22644_s18 + $0x648] sm:$0xf] %v542_v9  ;;  %545 = vst [vmem:[%s22644_s18 + $0x650] sm:$0xf] %v544_v10  ;;  %v548_v12 = vld [vmem:[%s22648_s4 + $0x660] sm:$0xf] }
  0xb3   : > { %547 = vst [vmem:[%s22644_s18 + $0x658] sm:$0xf] %v546_v11  ;;  %v550_v13 = vld [vmem:[%s22648_s4 + $0x664] sm:$0xf]  ;;  %v552_v14 = vld [vmem:[%s22648_s4 + $0x668] sm:$0xf] }
  0xb4   : > { %549 = vst [vmem:[%s22644_s18 + $0x660] sm:$0xf] %v548_v12  ;;  %551 = vst [vmem:[%s22644_s18 + $0x668] sm:$0xf] %v550_v13  ;;  %v554_v15 = vld [vmem:[%s22648_s4 + $0x66c] sm:$0xf] }
  0xb5   : > { %553 = vst [vmem:[%s22644_s18 + $0x670] sm:$0xf] %v552_v14  ;;  %v556_v16 = vld [vmem:[%s22648_s4 + $0x680] sm:$0xf]  ;;  %v558_v17 = vld [vmem:[%s22648_s4 + $0x684] sm:$0xf] }
  0xb6   : > { %555 = vst [vmem:[%s22644_s18 + $0x678] sm:$0xf] %v554_v15  ;;  %557 = vst [vmem:[%s22644_s18 + $0x680] sm:$0xf] %v556_v16  ;;  %v560_v18 = vld [vmem:[%s22648_s4 + $0x688] sm:$0xf] }
  0xb7   : > { %559 = vst [vmem:[%s22644_s18 + $0x688] sm:$0xf] %v558_v17  ;;  %v562_v19 = vld [vmem:[%s22648_s4 + $0x68c] sm:$0xf]  ;;  %v564_v20 = vld [vmem:[%s22648_s4 + $0x6a0] sm:$0xf] }
  0xb8   : > { %561 = vst [vmem:[%s22644_s18 + $0x690] sm:$0xf] %v560_v18  ;;  %563 = vst [vmem:[%s22644_s18 + $0x698] sm:$0xf] %v562_v19  ;;  %v566_v21 = vld [vmem:[%s22648_s4 + $0x6a4] sm:$0xf] }
  0xb9   : > { %565 = vst [vmem:[%s22644_s18 + $0x6a0] sm:$0xf] %v564_v20  ;;  %v568_v22 = vld [vmem:[%s22648_s4 + $0x6a8] sm:$0xf]  ;;  %v570_v23 = vld [vmem:[%s22648_s4 + $0x6ac] sm:$0xf] }
  0xba   : > { %567 = vst [vmem:[%s22644_s18 + $0x6a8] sm:$0xf] %v566_v21  ;;  %569 = vst [vmem:[%s22644_s18 + $0x6b0] sm:$0xf] %v568_v22  ;;  %v572_v24 = vld [vmem:[%s22648_s4 + $0x6c0] sm:$0xf] }
  0xbb   : > { %571 = vst [vmem:[%s22644_s18 + $0x6b8] sm:$0xf] %v570_v23  ;;  %v574_v25 = vld [vmem:[%s22648_s4 + $0x6c4] sm:$0xf]  ;;  %v576_v26 = vld [vmem:[%s22648_s4 + $0x6c8] sm:$0xf] }
  0xbc   : > { %573 = vst [vmem:[%s22644_s18 + $0x6c0] sm:$0xf] %v572_v24  ;;  %575 = vst [vmem:[%s22644_s18 + $0x6c8] sm:$0xf] %v574_v25  ;;  %v578_v27 = vld [vmem:[%s22648_s4 + $0x6cc] sm:$0xf] }
  0xbd   : > { %577 = vst [vmem:[%s22644_s18 + $0x6d0] sm:$0xf] %v576_v26  ;;  %v580_v28 = vld [vmem:[%s22648_s4 + $0x6e0] sm:$0xf]  ;;  %v582_v29 = vld [vmem:[%s22648_s4 + $0x6e4] sm:$0xf] }
  0xbe   : > { %579 = vst [vmem:[%s22644_s18 + $0x6d8] sm:$0xf] %v578_v27  ;;  %581 = vst [vmem:[%s22644_s18 + $0x6e0] sm:$0xf] %v580_v28  ;;  %v584_v30 = vld [vmem:[%s22648_s4 + $0x6e8] sm:$0xf] }
  0xbf   : > { %583 = vst [vmem:[%s22644_s18 + $0x6e8] sm:$0xf] %v582_v29  ;;  %v586_v31 = vld [vmem:[%s22648_s4 + $0x6ec] sm:$0xf]  ;;  %v588_v32 = vld [vmem:[%s22648_s4 + $0x700] sm:$0xf] }
  0xc0   : > { %585 = vst [vmem:[%s22644_s18 + $0x6f0] sm:$0xf] %v584_v30  ;;  %587 = vst [vmem:[%s22644_s18 + $0x6f8] sm:$0xf] %v586_v31  ;;  %v590_v33 = vld [vmem:[%s22648_s4 + $0x704] sm:$0xf] }
  0xc1   : > { %589 = vst [vmem:[%s22644_s18 + $0x700] sm:$0xf] %v588_v32  ;;  %v592_v34 = vld [vmem:[%s22648_s4 + $0x708] sm:$0xf]  ;;  %v594_v35 = vld [vmem:[%s22648_s4 + $0x70c] sm:$0xf] }
  0xc2   : > { %591 = vst [vmem:[%s22644_s18 + $0x708] sm:$0xf] %v590_v33  ;;  %593 = vst [vmem:[%s22644_s18 + $0x710] sm:$0xf] %v592_v34  ;;  %v596_v36 = vld [vmem:[%s22648_s4 + $0x720] sm:$0xf] }
  0xc3   : > { %595 = vst [vmem:[%s22644_s18 + $0x718] sm:$0xf] %v594_v35  ;;  %v598_v37 = vld [vmem:[%s22648_s4 + $0x724] sm:$0xf]  ;;  %v600_v38 = vld [vmem:[%s22648_s4 + $0x728] sm:$0xf] }
  0xc4   : > { %597 = vst [vmem:[%s22644_s18 + $0x720] sm:$0xf] %v596_v36  ;;  %599 = vst [vmem:[%s22644_s18 + $0x728] sm:$0xf] %v598_v37  ;;  %v602_v39 = vld [vmem:[%s22648_s4 + $0x72c] sm:$0xf] }
  0xc5   : > { %601 = vst [vmem:[%s22644_s18 + $0x730] sm:$0xf] %v600_v38  ;;  %v604_v40 = vld [vmem:[%s22648_s4 + $0x740] sm:$0xf]  ;;  %v606_v41 = vld [vmem:[%s22648_s4 + $0x744] sm:$0xf] }
  0xc6   : > { %603 = vst [vmem:[%s22644_s18 + $0x738] sm:$0xf] %v602_v39  ;;  %605 = vst [vmem:[%s22644_s18 + $0x740] sm:$0xf] %v604_v40  ;;  %v608_v42 = vld [vmem:[%s22648_s4 + $0x748] sm:$0xf] }
  0xc7   : > { %607 = vst [vmem:[%s22644_s18 + $0x748] sm:$0xf] %v606_v41  ;;  %v610_v43 = vld [vmem:[%s22648_s4 + $0x74c] sm:$0xf]  ;;  %v612_v44 = vld [vmem:[%s22648_s4 + $0x760] sm:$0xf] }
  0xc8   : > { %609 = vst [vmem:[%s22644_s18 + $0x750] sm:$0xf] %v608_v42  ;;  %611 = vst [vmem:[%s22644_s18 + $0x758] sm:$0xf] %v610_v43  ;;  %v614_v45 = vld [vmem:[%s22648_s4 + $0x764] sm:$0xf] }
  0xc9   : > { %613 = vst [vmem:[%s22644_s18 + $0x760] sm:$0xf] %v612_v44  ;;  %v616_v46 = vld [vmem:[%s22648_s4 + $0x768] sm:$0xf]  ;;  %v618_v47 = vld [vmem:[%s22648_s4 + $0x76c] sm:$0xf] }
  0xca   : > { %615 = vst [vmem:[%s22644_s18 + $0x768] sm:$0xf] %v614_v45  ;;  %617 = vst [vmem:[%s22644_s18 + $0x770] sm:$0xf] %v616_v46  ;;  %v620_v48 = vld [vmem:[%s22648_s4 + $0x780] sm:$0xf] }
  0xcb   : > { %619 = vst [vmem:[%s22644_s18 + $0x778] sm:$0xf] %v618_v47  ;;  %v622_v49 = vld [vmem:[%s22648_s4 + $0x784] sm:$0xf]  ;;  %v624_v50 = vld [vmem:[%s22648_s4 + $0x788] sm:$0xf] }
  0xcc   : > { %621 = vst [vmem:[%s22644_s18 + $0x780] sm:$0xf] %v620_v48  ;;  %623 = vst [vmem:[%s22644_s18 + $0x788] sm:$0xf] %v622_v49  ;;  %v626_v51 = vld [vmem:[%s22648_s4 + $0x78c] sm:$0xf] }
  0xcd   : > { %625 = vst [vmem:[%s22644_s18 + $0x790] sm:$0xf] %v624_v50  ;;  %v628_v52 = vld [vmem:[%s22648_s4 + $0x7a0] sm:$0xf]  ;;  %v630_v53 = vld [vmem:[%s22648_s4 + $0x7a4] sm:$0xf] }
  0xce   : > { %627 = vst [vmem:[%s22644_s18 + $0x798] sm:$0xf] %v626_v51  ;;  %629 = vst [vmem:[%s22644_s18 + $0x7a0] sm:$0xf] %v628_v52  ;;  %v632_v54 = vld [vmem:[%s22648_s4 + $0x7a8] sm:$0xf] }
  0xcf   : > { %631 = vst [vmem:[%s22644_s18 + $0x7a8] sm:$0xf] %v630_v53  ;;  %v634_v55 = vld [vmem:[%s22648_s4 + $0x7ac] sm:$0xf]  ;;  %v636_v56 = vld [vmem:[%s22648_s4 + $0x7c0] sm:$0xf] }
  0xd0   : > { %633 = vst [vmem:[%s22644_s18 + $0x7b0] sm:$0xf] %v632_v54  ;;  %635 = vst [vmem:[%s22644_s18 + $0x7b8] sm:$0xf] %v634_v55  ;;  %v638_v57 = vld [vmem:[%s22648_s4 + $0x7c4] sm:$0xf] }
  0xd1   : > { %637 = vst [vmem:[%s22644_s18 + $0x7c0] sm:$0xf] %v636_v56  ;;  %v640_v58 = vld [vmem:[%s22648_s4 + $0x7c8] sm:$0xf]  ;;  %v642_v59 = vld [vmem:[%s22648_s4 + $0x7cc] sm:$0xf] }
  0xd2   : > { %639 = vst [vmem:[%s22644_s18 + $0x7c8] sm:$0xf] %v638_v57  ;;  %641 = vst [vmem:[%s22644_s18 + $0x7d0] sm:$0xf] %v640_v58  ;;  %v644_v60 = vld [vmem:[%s22648_s4 + $0x7e0] sm:$0xf] }
  0xd3   : > { %643 = vst [vmem:[%s22644_s18 + $0x7d8] sm:$0xf] %v642_v59  ;;  %v646_v61 = vld [vmem:[%s22648_s4 + $0x7e4] sm:$0xf]  ;;  %v648_v62 = vld [vmem:[%s22648_s4 + $0x7e8] sm:$0xf] }
  0xd4   : > { %645 = vst [vmem:[%s22644_s18 + $0x7e0] sm:$0xf] %v644_v60  ;;  %647 = vst [vmem:[%s22644_s18 + $0x7e8] sm:$0xf] %v646_v61  ;;  %v650_v63 = vld [vmem:[%s22648_s4 + $0x7ec] sm:$0xf] }
  0xd5   : > { %649 = vst [vmem:[%s22644_s18 + $0x7f0] sm:$0xf] %v648_v62  ;;  %v652_v0 = vld [vmem:[%s22648_s4 + $0x800] sm:$0xf]  ;;  %v654_v1 = vld [vmem:[%s22648_s4 + $0x804] sm:$0xf] }
  0xd6   : > { %651 = vst [vmem:[%s22644_s18 + $0x7f8] sm:$0xf] %v650_v63  ;;  %653 = vst [vmem:[%s22644_s18 + $0x800] sm:$0xf] %v652_v0  ;;  %v656_v2 = vld [vmem:[%s22648_s4 + $0x808] sm:$0xf] }
  0xd7   : > { %655 = vst [vmem:[%s22644_s18 + $0x808] sm:$0xf] %v654_v1  ;;  %v658_v3 = vld [vmem:[%s22648_s4 + $0x80c] sm:$0xf]  ;;  %v660_v4 = vld [vmem:[%s22648_s4 + $0x820] sm:$0xf] }
  0xd8   : > { %657 = vst [vmem:[%s22644_s18 + $0x810] sm:$0xf] %v656_v2  ;;  %659 = vst [vmem:[%s22644_s18 + $0x818] sm:$0xf] %v658_v3  ;;  %v662_v5 = vld [vmem:[%s22648_s4 + $0x824] sm:$0xf] }
  0xd9   : > { %661 = vst [vmem:[%s22644_s18 + $0x820] sm:$0xf] %v660_v4  ;;  %v664_v6 = vld [vmem:[%s22648_s4 + $0x828] sm:$0xf]  ;;  %v666_v7 = vld [vmem:[%s22648_s4 + $0x82c] sm:$0xf] }
  0xda   : > { %663 = vst [vmem:[%s22644_s18 + $0x828] sm:$0xf] %v662_v5  ;;  %665 = vst [vmem:[%s22644_s18 + $0x830] sm:$0xf] %v664_v6  ;;  %v668_v8 = vld [vmem:[%s22648_s4 + $0x840] sm:$0xf] }
  0xdb   : > { %667 = vst [vmem:[%s22644_s18 + $0x838] sm:$0xf] %v666_v7  ;;  %v670_v9 = vld [vmem:[%s22648_s4 + $0x844] sm:$0xf]  ;;  %v672_v10 = vld [vmem:[%s22648_s4 + $0x848] sm:$0xf] }
  0xdc   : > { %669 = vst [vmem:[%s22644_s18 + $0x840] sm:$0xf] %v668_v8  ;;  %671 = vst [vmem:[%s22644_s18 + $0x848] sm:$0xf] %v670_v9  ;;  %v674_v11 = vld [vmem:[%s22648_s4 + $0x84c] sm:$0xf] }
  0xdd   : > { %673 = vst [vmem:[%s22644_s18 + $0x850] sm:$0xf] %v672_v10  ;;  %v676_v12 = vld [vmem:[%s22648_s4 + $0x860] sm:$0xf]  ;;  %v678_v13 = vld [vmem:[%s22648_s4 + $0x864] sm:$0xf] }
  0xde   : > { %675 = vst [vmem:[%s22644_s18 + $0x858] sm:$0xf] %v674_v11  ;;  %677 = vst [vmem:[%s22644_s18 + $0x860] sm:$0xf] %v676_v12  ;;  %v680_v14 = vld [vmem:[%s22648_s4 + $0x868] sm:$0xf] }
  0xdf   : > { %679 = vst [vmem:[%s22644_s18 + $0x868] sm:$0xf] %v678_v13  ;;  %v682_v15 = vld [vmem:[%s22648_s4 + $0x86c] sm:$0xf]  ;;  %v684_v16 = vld [vmem:[%s22648_s4 + $0x880] sm:$0xf] }
  0xe0   : > { %681 = vst [vmem:[%s22644_s18 + $0x870] sm:$0xf] %v680_v14  ;;  %683 = vst [vmem:[%s22644_s18 + $0x878] sm:$0xf] %v682_v15  ;;  %v686_v17 = vld [vmem:[%s22648_s4 + $0x884] sm:$0xf] }
  0xe1   : > { %685 = vst [vmem:[%s22644_s18 + $0x880] sm:$0xf] %v684_v16  ;;  %v688_v18 = vld [vmem:[%s22648_s4 + $0x888] sm:$0xf]  ;;  %v690_v19 = vld [vmem:[%s22648_s4 + $0x88c] sm:$0xf] }
  0xe2   : > { %687 = vst [vmem:[%s22644_s18 + $0x888] sm:$0xf] %v686_v17  ;;  %689 = vst [vmem:[%s22644_s18 + $0x890] sm:$0xf] %v688_v18  ;;  %v692_v20 = vld [vmem:[%s22648_s4 + $0x8a0] sm:$0xf] }
  0xe3   : > { %691 = vst [vmem:[%s22644_s18 + $0x898] sm:$0xf] %v690_v19  ;;  %v694_v21 = vld [vmem:[%s22648_s4 + $0x8a4] sm:$0xf]  ;;  %v696_v22 = vld [vmem:[%s22648_s4 + $0x8a8] sm:$0xf] }
  0xe4   : > { %693 = vst [vmem:[%s22644_s18 + $0x8a0] sm:$0xf] %v692_v20  ;;  %695 = vst [vmem:[%s22644_s18 + $0x8a8] sm:$0xf] %v694_v21  ;;  %v698_v23 = vld [vmem:[%s22648_s4 + $0x8ac] sm:$0xf] }
  0xe5   : > { %697 = vst [vmem:[%s22644_s18 + $0x8b0] sm:$0xf] %v696_v22  ;;  %v700_v24 = vld [vmem:[%s22648_s4 + $0x8c0] sm:$0xf]  ;;  %v702_v25 = vld [vmem:[%s22648_s4 + $0x8c4] sm:$0xf] }
  0xe6   : > { %699 = vst [vmem:[%s22644_s18 + $0x8b8] sm:$0xf] %v698_v23  ;;  %701 = vst [vmem:[%s22644_s18 + $0x8c0] sm:$0xf] %v700_v24  ;;  %v704_v26 = vld [vmem:[%s22648_s4 + $0x8c8] sm:$0xf] }
  0xe7   : > { %703 = vst [vmem:[%s22644_s18 + $0x8c8] sm:$0xf] %v702_v25  ;;  %v706_v27 = vld [vmem:[%s22648_s4 + $0x8cc] sm:$0xf]  ;;  %v708_v28 = vld [vmem:[%s22648_s4 + $0x8e0] sm:$0xf] }
  0xe8   : > { %705 = vst [vmem:[%s22644_s18 + $0x8d0] sm:$0xf] %v704_v26  ;;  %707 = vst [vmem:[%s22644_s18 + $0x8d8] sm:$0xf] %v706_v27  ;;  %v710_v29 = vld [vmem:[%s22648_s4 + $0x8e4] sm:$0xf] }
  0xe9   : > { %709 = vst [vmem:[%s22644_s18 + $0x8e0] sm:$0xf] %v708_v28  ;;  %v712_v30 = vld [vmem:[%s22648_s4 + $0x8e8] sm:$0xf]  ;;  %v714_v31 = vld [vmem:[%s22648_s4 + $0x8ec] sm:$0xf] }
  0xea   : > { %711 = vst [vmem:[%s22644_s18 + $0x8e8] sm:$0xf] %v710_v29  ;;  %713 = vst [vmem:[%s22644_s18 + $0x8f0] sm:$0xf] %v712_v30  ;;  %v716_v32 = vld [vmem:[%s22648_s4 + $0x900] sm:$0xf] }
  0xeb   : > { %715 = vst [vmem:[%s22644_s18 + $0x8f8] sm:$0xf] %v714_v31  ;;  %v718_v33 = vld [vmem:[%s22648_s4 + $0x904] sm:$0xf]  ;;  %v720_v34 = vld [vmem:[%s22648_s4 + $0x908] sm:$0xf] }
  0xec   : > { %717 = vst [vmem:[%s22644_s18 + $0x900] sm:$0xf] %v716_v32  ;;  %719 = vst [vmem:[%s22644_s18 + $0x908] sm:$0xf] %v718_v33  ;;  %v722_v35 = vld [vmem:[%s22648_s4 + $0x90c] sm:$0xf] }
  0xed   : > { %721 = vst [vmem:[%s22644_s18 + $0x910] sm:$0xf] %v720_v34  ;;  %v724_v36 = vld [vmem:[%s22648_s4 + $0x920] sm:$0xf]  ;;  %v726_v37 = vld [vmem:[%s22648_s4 + $0x924] sm:$0xf] }
  0xee   : > { %723 = vst [vmem:[%s22644_s18 + $0x918] sm:$0xf] %v722_v35  ;;  %725 = vst [vmem:[%s22644_s18 + $0x920] sm:$0xf] %v724_v36  ;;  %v728_v38 = vld [vmem:[%s22648_s4 + $0x928] sm:$0xf] }
  0xef   : > { %727 = vst [vmem:[%s22644_s18 + $0x928] sm:$0xf] %v726_v37  ;;  %v730_v39 = vld [vmem:[%s22648_s4 + $0x92c] sm:$0xf]  ;;  %v732_v40 = vld [vmem:[%s22648_s4 + $0x940] sm:$0xf] }
  0xf0   : > { %729 = vst [vmem:[%s22644_s18 + $0x930] sm:$0xf] %v728_v38  ;;  %731 = vst [vmem:[%s22644_s18 + $0x938] sm:$0xf] %v730_v39  ;;  %v734_v41 = vld [vmem:[%s22648_s4 + $0x944] sm:$0xf] }
  0xf1   : > { %733 = vst [vmem:[%s22644_s18 + $0x940] sm:$0xf] %v732_v40  ;;  %v736_v42 = vld [vmem:[%s22648_s4 + $0x948] sm:$0xf]  ;;  %v738_v43 = vld [vmem:[%s22648_s4 + $0x94c] sm:$0xf] }
  0xf2   : > { %735 = vst [vmem:[%s22644_s18 + $0x948] sm:$0xf] %v734_v41  ;;  %737 = vst [vmem:[%s22644_s18 + $0x950] sm:$0xf] %v736_v42  ;;  %v740_v44 = vld [vmem:[%s22648_s4 + $0x960] sm:$0xf] }
  0xf3   : > { %739 = vst [vmem:[%s22644_s18 + $0x958] sm:$0xf] %v738_v43  ;;  %v742_v45 = vld [vmem:[%s22648_s4 + $0x964] sm:$0xf]  ;;  %v744_v46 = vld [vmem:[%s22648_s4 + $0x968] sm:$0xf] }
  0xf4   : > { %741 = vst [vmem:[%s22644_s18 + $0x960] sm:$0xf] %v740_v44  ;;  %743 = vst [vmem:[%s22644_s18 + $0x968] sm:$0xf] %v742_v45  ;;  %v746_v47 = vld [vmem:[%s22648_s4 + $0x96c] sm:$0xf] }
  0xf5   : > { %745 = vst [vmem:[%s22644_s18 + $0x970] sm:$0xf] %v744_v46  ;;  %v748_v48 = vld [vmem:[%s22648_s4 + $0x980] sm:$0xf]  ;;  %v750_v49 = vld [vmem:[%s22648_s4 + $0x984] sm:$0xf] }
  0xf6   : > { %747 = vst [vmem:[%s22644_s18 + $0x978] sm:$0xf] %v746_v47  ;;  %749 = vst [vmem:[%s22644_s18 + $0x980] sm:$0xf] %v748_v48  ;;  %v752_v50 = vld [vmem:[%s22648_s4 + $0x988] sm:$0xf] }
  0xf7   : > { %751 = vst [vmem:[%s22644_s18 + $0x988] sm:$0xf] %v750_v49  ;;  %v754_v51 = vld [vmem:[%s22648_s4 + $0x98c] sm:$0xf]  ;;  %v756_v52 = vld [vmem:[%s22648_s4 + $0x9a0] sm:$0xf] }
  0xf8   : > { %753 = vst [vmem:[%s22644_s18 + $0x990] sm:$0xf] %v752_v50  ;;  %755 = vst [vmem:[%s22644_s18 + $0x998] sm:$0xf] %v754_v51  ;;  %v758_v53 = vld [vmem:[%s22648_s4 + $0x9a4] sm:$0xf] }
  0xf9   : > { %757 = vst [vmem:[%s22644_s18 + $0x9a0] sm:$0xf] %v756_v52  ;;  %v760_v54 = vld [vmem:[%s22648_s4 + $0x9a8] sm:$0xf]  ;;  %v762_v55 = vld [vmem:[%s22648_s4 + $0x9ac] sm:$0xf] }
  0xfa   : > { %759 = vst [vmem:[%s22644_s18 + $0x9a8] sm:$0xf] %v758_v53  ;;  %761 = vst [vmem:[%s22644_s18 + $0x9b0] sm:$0xf] %v760_v54  ;;  %v764_v56 = vld [vmem:[%s22648_s4 + $0x9c0] sm:$0xf] }
  0xfb   : > { %763 = vst [vmem:[%s22644_s18 + $0x9b8] sm:$0xf] %v762_v55  ;;  %v766_v57 = vld [vmem:[%s22648_s4 + $0x9c4] sm:$0xf]  ;;  %v768_v58 = vld [vmem:[%s22648_s4 + $0x9c8] sm:$0xf] }
  0xfc   : > { %765 = vst [vmem:[%s22644_s18 + $0x9c0] sm:$0xf] %v764_v56  ;;  %767 = vst [vmem:[%s22644_s18 + $0x9c8] sm:$0xf] %v766_v57  ;;  %v770_v59 = vld [vmem:[%s22648_s4 + $0x9cc] sm:$0xf] }
  0xfd   : > { %769 = vst [vmem:[%s22644_s18 + $0x9d0] sm:$0xf] %v768_v58  ;;  %v772_v60 = vld [vmem:[%s22648_s4 + $0x9e0] sm:$0xf]  ;;  %v774_v61 = vld [vmem:[%s22648_s4 + $0x9e4] sm:$0xf] }
  0xfe   : > { %771 = vst [vmem:[%s22644_s18 + $0x9d8] sm:$0xf] %v770_v59  ;;  %773 = vst [vmem:[%s22644_s18 + $0x9e0] sm:$0xf] %v772_v60  ;;  %v776_v62 = vld [vmem:[%s22648_s4 + $0x9e8] sm:$0xf] }
  0xff   : > { %775 = vst [vmem:[%s22644_s18 + $0x9e8] sm:$0xf] %v774_v61  ;;  %v778_v63 = vld [vmem:[%s22648_s4 + $0x9ec] sm:$0xf]  ;;  %v780_v0 = vld [vmem:[%s22648_s4 + $0xa00] sm:$0xf] }
 0x100   : > { %777 = vst [vmem:[%s22644_s18 + $0x9f0] sm:$0xf] %v776_v62  ;;  %779 = vst [vmem:[%s22644_s18 + $0x9f8] sm:$0xf] %v778_v63  ;;  %v782_v1 = vld [vmem:[%s22648_s4 + $0xa04] sm:$0xf] }
 0x101   : > { %781 = vst [vmem:[%s22644_s18 + $0xa00] sm:$0xf] %v780_v0  ;;  %v784_v2 = vld [vmem:[%s22648_s4 + $0xa08] sm:$0xf]  ;;  %v786_v3 = vld [vmem:[%s22648_s4 + $0xa0c] sm:$0xf] }
 0x102   : > { %783 = vst [vmem:[%s22644_s18 + $0xa08] sm:$0xf] %v782_v1  ;;  %785 = vst [vmem:[%s22644_s18 + $0xa10] sm:$0xf] %v784_v2  ;;  %v788_v4 = vld [vmem:[%s22648_s4 + $0xa20] sm:$0xf] }
 0x103   : > { %787 = vst [vmem:[%s22644_s18 + $0xa18] sm:$0xf] %v786_v3  ;;  %v790_v5 = vld [vmem:[%s22648_s4 + $0xa24] sm:$0xf]  ;;  %v792_v6 = vld [vmem:[%s22648_s4 + $0xa28] sm:$0xf] }
 0x104   : > { %789 = vst [vmem:[%s22644_s18 + $0xa20] sm:$0xf] %v788_v4  ;;  %791 = vst [vmem:[%s22644_s18 + $0xa28] sm:$0xf] %v790_v5  ;;  %v794_v7 = vld [vmem:[%s22648_s4 + $0xa2c] sm:$0xf] }
 0x105   : > { %793 = vst [vmem:[%s22644_s18 + $0xa30] sm:$0xf] %v792_v6  ;;  %v796_v8 = vld [vmem:[%s22648_s4 + $0xa40] sm:$0xf]  ;;  %v798_v9 = vld [vmem:[%s22648_s4 + $0xa44] sm:$0xf] }
 0x106   : > { %795 = vst [vmem:[%s22644_s18 + $0xa38] sm:$0xf] %v794_v7  ;;  %797 = vst [vmem:[%s22644_s18 + $0xa40] sm:$0xf] %v796_v8  ;;  %v800_v10 = vld [vmem:[%s22648_s4 + $0xa48] sm:$0xf] }
 0x107   : > { %799 = vst [vmem:[%s22644_s18 + $0xa48] sm:$0xf] %v798_v9  ;;  %v802_v11 = vld [vmem:[%s22648_s4 + $0xa4c] sm:$0xf]  ;;  %v804_v12 = vld [vmem:[%s22648_s4 + $0xa60] sm:$0xf] }
 0x108   : > { %801 = vst [vmem:[%s22644_s18 + $0xa50] sm:$0xf] %v800_v10  ;;  %803 = vst [vmem:[%s22644_s18 + $0xa58] sm:$0xf] %v802_v11  ;;  %v806_v13 = vld [vmem:[%s22648_s4 + $0xa64] sm:$0xf] }
 0x109   : > { %805 = vst [vmem:[%s22644_s18 + $0xa60] sm:$0xf] %v804_v12  ;;  %v808_v14 = vld [vmem:[%s22648_s4 + $0xa68] sm:$0xf]  ;;  %v810_v15 = vld [vmem:[%s22648_s4 + $0xa6c] sm:$0xf] }
 0x10a   : > { %807 = vst [vmem:[%s22644_s18 + $0xa68] sm:$0xf] %v806_v13  ;;  %809 = vst [vmem:[%s22644_s18 + $0xa70] sm:$0xf] %v808_v14  ;;  %v812_v16 = vld [vmem:[%s22648_s4 + $0xa80] sm:$0xf] }
 0x10b   : > { %811 = vst [vmem:[%s22644_s18 + $0xa78] sm:$0xf] %v810_v15  ;;  %v814_v17 = vld [vmem:[%s22648_s4 + $0xa84] sm:$0xf]  ;;  %v816_v18 = vld [vmem:[%s22648_s4 + $0xa88] sm:$0xf] }
 0x10c   : > { %813 = vst [vmem:[%s22644_s18 + $0xa80] sm:$0xf] %v812_v16  ;;  %815 = vst [vmem:[%s22644_s18 + $0xa88] sm:$0xf] %v814_v17  ;;  %v818_v19 = vld [vmem:[%s22648_s4 + $0xa8c] sm:$0xf] }
 0x10d   : > { %817 = vst [vmem:[%s22644_s18 + $0xa90] sm:$0xf] %v816_v18  ;;  %v820_v20 = vld [vmem:[%s22648_s4 + $0xaa0] sm:$0xf]  ;;  %v822_v21 = vld [vmem:[%s22648_s4 + $0xaa4] sm:$0xf] }
 0x10e   : > { %819 = vst [vmem:[%s22644_s18 + $0xa98] sm:$0xf] %v818_v19  ;;  %821 = vst [vmem:[%s22644_s18 + $0xaa0] sm:$0xf] %v820_v20  ;;  %v824_v22 = vld [vmem:[%s22648_s4 + $0xaa8] sm:$0xf] }
 0x10f   : > { %823 = vst [vmem:[%s22644_s18 + $0xaa8] sm:$0xf] %v822_v21  ;;  %v826_v23 = vld [vmem:[%s22648_s4 + $0xaac] sm:$0xf]  ;;  %v828_v24 = vld [vmem:[%s22648_s4 + $0xac0] sm:$0xf] }
 0x110   : > { %825 = vst [vmem:[%s22644_s18 + $0xab0] sm:$0xf] %v824_v22  ;;  %827 = vst [vmem:[%s22644_s18 + $0xab8] sm:$0xf] %v826_v23  ;;  %v830_v25 = vld [vmem:[%s22648_s4 + $0xac4] sm:$0xf] }
 0x111   : > { %829 = vst [vmem:[%s22644_s18 + $0xac0] sm:$0xf] %v828_v24  ;;  %v832_v26 = vld [vmem:[%s22648_s4 + $0xac8] sm:$0xf]  ;;  %v834_v27 = vld [vmem:[%s22648_s4 + $0xacc] sm:$0xf] }
 0x112   : > { %831 = vst [vmem:[%s22644_s18 + $0xac8] sm:$0xf] %v830_v25  ;;  %833 = vst [vmem:[%s22644_s18 + $0xad0] sm:$0xf] %v832_v26  ;;  %v836_v28 = vld [vmem:[%s22648_s4 + $0xae0] sm:$0xf] }
 0x113   : > { %835 = vst [vmem:[%s22644_s18 + $0xad8] sm:$0xf] %v834_v27  ;;  %v838_v29 = vld [vmem:[%s22648_s4 + $0xae4] sm:$0xf]  ;;  %v840_v30 = vld [vmem:[%s22648_s4 + $0xae8] sm:$0xf] }
 0x114   : > { %837 = vst [vmem:[%s22644_s18 + $0xae0] sm:$0xf] %v836_v28  ;;  %839 = vst [vmem:[%s22644_s18 + $0xae8] sm:$0xf] %v838_v29  ;;  %v842_v31 = vld [vmem:[%s22648_s4 + $0xaec] sm:$0xf] }
 0x115   : > { %841 = vst [vmem:[%s22644_s18 + $0xaf0] sm:$0xf] %v840_v30  ;;  %v844_v32 = vld [vmem:[%s22648_s4 + $0xb00] sm:$0xf]  ;;  %v846_v33 = vld [vmem:[%s22648_s4 + $0xb04] sm:$0xf] }
 0x116   : > { %843 = vst [vmem:[%s22644_s18 + $0xaf8] sm:$0xf] %v842_v31  ;;  %845 = vst [vmem:[%s22644_s18 + $0xb00] sm:$0xf] %v844_v32  ;;  %v848_v34 = vld [vmem:[%s22648_s4 + $0xb08] sm:$0xf] }
 0x117   : > { %847 = vst [vmem:[%s22644_s18 + $0xb08] sm:$0xf] %v846_v33  ;;  %v850_v35 = vld [vmem:[%s22648_s4 + $0xb0c] sm:$0xf]  ;;  %v852_v36 = vld [vmem:[%s22648_s4 + $0xb20] sm:$0xf] }
 0x118   : > { %849 = vst [vmem:[%s22644_s18 + $0xb10] sm:$0xf] %v848_v34  ;;  %851 = vst [vmem:[%s22644_s18 + $0xb18] sm:$0xf] %v850_v35  ;;  %v854_v37 = vld [vmem:[%s22648_s4 + $0xb24] sm:$0xf] }
 0x119   : > { %853 = vst [vmem:[%s22644_s18 + $0xb20] sm:$0xf] %v852_v36  ;;  %v856_v38 = vld [vmem:[%s22648_s4 + $0xb28] sm:$0xf]  ;;  %v858_v39 = vld [vmem:[%s22648_s4 + $0xb2c] sm:$0xf] }
 0x11a   : > { %855 = vst [vmem:[%s22644_s18 + $0xb28] sm:$0xf] %v854_v37  ;;  %857 = vst [vmem:[%s22644_s18 + $0xb30] sm:$0xf] %v856_v38  ;;  %v860_v40 = vld [vmem:[%s22648_s4 + $0xb40] sm:$0xf] }
 0x11b   : > { %859 = vst [vmem:[%s22644_s18 + $0xb38] sm:$0xf] %v858_v39  ;;  %v862_v41 = vld [vmem:[%s22648_s4 + $0xb44] sm:$0xf]  ;;  %v864_v42 = vld [vmem:[%s22648_s4 + $0xb48] sm:$0xf] }
 0x11c   : > { %861 = vst [vmem:[%s22644_s18 + $0xb40] sm:$0xf] %v860_v40  ;;  %863 = vst [vmem:[%s22644_s18 + $0xb48] sm:$0xf] %v862_v41  ;;  %v866_v43 = vld [vmem:[%s22648_s4 + $0xb4c] sm:$0xf] }
 0x11d   : > { %865 = vst [vmem:[%s22644_s18 + $0xb50] sm:$0xf] %v864_v42  ;;  %v868_v44 = vld [vmem:[%s22648_s4 + $0xb60] sm:$0xf]  ;;  %v870_v45 = vld [vmem:[%s22648_s4 + $0xb64] sm:$0xf] }
 0x11e   : > { %867 = vst [vmem:[%s22644_s18 + $0xb58] sm:$0xf] %v866_v43  ;;  %869 = vst [vmem:[%s22644_s18 + $0xb60] sm:$0xf] %v868_v44  ;;  %v872_v46 = vld [vmem:[%s22648_s4 + $0xb68] sm:$0xf] }
 0x11f   : > { %871 = vst [vmem:[%s22644_s18 + $0xb68] sm:$0xf] %v870_v45  ;;  %v874_v47 = vld [vmem:[%s22648_s4 + $0xb6c] sm:$0xf]  ;;  %v876_v48 = vld [vmem:[%s22648_s4 + $0xb80] sm:$0xf] }
 0x120   : > { %873 = vst [vmem:[%s22644_s18 + $0xb70] sm:$0xf] %v872_v46  ;;  %875 = vst [vmem:[%s22644_s18 + $0xb78] sm:$0xf] %v874_v47  ;;  %v878_v49 = vld [vmem:[%s22648_s4 + $0xb84] sm:$0xf] }
 0x121   : > { %877 = vst [vmem:[%s22644_s18 + $0xb80] sm:$0xf] %v876_v48  ;;  %v880_v50 = vld [vmem:[%s22648_s4 + $0xb88] sm:$0xf]  ;;  %v882_v51 = vld [vmem:[%s22648_s4 + $0xb8c] sm:$0xf] }
 0x122   : > { %879 = vst [vmem:[%s22644_s18 + $0xb88] sm:$0xf] %v878_v49  ;;  %881 = vst [vmem:[%s22644_s18 + $0xb90] sm:$0xf] %v880_v50  ;;  %v884_v52 = vld [vmem:[%s22648_s4 + $0xba0] sm:$0xf] }
 0x123   : > { %883 = vst [vmem:[%s22644_s18 + $0xb98] sm:$0xf] %v882_v51  ;;  %v886_v53 = vld [vmem:[%s22648_s4 + $0xba4] sm:$0xf]  ;;  %v888_v54 = vld [vmem:[%s22648_s4 + $0xba8] sm:$0xf] }
 0x124   : > { %885 = vst [vmem:[%s22644_s18 + $0xba0] sm:$0xf] %v884_v52  ;;  %887 = vst [vmem:[%s22644_s18 + $0xba8] sm:$0xf] %v886_v53  ;;  %v890_v55 = vld [vmem:[%s22648_s4 + $0xbac] sm:$0xf] }
 0x125   : > { %889 = vst [vmem:[%s22644_s18 + $0xbb0] sm:$0xf] %v888_v54  ;;  %v892_v56 = vld [vmem:[%s22648_s4 + $0xbc0] sm:$0xf]  ;;  %v894_v57 = vld [vmem:[%s22648_s4 + $0xbc4] sm:$0xf] }
 0x126   : > { %891 = vst [vmem:[%s22644_s18 + $0xbb8] sm:$0xf] %v890_v55  ;;  %893 = vst [vmem:[%s22644_s18 + $0xbc0] sm:$0xf] %v892_v56  ;;  %v896_v58 = vld [vmem:[%s22648_s4 + $0xbc8] sm:$0xf] }
 0x127   : > { %895 = vst [vmem:[%s22644_s18 + $0xbc8] sm:$0xf] %v894_v57  ;;  %v898_v59 = vld [vmem:[%s22648_s4 + $0xbcc] sm:$0xf]  ;;  %v900_v60 = vld [vmem:[%s22648_s4 + $0xbe0] sm:$0xf] }
 0x128   : > { %897 = vst [vmem:[%s22644_s18 + $0xbd0] sm:$0xf] %v896_v58  ;;  %899 = vst [vmem:[%s22644_s18 + $0xbd8] sm:$0xf] %v898_v59  ;;  %v902_v61 = vld [vmem:[%s22648_s4 + $0xbe4] sm:$0xf] }
 0x129   : > { %901 = vst [vmem:[%s22644_s18 + $0xbe0] sm:$0xf] %v900_v60  ;;  %v904_v62 = vld [vmem:[%s22648_s4 + $0xbe8] sm:$0xf]  ;;  %v906_v63 = vld [vmem:[%s22648_s4 + $0xbec] sm:$0xf] }
 0x12a   : > { %903 = vst [vmem:[%s22644_s18 + $0xbe8] sm:$0xf] %v902_v61  ;;  %905 = vst [vmem:[%s22644_s18 + $0xbf0] sm:$0xf] %v904_v62  ;;  %v908_v0 = vld [vmem:[%s22648_s4 + $0xc00] sm:$0xf] }
 0x12b   : > { %907 = vst [vmem:[%s22644_s18 + $0xbf8] sm:$0xf] %v906_v63  ;;  %v910_v1 = vld [vmem:[%s22648_s4 + $0xc04] sm:$0xf]  ;;  %v912_v2 = vld [vmem:[%s22648_s4 + $0xc08] sm:$0xf] }
 0x12c   : > { %909 = vst [vmem:[%s22644_s18 + $0xc00] sm:$0xf] %v908_v0  ;;  %911 = vst [vmem:[%s22644_s18 + $0xc08] sm:$0xf] %v910_v1  ;;  %v914_v3 = vld [vmem:[%s22648_s4 + $0xc0c] sm:$0xf] }
 0x12d   : > { %913 = vst [vmem:[%s22644_s18 + $0xc10] sm:$0xf] %v912_v2  ;;  %v916_v4 = vld [vmem:[%s22648_s4 + $0xc20] sm:$0xf]  ;;  %v918_v5 = vld [vmem:[%s22648_s4 + $0xc24] sm:$0xf] }
 0x12e   : > { %915 = vst [vmem:[%s22644_s18 + $0xc18] sm:$0xf] %v914_v3  ;;  %917 = vst [vmem:[%s22644_s18 + $0xc20] sm:$0xf] %v916_v4  ;;  %v920_v6 = vld [vmem:[%s22648_s4 + $0xc28] sm:$0xf] }
 0x12f   : > { %919 = vst [vmem:[%s22644_s18 + $0xc28] sm:$0xf] %v918_v5  ;;  %v922_v7 = vld [vmem:[%s22648_s4 + $0xc2c] sm:$0xf]  ;;  %v924_v8 = vld [vmem:[%s22648_s4 + $0xc40] sm:$0xf] }
 0x130   : > { %921 = vst [vmem:[%s22644_s18 + $0xc30] sm:$0xf] %v920_v6  ;;  %923 = vst [vmem:[%s22644_s18 + $0xc38] sm:$0xf] %v922_v7  ;;  %v926_v9 = vld [vmem:[%s22648_s4 + $0xc44] sm:$0xf] }
 0x131   : > { %925 = vst [vmem:[%s22644_s18 + $0xc40] sm:$0xf] %v924_v8  ;;  %v928_v10 = vld [vmem:[%s22648_s4 + $0xc48] sm:$0xf]  ;;  %v930_v11 = vld [vmem:[%s22648_s4 + $0xc4c] sm:$0xf] }
 0x132   : > { %927 = vst [vmem:[%s22644_s18 + $0xc48] sm:$0xf] %v926_v9  ;;  %929 = vst [vmem:[%s22644_s18 + $0xc50] sm:$0xf] %v928_v10  ;;  %v932_v12 = vld [vmem:[%s22648_s4 + $0xc60] sm:$0xf] }
 0x133   : > { %931 = vst [vmem:[%s22644_s18 + $0xc58] sm:$0xf] %v930_v11  ;;  %v934_v13 = vld [vmem:[%s22648_s4 + $0xc64] sm:$0xf]  ;;  %v936_v14 = vld [vmem:[%s22648_s4 + $0xc68] sm:$0xf] }
 0x134   : > { %933 = vst [vmem:[%s22644_s18 + $0xc60] sm:$0xf] %v932_v12  ;;  %935 = vst [vmem:[%s22644_s18 + $0xc68] sm:$0xf] %v934_v13  ;;  %v938_v15 = vld [vmem:[%s22648_s4 + $0xc6c] sm:$0xf] }
 0x135   : > { %937 = vst [vmem:[%s22644_s18 + $0xc70] sm:$0xf] %v936_v14  ;;  %v940_v16 = vld [vmem:[%s22648_s4 + $0xc80] sm:$0xf]  ;;  %v942_v17 = vld [vmem:[%s22648_s4 + $0xc84] sm:$0xf] }
 0x136   : > { %939 = vst [vmem:[%s22644_s18 + $0xc78] sm:$0xf] %v938_v15  ;;  %941 = vst [vmem:[%s22644_s18 + $0xc80] sm:$0xf] %v940_v16  ;;  %v944_v18 = vld [vmem:[%s22648_s4 + $0xc88] sm:$0xf] }
 0x137   : > { %943 = vst [vmem:[%s22644_s18 + $0xc88] sm:$0xf] %v942_v17  ;;  %v946_v19 = vld [vmem:[%s22648_s4 + $0xc8c] sm:$0xf]  ;;  %v948_v20 = vld [vmem:[%s22648_s4 + $0xca0] sm:$0xf] }
 0x138   : > { %945 = vst [vmem:[%s22644_s18 + $0xc90] sm:$0xf] %v944_v18  ;;  %947 = vst [vmem:[%s22644_s18 + $0xc98] sm:$0xf] %v946_v19  ;;  %v950_v21 = vld [vmem:[%s22648_s4 + $0xca4] sm:$0xf] }
 0x139   : > { %949 = vst [vmem:[%s22644_s18 + $0xca0] sm:$0xf] %v948_v20  ;;  %v952_v22 = vld [vmem:[%s22648_s4 + $0xca8] sm:$0xf]  ;;  %v954_v23 = vld [vmem:[%s22648_s4 + $0xcac] sm:$0xf] }
 0x13a   : > { %951 = vst [vmem:[%s22644_s18 + $0xca8] sm:$0xf] %v950_v21  ;;  %953 = vst [vmem:[%s22644_s18 + $0xcb0] sm:$0xf] %v952_v22  ;;  %v956_v24 = vld [vmem:[%s22648_s4 + $0xcc0] sm:$0xf] }
 0x13b   : > { %955 = vst [vmem:[%s22644_s18 + $0xcb8] sm:$0xf] %v954_v23  ;;  %v958_v25 = vld [vmem:[%s22648_s4 + $0xcc4] sm:$0xf]  ;;  %v960_v26 = vld [vmem:[%s22648_s4 + $0xcc8] sm:$0xf] }
 0x13c   : > { %957 = vst [vmem:[%s22644_s18 + $0xcc0] sm:$0xf] %v956_v24  ;;  %959 = vst [vmem:[%s22644_s18 + $0xcc8] sm:$0xf] %v958_v25  ;;  %v962_v27 = vld [vmem:[%s22648_s4 + $0xccc] sm:$0xf] }
 0x13d   : > { %961 = vst [vmem:[%s22644_s18 + $0xcd0] sm:$0xf] %v960_v26  ;;  %v964_v28 = vld [vmem:[%s22648_s4 + $0xce0] sm:$0xf]  ;;  %v966_v29 = vld [vmem:[%s22648_s4 + $0xce4] sm:$0xf] }
 0x13e   : > { %963 = vst [vmem:[%s22644_s18 + $0xcd8] sm:$0xf] %v962_v27  ;;  %965 = vst [vmem:[%s22644_s18 + $0xce0] sm:$0xf] %v964_v28  ;;  %v968_v30 = vld [vmem:[%s22648_s4 + $0xce8] sm:$0xf] }
 0x13f   : > { %967 = vst [vmem:[%s22644_s18 + $0xce8] sm:$0xf] %v966_v29  ;;  %v970_v31 = vld [vmem:[%s22648_s4 + $0xcec] sm:$0xf]  ;;  %v972_v32 = vld [vmem:[%s22648_s4 + $0xd00] sm:$0xf] }
 0x140   : > { %969 = vst [vmem:[%s22644_s18 + $0xcf0] sm:$0xf] %v968_v30  ;;  %971 = vst [vmem:[%s22644_s18 + $0xcf8] sm:$0xf] %v970_v31  ;;  %v974_v33 = vld [vmem:[%s22648_s4 + $0xd04] sm:$0xf] }
 0x141   : > { %973 = vst [vmem:[%s22644_s18 + $0xd00] sm:$0xf] %v972_v32  ;;  %v976_v34 = vld [vmem:[%s22648_s4 + $0xd08] sm:$0xf]  ;;  %v978_v35 = vld [vmem:[%s22648_s4 + $0xd0c] sm:$0xf] }
 0x142   : > { %975 = vst [vmem:[%s22644_s18 + $0xd08] sm:$0xf] %v974_v33  ;;  %977 = vst [vmem:[%s22644_s18 + $0xd10] sm:$0xf] %v976_v34  ;;  %v980_v36 = vld [vmem:[%s22648_s4 + $0xd20] sm:$0xf] }
 0x143   : > { %979 = vst [vmem:[%s22644_s18 + $0xd18] sm:$0xf] %v978_v35  ;;  %v982_v37 = vld [vmem:[%s22648_s4 + $0xd24] sm:$0xf]  ;;  %v984_v38 = vld [vmem:[%s22648_s4 + $0xd28] sm:$0xf] }
 0x144   : > { %981 = vst [vmem:[%s22644_s18 + $0xd20] sm:$0xf] %v980_v36  ;;  %983 = vst [vmem:[%s22644_s18 + $0xd28] sm:$0xf] %v982_v37  ;;  %v986_v39 = vld [vmem:[%s22648_s4 + $0xd2c] sm:$0xf] }
 0x145   : > { %985 = vst [vmem:[%s22644_s18 + $0xd30] sm:$0xf] %v984_v38  ;;  %v988_v40 = vld [vmem:[%s22648_s4 + $0xd40] sm:$0xf]  ;;  %v990_v41 = vld [vmem:[%s22648_s4 + $0xd44] sm:$0xf] }
 0x146   : > { %987 = vst [vmem:[%s22644_s18 + $0xd38] sm:$0xf] %v986_v39  ;;  %989 = vst [vmem:[%s22644_s18 + $0xd40] sm:$0xf] %v988_v40  ;;  %v992_v42 = vld [vmem:[%s22648_s4 + $0xd48] sm:$0xf] }
 0x147   : > { %991 = vst [vmem:[%s22644_s18 + $0xd48] sm:$0xf] %v990_v41  ;;  %v994_v43 = vld [vmem:[%s22648_s4 + $0xd4c] sm:$0xf]  ;;  %v996_v44 = vld [vmem:[%s22648_s4 + $0xd60] sm:$0xf] }
 0x148   : > { %993 = vst [vmem:[%s22644_s18 + $0xd50] sm:$0xf] %v992_v42  ;;  %995 = vst [vmem:[%s22644_s18 + $0xd58] sm:$0xf] %v994_v43  ;;  %v998_v45 = vld [vmem:[%s22648_s4 + $0xd64] sm:$0xf] }
 0x149   : > { %997 = vst [vmem:[%s22644_s18 + $0xd60] sm:$0xf] %v996_v44  ;;  %v1000_v46 = vld [vmem:[%s22648_s4 + $0xd68] sm:$0xf]  ;;  %v1002_v47 = vld [vmem:[%s22648_s4 + $0xd6c] sm:$0xf] }
 0x14a   : > { %999 = vst [vmem:[%s22644_s18 + $0xd68] sm:$0xf] %v998_v45  ;;  %1001 = vst [vmem:[%s22644_s18 + $0xd70] sm:$0xf] %v1000_v46  ;;  %v1004_v48 = vld [vmem:[%s22648_s4 + $0xd80] sm:$0xf] }
 0x14b   : > { %1003 = vst [vmem:[%s22644_s18 + $0xd78] sm:$0xf] %v1002_v47  ;;  %v1006_v49 = vld [vmem:[%s22648_s4 + $0xd84] sm:$0xf]  ;;  %v1008_v50 = vld [vmem:[%s22648_s4 + $0xd88] sm:$0xf] }
 0x14c   : > { %1005 = vst [vmem:[%s22644_s18 + $0xd80] sm:$0xf] %v1004_v48  ;;  %1007 = vst [vmem:[%s22644_s18 + $0xd88] sm:$0xf] %v1006_v49  ;;  %v1010_v51 = vld [vmem:[%s22648_s4 + $0xd8c] sm:$0xf] }
 0x14d   : > { %1009 = vst [vmem:[%s22644_s18 + $0xd90] sm:$0xf] %v1008_v50  ;;  %v1012_v52 = vld [vmem:[%s22648_s4 + $0xda0] sm:$0xf]  ;;  %v1014_v53 = vld [vmem:[%s22648_s4 + $0xda4] sm:$0xf] }
 0x14e   : > { %1011 = vst [vmem:[%s22644_s18 + $0xd98] sm:$0xf] %v1010_v51  ;;  %1013 = vst [vmem:[%s22644_s18 + $0xda0] sm:$0xf] %v1012_v52  ;;  %v1016_v54 = vld [vmem:[%s22648_s4 + $0xda8] sm:$0xf] }
 0x14f   : > { %1015 = vst [vmem:[%s22644_s18 + $0xda8] sm:$0xf] %v1014_v53  ;;  %v1018_v55 = vld [vmem:[%s22648_s4 + $0xdac] sm:$0xf]  ;;  %v1020_v56 = vld [vmem:[%s22648_s4 + $0xdc0] sm:$0xf] }
 0x150   : > { %1017 = vst [vmem:[%s22644_s18 + $0xdb0] sm:$0xf] %v1016_v54  ;;  %1019 = vst [vmem:[%s22644_s18 + $0xdb8] sm:$0xf] %v1018_v55  ;;  %v1022_v57 = vld [vmem:[%s22648_s4 + $0xdc4] sm:$0xf] }
 0x151   : > { %1021 = vst [vmem:[%s22644_s18 + $0xdc0] sm:$0xf] %v1020_v56  ;;  %v1024_v58 = vld [vmem:[%s22648_s4 + $0xdc8] sm:$0xf]  ;;  %v1026_v59 = vld [vmem:[%s22648_s4 + $0xdcc] sm:$0xf] }
 0x152   : > { %1023 = vst [vmem:[%s22644_s18 + $0xdc8] sm:$0xf] %v1022_v57  ;;  %1025 = vst [vmem:[%s22644_s18 + $0xdd0] sm:$0xf] %v1024_v58  ;;  %v1028_v60 = vld [vmem:[%s22648_s4 + $0xde0] sm:$0xf] }
 0x153   : > { %1027 = vst [vmem:[%s22644_s18 + $0xdd8] sm:$0xf] %v1026_v59  ;;  %v1030_v61 = vld [vmem:[%s22648_s4 + $0xde4] sm:$0xf]  ;;  %v1032_v62 = vld [vmem:[%s22648_s4 + $0xde8] sm:$0xf] }
 0x154   : > { %1029 = vst [vmem:[%s22644_s18 + $0xde0] sm:$0xf] %v1028_v60  ;;  %1031 = vst [vmem:[%s22644_s18 + $0xde8] sm:$0xf] %v1030_v61  ;;  %v1034_v63 = vld [vmem:[%s22648_s4 + $0xdec] sm:$0xf] }
 0x155   : > { %1033 = vst [vmem:[%s22644_s18 + $0xdf0] sm:$0xf] %v1032_v62  ;;  %v1036_v0 = vld [vmem:[%s22648_s4 + $0xe00] sm:$0xf]  ;;  %v1038_v1 = vld [vmem:[%s22648_s4 + $0xe04] sm:$0xf] }
 0x156   : > { %1035 = vst [vmem:[%s22644_s18 + $0xdf8] sm:$0xf] %v1034_v63  ;;  %1037 = vst [vmem:[%s22644_s18 + $0xe00] sm:$0xf] %v1036_v0  ;;  %v1040_v2 = vld [vmem:[%s22648_s4 + $0xe08] sm:$0xf] }
 0x157   : > { %1039 = vst [vmem:[%s22644_s18 + $0xe08] sm:$0xf] %v1038_v1  ;;  %v1042_v3 = vld [vmem:[%s22648_s4 + $0xe0c] sm:$0xf]  ;;  %v1044_v4 = vld [vmem:[%s22648_s4 + $0xe20] sm:$0xf] }
 0x158   : > { %1041 = vst [vmem:[%s22644_s18 + $0xe10] sm:$0xf] %v1040_v2  ;;  %1043 = vst [vmem:[%s22644_s18 + $0xe18] sm:$0xf] %v1042_v3  ;;  %v1046_v5 = vld [vmem:[%s22648_s4 + $0xe24] sm:$0xf] }
 0x159   : > { %1045 = vst [vmem:[%s22644_s18 + $0xe20] sm:$0xf] %v1044_v4  ;;  %v1048_v6 = vld [vmem:[%s22648_s4 + $0xe28] sm:$0xf]  ;;  %v1050_v7 = vld [vmem:[%s22648_s4 + $0xe2c] sm:$0xf] }
 0x15a   : > { %1047 = vst [vmem:[%s22644_s18 + $0xe28] sm:$0xf] %v1046_v5  ;;  %1049 = vst [vmem:[%s22644_s18 + $0xe30] sm:$0xf] %v1048_v6  ;;  %v1052_v8 = vld [vmem:[%s22648_s4 + $0xe40] sm:$0xf] }
 0x15b   : > { %1051 = vst [vmem:[%s22644_s18 + $0xe38] sm:$0xf] %v1050_v7  ;;  %v1054_v9 = vld [vmem:[%s22648_s4 + $0xe44] sm:$0xf]  ;;  %v1056_v10 = vld [vmem:[%s22648_s4 + $0xe48] sm:$0xf] }
 0x15c   : > { %1053 = vst [vmem:[%s22644_s18 + $0xe40] sm:$0xf] %v1052_v8  ;;  %1055 = vst [vmem:[%s22644_s18 + $0xe48] sm:$0xf] %v1054_v9  ;;  %v1058_v11 = vld [vmem:[%s22648_s4 + $0xe4c] sm:$0xf] }
 0x15d   : > { %1057 = vst [vmem:[%s22644_s18 + $0xe50] sm:$0xf] %v1056_v10  ;;  %v1060_v12 = vld [vmem:[%s22648_s4 + $0xe60] sm:$0xf]  ;;  %v1062_v13 = vld [vmem:[%s22648_s4 + $0xe64] sm:$0xf] }
 0x15e   : > { %1059 = vst [vmem:[%s22644_s18 + $0xe58] sm:$0xf] %v1058_v11  ;;  %1061 = vst [vmem:[%s22644_s18 + $0xe60] sm:$0xf] %v1060_v12  ;;  %v1064_v14 = vld [vmem:[%s22648_s4 + $0xe68] sm:$0xf] }
 0x15f   : > { %1063 = vst [vmem:[%s22644_s18 + $0xe68] sm:$0xf] %v1062_v13  ;;  %v1066_v15 = vld [vmem:[%s22648_s4 + $0xe6c] sm:$0xf]  ;;  %v1068_v16 = vld [vmem:[%s22648_s4 + $0xe80] sm:$0xf] }
 0x160   : > { %1065 = vst [vmem:[%s22644_s18 + $0xe70] sm:$0xf] %v1064_v14  ;;  %1067 = vst [vmem:[%s22644_s18 + $0xe78] sm:$0xf] %v1066_v15  ;;  %v1070_v17 = vld [vmem:[%s22648_s4 + $0xe84] sm:$0xf] }
 0x161   : > { %1069 = vst [vmem:[%s22644_s18 + $0xe80] sm:$0xf] %v1068_v16  ;;  %v1072_v18 = vld [vmem:[%s22648_s4 + $0xe88] sm:$0xf]  ;;  %v1074_v19 = vld [vmem:[%s22648_s4 + $0xe8c] sm:$0xf] }
 0x162   : > { %1071 = vst [vmem:[%s22644_s18 + $0xe88] sm:$0xf] %v1070_v17  ;;  %1073 = vst [vmem:[%s22644_s18 + $0xe90] sm:$0xf] %v1072_v18  ;;  %v1076_v20 = vld [vmem:[%s22648_s4 + $0xea0] sm:$0xf] }
 0x163   : > { %1075 = vst [vmem:[%s22644_s18 + $0xe98] sm:$0xf] %v1074_v19  ;;  %v1078_v21 = vld [vmem:[%s22648_s4 + $0xea4] sm:$0xf]  ;;  %v1080_v22 = vld [vmem:[%s22648_s4 + $0xea8] sm:$0xf] }
 0x164   : > { %1077 = vst [vmem:[%s22644_s18 + $0xea0] sm:$0xf] %v1076_v20  ;;  %1079 = vst [vmem:[%s22644_s18 + $0xea8] sm:$0xf] %v1078_v21  ;;  %v1082_v23 = vld [vmem:[%s22648_s4 + $0xeac] sm:$0xf] }
 0x165   : > { %1081 = vst [vmem:[%s22644_s18 + $0xeb0] sm:$0xf] %v1080_v22  ;;  %v1084_v24 = vld [vmem:[%s22648_s4 + $0xec0] sm:$0xf]  ;;  %v1086_v25 = vld [vmem:[%s22648_s4 + $0xec4] sm:$0xf] }
 0x166   : > { %1083 = vst [vmem:[%s22644_s18 + $0xeb8] sm:$0xf] %v1082_v23  ;;  %1085 = vst [vmem:[%s22644_s18 + $0xec0] sm:$0xf] %v1084_v24  ;;  %v1088_v26 = vld [vmem:[%s22648_s4 + $0xec8] sm:$0xf] }
 0x167   : > { %1087 = vst [vmem:[%s22644_s18 + $0xec8] sm:$0xf] %v1086_v25  ;;  %v1090_v27 = vld [vmem:[%s22648_s4 + $0xecc] sm:$0xf]  ;;  %v1092_v28 = vld [vmem:[%s22648_s4 + $0xee0] sm:$0xf] }
 0x168   : > { %1089 = vst [vmem:[%s22644_s18 + $0xed0] sm:$0xf] %v1088_v26  ;;  %1091 = vst [vmem:[%s22644_s18 + $0xed8] sm:$0xf] %v1090_v27  ;;  %v1094_v29 = vld [vmem:[%s22648_s4 + $0xee4] sm:$0xf] }
 0x169   : > { %1093 = vst [vmem:[%s22644_s18 + $0xee0] sm:$0xf] %v1092_v28  ;;  %v1096_v30 = vld [vmem:[%s22648_s4 + $0xee8] sm:$0xf]  ;;  %v1098_v31 = vld [vmem:[%s22648_s4 + $0xeec] sm:$0xf] }
 0x16a   : > { %1095 = vst [vmem:[%s22644_s18 + $0xee8] sm:$0xf] %v1094_v29  ;;  %1097 = vst [vmem:[%s22644_s18 + $0xef0] sm:$0xf] %v1096_v30  ;;  %v1100_v32 = vld [vmem:[%s22648_s4 + $0xf00] sm:$0xf] }
 0x16b   : > { %1099 = vst [vmem:[%s22644_s18 + $0xef8] sm:$0xf] %v1098_v31  ;;  %v1102_v33 = vld [vmem:[%s22648_s4 + $0xf04] sm:$0xf]  ;;  %v1104_v34 = vld [vmem:[%s22648_s4 + $0xf08] sm:$0xf] }
 0x16c   : > { %1101 = vst [vmem:[%s22644_s18 + $0xf00] sm:$0xf] %v1100_v32  ;;  %1103 = vst [vmem:[%s22644_s18 + $0xf08] sm:$0xf] %v1102_v33  ;;  %v1106_v35 = vld [vmem:[%s22648_s4 + $0xf0c] sm:$0xf] }
 0x16d   : > { %1105 = vst [vmem:[%s22644_s18 + $0xf10] sm:$0xf] %v1104_v34  ;;  %v1108_v36 = vld [vmem:[%s22648_s4 + $0xf20] sm:$0xf]  ;;  %v1110_v37 = vld [vmem:[%s22648_s4 + $0xf24] sm:$0xf] }
 0x16e   : > { %1107 = vst [vmem:[%s22644_s18 + $0xf18] sm:$0xf] %v1106_v35  ;;  %1109 = vst [vmem:[%s22644_s18 + $0xf20] sm:$0xf] %v1108_v36  ;;  %v1112_v38 = vld [vmem:[%s22648_s4 + $0xf28] sm:$0xf] }
 0x16f   : > { %1111 = vst [vmem:[%s22644_s18 + $0xf28] sm:$0xf] %v1110_v37  ;;  %v1114_v39 = vld [vmem:[%s22648_s4 + $0xf2c] sm:$0xf]  ;;  %v1116_v40 = vld [vmem:[%s22648_s4 + $0xf40] sm:$0xf] }
 0x170   : > { %1113 = vst [vmem:[%s22644_s18 + $0xf30] sm:$0xf] %v1112_v38  ;;  %1115 = vst [vmem:[%s22644_s18 + $0xf38] sm:$0xf] %v1114_v39  ;;  %v1118_v41 = vld [vmem:[%s22648_s4 + $0xf44] sm:$0xf] }
 0x171   : > { %1117 = vst [vmem:[%s22644_s18 + $0xf40] sm:$0xf] %v1116_v40  ;;  %v1120_v42 = vld [vmem:[%s22648_s4 + $0xf48] sm:$0xf]  ;;  %v1122_v43 = vld [vmem:[%s22648_s4 + $0xf4c] sm:$0xf] }
 0x172   : > { %1119 = vst [vmem:[%s22644_s18 + $0xf48] sm:$0xf] %v1118_v41  ;;  %1121 = vst [vmem:[%s22644_s18 + $0xf50] sm:$0xf] %v1120_v42  ;;  %v1124_v44 = vld [vmem:[%s22648_s4 + $0xf60] sm:$0xf] }
 0x173   : > { %1123 = vst [vmem:[%s22644_s18 + $0xf58] sm:$0xf] %v1122_v43  ;;  %v1126_v45 = vld [vmem:[%s22648_s4 + $0xf64] sm:$0xf]  ;;  %v1128_v46 = vld [vmem:[%s22648_s4 + $0xf68] sm:$0xf] }
 0x174   : > { %1125 = vst [vmem:[%s22644_s18 + $0xf60] sm:$0xf] %v1124_v44  ;;  %1127 = vst [vmem:[%s22644_s18 + $0xf68] sm:$0xf] %v1126_v45  ;;  %v1130_v47 = vld [vmem:[%s22648_s4 + $0xf6c] sm:$0xf] }
 0x175   : > { %1129 = vst [vmem:[%s22644_s18 + $0xf70] sm:$0xf] %v1128_v46  ;;  %v1132_v48 = vld [vmem:[%s22648_s4 + $0xf80] sm:$0xf]  ;;  %v1134_v49 = vld [vmem:[%s22648_s4 + $0xf84] sm:$0xf] }
 0x176   : > { %1131 = vst [vmem:[%s22644_s18 + $0xf78] sm:$0xf] %v1130_v47  ;;  %1133 = vst [vmem:[%s22644_s18 + $0xf80] sm:$0xf] %v1132_v48  ;;  %v1136_v50 = vld [vmem:[%s22648_s4 + $0xf88] sm:$0xf] }
 0x177   : > { %1135 = vst [vmem:[%s22644_s18 + $0xf88] sm:$0xf] %v1134_v49  ;;  %v1138_v51 = vld [vmem:[%s22648_s4 + $0xf8c] sm:$0xf]  ;;  %v1140_v52 = vld [vmem:[%s22648_s4 + $0xfa0] sm:$0xf] }
 0x178   : > { %1137 = vst [vmem:[%s22644_s18 + $0xf90] sm:$0xf] %v1136_v50  ;;  %1139 = vst [vmem:[%s22644_s18 + $0xf98] sm:$0xf] %v1138_v51  ;;  %v1142_v53 = vld [vmem:[%s22648_s4 + $0xfa4] sm:$0xf] }
 0x179   : > { %1141 = vst [vmem:[%s22644_s18 + $0xfa0] sm:$0xf] %v1140_v52  ;;  %v1144_v54 = vld [vmem:[%s22648_s4 + $0xfa8] sm:$0xf]  ;;  %v1146_v55 = vld [vmem:[%s22648_s4 + $0xfac] sm:$0xf] }
 0x17a   : > { %1143 = vst [vmem:[%s22644_s18 + $0xfa8] sm:$0xf] %v1142_v53  ;;  %1145 = vst [vmem:[%s22644_s18 + $0xfb0] sm:$0xf] %v1144_v54  ;;  %v1148_v56 = vld [vmem:[%s22648_s4 + $0xfc0] sm:$0xf] }
 0x17b   : > { %1147 = vst [vmem:[%s22644_s18 + $0xfb8] sm:$0xf] %v1146_v55  ;;  %v1150_v57 = vld [vmem:[%s22648_s4 + $0xfc4] sm:$0xf]  ;;  %v1152_v58 = vld [vmem:[%s22648_s4 + $0xfc8] sm:$0xf] }
 0x17c   : > { %1149 = vst [vmem:[%s22644_s18 + $0xfc0] sm:$0xf] %v1148_v56  ;;  %1151 = vst [vmem:[%s22644_s18 + $0xfc8] sm:$0xf] %v1150_v57  ;;  %v1154_v59 = vld [vmem:[%s22648_s4 + $0xfcc] sm:$0xf] }
 0x17d   : > { %1153 = vst [vmem:[%s22644_s18 + $0xfd0] sm:$0xf] %v1152_v58  ;;  %v1156_v60 = vld [vmem:[%s22648_s4 + $0xfe0] sm:$0xf]  ;;  %v1158_v61 = vld [vmem:[%s22648_s4 + $0xfe4] sm:$0xf] }
 0x17e   : > { %1155 = vst [vmem:[%s22644_s18 + $0xfd8] sm:$0xf] %v1154_v59  ;;  %1157 = vst [vmem:[%s22644_s18 + $0xfe0] sm:$0xf] %v1156_v60  ;;  %v1160_v62 = vld [vmem:[%s22648_s4 + $0xfe8] sm:$0xf] }
 0x17f   : > { %1159 = vst [vmem:[%s22644_s18 + $0xfe8] sm:$0xf] %v1158_v61  ;;  %v1162_v63 = vld [vmem:[%s22648_s4 + $0xfec] sm:$0xf]  ;;  %v1164_v0 = vld [vmem:[%s22648_s4 + $0x1000] sm:$0xf] }
 0x180   : > { %1161 = vst [vmem:[%s22644_s18 + $0xff0] sm:$0xf] %v1160_v62  ;;  %1163 = vst [vmem:[%s22644_s18 + $0xff8] sm:$0xf] %v1162_v63  ;;  %v1166_v1 = vld [vmem:[%s22648_s4 + $0x1004] sm:$0xf] }
 0x181   : > { %1165 = vst [vmem:[%s22644_s18 + $0x1000] sm:$0xf] %v1164_v0  ;;  %v1168_v2 = vld [vmem:[%s22648_s4 + $0x1008] sm:$0xf]  ;;  %v1170_v3 = vld [vmem:[%s22648_s4 + $0x100c] sm:$0xf] }
 0x182   : > { %1167 = vst [vmem:[%s22644_s18 + $0x1008] sm:$0xf] %v1166_v1  ;;  %1169 = vst [vmem:[%s22644_s18 + $0x1010] sm:$0xf] %v1168_v2  ;;  %v1172_v4 = vld [vmem:[%s22648_s4 + $0x1020] sm:$0xf] }
 0x183   : > { %1171 = vst [vmem:[%s22644_s18 + $0x1018] sm:$0xf] %v1170_v3  ;;  %v1174_v5 = vld [vmem:[%s22648_s4 + $0x1024] sm:$0xf]  ;;  %v1176_v6 = vld [vmem:[%s22648_s4 + $0x1028] sm:$0xf] }
 0x184   : > { %1173 = vst [vmem:[%s22644_s18 + $0x1020] sm:$0xf] %v1172_v4  ;;  %1175 = vst [vmem:[%s22644_s18 + $0x1028] sm:$0xf] %v1174_v5  ;;  %v1178_v7 = vld [vmem:[%s22648_s4 + $0x102c] sm:$0xf] }
 0x185   : > { %1177 = vst [vmem:[%s22644_s18 + $0x1030] sm:$0xf] %v1176_v6  ;;  %v1180_v8 = vld [vmem:[%s22648_s4 + $0x1040] sm:$0xf]  ;;  %v1182_v9 = vld [vmem:[%s22648_s4 + $0x1044] sm:$0xf] }
 0x186   : > { %1179 = vst [vmem:[%s22644_s18 + $0x1038] sm:$0xf] %v1178_v7  ;;  %1181 = vst [vmem:[%s22644_s18 + $0x1040] sm:$0xf] %v1180_v8  ;;  %v1184_v10 = vld [vmem:[%s22648_s4 + $0x1048] sm:$0xf] }
 0x187   : > { %1183 = vst [vmem:[%s22644_s18 + $0x1048] sm:$0xf] %v1182_v9  ;;  %v1186_v11 = vld [vmem:[%s22648_s4 + $0x104c] sm:$0xf]  ;;  %v1188_v12 = vld [vmem:[%s22648_s4 + $0x1060] sm:$0xf] }
 0x188   : > { %1185 = vst [vmem:[%s22644_s18 + $0x1050] sm:$0xf] %v1184_v10  ;;  %1187 = vst [vmem:[%s22644_s18 + $0x1058] sm:$0xf] %v1186_v11  ;;  %v1190_v13 = vld [vmem:[%s22648_s4 + $0x1064] sm:$0xf] }
 0x189   : > { %1189 = vst [vmem:[%s22644_s18 + $0x1060] sm:$0xf] %v1188_v12  ;;  %v1192_v14 = vld [vmem:[%s22648_s4 + $0x1068] sm:$0xf]  ;;  %v1194_v15 = vld [vmem:[%s22648_s4 + $0x106c] sm:$0xf] }
 0x18a   : > { %1191 = vst [vmem:[%s22644_s18 + $0x1068] sm:$0xf] %v1190_v13  ;;  %1193 = vst [vmem:[%s22644_s18 + $0x1070] sm:$0xf] %v1192_v14  ;;  %v1196_v16 = vld [vmem:[%s22648_s4 + $0x1080] sm:$0xf] }
 0x18b   : > { %1195 = vst [vmem:[%s22644_s18 + $0x1078] sm:$0xf] %v1194_v15  ;;  %v1198_v17 = vld [vmem:[%s22648_s4 + $0x1084] sm:$0xf]  ;;  %v1200_v18 = vld [vmem:[%s22648_s4 + $0x1088] sm:$0xf] }
 0x18c   : > { %1197 = vst [vmem:[%s22644_s18 + $0x1080] sm:$0xf] %v1196_v16  ;;  %1199 = vst [vmem:[%s22644_s18 + $0x1088] sm:$0xf] %v1198_v17  ;;  %v1202_v19 = vld [vmem:[%s22648_s4 + $0x108c] sm:$0xf] }
 0x18d   : > { %1201 = vst [vmem:[%s22644_s18 + $0x1090] sm:$0xf] %v1200_v18  ;;  %v1204_v20 = vld [vmem:[%s22648_s4 + $0x10a0] sm:$0xf]  ;;  %v1206_v21 = vld [vmem:[%s22648_s4 + $0x10a4] sm:$0xf] }
 0x18e   : > { %1203 = vst [vmem:[%s22644_s18 + $0x1098] sm:$0xf] %v1202_v19  ;;  %1205 = vst [vmem:[%s22644_s18 + $0x10a0] sm:$0xf] %v1204_v20  ;;  %v1208_v22 = vld [vmem:[%s22648_s4 + $0x10a8] sm:$0xf] }
 0x18f   : > { %1207 = vst [vmem:[%s22644_s18 + $0x10a8] sm:$0xf] %v1206_v21  ;;  %v1210_v23 = vld [vmem:[%s22648_s4 + $0x10ac] sm:$0xf]  ;;  %v1212_v24 = vld [vmem:[%s22648_s4 + $0x10c0] sm:$0xf] }
 0x190   : > { %1209 = vst [vmem:[%s22644_s18 + $0x10b0] sm:$0xf] %v1208_v22  ;;  %1211 = vst [vmem:[%s22644_s18 + $0x10b8] sm:$0xf] %v1210_v23  ;;  %v1214_v25 = vld [vmem:[%s22648_s4 + $0x10c4] sm:$0xf] }
 0x191   : > { %1213 = vst [vmem:[%s22644_s18 + $0x10c0] sm:$0xf] %v1212_v24  ;;  %v1216_v26 = vld [vmem:[%s22648_s4 + $0x10c8] sm:$0xf]  ;;  %v1218_v27 = vld [vmem:[%s22648_s4 + $0x10cc] sm:$0xf] }
 0x192   : > { %1215 = vst [vmem:[%s22644_s18 + $0x10c8] sm:$0xf] %v1214_v25  ;;  %1217 = vst [vmem:[%s22644_s18 + $0x10d0] sm:$0xf] %v1216_v26  ;;  %v1220_v28 = vld [vmem:[%s22648_s4 + $0x10e0] sm:$0xf] }
 0x193   : > { %1219 = vst [vmem:[%s22644_s18 + $0x10d8] sm:$0xf] %v1218_v27  ;;  %v1222_v29 = vld [vmem:[%s22648_s4 + $0x10e4] sm:$0xf]  ;;  %v1224_v30 = vld [vmem:[%s22648_s4 + $0x10e8] sm:$0xf] }
 0x194   : > { %1221 = vst [vmem:[%s22644_s18 + $0x10e0] sm:$0xf] %v1220_v28  ;;  %1223 = vst [vmem:[%s22644_s18 + $0x10e8] sm:$0xf] %v1222_v29  ;;  %v1226_v31 = vld [vmem:[%s22648_s4 + $0x10ec] sm:$0xf] }
 0x195   : > { %1225 = vst [vmem:[%s22644_s18 + $0x10f0] sm:$0xf] %v1224_v30  ;;  %v1228_v32 = vld [vmem:[%s22648_s4 + $0x1100] sm:$0xf]  ;;  %v1230_v33 = vld [vmem:[%s22648_s4 + $0x1104] sm:$0xf] }
 0x196   : > { %1227 = vst [vmem:[%s22644_s18 + $0x10f8] sm:$0xf] %v1226_v31  ;;  %1229 = vst [vmem:[%s22644_s18 + $0x1100] sm:$0xf] %v1228_v32  ;;  %v1232_v34 = vld [vmem:[%s22648_s4 + $0x1108] sm:$0xf] }
 0x197   : > { %1231 = vst [vmem:[%s22644_s18 + $0x1108] sm:$0xf] %v1230_v33  ;;  %v1234_v35 = vld [vmem:[%s22648_s4 + $0x110c] sm:$0xf]  ;;  %v1236_v36 = vld [vmem:[%s22648_s4 + $0x1120] sm:$0xf] }
 0x198   : > { %1233 = vst [vmem:[%s22644_s18 + $0x1110] sm:$0xf] %v1232_v34  ;;  %1235 = vst [vmem:[%s22644_s18 + $0x1118] sm:$0xf] %v1234_v35  ;;  %v1238_v37 = vld [vmem:[%s22648_s4 + $0x1124] sm:$0xf] }
 0x199   : > { %1237 = vst [vmem:[%s22644_s18 + $0x1120] sm:$0xf] %v1236_v36  ;;  %v1240_v38 = vld [vmem:[%s22648_s4 + $0x1128] sm:$0xf]  ;;  %v1242_v39 = vld [vmem:[%s22648_s4 + $0x112c] sm:$0xf] }
 0x19a   : > { %1239 = vst [vmem:[%s22644_s18 + $0x1128] sm:$0xf] %v1238_v37  ;;  %1241 = vst [vmem:[%s22644_s18 + $0x1130] sm:$0xf] %v1240_v38  ;;  %v1244_v40 = vld [vmem:[%s22648_s4 + $0x1140] sm:$0xf] }
 0x19b   : > { %1243 = vst [vmem:[%s22644_s18 + $0x1138] sm:$0xf] %v1242_v39  ;;  %v1246_v41 = vld [vmem:[%s22648_s4 + $0x1144] sm:$0xf]  ;;  %v1248_v42 = vld [vmem:[%s22648_s4 + $0x1148] sm:$0xf] }
 0x19c   : > { %1245 = vst [vmem:[%s22644_s18 + $0x1140] sm:$0xf] %v1244_v40  ;;  %1247 = vst [vmem:[%s22644_s18 + $0x1148] sm:$0xf] %v1246_v41  ;;  %v1250_v43 = vld [vmem:[%s22648_s4 + $0x114c] sm:$0xf] }
 0x19d   : > { %1249 = vst [vmem:[%s22644_s18 + $0x1150] sm:$0xf] %v1248_v42  ;;  %v1252_v44 = vld [vmem:[%s22648_s4 + $0x1160] sm:$0xf]  ;;  %v1254_v45 = vld [vmem:[%s22648_s4 + $0x1164] sm:$0xf] }
 0x19e   : > { %1251 = vst [vmem:[%s22644_s18 + $0x1158] sm:$0xf] %v1250_v43  ;;  %1253 = vst [vmem:[%s22644_s18 + $0x1160] sm:$0xf] %v1252_v44  ;;  %v1256_v46 = vld [vmem:[%s22648_s4 + $0x1168] sm:$0xf] }
 0x19f   : > { %1255 = vst [vmem:[%s22644_s18 + $0x1168] sm:$0xf] %v1254_v45  ;;  %v1258_v47 = vld [vmem:[%s22648_s4 + $0x116c] sm:$0xf]  ;;  %v1260_v48 = vld [vmem:[%s22648_s4 + $0x1180] sm:$0xf] }
 0x1a0   : > { %1257 = vst [vmem:[%s22644_s18 + $0x1170] sm:$0xf] %v1256_v46  ;;  %1259 = vst [vmem:[%s22644_s18 + $0x1178] sm:$0xf] %v1258_v47  ;;  %v1262_v49 = vld [vmem:[%s22648_s4 + $0x1184] sm:$0xf] }
 0x1a1   : > { %1261 = vst [vmem:[%s22644_s18 + $0x1180] sm:$0xf] %v1260_v48  ;;  %v1264_v50 = vld [vmem:[%s22648_s4 + $0x1188] sm:$0xf]  ;;  %v1266_v51 = vld [vmem:[%s22648_s4 + $0x118c] sm:$0xf] }
 0x1a2   : > { %1263 = vst [vmem:[%s22644_s18 + $0x1188] sm:$0xf] %v1262_v49  ;;  %1265 = vst [vmem:[%s22644_s18 + $0x1190] sm:$0xf] %v1264_v50  ;;  %v1268_v52 = vld [vmem:[%s22648_s4 + $0x11a0] sm:$0xf] }
 0x1a3   : > { %1267 = vst [vmem:[%s22644_s18 + $0x1198] sm:$0xf] %v1266_v51  ;;  %v1270_v53 = vld [vmem:[%s22648_s4 + $0x11a4] sm:$0xf]  ;;  %v1272_v54 = vld [vmem:[%s22648_s4 + $0x11a8] sm:$0xf] }
 0x1a4   : > { %1269 = vst [vmem:[%s22644_s18 + $0x11a0] sm:$0xf] %v1268_v52  ;;  %1271 = vst [vmem:[%s22644_s18 + $0x11a8] sm:$0xf] %v1270_v53  ;;  %v1274_v55 = vld [vmem:[%s22648_s4 + $0x11ac] sm:$0xf] }
 0x1a5   : > { %1273 = vst [vmem:[%s22644_s18 + $0x11b0] sm:$0xf] %v1272_v54  ;;  %v1276_v56 = vld [vmem:[%s22648_s4 + $0x11c0] sm:$0xf]  ;;  %v1278_v57 = vld [vmem:[%s22648_s4 + $0x11c4] sm:$0xf] }
 0x1a6   : > { %1275 = vst [vmem:[%s22644_s18 + $0x11b8] sm:$0xf] %v1274_v55  ;;  %1277 = vst [vmem:[%s22644_s18 + $0x11c0] sm:$0xf] %v1276_v56  ;;  %v1280_v58 = vld [vmem:[%s22648_s4 + $0x11c8] sm:$0xf] }
 0x1a7   : > { %1279 = vst [vmem:[%s22644_s18 + $0x11c8] sm:$0xf] %v1278_v57  ;;  %v1282_v59 = vld [vmem:[%s22648_s4 + $0x11cc] sm:$0xf]  ;;  %v1284_v60 = vld [vmem:[%s22648_s4 + $0x11e0] sm:$0xf] }
 0x1a8   : > { %1281 = vst [vmem:[%s22644_s18 + $0x11d0] sm:$0xf] %v1280_v58  ;;  %1283 = vst [vmem:[%s22644_s18 + $0x11d8] sm:$0xf] %v1282_v59  ;;  %v1286_v61 = vld [vmem:[%s22648_s4 + $0x11e4] sm:$0xf] }
 0x1a9   : > { %1285 = vst [vmem:[%s22644_s18 + $0x11e0] sm:$0xf] %v1284_v60  ;;  %v1288_v62 = vld [vmem:[%s22648_s4 + $0x11e8] sm:$0xf]  ;;  %v1290_v63 = vld [vmem:[%s22648_s4 + $0x11ec] sm:$0xf] }
 0x1aa   : > { %1287 = vst [vmem:[%s22644_s18 + $0x11e8] sm:$0xf] %v1286_v61  ;;  %1289 = vst [vmem:[%s22644_s18 + $0x11f0] sm:$0xf] %v1288_v62  ;;  %v1292_v0 = vld [vmem:[%s22648_s4 + $0x1200] sm:$0xf] }
 0x1ab   : > { %1291 = vst [vmem:[%s22644_s18 + $0x11f8] sm:$0xf] %v1290_v63  ;;  %v1294_v1 = vld [vmem:[%s22648_s4 + $0x1204] sm:$0xf]  ;;  %v1296_v2 = vld [vmem:[%s22648_s4 + $0x1208] sm:$0xf] }
 0x1ac   : > { %1293 = vst [vmem:[%s22644_s18 + $0x1200] sm:$0xf] %v1292_v0  ;;  %1295 = vst [vmem:[%s22644_s18 + $0x1208] sm:$0xf] %v1294_v1  ;;  %v1298_v3 = vld [vmem:[%s22648_s4 + $0x120c] sm:$0xf] }
 0x1ad   : > { %1297 = vst [vmem:[%s22644_s18 + $0x1210] sm:$0xf] %v1296_v2  ;;  %v1300_v4 = vld [vmem:[%s22648_s4 + $0x1220] sm:$0xf]  ;;  %v1302_v5 = vld [vmem:[%s22648_s4 + $0x1224] sm:$0xf] }
 0x1ae   : > { %1299 = vst [vmem:[%s22644_s18 + $0x1218] sm:$0xf] %v1298_v3  ;;  %1301 = vst [vmem:[%s22644_s18 + $0x1220] sm:$0xf] %v1300_v4  ;;  %v1304_v6 = vld [vmem:[%s22648_s4 + $0x1228] sm:$0xf] }
 0x1af   : > { %1303 = vst [vmem:[%s22644_s18 + $0x1228] sm:$0xf] %v1302_v5  ;;  %v1306_v7 = vld [vmem:[%s22648_s4 + $0x122c] sm:$0xf]  ;;  %v1308_v8 = vld [vmem:[%s22648_s4 + $0x1240] sm:$0xf] }
 0x1b0   : > { %1305 = vst [vmem:[%s22644_s18 + $0x1230] sm:$0xf] %v1304_v6  ;;  %1307 = vst [vmem:[%s22644_s18 + $0x1238] sm:$0xf] %v1306_v7  ;;  %v1310_v9 = vld [vmem:[%s22648_s4 + $0x1244] sm:$0xf] }
 0x1b1   : > { %1309 = vst [vmem:[%s22644_s18 + $0x1240] sm:$0xf] %v1308_v8  ;;  %v1312_v10 = vld [vmem:[%s22648_s4 + $0x1248] sm:$0xf]  ;;  %v1314_v11 = vld [vmem:[%s22648_s4 + $0x124c] sm:$0xf] }
 0x1b2   : > { %1311 = vst [vmem:[%s22644_s18 + $0x1248] sm:$0xf] %v1310_v9  ;;  %1313 = vst [vmem:[%s22644_s18 + $0x1250] sm:$0xf] %v1312_v10  ;;  %v1316_v12 = vld [vmem:[%s22648_s4 + $0x1260] sm:$0xf] }
 0x1b3   : > { %1315 = vst [vmem:[%s22644_s18 + $0x1258] sm:$0xf] %v1314_v11  ;;  %v1318_v13 = vld [vmem:[%s22648_s4 + $0x1264] sm:$0xf]  ;;  %v1320_v14 = vld [vmem:[%s22648_s4 + $0x1268] sm:$0xf] }
 0x1b4   : > { %1317 = vst [vmem:[%s22644_s18 + $0x1260] sm:$0xf] %v1316_v12  ;;  %1319 = vst [vmem:[%s22644_s18 + $0x1268] sm:$0xf] %v1318_v13  ;;  %v1322_v15 = vld [vmem:[%s22648_s4 + $0x126c] sm:$0xf] }
 0x1b5   : > { %1321 = vst [vmem:[%s22644_s18 + $0x1270] sm:$0xf] %v1320_v14  ;;  %v1324_v16 = vld [vmem:[%s22648_s4 + $0x1280] sm:$0xf]  ;;  %v1326_v17 = vld [vmem:[%s22648_s4 + $0x1284] sm:$0xf] }
 0x1b6   : > { %1323 = vst [vmem:[%s22644_s18 + $0x1278] sm:$0xf] %v1322_v15  ;;  %1325 = vst [vmem:[%s22644_s18 + $0x1280] sm:$0xf] %v1324_v16  ;;  %v1328_v18 = vld [vmem:[%s22648_s4 + $0x1288] sm:$0xf] }
 0x1b7   : > { %1327 = vst [vmem:[%s22644_s18 + $0x1288] sm:$0xf] %v1326_v17  ;;  %v1330_v19 = vld [vmem:[%s22648_s4 + $0x128c] sm:$0xf]  ;;  %v1332_v20 = vld [vmem:[%s22648_s4 + $0x12a0] sm:$0xf] }
 0x1b8   : > { %1329 = vst [vmem:[%s22644_s18 + $0x1290] sm:$0xf] %v1328_v18  ;;  %1331 = vst [vmem:[%s22644_s18 + $0x1298] sm:$0xf] %v1330_v19  ;;  %v1334_v21 = vld [vmem:[%s22648_s4 + $0x12a4] sm:$0xf] }
 0x1b9   : > { %1333 = vst [vmem:[%s22644_s18 + $0x12a0] sm:$0xf] %v1332_v20  ;;  %v1336_v22 = vld [vmem:[%s22648_s4 + $0x12a8] sm:$0xf]  ;;  %v1338_v23 = vld [vmem:[%s22648_s4 + $0x12ac] sm:$0xf] }
 0x1ba   : > { %1335 = vst [vmem:[%s22644_s18 + $0x12a8] sm:$0xf] %v1334_v21  ;;  %1337 = vst [vmem:[%s22644_s18 + $0x12b0] sm:$0xf] %v1336_v22  ;;  %v1340_v24 = vld [vmem:[%s22648_s4 + $0x12c0] sm:$0xf] }
 0x1bb   : > { %1339 = vst [vmem:[%s22644_s18 + $0x12b8] sm:$0xf] %v1338_v23  ;;  %v1342_v25 = vld [vmem:[%s22648_s4 + $0x12c4] sm:$0xf]  ;;  %v1344_v26 = vld [vmem:[%s22648_s4 + $0x12c8] sm:$0xf] }
 0x1bc   : > { %1341 = vst [vmem:[%s22644_s18 + $0x12c0] sm:$0xf] %v1340_v24  ;;  %1343 = vst [vmem:[%s22644_s18 + $0x12c8] sm:$0xf] %v1342_v25  ;;  %v1346_v27 = vld [vmem:[%s22648_s4 + $0x12cc] sm:$0xf] }
 0x1bd   : > { %1345 = vst [vmem:[%s22644_s18 + $0x12d0] sm:$0xf] %v1344_v26  ;;  %v1348_v28 = vld [vmem:[%s22648_s4 + $0x12e0] sm:$0xf]  ;;  %v1350_v29 = vld [vmem:[%s22648_s4 + $0x12e4] sm:$0xf] }
 0x1be   : > { %1347 = vst [vmem:[%s22644_s18 + $0x12d8] sm:$0xf] %v1346_v27  ;;  %1349 = vst [vmem:[%s22644_s18 + $0x12e0] sm:$0xf] %v1348_v28  ;;  %v1352_v30 = vld [vmem:[%s22648_s4 + $0x12e8] sm:$0xf] }
 0x1bf   : > { %1351 = vst [vmem:[%s22644_s18 + $0x12e8] sm:$0xf] %v1350_v29  ;;  %v1354_v31 = vld [vmem:[%s22648_s4 + $0x12ec] sm:$0xf]  ;;  %v1356_v32 = vld [vmem:[%s22648_s4 + $0x1300] sm:$0xf] }
 0x1c0   : > { %1353 = vst [vmem:[%s22644_s18 + $0x12f0] sm:$0xf] %v1352_v30  ;;  %1355 = vst [vmem:[%s22644_s18 + $0x12f8] sm:$0xf] %v1354_v31  ;;  %v1358_v33 = vld [vmem:[%s22648_s4 + $0x1304] sm:$0xf] }
 0x1c1   : > { %1357 = vst [vmem:[%s22644_s18 + $0x1300] sm:$0xf] %v1356_v32  ;;  %v1360_v34 = vld [vmem:[%s22648_s4 + $0x1308] sm:$0xf]  ;;  %v1362_v35 = vld [vmem:[%s22648_s4 + $0x130c] sm:$0xf] }
 0x1c2   : > { %1359 = vst [vmem:[%s22644_s18 + $0x1308] sm:$0xf] %v1358_v33  ;;  %1361 = vst [vmem:[%s22644_s18 + $0x1310] sm:$0xf] %v1360_v34  ;;  %v1364_v36 = vld [vmem:[%s22648_s4 + $0x1320] sm:$0xf] }
 0x1c3   : > { %1363 = vst [vmem:[%s22644_s18 + $0x1318] sm:$0xf] %v1362_v35  ;;  %v1366_v37 = vld [vmem:[%s22648_s4 + $0x1324] sm:$0xf]  ;;  %v1368_v38 = vld [vmem:[%s22648_s4 + $0x1328] sm:$0xf] }
 0x1c4   : > { %1365 = vst [vmem:[%s22644_s18 + $0x1320] sm:$0xf] %v1364_v36  ;;  %1367 = vst [vmem:[%s22644_s18 + $0x1328] sm:$0xf] %v1366_v37  ;;  %v1370_v39 = vld [vmem:[%s22648_s4 + $0x132c] sm:$0xf] }
 0x1c5   : > { %1369 = vst [vmem:[%s22644_s18 + $0x1330] sm:$0xf] %v1368_v38  ;;  %v1372_v40 = vld [vmem:[%s22648_s4 + $0x1340] sm:$0xf]  ;;  %v1374_v41 = vld [vmem:[%s22648_s4 + $0x1344] sm:$0xf] }
 0x1c6   : > { %1371 = vst [vmem:[%s22644_s18 + $0x1338] sm:$0xf] %v1370_v39  ;;  %1373 = vst [vmem:[%s22644_s18 + $0x1340] sm:$0xf] %v1372_v40  ;;  %v1376_v42 = vld [vmem:[%s22648_s4 + $0x1348] sm:$0xf] }
 0x1c7   : > { %1375 = vst [vmem:[%s22644_s18 + $0x1348] sm:$0xf] %v1374_v41  ;;  %v1378_v43 = vld [vmem:[%s22648_s4 + $0x134c] sm:$0xf]  ;;  %v1380_v44 = vld [vmem:[%s22648_s4 + $0x1360] sm:$0xf] }
 0x1c8   : > { %1377 = vst [vmem:[%s22644_s18 + $0x1350] sm:$0xf] %v1376_v42  ;;  %1379 = vst [vmem:[%s22644_s18 + $0x1358] sm:$0xf] %v1378_v43  ;;  %v1382_v45 = vld [vmem:[%s22648_s4 + $0x1364] sm:$0xf] }
 0x1c9   : > { %1381 = vst [vmem:[%s22644_s18 + $0x1360] sm:$0xf] %v1380_v44  ;;  %v1384_v46 = vld [vmem:[%s22648_s4 + $0x1368] sm:$0xf]  ;;  %v1386_v47 = vld [vmem:[%s22648_s4 + $0x136c] sm:$0xf] }
 0x1ca   : > { %1383 = vst [vmem:[%s22644_s18 + $0x1368] sm:$0xf] %v1382_v45  ;;  %1385 = vst [vmem:[%s22644_s18 + $0x1370] sm:$0xf] %v1384_v46  ;;  %v1388_v48 = vld [vmem:[%s22648_s4 + $0x1380] sm:$0xf] }
 0x1cb   : > { %1387 = vst [vmem:[%s22644_s18 + $0x1378] sm:$0xf] %v1386_v47  ;;  %v1390_v49 = vld [vmem:[%s22648_s4 + $0x1384] sm:$0xf]  ;;  %v1392_v50 = vld [vmem:[%s22648_s4 + $0x1388] sm:$0xf] }
 0x1cc   : > { %1389 = vst [vmem:[%s22644_s18 + $0x1380] sm:$0xf] %v1388_v48  ;;  %1391 = vst [vmem:[%s22644_s18 + $0x1388] sm:$0xf] %v1390_v49  ;;  %v1394_v51 = vld [vmem:[%s22648_s4 + $0x138c] sm:$0xf] }
 0x1cd   : > { %1393 = vst [vmem:[%s22644_s18 + $0x1390] sm:$0xf] %v1392_v50  ;;  %v1396_v52 = vld [vmem:[%s22648_s4 + $0x13a0] sm:$0xf]  ;;  %v1398_v53 = vld [vmem:[%s22648_s4 + $0x13a4] sm:$0xf] }
 0x1ce   : > { %1395 = vst [vmem:[%s22644_s18 + $0x1398] sm:$0xf] %v1394_v51  ;;  %1397 = vst [vmem:[%s22644_s18 + $0x13a0] sm:$0xf] %v1396_v52  ;;  %v1400_v54 = vld [vmem:[%s22648_s4 + $0x13a8] sm:$0xf] }
 0x1cf   : > { %1399 = vst [vmem:[%s22644_s18 + $0x13a8] sm:$0xf] %v1398_v53  ;;  %v1402_v55 = vld [vmem:[%s22648_s4 + $0x13ac] sm:$0xf]  ;;  %v1404_v56 = vld [vmem:[%s22648_s4 + $0x13c0] sm:$0xf] }
 0x1d0   : > { %1401 = vst [vmem:[%s22644_s18 + $0x13b0] sm:$0xf] %v1400_v54  ;;  %1403 = vst [vmem:[%s22644_s18 + $0x13b8] sm:$0xf] %v1402_v55  ;;  %v1406_v57 = vld [vmem:[%s22648_s4 + $0x13c4] sm:$0xf] }
 0x1d1   : > { %1405 = vst [vmem:[%s22644_s18 + $0x13c0] sm:$0xf] %v1404_v56  ;;  %v1408_v58 = vld [vmem:[%s22648_s4 + $0x13c8] sm:$0xf]  ;;  %v1410_v59 = vld [vmem:[%s22648_s4 + $0x13cc] sm:$0xf] }
 0x1d2   : > { %1407 = vst [vmem:[%s22644_s18 + $0x13c8] sm:$0xf] %v1406_v57  ;;  %1409 = vst [vmem:[%s22644_s18 + $0x13d0] sm:$0xf] %v1408_v58  ;;  %v1412_v60 = vld [vmem:[%s22648_s4 + $0x13e0] sm:$0xf] }
 0x1d3   : > { %1411 = vst [vmem:[%s22644_s18 + $0x13d8] sm:$0xf] %v1410_v59  ;;  %v1414_v61 = vld [vmem:[%s22648_s4 + $0x13e4] sm:$0xf]  ;;  %v1416_v62 = vld [vmem:[%s22648_s4 + $0x13e8] sm:$0xf] }
 0x1d4   : > { %1413 = vst [vmem:[%s22644_s18 + $0x13e0] sm:$0xf] %v1412_v60  ;;  %1415 = vst [vmem:[%s22644_s18 + $0x13e8] sm:$0xf] %v1414_v61  ;;  %v1418_v63 = vld [vmem:[%s22648_s4 + $0x13ec] sm:$0xf] }
 0x1d5   : > { %1417 = vst [vmem:[%s22644_s18 + $0x13f0] sm:$0xf] %v1416_v62  ;;  %v1420_v0 = vld [vmem:[%s22648_s4 + $0x1400] sm:$0xf]  ;;  %v1422_v1 = vld [vmem:[%s22648_s4 + $0x1404] sm:$0xf] }
 0x1d6   : > { %1419 = vst [vmem:[%s22644_s18 + $0x13f8] sm:$0xf] %v1418_v63  ;;  %1421 = vst [vmem:[%s22644_s18 + $0x1400] sm:$0xf] %v1420_v0  ;;  %v1424_v2 = vld [vmem:[%s22648_s4 + $0x1408] sm:$0xf] }
 0x1d7   : > { %1423 = vst [vmem:[%s22644_s18 + $0x1408] sm:$0xf] %v1422_v1  ;;  %v1426_v3 = vld [vmem:[%s22648_s4 + $0x140c] sm:$0xf]  ;;  %v1428_v4 = vld [vmem:[%s22648_s4 + $0x1420] sm:$0xf] }
 0x1d8   : > { %1425 = vst [vmem:[%s22644_s18 + $0x1410] sm:$0xf] %v1424_v2  ;;  %1427 = vst [vmem:[%s22644_s18 + $0x1418] sm:$0xf] %v1426_v3  ;;  %v1430_v5 = vld [vmem:[%s22648_s4 + $0x1424] sm:$0xf] }
 0x1d9   : > { %1429 = vst [vmem:[%s22644_s18 + $0x1420] sm:$0xf] %v1428_v4  ;;  %v1432_v6 = vld [vmem:[%s22648_s4 + $0x1428] sm:$0xf]  ;;  %v1434_v7 = vld [vmem:[%s22648_s4 + $0x142c] sm:$0xf] }
 0x1da   : > { %1431 = vst [vmem:[%s22644_s18 + $0x1428] sm:$0xf] %v1430_v5  ;;  %1433 = vst [vmem:[%s22644_s18 + $0x1430] sm:$0xf] %v1432_v6  ;;  %v1436_v8 = vld [vmem:[%s22648_s4 + $0x1440] sm:$0xf] }
 0x1db   : > { %1435 = vst [vmem:[%s22644_s18 + $0x1438] sm:$0xf] %v1434_v7  ;;  %v1438_v9 = vld [vmem:[%s22648_s4 + $0x1444] sm:$0xf]  ;;  %v1440_v10 = vld [vmem:[%s22648_s4 + $0x1448] sm:$0xf] }
 0x1dc   : > { %1437 = vst [vmem:[%s22644_s18 + $0x1440] sm:$0xf] %v1436_v8  ;;  %1439 = vst [vmem:[%s22644_s18 + $0x1448] sm:$0xf] %v1438_v9  ;;  %v1442_v11 = vld [vmem:[%s22648_s4 + $0x144c] sm:$0xf] }
 0x1dd   : > { %1441 = vst [vmem:[%s22644_s18 + $0x1450] sm:$0xf] %v1440_v10  ;;  %v1444_v12 = vld [vmem:[%s22648_s4 + $0x1460] sm:$0xf]  ;;  %v1446_v13 = vld [vmem:[%s22648_s4 + $0x1464] sm:$0xf] }
 0x1de   : > { %1443 = vst [vmem:[%s22644_s18 + $0x1458] sm:$0xf] %v1442_v11  ;;  %1445 = vst [vmem:[%s22644_s18 + $0x1460] sm:$0xf] %v1444_v12  ;;  %v1448_v14 = vld [vmem:[%s22648_s4 + $0x1468] sm:$0xf] }
 0x1df   : > { %1447 = vst [vmem:[%s22644_s18 + $0x1468] sm:$0xf] %v1446_v13  ;;  %v1450_v15 = vld [vmem:[%s22648_s4 + $0x146c] sm:$0xf]  ;;  %v1452_v16 = vld [vmem:[%s22648_s4 + $0x1480] sm:$0xf] }
 0x1e0   : > { %1449 = vst [vmem:[%s22644_s18 + $0x1470] sm:$0xf] %v1448_v14  ;;  %1451 = vst [vmem:[%s22644_s18 + $0x1478] sm:$0xf] %v1450_v15  ;;  %v1454_v17 = vld [vmem:[%s22648_s4 + $0x1484] sm:$0xf] }
 0x1e1   : > { %1453 = vst [vmem:[%s22644_s18 + $0x1480] sm:$0xf] %v1452_v16  ;;  %v1456_v18 = vld [vmem:[%s22648_s4 + $0x1488] sm:$0xf]  ;;  %v1458_v19 = vld [vmem:[%s22648_s4 + $0x148c] sm:$0xf] }
 0x1e2   : > { %1455 = vst [vmem:[%s22644_s18 + $0x1488] sm:$0xf] %v1454_v17  ;;  %1457 = vst [vmem:[%s22644_s18 + $0x1490] sm:$0xf] %v1456_v18  ;;  %v1460_v20 = vld [vmem:[%s22648_s4 + $0x14a0] sm:$0xf] }
 0x1e3   : > { %1459 = vst [vmem:[%s22644_s18 + $0x1498] sm:$0xf] %v1458_v19  ;;  %v1462_v21 = vld [vmem:[%s22648_s4 + $0x14a4] sm:$0xf]  ;;  %v1464_v22 = vld [vmem:[%s22648_s4 + $0x14a8] sm:$0xf] }
 0x1e4   : > { %1461 = vst [vmem:[%s22644_s18 + $0x14a0] sm:$0xf] %v1460_v20  ;;  %1463 = vst [vmem:[%s22644_s18 + $0x14a8] sm:$0xf] %v1462_v21  ;;  %v1466_v23 = vld [vmem:[%s22648_s4 + $0x14ac] sm:$0xf] }
 0x1e5   : > { %1465 = vst [vmem:[%s22644_s18 + $0x14b0] sm:$0xf] %v1464_v22  ;;  %v1468_v24 = vld [vmem:[%s22648_s4 + $0x14c0] sm:$0xf]  ;;  %v1470_v25 = vld [vmem:[%s22648_s4 + $0x14c4] sm:$0xf] }
 0x1e6   : > { %1467 = vst [vmem:[%s22644_s18 + $0x14b8] sm:$0xf] %v1466_v23  ;;  %1469 = vst [vmem:[%s22644_s18 + $0x14c0] sm:$0xf] %v1468_v24  ;;  %v1472_v26 = vld [vmem:[%s22648_s4 + $0x14c8] sm:$0xf] }
 0x1e7   : > { %1471 = vst [vmem:[%s22644_s18 + $0x14c8] sm:$0xf] %v1470_v25  ;;  %v1474_v27 = vld [vmem:[%s22648_s4 + $0x14cc] sm:$0xf]  ;;  %v1476_v28 = vld [vmem:[%s22648_s4 + $0x14e0] sm:$0xf] }
 0x1e8   : > { %1473 = vst [vmem:[%s22644_s18 + $0x14d0] sm:$0xf] %v1472_v26  ;;  %1475 = vst [vmem:[%s22644_s18 + $0x14d8] sm:$0xf] %v1474_v27  ;;  %v1478_v29 = vld [vmem:[%s22648_s4 + $0x14e4] sm:$0xf] }
 0x1e9   : > { %1477 = vst [vmem:[%s22644_s18 + $0x14e0] sm:$0xf] %v1476_v28  ;;  %v1480_v30 = vld [vmem:[%s22648_s4 + $0x14e8] sm:$0xf]  ;;  %v1482_v31 = vld [vmem:[%s22648_s4 + $0x14ec] sm:$0xf] }
 0x1ea   : > { %1479 = vst [vmem:[%s22644_s18 + $0x14e8] sm:$0xf] %v1478_v29  ;;  %1481 = vst [vmem:[%s22644_s18 + $0x14f0] sm:$0xf] %v1480_v30  ;;  %v1484_v32 = vld [vmem:[%s22648_s4 + $0x1500] sm:$0xf] }
 0x1eb   : > { %1483 = vst [vmem:[%s22644_s18 + $0x14f8] sm:$0xf] %v1482_v31  ;;  %v1486_v33 = vld [vmem:[%s22648_s4 + $0x1504] sm:$0xf]  ;;  %v1488_v34 = vld [vmem:[%s22648_s4 + $0x1508] sm:$0xf] }
 0x1ec   : > { %1485 = vst [vmem:[%s22644_s18 + $0x1500] sm:$0xf] %v1484_v32  ;;  %1487 = vst [vmem:[%s22644_s18 + $0x1508] sm:$0xf] %v1486_v33  ;;  %v1490_v35 = vld [vmem:[%s22648_s4 + $0x150c] sm:$0xf] }
 0x1ed   : > { %1489 = vst [vmem:[%s22644_s18 + $0x1510] sm:$0xf] %v1488_v34  ;;  %v1492_v36 = vld [vmem:[%s22648_s4 + $0x1520] sm:$0xf]  ;;  %v1494_v37 = vld [vmem:[%s22648_s4 + $0x1524] sm:$0xf] }
 0x1ee   : > { %1491 = vst [vmem:[%s22644_s18 + $0x1518] sm:$0xf] %v1490_v35  ;;  %1493 = vst [vmem:[%s22644_s18 + $0x1520] sm:$0xf] %v1492_v36  ;;  %v1496_v38 = vld [vmem:[%s22648_s4 + $0x1528] sm:$0xf] }
 0x1ef   : > { %1495 = vst [vmem:[%s22644_s18 + $0x1528] sm:$0xf] %v1494_v37  ;;  %v1498_v39 = vld [vmem:[%s22648_s4 + $0x152c] sm:$0xf]  ;;  %v1500_v40 = vld [vmem:[%s22648_s4 + $0x1540] sm:$0xf] }
 0x1f0   : > { %1497 = vst [vmem:[%s22644_s18 + $0x1530] sm:$0xf] %v1496_v38  ;;  %1499 = vst [vmem:[%s22644_s18 + $0x1538] sm:$0xf] %v1498_v39  ;;  %v1502_v41 = vld [vmem:[%s22648_s4 + $0x1544] sm:$0xf] }
 0x1f1   : > { %1501 = vst [vmem:[%s22644_s18 + $0x1540] sm:$0xf] %v1500_v40  ;;  %v1504_v42 = vld [vmem:[%s22648_s4 + $0x1548] sm:$0xf]  ;;  %v1506_v43 = vld [vmem:[%s22648_s4 + $0x154c] sm:$0xf] }
 0x1f2   : > { %1503 = vst [vmem:[%s22644_s18 + $0x1548] sm:$0xf] %v1502_v41  ;;  %1505 = vst [vmem:[%s22644_s18 + $0x1550] sm:$0xf] %v1504_v42  ;;  %v1508_v44 = vld [vmem:[%s22648_s4 + $0x1560] sm:$0xf] }
 0x1f3   : > { %1507 = vst [vmem:[%s22644_s18 + $0x1558] sm:$0xf] %v1506_v43  ;;  %v1510_v45 = vld [vmem:[%s22648_s4 + $0x1564] sm:$0xf]  ;;  %v1512_v46 = vld [vmem:[%s22648_s4 + $0x1568] sm:$0xf] }
 0x1f4   : > { %1509 = vst [vmem:[%s22644_s18 + $0x1560] sm:$0xf] %v1508_v44  ;;  %1511 = vst [vmem:[%s22644_s18 + $0x1568] sm:$0xf] %v1510_v45  ;;  %v1514_v47 = vld [vmem:[%s22648_s4 + $0x156c] sm:$0xf] }
 0x1f5   : > { %1513 = vst [vmem:[%s22644_s18 + $0x1570] sm:$0xf] %v1512_v46  ;;  %v1516_v48 = vld [vmem:[%s22648_s4 + $0x1580] sm:$0xf]  ;;  %v1518_v49 = vld [vmem:[%s22648_s4 + $0x1584] sm:$0xf] }
 0x1f6   : > { %1515 = vst [vmem:[%s22644_s18 + $0x1578] sm:$0xf] %v1514_v47  ;;  %1517 = vst [vmem:[%s22644_s18 + $0x1580] sm:$0xf] %v1516_v48  ;;  %v1520_v50 = vld [vmem:[%s22648_s4 + $0x1588] sm:$0xf] }
 0x1f7   : > { %1519 = vst [vmem:[%s22644_s18 + $0x1588] sm:$0xf] %v1518_v49  ;;  %v1522_v51 = vld [vmem:[%s22648_s4 + $0x158c] sm:$0xf]  ;;  %v1524_v52 = vld [vmem:[%s22648_s4 + $0x15a0] sm:$0xf] }
 0x1f8   : > { %1521 = vst [vmem:[%s22644_s18 + $0x1590] sm:$0xf] %v1520_v50  ;;  %1523 = vst [vmem:[%s22644_s18 + $0x1598] sm:$0xf] %v1522_v51  ;;  %v1526_v53 = vld [vmem:[%s22648_s4 + $0x15a4] sm:$0xf] }
 0x1f9   : > { %1525 = vst [vmem:[%s22644_s18 + $0x15a0] sm:$0xf] %v1524_v52  ;;  %v1528_v54 = vld [vmem:[%s22648_s4 + $0x15a8] sm:$0xf]  ;;  %v1530_v55 = vld [vmem:[%s22648_s4 + $0x15ac] sm:$0xf] }
 0x1fa   : > { %1527 = vst [vmem:[%s22644_s18 + $0x15a8] sm:$0xf] %v1526_v53  ;;  %1529 = vst [vmem:[%s22644_s18 + $0x15b0] sm:$0xf] %v1528_v54  ;;  %v1532_v56 = vld [vmem:[%s22648_s4 + $0x15c0] sm:$0xf] }
 0x1fb   : > { %1531 = vst [vmem:[%s22644_s18 + $0x15b8] sm:$0xf] %v1530_v55  ;;  %v1534_v57 = vld [vmem:[%s22648_s4 + $0x15c4] sm:$0xf]  ;;  %v1536_v58 = vld [vmem:[%s22648_s4 + $0x15c8] sm:$0xf] }
 0x1fc   : > { %1533 = vst [vmem:[%s22644_s18 + $0x15c0] sm:$0xf] %v1532_v56  ;;  %1535 = vst [vmem:[%s22644_s18 + $0x15c8] sm:$0xf] %v1534_v57  ;;  %v1538_v59 = vld [vmem:[%s22648_s4 + $0x15cc] sm:$0xf] }
 0x1fd   : > { %1537 = vst [vmem:[%s22644_s18 + $0x15d0] sm:$0xf] %v1536_v58  ;;  %v1540_v60 = vld [vmem:[%s22648_s4 + $0x15e0] sm:$0xf]  ;;  %v1542_v61 = vld [vmem:[%s22648_s4 + $0x15e4] sm:$0xf] }
 0x1fe   : > { %1539 = vst [vmem:[%s22644_s18 + $0x15d8] sm:$0xf] %v1538_v59  ;;  %1541 = vst [vmem:[%s22644_s18 + $0x15e0] sm:$0xf] %v1540_v60  ;;  %v1544_v62 = vld [vmem:[%s22648_s4 + $0x15e8] sm:$0xf] }
 0x1ff   : > { %1543 = vst [vmem:[%s22644_s18 + $0x15e8] sm:$0xf] %v1542_v61  ;;  %v1546_v63 = vld [vmem:[%s22648_s4 + $0x15ec] sm:$0xf]  ;;  %v1548_v0 = vld [vmem:[%s22648_s4 + $0x1600] sm:$0xf] }
 0x200   : > { %1545 = vst [vmem:[%s22644_s18 + $0x15f0] sm:$0xf] %v1544_v62  ;;  %1547 = vst [vmem:[%s22644_s18 + $0x15f8] sm:$0xf] %v1546_v63  ;;  %v1550_v1 = vld [vmem:[%s22648_s4 + $0x1604] sm:$0xf] }
 0x201   : > { %1549 = vst [vmem:[%s22644_s18 + $0x1600] sm:$0xf] %v1548_v0  ;;  %v1552_v2 = vld [vmem:[%s22648_s4 + $0x1608] sm:$0xf]  ;;  %v1554_v3 = vld [vmem:[%s22648_s4 + $0x160c] sm:$0xf] }
 0x202   : > { %1551 = vst [vmem:[%s22644_s18 + $0x1608] sm:$0xf] %v1550_v1  ;;  %1553 = vst [vmem:[%s22644_s18 + $0x1610] sm:$0xf] %v1552_v2  ;;  %v1556_v4 = vld [vmem:[%s22648_s4 + $0x1620] sm:$0xf] }
 0x203   : > { %1555 = vst [vmem:[%s22644_s18 + $0x1618] sm:$0xf] %v1554_v3  ;;  %v1558_v5 = vld [vmem:[%s22648_s4 + $0x1624] sm:$0xf]  ;;  %v1560_v6 = vld [vmem:[%s22648_s4 + $0x1628] sm:$0xf] }
 0x204   : > { %1557 = vst [vmem:[%s22644_s18 + $0x1620] sm:$0xf] %v1556_v4  ;;  %1559 = vst [vmem:[%s22644_s18 + $0x1628] sm:$0xf] %v1558_v5  ;;  %v1562_v7 = vld [vmem:[%s22648_s4 + $0x162c] sm:$0xf] }
 0x205   : > { %1561 = vst [vmem:[%s22644_s18 + $0x1630] sm:$0xf] %v1560_v6  ;;  %v1564_v8 = vld [vmem:[%s22648_s4 + $0x1640] sm:$0xf]  ;;  %v1566_v9 = vld [vmem:[%s22648_s4 + $0x1644] sm:$0xf] }
 0x206   : > { %1563 = vst [vmem:[%s22644_s18 + $0x1638] sm:$0xf] %v1562_v7  ;;  %1565 = vst [vmem:[%s22644_s18 + $0x1640] sm:$0xf] %v1564_v8  ;;  %v1568_v10 = vld [vmem:[%s22648_s4 + $0x1648] sm:$0xf] }
 0x207   : > { %1567 = vst [vmem:[%s22644_s18 + $0x1648] sm:$0xf] %v1566_v9  ;;  %v1570_v11 = vld [vmem:[%s22648_s4 + $0x164c] sm:$0xf]  ;;  %v1572_v12 = vld [vmem:[%s22648_s4 + $0x1660] sm:$0xf] }
 0x208   : > { %1569 = vst [vmem:[%s22644_s18 + $0x1650] sm:$0xf] %v1568_v10  ;;  %1571 = vst [vmem:[%s22644_s18 + $0x1658] sm:$0xf] %v1570_v11  ;;  %v1574_v13 = vld [vmem:[%s22648_s4 + $0x1664] sm:$0xf] }
 0x209   : > { %1573 = vst [vmem:[%s22644_s18 + $0x1660] sm:$0xf] %v1572_v12  ;;  %v1576_v14 = vld [vmem:[%s22648_s4 + $0x1668] sm:$0xf]  ;;  %v1578_v15 = vld [vmem:[%s22648_s4 + $0x166c] sm:$0xf] }
 0x20a   : > { %1575 = vst [vmem:[%s22644_s18 + $0x1668] sm:$0xf] %v1574_v13  ;;  %1577 = vst [vmem:[%s22644_s18 + $0x1670] sm:$0xf] %v1576_v14  ;;  %v1580_v16 = vld [vmem:[%s22648_s4 + $0x1680] sm:$0xf] }
 0x20b   : > { %1579 = vst [vmem:[%s22644_s18 + $0x1678] sm:$0xf] %v1578_v15  ;;  %v1582_v17 = vld [vmem:[%s22648_s4 + $0x1684] sm:$0xf]  ;;  %v1584_v18 = vld [vmem:[%s22648_s4 + $0x1688] sm:$0xf] }
 0x20c   : > { %1581 = vst [vmem:[%s22644_s18 + $0x1680] sm:$0xf] %v1580_v16  ;;  %1583 = vst [vmem:[%s22644_s18 + $0x1688] sm:$0xf] %v1582_v17  ;;  %v1586_v19 = vld [vmem:[%s22648_s4 + $0x168c] sm:$0xf] }
 0x20d   : > { %1585 = vst [vmem:[%s22644_s18 + $0x1690] sm:$0xf] %v1584_v18  ;;  %v1588_v20 = vld [vmem:[%s22648_s4 + $0x16a0] sm:$0xf]  ;;  %v1590_v21 = vld [vmem:[%s22648_s4 + $0x16a4] sm:$0xf] }
 0x20e   : > { %1587 = vst [vmem:[%s22644_s18 + $0x1698] sm:$0xf] %v1586_v19  ;;  %1589 = vst [vmem:[%s22644_s18 + $0x16a0] sm:$0xf] %v1588_v20  ;;  %v1592_v22 = vld [vmem:[%s22648_s4 + $0x16a8] sm:$0xf] }
 0x20f   : > { %1591 = vst [vmem:[%s22644_s18 + $0x16a8] sm:$0xf] %v1590_v21  ;;  %v1594_v23 = vld [vmem:[%s22648_s4 + $0x16ac] sm:$0xf]  ;;  %v1596_v24 = vld [vmem:[%s22648_s4 + $0x16c0] sm:$0xf] }
 0x210   : > { %1593 = vst [vmem:[%s22644_s18 + $0x16b0] sm:$0xf] %v1592_v22  ;;  %1595 = vst [vmem:[%s22644_s18 + $0x16b8] sm:$0xf] %v1594_v23  ;;  %v1598_v25 = vld [vmem:[%s22648_s4 + $0x16c4] sm:$0xf] }
 0x211   : > { %1597 = vst [vmem:[%s22644_s18 + $0x16c0] sm:$0xf] %v1596_v24  ;;  %v1600_v26 = vld [vmem:[%s22648_s4 + $0x16c8] sm:$0xf]  ;;  %v1602_v27 = vld [vmem:[%s22648_s4 + $0x16cc] sm:$0xf] }
 0x212   : > { %1599 = vst [vmem:[%s22644_s18 + $0x16c8] sm:$0xf] %v1598_v25  ;;  %1601 = vst [vmem:[%s22644_s18 + $0x16d0] sm:$0xf] %v1600_v26  ;;  %v1604_v28 = vld [vmem:[%s22648_s4 + $0x16e0] sm:$0xf] }
 0x213   : > { %1603 = vst [vmem:[%s22644_s18 + $0x16d8] sm:$0xf] %v1602_v27  ;;  %v1606_v29 = vld [vmem:[%s22648_s4 + $0x16e4] sm:$0xf]  ;;  %v1608_v30 = vld [vmem:[%s22648_s4 + $0x16e8] sm:$0xf] }
 0x214   : > { %1605 = vst [vmem:[%s22644_s18 + $0x16e0] sm:$0xf] %v1604_v28  ;;  %1607 = vst [vmem:[%s22644_s18 + $0x16e8] sm:$0xf] %v1606_v29  ;;  %v1610_v31 = vld [vmem:[%s22648_s4 + $0x16ec] sm:$0xf] }
 0x215   : > { %1609 = vst [vmem:[%s22644_s18 + $0x16f0] sm:$0xf] %v1608_v30  ;;  %v1612_v32 = vld [vmem:[%s22648_s4 + $0x1700] sm:$0xf]  ;;  %v1614_v33 = vld [vmem:[%s22648_s4 + $0x1704] sm:$0xf] }
 0x216   : > { %1611 = vst [vmem:[%s22644_s18 + $0x16f8] sm:$0xf] %v1610_v31  ;;  %1613 = vst [vmem:[%s22644_s18 + $0x1700] sm:$0xf] %v1612_v32  ;;  %v1616_v34 = vld [vmem:[%s22648_s4 + $0x1708] sm:$0xf] }
 0x217   : > { %1615 = vst [vmem:[%s22644_s18 + $0x1708] sm:$0xf] %v1614_v33  ;;  %v1618_v35 = vld [vmem:[%s22648_s4 + $0x170c] sm:$0xf]  ;;  %v1620_v36 = vld [vmem:[%s22648_s4 + $0x1720] sm:$0xf] }
 0x218   : > { %1617 = vst [vmem:[%s22644_s18 + $0x1710] sm:$0xf] %v1616_v34  ;;  %1619 = vst [vmem:[%s22644_s18 + $0x1718] sm:$0xf] %v1618_v35  ;;  %v1622_v37 = vld [vmem:[%s22648_s4 + $0x1724] sm:$0xf] }
 0x219   : > { %1621 = vst [vmem:[%s22644_s18 + $0x1720] sm:$0xf] %v1620_v36  ;;  %v1624_v38 = vld [vmem:[%s22648_s4 + $0x1728] sm:$0xf]  ;;  %v1626_v39 = vld [vmem:[%s22648_s4 + $0x172c] sm:$0xf] }
 0x21a   : > { %1623 = vst [vmem:[%s22644_s18 + $0x1728] sm:$0xf] %v1622_v37  ;;  %1625 = vst [vmem:[%s22644_s18 + $0x1730] sm:$0xf] %v1624_v38  ;;  %p1629_p0 = scmp.ge.s32.totalorder %s1628_s0, 2  ;;  %s136_s12 = sadd.s32 1, %s22656_s12  }
 0x21b   : > { %1627 = vst [vmem:[%s22644_s18 + $0x1738] sm:$0xf] %v1626_v39  ;;  %p133_p1 = scmp.ge.s32.totalorder %s136_s12, 2  }
 0x21c   : > { %s27225_s0 = smov (%p1629_p0, %s1628_s0), 0 }
 0x21d   : > { %s17523_s23 = sshll.u32 %s27225_s0, 4  ;;  %s17524_s13 = sshll.u32 %s27225_s0, 2 }
 0x21e   : > { %s1633_s4 = scalar_lea.vmem %s22757_s19, %s17523_s23   ;;  %s1634_s18 = scalar_lea.vmem [#allocation2], %s17524_s13  }
 0x21f   : > { %s27034_s9 = smov %s27225_s0  ;;  %135 = sbr.rel (!%p133_p1) target bundleno = 43 (0x2b), region = 258 }
 0x226   :  { %6196 = vsyncadd [#allocation3], 95232  ;;  %v6197_v40 = vld [vmem:[%s22706_s5] sm:$0xff]  ;;  %v6198_v41 = vld [vmem:[%s22706_s5 + $0x8] sm:$0xff]  ;;  %vm6639_vm0 = vcmask 523264   ;;  %vm8405_vm1 = vcmask 1045504  }
 0x227   :  { %v19464_v42 = vpack.c.bf16 %v6198_v41, %v6197_v40  ;;  %v6199_v43 = vld [vmem:[%s22706_s5 + $0x10] sm:$0xff]  ;;  %v6200_v44 = vld [vmem:[%s22706_s5 + $0x18] sm:$0xff]  ;;  %v6201_v46 = vld [vmem:[%s22706_s5 + $0x20] sm:$0xff]  ;;  %vm8704_vm2 = vcmask 1040384   ;;  %vm8498_vm3 = vcmask 785408   ;;  %vm8512_vm4 = vcmask 783360  }
 0x228   :  { %v19468_v45 = vpack.c.bf16 %v6200_v44, %v6199_v43  ;;  %v6202_v47 = vld [vmem:[%s22706_s5 + $0x28] sm:$0xff]  ;;  %v17928_v49 = vld [vmem:[%s22721_s17] sm:$0xff]   ;;  %v6203_v50 = vld [vmem:[%s22706_s5 + $0x30] sm:$0xff]  ;;  %vm9288_vm5 = vcmask 261120  }
 0x229   :  { %19465 = vmatprep.subr.bf16.mxu0 %v19464_v42  ;;  %v19472_v48 = vpack.c.bf16 %v6202_v47, %v6201_v46  ;;  %v6204_v51 = vld [vmem:[%s22706_s5 + $0x38] sm:$0xff]  ;;  %v17929_v52 = vunpack.c.l.bf16 %v17928_v49  ;;  %v6205_v54 = vld [vmem:[%s22706_s5 + $0x40] sm:$0xff]  ;;  %v6206_v55 = vld [vmem:[%s22706_s5 + $0x48] sm:$0xff]  ;;  %v17930_v3 = vunpack.c.h.bf16 %v17928_v49 }
 0x22a   :  { %19467 = vmatpush3.bf16.msra.mxu0 %v19464_v42  ;;  %v19476_v53 = vpack.c.bf16 %v6204_v51, %v6203_v50  ;;  %v19480_v56 = vpack.c.bf16 %v6206_v55, %v6205_v54  ;;  %v6207_v57 = vld [vmem:[%s22706_s5 + $0x50] sm:$0xff]  ;;  %v6208_v58 = vld [vmem:[%s22706_s5 + $0x58] sm:$0xff]  ;;  %v6209_v60 = vld [vmem:[%s22706_s5 + $0x60] sm:$0xff] }
 0x22b   :  { %19469 = vmatprep.subr.bf16.mxu0 %v19468_v45  ;;  %19352 = vmatprep.mubr.f32.mxu0 %v17929_v52  ;;  %v19484_v59 = vpack.c.bf16 %v6208_v58, %v6207_v57  ;;  %v6210_v61 = vld [vmem:[%s22706_s5 + $0x68] sm:$0xff]  ;;  %v6211_v63 = vld [vmem:[%s22706_s5 + $0x70] sm:$0xff]  ;;  %v6212_v0 = vld [vmem:[%s22706_s5 + $0x78] sm:$0xff]  ;;  %s22690_s5 = smov 96  }
 0x22c   :  { %v19488_v62 = vpack.c.bf16 %v6210_v61, %v6209_v60  ;;  %v19492_v1 = vpack.c.bf16 %v6212_v0, %v6211_v63  ;;  %v18783_v2 = vld [vmem:[%s22721_s17 + $0x8] sm:$0xff]   ;;  %v18784_v5 = vld [vmem:[%s22721_s17 + $0x10] sm:$0xff]   ;;  %v18785_v8 = vld [vmem:[%s22721_s17 + $0x18] sm:$0xff]  }
 0x22d   :  { %v17933_v4 = vunpack.c.l.bf16 %v18783_v2  ;;  %v17934_v6 = vunpack.c.h.bf16 %v18783_v2  ;;  %v17937_v7 = vunpack.c.l.bf16 %v18784_v5  ;;  %v17938_v9 = vunpack.c.h.bf16 %v18784_v5  ;;  %v18786_v11 = vld [vmem:[%s22721_s17 + $0x20] sm:$0xff]   ;;  %v18787_v14 = vld [vmem:[%s22721_s17 + $0x28] sm:$0xff]   ;;  %v18788_v17 = vld [vmem:[%s22721_s17 + $0x30] sm:$0xff]  }
 0x22e   :  { %19471 = vmatpush3.bf16.msra.mxu0 %v19468_v45  ;;  %v17941_v10 = vunpack.c.l.bf16 %v18785_v8  ;;  %v17942_v12 = vunpack.c.h.bf16 %v18785_v8  ;;  %v17945_v13 = vunpack.c.l.bf16 %v18786_v11  ;;  %v17946_v15 = vunpack.c.h.bf16 %v18786_v11  ;;  %v18789_v20 = vld [vmem:[%s22721_s17 + $0x38] sm:$0xff]   ;;  %v18790_v23 = vld [vmem:[%s22721_s17 + $0x40] sm:$0xff]   ;;  %v18791_v26 = vld [vmem:[%s22721_s17 + $0x48] sm:$0xff]  }
 0x22f   :  { %19473 = vmatprep.subr.bf16.mxu0 %v19472_v48  ;;  %v17949_v16 = vunpack.c.l.bf16 %v18787_v14  ;;  %v17950_v18 = vunpack.c.h.bf16 %v18787_v14  ;;  %v17953_v19 = vunpack.c.l.bf16 %v18788_v17  ;;  %v17954_v21 = vunpack.c.h.bf16 %v18788_v17  ;;  %v18792_v29 = vld [vmem:[%s22721_s17 + $0x50] sm:$0xff]   ;;  %v18793_v32 = vld [vmem:[%s22721_s17 + $0x58] sm:$0xff]   ;;  %v17525_v36 = vld [vmem:[%s22726_s21 + $0x100] sm:$0xff]  ;;  %s22691_s17 = smov 32  }
 0x230   :  { %v17957_v22 = vunpack.c.l.bf16 %v18789_v20  ;;  %v17958_v24 = vunpack.c.h.bf16 %v18789_v20  ;;  %v17961_v25 = vunpack.c.l.bf16 %v18790_v23  ;;  %v17962_v27 = vunpack.c.h.bf16 %v18790_v23  ;;  %v17529_v37 = vld [vmem:[%s22726_s21 + $0x120] sm:$0xff]  ;;  %v17527_v38 = vld [vmem:[%s22726_s21 + $0x110] sm:$0xff]  ;;  %v17526_v5 = vld [vmem:[%s22726_s21 + $0x108] sm:$0xff] }
 0x231   :  { %v17965_v28 = vunpack.c.l.bf16 %v18791_v26  ;;  %v17966_v30 = vunpack.c.h.bf16 %v18791_v26  ;;  %v17969_v31 = vunpack.c.l.bf16 %v18792_v29  ;;  %v17970_v33 = vunpack.c.h.bf16 %v18792_v29  ;;  %v17531_v40 = vld [vmem:[%s22726_s21 + $0x130] sm:$0xff]  ;;  %v17533_v44 = vld [vmem:[%s22726_s21 + $0x140] sm:$0xff]  ;;  %v17546_v29 = vld [vmem:[%s22726_s21 + $0x1a8] sm:$0xff] }
 0x232   :  { %19475 = vmatpush3.bf16.msra.mxu0 %v19472_v48  ;;  %v17973_v34 = vunpack.c.l.bf16 %v18793_v32  ;;  %v17974_v35 = vunpack.c.h.bf16 %v18793_v32  ;;  %v22219_v39 = vcombine.high %v17525_v36, %v17529_v37  ;;  %v22220_v41 = vcombine.low %v17525_v36, %v17529_v37  ;;  %v17537_v45 = vld [vmem:[%s22726_s21 + $0x160] sm:$0xff]  ;;  %v17535_v46 = vld [vmem:[%s22726_s21 + $0x150] sm:$0xff] }
 0x233   :  { %19477 = vmatprep.subr.bf16.mxu0 %v19476_v53  ;;  %v22235_v42 = vcombine.high %v17527_v38, %v17531_v40  ;;  %v22236_v43 = vcombine.low %v17527_v38, %v17531_v40  ;;  %v22221_v47 = vcombine.high %v17533_v44, %v17537_v45  ;;  %v17539_v48 = vld [vmem:[%s22726_s21 + $0x170] sm:$0xff]  ;;  %v22222_v49 = vcombine.low %v17533_v44, %v17537_v45  ;;  %v17541_v52 = vld [vmem:[%s22726_s21 + $0x180] sm:$0xff]  ;;  %v17550_v38 = vld [vmem:[%s22726_s21 + $0x1c8] sm:$0xff] }
 0x234   :  { %19497 = vmatprep.subr.bf16.mxu1 %v22219_v39  ;;  %v22237_v50 = vcombine.high %v17535_v46, %v17539_v48  ;;  %v22238_v51 = vcombine.low %v17535_v46, %v17539_v48  ;;  %v17543_v54 = vld [vmem:[%s22726_s21 + $0x190] sm:$0xff]  ;;  %v17549_v60 = vld [vmem:[%s22726_s21 + $0x1c0] sm:$0xff]  ;;  %v17554_v39 = vld [vmem:[%s22726_s21 + $0x1e8] sm:$0xff] }
 0x235   :  { %19499 = vmatpush1.bf16.msra.mxu1 %v22220_v41  ;;  %v17553_v61 = vld [vmem:[%s22726_s21 + $0x1e0] sm:$0xff]  ;;  %v17555_v0 = vld [vmem:[%s22726_s21 + $0x1f0] sm:$0xff]  ;;  %v22233_v44 = vcombine.high %v17550_v38, %v17554_v39  ;;  %v17528_v48 = vld [vmem:[%s22726_s21 + $0x118] sm:$0xff] }
 0x236   :  { %19479 = vmatpush3.bf16.msra.mxu0 %v19476_v53  ;;  %19501 = vmatprep.subr.bf16.mxu1 %v22221_v47  ;;  %v17545_v53 = vld [vmem:[%s22726_s21 + $0x1a0] sm:$0xff]  ;;  %v22225_v63 = vcombine.high %v17549_v60, %v17553_v61  ;;  %v6456_v26 = vld [vmem:[%s22726_s21 + $0x50] sm:$0xff] }
 0x237   :  { %19481 = vmatprep.subr.bf16.mxu0 %v19480_v56  ;;  %v22223_v55 = vcombine.high %v17541_v52, %v17545_v53  ;;  %v22224_v57 = vcombine.low %v17541_v52, %v17545_v53  ;;  %v6464_v36 = vld [vmem:[%s22726_s21 + $0x90] sm:$0xff] }
 0x238   :  { %v6468_v37 = vld [vmem:[%s22726_s21 + $0xb0] sm:$0xff] }
 0x239   :  { %19503 = vmatpush1.bf16.msra.mxu1 %v22222_v49  ;;  %v22272_v45 = vcombine.low %v6464_v36, %v6468_v37  ;;  %v6472_v46 = vld [vmem:[%s22726_s21 + $0xd0] sm:$0xff]  ;;  %v17532_v49 = vld [vmem:[%s22726_s21 + $0x138] sm:$0xff] }
 0x23a   :  { %19483 = vmatpush3.bf16.msra.mxu0 %v19480_v56  ;;  %v17547_v56 = vld [vmem:[%s22726_s21 + $0x1b0] sm:$0xff]  ;;  %19505 = vmatprep.subr.bf16.mxu1 %v22223_v55  ;;  %v22243_v55 = vcombine.high %v17528_v48, %v17532_v49 }
 0x23b   :  { %19485 = vmatprep.subr.bf16.mxu0 %v19484_v59  ;;  %v22239_v58 = vcombine.high %v17543_v54, %v17547_v56  ;;  %v6476_v47 = vld [vmem:[%s22726_s21 + $0xf0] sm:$0xff] }
 0x23c   :  { %v22273_v52 = vcombine.high %v6472_v46, %v6476_v47 }
 0x23d   :  { %19507 = vmatpush1.bf16.msra.mxu1 %v22224_v57  ;;  %v17627_v57 = vld [vmem:[%s22726_s21 + $0x230] sm:$0xff] }
 0x23e   :  { %19487 = vmatpush3.bf16.msra.mxu0 %v19484_v59  ;;  %v22240_v59 = vcombine.low %v17543_v54, %v17547_v56  ;;  %19509 = vmatprep.subr.bf16.mxu1 %v22225_v63  ;;  %v22274_v54 = vcombine.low %v6472_v46, %v6476_v47  ;;  %v17623_v56 = vld [vmem:[%s22726_s21 + $0x210] sm:$0xff]  ;;  %v6454_v47 = vld [vmem:[%s22726_s21 + $0x40] sm:$0xff] }
 0x23f   :  { %19489 = vmatprep.subr.bf16.mxu0 %v19488_v62 }
 0x242   :  { %19491 = vmatpush3.bf16.msra.mxu0 %v19488_v62  ;;  %v17551_v62 = vld [vmem:[%s22726_s21 + $0x1d0] sm:$0xff] }
 0x243   :  { %19493 = vmatprep.subr.bf16.mxu0 %v19492_v1  ;;  %v22241_v2 = vcombine.high %v17551_v62, %v17555_v0 }
 0x246   :  { %19495 = vmatpush3.bf16.msra.mxu0 %v19492_v1  ;;  %v22226_v1 = vcombine.low %v17549_v60, %v17553_v61 }
 0x247   :  { %19529 = vmatprep.subr.bf16.mxu0 %v22235_v42  ;;  %v22271_v42 = vcombine.high %v6464_v36, %v6468_v37  ;;  %v17647_v37 = vld [vmem:[%s22726_s21 + $0x2d0] sm:$0xff] }
 0x248   :  { %19511 = vmatpush1.bf16.msra.mxu1 %v22226_v1 }
 0x249   :  { %19353 = vmatmul.mubr.f32.vlgmr.msra.gmra.mrb[0].mxu0 %v17930_v3  ;;  %v22242_v3 = vcombine.low %v17551_v62, %v17555_v0 }
 0x24a   :  { %19355 = vmatprep.mubr.f32.mxu0 %v17933_v4  ;;  %19531 = vmatpush1.bf16.msra.mxu0 %v22236_v43  ;;  %v26943_v4 = vmov 0.0  }
 0x24b   :  { %19533 = vmatprep.subr.bf16.mxu0 %v22237_v50  ;;  %6728 = vmatprep.mubr.f32.mxu1 %v26943_v4 }
 0x24d   :  { %19356 = vmatmul.mubr.f32.gmra.mrb[2].mxu0 %v17934_v6  ;;  %v17530_v6 = vld [vmem:[%s22726_s21 + $0x128] sm:$0xff] }
 0x24e   :  { %19358 = vmatprep.mubr.f32.mxu0 %v17937_v7  ;;  %19535 = vmatpush1.bf16.msra.mxu0 %v22238_v51  ;;  %v22227_v7 = vcombine.high %v17526_v5, %v17530_v6  ;;  %v22228_v8 = vcombine.low %v17526_v5, %v17530_v6  ;;  %v22234_v51 = vcombine.low %v17550_v38, %v17554_v39  ;;  %v17651_v38 = vld [vmem:[%s22726_s21 + $0x2f0] sm:$0xff]  ;;  %v6446_v39 = vld [vmem:[%s22726_s21] sm:$0xff] }
 0x24f   :  { %19537 = vmatprep.subr.bf16.mxu0 %v22239_v58  ;;  %v22299_v58 = vcombine.high %v17623_v56, %v17627_v57  ;;  %v22244_v6 = vcombine.low %v17528_v48, %v17532_v49  ;;  %v6458_v48 = vld [vmem:[%s22726_s21 + $0x60] sm:$0xff] }
 0x250   :  { %19513 = vmatprep.subr.bf16.mxu1 %v22227_v7 }
 0x251   :  { %19359 = vmatmul.mubr.f32.gmra.mrb[4].mxu0 %v17938_v9  ;;  %v6448_v9 = vld [vmem:[%s22726_s21 + $0x10] sm:$0xff] }
 0x252   :  { %19361 = vmatprep.mubr.f32.mxu0 %v17941_v10  ;;  %19539 = vmatpush1.bf16.msra.mxu0 %v22240_v59  ;;  %v6452_v10 = vld [vmem:[%s22726_s21 + $0x30] sm:$0xff] }
 0x253   :  { %19541 = vmatprep.subr.bf16.mxu0 %v22241_v2  ;;  %v22267_v11 = vcombine.high %v6448_v9, %v6452_v10  ;;  %v17536_v2 = vld [vmem:[%s22726_s21 + $0x158] sm:$0xff] }
 0x255   :  { %19362 = vmatmul.mubr.f32.gmra.mrb[6].mxu0 %v17942_v12  ;;  %v22268_v12 = vcombine.low %v6448_v9, %v6452_v10  ;;  %v17631_v9 = vld [vmem:[%s22726_s21 + $0x250] sm:$0xff] }
 0x256   :  { %19364 = vmatprep.mubr.f32.mxu0 %v17945_v13  ;;  %19543 = vmatpush1.bf16.msra.mxu0 %v22242_v3  ;;  %v17540_v3 = vld [vmem:[%s22726_s21 + $0x178] sm:$0xff]  ;;  %v17635_v10 = vld [vmem:[%s22726_s21 + $0x270] sm:$0xff] }
 0x257   :  { %19593 = vmatprep.subr.bf16.mxu0 %v22267_v11  ;;  %v22245_v7 = vcombine.high %v17536_v2, %v17540_v3  ;;  %v17544_v11 = vld [vmem:[%s22726_s21 + $0x198] sm:$0xff] }
 0x259   :  { %19365 = vmatmul.mubr.f32.gmra.mrb[8].mxu0 %v17946_v15 }
 0x25a   :  { %19367 = vmatprep.mubr.f32.mxu0 %v17949_v16 }
 0x25d   :  { %19368 = vmatmul.mubr.f32.gmra.mrb[10].mxu0 %v17950_v18 }
 0x25e   :  { %19370 = vmatprep.mubr.f32.mxu0 %v17953_v19 }
 0x261   :  { %19371 = vmatmul.mubr.f32.gmra.mrb[12].mxu0 %v17954_v21  ;;  %v17534_v21 = vld [vmem:[%s22726_s21 + $0x148] sm:$0xff] }
 0x262   :  { %19373 = vmatprep.mubr.f32.mxu0 %v17957_v22  ;;  %v17538_v22 = vld [vmem:[%s22726_s21 + $0x168] sm:$0xff] }
 0x265   :  { %19374 = vmatmul.mubr.f32.gmra.mrb[14].mxu0 %v17958_v24  ;;  %v22229_v24 = vcombine.high %v17534_v21, %v17538_v22 }
 0x266   :  { %19376 = vmatprep.mubr.f32.mxu0 %v17961_v25 }
 0x269   :  { %19377 = vmatmul.mubr.f32.gmra.mrb[16].mxu0 %v17962_v27  ;;  %v6460_v27 = vld [vmem:[%s22726_s21 + $0x70] sm:$0xff] }
 0x26a   :  { %19379 = vmatprep.mubr.f32.mxu0 %v17965_v28  ;;  %v17542_v28 = vld [vmem:[%s22726_s21 + $0x188] sm:$0xff]  ;;  %v22269_v32 = vcombine.high %v6456_v26, %v6460_v27 }
 0x26b   :  { %v22232_v41 = vcombine.low %v17542_v28, %v17546_v29 }
 0x26d   :  { %19380 = vmatmul.mubr.f32.gmra.mrb[18].mxu0 %v17966_v30 }
 0x26e   :  { %19382 = vmatprep.mubr.f32.mxu0 %v17969_v31  ;;  %v22230_v31 = vcombine.low %v17534_v21, %v17538_v22  ;;  %v22246_v21 = vcombine.low %v17536_v2, %v17540_v3  ;;  %v22301_v22 = vcombine.high %v17631_v9, %v17635_v10  ;;  %v6451_v3 = vld [vmem:[%s22726_s21 + $0x28] sm:$0xff] }
 0x271   :  { %19383 = vmatmul.mubr.f32.gmra.mrb[20].mxu0 %v17970_v33 }
 0x272   :  { %19385 = vmatprep.mubr.f32.mxu0 %v17973_v34  ;;  %v22231_v34 = vcombine.high %v17542_v28, %v17546_v29  ;;  %v17643_v28 = vld [vmem:[%s22726_s21 + $0x2b0] sm:$0xff]  ;;  %v17552_v29 = vld [vmem:[%s22726_s21 + $0x1d8] sm:$0xff] }
 0x275   :  { %19386 = vmatmul.mubr.f32.gmra.mrb[22].mxu0 %v17974_v35  ;;  %v22270_v35 = vcombine.low %v6456_v26, %v6460_v27  ;;  %v22302_v26 = vcombine.low %v17631_v9, %v17635_v10  ;;  %v17639_v27 = vld [vmem:[%s22726_s21 + $0x290] sm:$0xff]  ;;  %v6471_v10 = vld [vmem:[%s22726_s21 + $0xc8] sm:$0xff] }
 0x276   :  { %6954 = vmatprep.mubr.f32.mxu0 %v26943_v4  ;;  %v22304_v36 = vcombine.low %v17639_v27, %v17643_v28 }
 0x31c   :  { %v24426_v13 = vpop.f32.mrb[0].mxu0 }
 0x31d   :  { %v24428_v14 = vpop.f32.mrb[1].mxu0 }
 0x320   :  { %v24430_v15 = vpop.f32.mrb[2].mxu0 }
 0x321   :  { %v24432_v16 = vpop.f32.mrb[3].mxu0 }
 0x324   :  { %v24434_v17 = vpop.f32.mrb[4].mxu0 }
 0x325   :  { %v24436_v18 = vpop.f32.mrb[5].mxu0 }
 0x328   :  { %v24438_v19 = vpop.f32.mrb[6].mxu0 }
 0x329   :  { %v24440_v20 = vpop.f32.mrb[7].mxu0 }
 0x32c   :  { %v24444_v23 = vpop.f32.mrb[8].mxu0 }
 0x32d   :  { %v24446_v25 = vpop.f32.mrb[9].mxu0 }
 0x32e   :  { %17557 = vmatmul.mubr.msk.f32.vlgmr.msra.gmra.mrb[0].mxu1 %vm6639_vm0, %v24446_v25  ;;  %17573 = vmatmul.mubr.msk.f32.vlgmr.msra.gmra.mrb[24].mxu0 %vm6639_vm0, %v24446_v25 }
 0x32f   :  { %19515 = vmatpush1.bf16.msra.mxu1 %v22228_v8  ;;  %6734 = vmatprep.mubr.f32.mxu1 %v26943_v4  ;;  %v22300_v8 = vcombine.low %v17623_v56, %v17627_v57  ;;  %v6474_v57 = vld [vmem:[%s22726_s21 + $0xe0] sm:$0xff] }
 0x330   :  { %6960 = vmatprep.mubr.f32.mxu0 %v26943_v4  ;;  %v24458_v30 = vpop.f32.mrb[10].mxu0  ;;  %19517 = vmatprep.subr.bf16.mxu1 %v22229_v24 }
 0x331   :  { %v24460_v33 = vpop.f32.mrb[11].mxu0  ;;  %19595 = vmatpush1.bf16.msra.mxu0 %v22268_v12  ;;  %v17548_v12 = vld [vmem:[%s22726_s21 + $0x1b8] sm:$0xff] }
 0x332   :  { %17558 = vmatmul.mubr.msk.f32.gmra.mrb[2].mxu1 %vm6639_vm0, %v24444_v23  ;;  %17574 = vmatmul.mubr.msk.f32.gmra.mrb[26].mxu0 %vm6639_vm0, %v24444_v23  ;;  %v22247_v24 = vcombine.high %v17544_v11, %v17548_v12 }
 0x333   :  { %6740 = vmatprep.mubr.f32.mxu1 %v26943_v4  ;;  %6966 = vmatprep.mubr.f32.mxu0 %v26943_v4 }
 0x334   :  { %19519 = vmatpush1.bf16.msra.mxu1 %v22230_v31  ;;  %v24472_v40 = vpop.f32.mrb[12].mxu0  ;;  %19597 = vmatprep.subr.bf16.mxu0 %v22269_v32  ;;  %v17556_v31 = vld [vmem:[%s22726_s21 + $0x1f8] sm:$0xff]  ;;  %v22248_v32 = vcombine.low %v17544_v11, %v17548_v12  ;;  %v6475_v11 = vld [vmem:[%s22726_s21 + $0xe8] sm:$0xff] }
 0x335   :  { %v24474_v43 = vpop.f32.mrb[13].mxu0  ;;  %19521 = vmatprep.subr.bf16.mxu1 %v22231_v34  ;;  %19599 = vmatpush1.bf16.msra.mxu0 %v22270_v35  ;;  %v22303_v34 = vcombine.high %v17639_v27, %v17643_v28  ;;  %v22249_v35 = vcombine.high %v17552_v29, %v17556_v31  ;;  %v6457_v28 = vld [vmem:[%s22726_s21 + $0x58] sm:$0xff] }
 0x336   :  { %17559 = vmatmul.mubr.msk.f32.gmra.mrb[4].mxu1 %vm6639_vm0, %v24460_v33  ;;  %17575 = vmatmul.mubr.msk.f32.gmra.mrb[28].mxu0 %vm6639_vm0, %v24460_v33 }
 0x337   :  { %6746 = vmatprep.mubr.f32.mxu1 %v26943_v4  ;;  %6972 = vmatprep.mubr.f32.mxu0 %v26943_v4 }
 0x338   :  { %19523 = vmatpush1.bf16.msra.mxu1 %v22232_v41  ;;  %v24486_v50 = vpop.f32.mrb[14].mxu0  ;;  %19601 = vmatprep.subr.bf16.mxu0 %v22271_v42  ;;  %v6450_v41 = vld [vmem:[%s22726_s21 + $0x20] sm:$0xff]  ;;  %v22250_v42 = vcombine.low %v17552_v29, %v17556_v31  ;;  %v6461_v29 = vld [vmem:[%s22726_s21 + $0x78] sm:$0xff] }
 0x339   :  { %v24488_v53 = vpop.f32.mrb[15].mxu0  ;;  %19525 = vmatprep.subr.bf16.mxu1 %v22233_v44  ;;  %19603 = vmatpush1.bf16.msra.mxu0 %v22272_v45  ;;  %v22305_v44 = vcombine.high %v17647_v37, %v17651_v38  ;;  %v22306_v45 = vcombine.low %v17647_v37, %v17651_v38  ;;  %v22251_v46 = vcombine.high %v6446_v39, %v6450_v41  ;;  %v6473_v38 = vld [vmem:[%s22726_s21 + $0xd8] sm:$0xff] }
 0x33a   :  { %17560 = vmatmul.mubr.msk.f32.gmra.mrb[6].mxu1 %vm6639_vm0, %v24458_v30  ;;  %17576 = vmatmul.mubr.msk.f32.gmra.mrb[30].mxu0 %vm6639_vm0, %v24458_v30  ;;  %v22252_v49 = vcombine.low %v6446_v39, %v6450_v41  ;;  %v6477_v39 = vld [vmem:[%s22726_s21 + $0xf8] sm:$0xff] }
 0x33b   :  { %6752 = vmatprep.mubr.f32.mxu1 %v26943_v4  ;;  %6978 = vmatprep.mubr.f32.mxu0 %v26943_v4 }
 0x33c   :  { %19527 = vmatpush1.bf16.msra.mxu1 %v22234_v51  ;;  %19605 = vmatprep.subr.bf16.mxu0 %v22273_v52  ;;  %v24498_v59 = vpop.f32.mrb[16].mxu0  ;;  %v22253_v51 = vcombine.high %v6454_v47, %v6458_v48  ;;  %v6462_v52 = vld [vmem:[%s22726_s21 + $0x80] sm:$0xff] }
 0x33d   :  { %19607 = vmatpush1.bf16.msra.mxu0 %v22274_v54  ;;  %19545 = vmatprep.subr.bf16.mxu1 %v22243_v55  ;;  %v24500_v60 = vpop.f32.mrb[17].mxu0  ;;  %v6466_v54 = vld [vmem:[%s22726_s21 + $0xa0] sm:$0xff]  ;;  %v22254_v55 = vcombine.low %v6454_v47, %v6458_v48 }
 0x33e   :  { %17561 = vmatmul.mubr.msk.f32.gmra.mrb[8].mxu1 %vm6639_vm0, %v24474_v43  ;;  %17577 = vmatmul.mubr.msk.f32.gmra.mrb[32].mxu0 %vm6639_vm0, %v24474_v43  ;;  %v22255_v56 = vcombine.high %v6462_v52, %v6466_v54  ;;  %v17629_v48 = vld [vmem:[%s22726_s21 + $0x240] sm:$0xff] }
 0x33f   :  { %6758 = vmatprep.mubr.f32.mxu1 %v26943_v4  ;;  %6984 = vmatprep.mubr.f32.mxu0 %v26943_v4 }
 0x340   :  { %19657 = vmatprep.subr.bf16.mxu0 %v22299_v58  ;;  %v24508_v61 = vpop.f32.mrb[18].mxu0  ;;  %v22256_v58 = vcombine.low %v6462_v52, %v6466_v54  ;;  %v17637_v54 = vld [vmem:[%s22726_s21 + $0x280] sm:$0xff] }
 0x341   :  { %v24510_v62 = vpop.f32.mrb[19].mxu0 }
 0x342   :  { %17562 = vmatmul.mubr.msk.f32.gmra.mrb[10].mxu1 %vm6639_vm0, %v24472_v40  ;;  %17578 = vmatmul.mubr.msk.f32.gmra.mrb[34].mxu0 %vm6639_vm0, %v24472_v40 }
 0x343   :  { %6764 = vmatprep.mubr.f32.mxu1 %v26943_v4  ;;  %6990 = vmatprep.mubr.f32.mxu0 %v26943_v4 }
 0x344   :  { %v24518_v63 = vpop.f32.mrb[20].mxu0 }
 0x345   :  { %v24520_v0 = vpop.f32.mrb[21].mxu0 }
 0x346   :  { %17563 = vmatmul.mubr.msk.f32.gmra.mrb[12].mxu1 %vm6639_vm0, %v24488_v53  ;;  %17579 = vmatmul.mubr.msk.f32.gmra.mrb[36].mxu0 %vm6639_vm0, %v24488_v53 }
 0x347   :  { %6770 = vmatprep.mubr.f32.mxu1 %v26943_v4  ;;  %6996 = vmatprep.mubr.f32.mxu0 %v26943_v4 }
 0x348   :  { %v24528_v1 = vpop.f32.mrb[22].mxu0 }
 0x349   :  { %v24532_v5 = vpop.f32.mrb[23].mxu0 }
 0x34a   :  { %17564 = vmatmul.mubr.msk.f32.gmra.mrb[14].mxu1 %vm6639_vm0, %v24486_v50  ;;  %17580 = vmatmul.mubr.msk.f32.gmra.mrb[38].mxu0 %vm6639_vm0, %v24486_v50 }
 0x34b   :  { %6841 = vmatprep.mubr.f32.mxu1 %v26943_v4  ;;  %7430 = vmatprep.mubr.f32.mxu0 %v26943_v4 }
 0x34e   :  { %17565 = vmatmul.mubr.msk.f32.vlgmr.msra.gmra.mrb[16].mxu1 %vm6639_vm0, %v24446_v25  ;;  %17605 = vmatmul.mubr.msk.f32.vlgmr.msra.gmra.mrb[24].mxu0 %vm6639_vm0, %v24428_v14 }
 0x34f   :  { %19547 = vmatpush1.bf16.msra.mxu1 %v22244_v6  ;;  %6847 = vmatprep.mubr.f32.mxu1 %v26943_v4 }
 0x350   :  { %7436 = vmatprep.mubr.f32.mxu0 %v26943_v4  ;;  %19549 = vmatprep.subr.bf16.mxu1 %v22245_v7 }
 0x351   :  { %19659 = vmatpush1.bf16.msra.mxu0 %v22300_v8  ;;  %v6467_v8 = vld [vmem:[%s22726_s21 + $0xa8] sm:$0xff] }
 0x352   :  { %17566 = vmatmul.mubr.msk.f32.gmra.mrb[18].mxu1 %vm6639_vm0, %v24444_v23  ;;  %17606 = vmatmul.mubr.msk.f32.gmra.mrb[26].mxu0 %vm6639_vm0, %v24426_v13 }
 0x353   :  { %6853 = vmatprep.mubr.f32.mxu1 %v26943_v4  ;;  %7442 = vmatprep.mubr.f32.mxu0 %v26943_v4 }
 0x354   :  { %19551 = vmatpush1.bf16.msra.mxu1 %v22246_v21  ;;  %19661 = vmatprep.subr.bf16.mxu0 %v22301_v22  ;;  %v22265_v21 = vcombine.high %v6471_v10, %v6475_v11  ;;  %v6449_v22 = vld [vmem:[%s22726_s21 + $0x18] sm:$0xff] }
 0x355   :  { %19553 = vmatprep.subr.bf16.mxu1 %v22247_v24  ;;  %19663 = vmatpush1.bf16.msra.mxu0 %v22302_v26  ;;  %v6453_v24 = vld [vmem:[%s22726_s21 + $0x38] sm:$0xff]  ;;  %v22266_v26 = vcombine.low %v6471_v10, %v6475_v11 }
 0x356   :  { %17567 = vmatmul.mubr.msk.f32.gmra.mrb[20].mxu1 %vm6639_vm0, %v24460_v33  ;;  %17607 = vmatmul.mubr.msk.f32.gmra.mrb[28].mxu0 %vm6639_vm0, %v24432_v16  ;;  %v22275_v27 = vcombine.high %v6449_v22, %v6453_v24  ;;  %v22276_v31 = vcombine.low %v6449_v22, %v6453_v24  ;;  %v17632_v11 = vld [vmem:[%s22726_s21 + $0x258] sm:$0xff] }
 0x357   :  { %6859 = vmatprep.mubr.f32.mxu1 %v26943_v4  ;;  %7448 = vmatprep.mubr.f32.mxu0 %v26943_v4  ;;  %v17640_v24 = vld [vmem:[%s22726_s21 + $0x298] sm:$0xff] }
 0x358   :  { %19555 = vmatpush1.bf16.msra.mxu1 %v22248_v32  ;;  %19665 = vmatprep.subr.bf16.mxu0 %v22303_v34  ;;  %v22277_v32 = vcombine.high %v6457_v28, %v6461_v29  ;;  %v6465_v34 = vld [vmem:[%s22726_s21 + $0x98] sm:$0xff] }
 0x359   :  { %19557 = vmatprep.subr.bf16.mxu1 %v22249_v35  ;;  %19667 = vmatpush1.bf16.msra.mxu0 %v22304_v36  ;;  %v6469_v35 = vld [vmem:[%s22726_s21 + $0xb8] sm:$0xff]  ;;  %v22278_v36 = vcombine.low %v6457_v28, %v6461_v29 }
 0x35a   :  { %17568 = vmatmul.mubr.msk.f32.gmra.mrb[22].mxu1 %vm6639_vm0, %v24458_v30  ;;  %17608 = vmatmul.mubr.msk.f32.gmra.mrb[30].mxu0 %vm6639_vm0, %v24430_v15  ;;  %v22279_v37 = vcombine.high %v6465_v34, %v6469_v35  ;;  %v22280_v41 = vcombine.low %v6465_v34, %v6469_v35  ;;  %v17648_v29 = vld [vmem:[%s22726_s21 + $0x2d8] sm:$0xff] }
 0x35b   :  { %6865 = vmatprep.mubr.f32.mxu1 %v26943_v4  ;;  %7454 = vmatprep.mubr.f32.mxu0 %v26943_v4 }
 0x35c   :  { %19559 = vmatpush1.bf16.msra.mxu1 %v22250_v42  ;;  %19669 = vmatprep.subr.bf16.mxu0 %v22305_v44  ;;  %v22281_v42 = vcombine.high %v6473_v38, %v6477_v39  ;;  %v17621_v44 = vld [vmem:[%s22726_s21 + $0x200] sm:$0xff] }
 0x35d   :  { %19671 = vmatpush1.bf16.msra.mxu0 %v22306_v45  ;;  %19561 = vmatprep.subr.bf16.mxu1 %v22251_v46  ;;  %v17625_v45 = vld [vmem:[%s22726_s21 + $0x220] sm:$0xff]  ;;  %v22282_v46 = vcombine.low %v6473_v38, %v6477_v39 }
 0x35e   :  { %17569 = vmatmul.mubr.msk.f32.gmra.mrb[24].mxu1 %vm6639_vm0, %v24474_v43  ;;  %17609 = vmatmul.mubr.msk.f32.gmra.mrb[32].mxu0 %vm6639_vm0, %v24436_v18  ;;  %v22283_v47 = vcombine.high %v17621_v44, %v17625_v45 }
 0x35f   :  { %6871 = vmatprep.mubr.f32.mxu1 %v26943_v4  ;;  %7460 = vmatprep.mubr.f32.mxu0 %v26943_v4 }
 0x362   :  { %17570 = vmatmul.mubr.msk.f32.gmra.mrb[26].mxu1 %vm6639_vm0, %v24472_v40  ;;  %17610 = vmatmul.mubr.msk.f32.gmra.mrb[34].mxu0 %vm6639_vm0, %v24434_v17 }
 0x363   :  { %6877 = vmatprep.mubr.f32.mxu1 %v26943_v4  ;;  %7466 = vmatprep.mubr.f32.mxu0 %v26943_v4 }
 0x366   :  { %17571 = vmatmul.mubr.msk.f32.gmra.mrb[28].mxu1 %vm6639_vm0, %v24488_v53  ;;  %17611 = vmatmul.mubr.msk.f32.gmra.mrb[36].mxu0 %vm6639_vm0, %v24440_v20 }
 0x367   :  { %6883 = vmatprep.mubr.f32.mxu1 %v26943_v4  ;;  %7472 = vmatprep.mubr.f32.mxu0 %v26943_v4 }
 0x36a   :  { %17572 = vmatmul.mubr.msk.f32.gmra.mrb[30].mxu1 %vm6639_vm0, %v24486_v50  ;;  %17612 = vmatmul.mubr.msk.f32.gmra.mrb[38].mxu0 %vm6639_vm0, %v24438_v19 }
 0x36b   :  { %7067 = vmatprep.mubr.f32.mxu1 %v26943_v4  ;;  %8003 = vmatprep.mubr.f32.mxu0 %v26943_v4 }
 0x36e   :  { %17581 = vmatmul.mubr.msk.f32.vlgmr.msra.gmra.mrb[32].mxu1 %vm6639_vm0, %v24446_v25  ;;  %17669 = vmatmul.mubr.msk.f32.vlgmr.msra.gmra.mrb[24].mxu0 %vm6639_vm0, %v24500_v60  ;;  %v6470_v25 = vld [vmem:[%s22726_s21 + $0xc0] sm:$0xff] }
 0x36f   :  { %19563 = vmatpush1.bf16.msra.mxu1 %v22252_v49  ;;  %7073 = vmatprep.mubr.f32.mxu1 %v26943_v4  ;;  %v22257_v2 = vcombine.high %v6470_v25, %v6474_v57  ;;  %v22258_v6 = vcombine.low %v6470_v25, %v6474_v57  ;;  %v17633_v49 = vld [vmem:[%s22726_s21 + $0x260] sm:$0xff] }
 0x370   :  { %8009 = vmatprep.mubr.f32.mxu0 %v26943_v4  ;;  %19565 = vmatprep.subr.bf16.mxu1 %v22253_v51  ;;  %v22284_v51 = vcombine.low %v17621_v44, %v17625_v45  ;;  %v22285_v52 = vcombine.high %v17629_v48, %v17633_v49  ;;  %v17645_v57 = vld [vmem:[%s22726_s21 + $0x2c0] sm:$0xff] }
 0x372   :  { %17582 = vmatmul.mubr.msk.f32.gmra.mrb[34].mxu1 %vm6639_vm0, %v24444_v23  ;;  %17670 = vmatmul.mubr.msk.f32.gmra.mrb[26].mxu0 %vm6639_vm0, %v24498_v59  ;;  %v6447_v23 = vld [vmem:[%s22726_s21 + $0x8] sm:$0xff] }
 0x373   :  { %7079 = vmatprep.mubr.f32.mxu1 %v26943_v4  ;;  %8015 = vmatprep.mubr.f32.mxu0 %v26943_v4  ;;  %v22259_v7 = vcombine.high %v6447_v23, %v6451_v3 }
 0x374   :  { %19567 = vmatpush1.bf16.msra.mxu1 %v22254_v55  ;;  %v17641_v55 = vld [vmem:[%s22726_s21 + $0x2a0] sm:$0xff] }
 0x375   :  { %19569 = vmatprep.subr.bf16.mxu1 %v22255_v56  ;;  %v22286_v56 = vcombine.low %v17629_v48, %v17633_v49  ;;  %v22287_v25 = vcombine.high %v17637_v54, %v17641_v55  ;;  %v18803_v48 = vld [vmem:[%s22736_s29 + $0x50] sm:$0xff]  }
 0x376   :  { %17583 = vmatmul.mubr.msk.f32.gmra.mrb[36].mxu1 %vm6639_vm0, %v24460_v33  ;;  %17671 = vmatmul.mubr.msk.f32.gmra.mrb[28].mxu0 %vm6639_vm0, %v24510_v62  ;;  %v6459_v33 = vld [vmem:[%s22726_s21 + $0x68] sm:$0xff] }
 0x377   :  { %7085 = vmatprep.mubr.f32.mxu1 %v26943_v4  ;;  %8021 = vmatprep.mubr.f32.mxu0 %v26943_v4 }
 0x378   :  { %19571 = vmatpush1.bf16.msra.mxu1 %v22256_v58  ;;  %v17649_v58 = vld [vmem:[%s22726_s21 + $0x2e0] sm:$0xff] }
 0x379   :  { %19573 = vmatprep.subr.bf16.mxu1 %v22257_v2  ;;  %v22288_v2 = vcombine.low %v17637_v54, %v17641_v55  ;;  %v18804_v54 = vld [vmem:[%s22736_s29 + $0x58] sm:$0xff]  }
 0x37a   :  { %17584 = vmatmul.mubr.msk.f32.gmra.mrb[38].mxu1 %vm6639_vm0, %v24458_v30  ;;  %17672 = vmatmul.mubr.msk.f32.gmra.mrb[30].mxu0 %vm6639_vm0, %v24508_v61  ;;  %v6455_v30 = vld [vmem:[%s22726_s21 + $0x48] sm:$0xff]  ;;  %v18796_v55 = vld [vmem:[%s22736_s29 + $0x18] sm:$0xff]  }
 0x37b   :  { %7091 = vmatprep.mubr.f32.mxu1 %v26943_v4  ;;  %8027 = vmatprep.mubr.f32.mxu0 %v26943_v4  ;;  %v22262_v9 = vcombine.low %v6455_v30, %v6459_v33 }
 0x37c   :  { %19575 = vmatpush1.bf16.msra.mxu1 %v22258_v6  ;;  %v17626_v6 = vld [vmem:[%s22726_s21 + $0x228] sm:$0xff] }
 0x37d   :  { %19577 = vmatprep.subr.bf16.mxu1 %v22259_v7 }
 0x37e   :  { %17585 = vmatmul.mubr.msk.f32.gmra.mrb[40].mxu1 %vm6639_vm0, %v24474_v43  ;;  %17673 = vmatmul.mubr.msk.f32.gmra.mrb[32].mxu0 %vm6639_vm0, %v24520_v0  ;;  %v22261_v43 = vcombine.high %v6455_v30, %v6459_v33  ;;  %v17638_v30 = vld [vmem:[%s22726_s21 + $0x288] sm:$0xff] }
 0x37f   :  { %7097 = vmatprep.mubr.f32.mxu1 %v26943_v4  ;;  %8033 = vmatprep.mubr.f32.mxu0 %v26943_v4 }
 0x382   :  { %17586 = vmatmul.mubr.msk.f32.gmra.mrb[42].mxu1 %vm6639_vm0, %v24472_v40  ;;  %17674 = vmatmul.mubr.msk.f32.gmra.mrb[34].mxu0 %vm6639_vm0, %v24518_v63  ;;  %v22260_v40 = vcombine.low %v6447_v23, %v6451_v3  ;;  %v22289_v23 = vcombine.high %v17645_v57, %v17649_v58  ;;  %v17622_v3 = vld [vmem:[%s22726_s21 + $0x208] sm:$0xff] }
 0x383   :  { %7103 = vmatprep.mubr.f32.mxu1 %v26943_v4  ;;  %8039 = vmatprep.mubr.f32.mxu0 %v26943_v4  ;;  %v22291_v7 = vcombine.high %v17622_v3, %v17626_v6 }
 0x386   :  { %17587 = vmatmul.mubr.msk.f32.gmra.mrb[44].mxu1 %vm6639_vm0, %v24488_v53  ;;  %17675 = vmatmul.mubr.msk.f32.gmra.mrb[36].mxu0 %vm6639_vm0, %v24532_v5  ;;  %v6463_v53 = vld [vmem:[%s22726_s21 + $0x88] sm:$0xff] }
 0x387   :  { %7109 = vmatprep.mubr.f32.mxu1 %v26943_v4  ;;  %8045 = vmatprep.mubr.f32.mxu0 %v26943_v4  ;;  %v22264_v12 = vcombine.low %v6463_v53, %v6467_v8 }
 0x38a   :  { %17588 = vmatmul.mubr.msk.f32.gmra.mrb[46].mxu1 %vm6639_vm0, %v24486_v50  ;;  %17676 = vmatmul.mubr.msk.f32.gmra.mrb[38].mxu0 %vm6639_vm0, %v24528_v1  ;;  %v22263_v50 = vcombine.high %v6463_v53, %v6467_v8  ;;  %v17624_v8 = vld [vmem:[%s22726_s21 + $0x218] sm:$0xff] }
 0x38b   :  { %7204 = vmatprep.mubr.f32.mxu1 %v26943_v4 }
 0x38e   :  { %17589 = vmatmul.mubr.msk.f32.vlgmr.msra.gmra.mrb[0].mxu1 %vm6639_vm0, %v24428_v14 }
 0x38f   :  { %19579 = vmatpush1.bf16.msra.mxu1 %v22260_v40  ;;  %7210 = vmatprep.mubr.f32.mxu1 %v26943_v4  ;;  %v17646_v40 = vld [vmem:[%s22726_s21 + $0x2c8] sm:$0xff] }
 0x390   :  { %19581 = vmatprep.subr.bf16.mxu1 %v22261_v43  ;;  %v17650_v43 = vld [vmem:[%s22726_s21 + $0x2e8] sm:$0xff] }
 0x391   :  { %v22297_v53 = vcombine.high %v17646_v40, %v17650_v43 }
 0x392   :  { %17590 = vmatmul.mubr.msk.f32.gmra.mrb[2].mxu1 %vm6639_vm0, %v24426_v13 }
 0x393   :  { %7216 = vmatprep.mubr.f32.mxu1 %v26943_v4  ;;  %19583 = vmatpush1.bf16.msra.mxu1 %v22262_v9  ;;  %v17628_v9 = vld [vmem:[%s22726_s21 + $0x238] sm:$0xff] }
 0x394   :  { %19585 = vmatprep.subr.bf16.mxu1 %v22263_v50  ;;  %v22298_v50 = vcombine.low %v17646_v40, %v17650_v43  ;;  %v22307_v10 = vcombine.high %v17624_v8, %v17628_v9 }
 0x396   :  { %17591 = vmatmul.mubr.msk.f32.gmra.mrb[4].mxu1 %vm6639_vm0, %v24432_v16 }
 0x397   :  { %7222 = vmatprep.mubr.f32.mxu1 %v26943_v4  ;;  %19587 = vmatpush1.bf16.msra.mxu1 %v22264_v12  ;;  %v17636_v12 = vld [vmem:[%s22726_s21 + $0x278] sm:$0xff] }
 0x398   :  { %19589 = vmatprep.subr.bf16.mxu1 %v22265_v21  ;;  %v22308_v21 = vcombine.low %v17624_v8, %v17628_v9  ;;  %v22309_v22 = vcombine.high %v17632_v11, %v17636_v12 }
 0x39a   :  { %17592 = vmatmul.mubr.msk.f32.gmra.mrb[6].mxu1 %vm6639_vm0, %v24430_v15 }
 0x39b   :  { %7228 = vmatprep.mubr.f32.mxu1 %v26943_v4  ;;  %19591 = vmatpush1.bf16.msra.mxu1 %v22266_v26  ;;  %v17644_v26 = vld [vmem:[%s22726_s21 + $0x2b8] sm:$0xff] }
 0x39c   :  { %19609 = vmatprep.subr.bf16.mxu1 %v22275_v27  ;;  %v22310_v27 = vcombine.low %v17632_v11, %v17636_v12  ;;  %v22311_v28 = vcombine.high %v17640_v24, %v17644_v26 }
 0x39e   :  { %17593 = vmatmul.mubr.msk.f32.gmra.mrb[8].mxu1 %vm6639_vm0, %v24436_v18 }
 0x39f   :  { %7234 = vmatprep.mubr.f32.mxu1 %v26943_v4 }
 0x3a2   :  { %17594 = vmatmul.mubr.msk.f32.gmra.mrb[10].mxu1 %vm6639_vm0, %v24434_v17 }
 0x3a3   :  { %7240 = vmatprep.mubr.f32.mxu1 %v26943_v4 }
 0x3a6   :  { %17595 = vmatmul.mubr.msk.f32.gmra.mrb[12].mxu1 %vm6639_vm0, %v24440_v20 }
 0x3a7   :  { %7246 = vmatprep.mubr.f32.mxu1 %v26943_v4 }
 0x3aa   :  { %17596 = vmatmul.mubr.msk.f32.gmra.mrb[14].mxu1 %vm6639_vm0, %v24438_v19 }
 0x3ab   :  { %7317 = vmatprep.mubr.f32.mxu1 %v26943_v4 }
 0x3ae   :  { %17597 = vmatmul.mubr.msk.f32.vlgmr.msra.gmra.mrb[16].mxu1 %vm6639_vm0, %v24428_v14 }
 0x3af   :  { %19611 = vmatpush1.bf16.msra.mxu1 %v22276_v31  ;;  %7323 = vmatprep.mubr.f32.mxu1 %v26943_v4  ;;  %v17652_v31 = vld [vmem:[%s22726_s21 + $0x2f8] sm:$0xff] }
 0x3b0   :  { %19613 = vmatprep.subr.bf16.mxu1 %v22277_v32  ;;  %v22312_v32 = vcombine.low %v17640_v24, %v17644_v26  ;;  %v22313_v34 = vcombine.high %v17648_v29, %v17652_v31  ;;  %v22314_v35 = vcombine.low %v17648_v29, %v17652_v31 }
 0x3b2   :  { %17598 = vmatmul.mubr.msk.f32.gmra.mrb[18].mxu1 %vm6639_vm0, %v24426_v13 }
 0x3b3   :  { %7329 = vmatprep.mubr.f32.mxu1 %v26943_v4  ;;  %19615 = vmatpush1.bf16.msra.mxu1 %v22278_v36 }
 0x3b4   :  { %19617 = vmatprep.subr.bf16.mxu1 %v22279_v37 }
 0x3b6   :  { %17599 = vmatmul.mubr.msk.f32.gmra.mrb[20].mxu1 %vm6639_vm0, %v24432_v16 }
 0x3b7   :  { %7335 = vmatprep.mubr.f32.mxu1 %v26943_v4  ;;  %19619 = vmatpush1.bf16.msra.mxu1 %v22280_v41 }
 0x3b8   :  { %19621 = vmatprep.subr.bf16.mxu1 %v22281_v42  ;;  %v17976_v42 = vld [vmem:[%s22736_s29] sm:$0xff]  }
 0x3ba   :  { %17600 = vmatmul.mubr.msk.f32.gmra.mrb[22].mxu1 %vm6639_vm0, %v24430_v15 }
 0x3bb   :  { %7341 = vmatprep.mubr.f32.mxu1 %v26943_v4  ;;  %19623 = vmatpush1.bf16.msra.mxu1 %v22282_v46  ;;  %v18794_v46 = vld [vmem:[%s22736_s29 + $0x8] sm:$0xff]  }
 0x3bc   :  { %19625 = vmatprep.subr.bf16.mxu1 %v22283_v47 }
 0x3be   :  { %17601 = vmatmul.mubr.msk.f32.gmra.mrb[24].mxu1 %vm6639_vm0, %v24436_v18 }
 0x3bf   :  { %7347 = vmatprep.mubr.f32.mxu1 %v26943_v4 }
 0x3c2   :  { %17602 = vmatmul.mubr.msk.f32.gmra.mrb[26].mxu1 %vm6639_vm0, %v24434_v17 }
 0x3c3   :  { %7353 = vmatprep.mubr.f32.mxu1 %v26943_v4 }
 0x3c6   :  { %17603 = vmatmul.mubr.msk.f32.gmra.mrb[28].mxu1 %vm6639_vm0, %v24440_v20 }
 0x3c7   :  { %7359 = vmatprep.mubr.f32.mxu1 %v26943_v4 }
 0x3ca   :  { %17604 = vmatmul.mubr.msk.f32.gmra.mrb[30].mxu1 %vm6639_vm0, %v24438_v19 }
 0x3cb   :  { %7543 = vmatprep.mubr.f32.mxu1 %v26943_v4 }
 0x3ce   :  { %17613 = vmatmul.mubr.msk.f32.vlgmr.msra.gmra.mrb[32].mxu1 %vm6639_vm0, %v24428_v14  ;;  %v22290_v14 = vcombine.low %v17645_v57, %v17649_v58  ;;  %v18806_v57 = vld [vmem:[%s22736_s29 + $0x68] sm:$0xff]  }
 0x3cf   :  { %19627 = vmatpush1.bf16.msra.mxu1 %v22284_v51  ;;  %7549 = vmatprep.mubr.f32.mxu1 %v26943_v4  ;;  %v18795_v51 = vld [vmem:[%s22736_s29 + $0x10] sm:$0xff]   ;;  %v18798_v58 = vld [vmem:[%s22736_s29 + $0x28] sm:$0xff]  }
 0x3d0   :  { %19629 = vmatprep.subr.bf16.mxu1 %v22285_v52 }
 0x3d2   :  { %17614 = vmatmul.mubr.msk.f32.gmra.mrb[34].mxu1 %vm6639_vm0, %v24426_v13  ;;  %v17630_v13 = vld [vmem:[%s22726_s21 + $0x248] sm:$0xff] }
 0x3d3   :  { %7555 = vmatprep.mubr.f32.mxu1 %v26943_v4  ;;  %19631 = vmatpush1.bf16.msra.mxu1 %v22286_v56  ;;  %v18805_v56 = vld [vmem:[%s22736_s29 + $0x60] sm:$0xff]  }
 0x3d4   :  { %19633 = vmatprep.subr.bf16.mxu1 %v22287_v25  ;;  %v18797_v25 = vld [vmem:[%s22736_s29 + $0x20] sm:$0xff]  }
 0x3d6   :  { %17615 = vmatmul.mubr.msk.f32.gmra.mrb[36].mxu1 %vm6639_vm0, %v24432_v16  ;;  %v22292_v16 = vcombine.low %v17622_v3, %v17626_v6  ;;  %v18808_v3 = vld [vmem:[%s22736_s29 + $0x78] sm:$0xff]  }
 0x3d7   :  { %7561 = vmatprep.mubr.f32.mxu1 %v26943_v4  ;;  %19635 = vmatpush1.bf16.msra.mxu1 %v22288_v2  ;;  %v18807_v2 = vld [vmem:[%s22736_s29 + $0x70] sm:$0xff]   ;;  %v18800_v6 = vld [vmem:[%s22736_s29 + $0x38] sm:$0xff]  }
 0x3d8   :  { %19637 = vmatprep.subr.bf16.mxu1 %v22289_v23  ;;  %v18799_v23 = vld [vmem:[%s22736_s29 + $0x30] sm:$0xff]  }
 0x3da   :  { %17616 = vmatmul.mubr.msk.f32.gmra.mrb[38].mxu1 %vm6639_vm0, %v24430_v15  ;;  %v17634_v15 = vld [vmem:[%s22726_s21 + $0x268] sm:$0xff] }
 0x3db   :  { %7567 = vmatprep.mubr.f32.mxu1 %v26943_v4  ;;  %19639 = vmatpush1.bf16.msra.mxu1 %v22290_v14  ;;  %v18817_v14 = vld [vmem:[%s22736_s29 + $0xc0] sm:$0xff]  }
 0x3dc   :  { %19641 = vmatprep.subr.bf16.mxu1 %v22291_v7  ;;  %v8231_v7 = vlaneseq }
 0x3de   :  { %17617 = vmatmul.mubr.msk.f32.gmra.mrb[40].mxu1 %vm6639_vm0, %v24436_v18  ;;  %v22293_v18 = vcombine.high %v17630_v13, %v17634_v15 }
 0x3df   :  { %7573 = vmatprep.mubr.f32.mxu1 %v26943_v4 }
 0x3e2   :  { %17618 = vmatmul.mubr.msk.f32.gmra.mrb[42].mxu1 %vm6639_vm0, %v24434_v17  ;;  %v17642_v17 = vld [vmem:[%s22726_s21 + $0x2a8] sm:$0xff]  ;;  %s22692_s21 = smov 64  }
 0x3e3   :  { %7579 = vmatprep.mubr.f32.mxu1 %v26943_v4  ;;  %v22295_v33 = vcombine.high %v17638_v30, %v17642_v17 }
 0x3e6   :  { %17619 = vmatmul.mubr.msk.f32.gmra.mrb[44].mxu1 %vm6639_vm0, %v24440_v20  ;;  %v22294_v20 = vcombine.low %v17630_v13, %v17634_v15  ;;  %v24879_v13 = vshrl.u32 %v8231_v7, 7 }
 0x3e7   :  { %7585 = vmatprep.mubr.f32.mxu1 %v26943_v4 }
 0x3e8   :  { %27035 = vst [vmem:[#allocation18_spill] sm:$0xff] %v24879_v13  ;;  %v8249_v15 = vsub.s32 4, %v24879_v13 }
 0x3ea   :  { %17620 = vmatmul.mubr.msk.f32.gmra.mrb[46].mxu1 %vm6639_vm0, %v24438_v19  ;;  %v22296_v19 = vcombine.low %v17638_v30, %v17642_v17 }
 0x3eb   :  { %7777 = vmatprep.mubr.f32.mxu1 %v26943_v4 }
 0x3ee   :  { %17653 = vmatmul.mubr.msk.f32.vlgmr.msra.gmra.mrb[0].mxu1 %vm6639_vm0, %v24500_v60 }
 0x3ef   :  { %19643 = vmatpush1.bf16.msra.mxu1 %v22292_v16  ;;  %7783 = vmatprep.mubr.f32.mxu1 %v26943_v4  ;;  %v24883_v16 = vld [vmem:[%s22731_s25] sm:$0xff] }
 0x3f0   :  { %19645 = vmatprep.subr.bf16.mxu1 %v22293_v18  ;;  %v8253_v18 = vsub.s32 5, %v24879_v13  ;;  %v24887_v30 = vrot.slane %v24883_v16, %v8249_v15 }
 0x3f2   :  { %17654 = vmatmul.mubr.msk.f32.gmra.mrb[2].mxu1 %vm6639_vm0, %v24498_v59  ;;  %v24890_v17 = vrot.slane %v24883_v16, %v8253_v18 }
 0x3f3   :  { %7789 = vmatprep.mubr.f32.mxu1 %v26943_v4  ;;  %19647 = vmatpush1.bf16.msra.mxu1 %v22294_v20 }
 0x3f4   :  { %19649 = vmatprep.subr.bf16.mxu1 %v22295_v33 }
 0x3f6   :  { %17655 = vmatmul.mubr.msk.f32.gmra.mrb[4].mxu1 %vm6639_vm0, %v24510_v62 }
 0x3f7   :  { %7795 = vmatprep.mubr.f32.mxu1 %v26943_v4  ;;  %19651 = vmatpush1.bf16.msra.mxu1 %v22296_v19 }
 0x3f8   :  { %19653 = vmatprep.subr.bf16.mxu1 %v22297_v53 }
 0x3fa   :  { %17656 = vmatmul.mubr.msk.f32.gmra.mrb[6].mxu1 %vm6639_vm0, %v24508_v61 }
 0x3fb   :  { %7801 = vmatprep.mubr.f32.mxu1 %v26943_v4  ;;  %19655 = vmatpush1.bf16.msra.mxu1 %v22298_v50  ;;  %v24900_v50 = vsub.s32 0, %v24879_v13 }
 0x3fc   :  { %19673 = vmatprep.subr.bf16.mxu1 %v22307_v10  ;;  %v24903_v10 = vsub.s32 1, %v24879_v13 }
 0x3fd   :  { %27036 = vst [vmem:[#allocation19_spill] sm:$0xff] %v24900_v50 }
 0x3fe   :  { %17657 = vmatmul.mubr.msk.f32.gmra.mrb[8].mxu1 %vm6639_vm0, %v24520_v0  ;;  %27037 = vst [vmem:[#allocation20_spill] sm:$0xff] %v24903_v10  ;;  %v24921_v29 = vrot.slane %v24883_v16, %v24903_v10 }
 0x3ff   :  { %7807 = vmatprep.mubr.f32.mxu1 %v26943_v4 }
 0x402   :  { %17658 = vmatmul.mubr.msk.f32.gmra.mrb[10].mxu1 %vm6639_vm0, %v24518_v63 }
 0x403   :  { %7813 = vmatprep.mubr.f32.mxu1 %v26943_v4 }
 0x406   :  { %17659 = vmatmul.mubr.msk.f32.gmra.mrb[12].mxu1 %vm6639_vm0, %v24532_v5 }
 0x407   :  { %7819 = vmatprep.mubr.f32.mxu1 %v26943_v4 }
 0x40a   :  { %17660 = vmatmul.mubr.msk.f32.gmra.mrb[14].mxu1 %vm6639_vm0, %v24528_v1 }
 0x40b   :  { %7890 = vmatprep.mubr.f32.mxu1 %v26943_v4 }
 0x40e   :  { %17661 = vmatmul.mubr.msk.f32.vlgmr.msra.gmra.mrb[16].mxu1 %vm6639_vm0, %v24500_v60 }
 0x40f   :  { %7896 = vmatprep.mubr.f32.mxu1 %v26943_v4  ;;  %19675 = vmatpush1.bf16.msra.mxu1 %v22308_v21 }
 0x410   :  { %19677 = vmatprep.subr.bf16.mxu1 %v22309_v22 }
 0x412   :  { %17662 = vmatmul.mubr.msk.f32.gmra.mrb[18].mxu1 %vm6639_vm0, %v24498_v59 }
 0x413   :  { %7902 = vmatprep.mubr.f32.mxu1 %v26943_v4  ;;  %19679 = vmatpush1.bf16.msra.mxu1 %v22310_v27 }
 0x414   :  { %19681 = vmatprep.subr.bf16.mxu1 %v22311_v28  ;;  %v24917_v28 = vrot.slane %v24883_v16, %v24900_v50 }
 0x416   :  { %17663 = vmatmul.mubr.msk.f32.gmra.mrb[20].mxu1 %vm6639_vm0, %v24510_v62 }
 0x417   :  { %7908 = vmatprep.mubr.f32.mxu1 %v26943_v4  ;;  %19683 = vmatpush1.bf16.msra.mxu1 %v22312_v32 }
 0x418   :  { %19685 = vmatprep.subr.bf16.mxu1 %v22313_v34 }
 0x41a   :  { %17664 = vmatmul.mubr.msk.f32.gmra.mrb[22].mxu1 %vm6639_vm0, %v24508_v61 }
 0x41b   :  { %7914 = vmatprep.mubr.f32.mxu1 %v26943_v4  ;;  %19687 = vmatpush1.bf16.msra.mxu1 %v22314_v35 }
 0x41e   :  { %17665 = vmatmul.mubr.msk.f32.gmra.mrb[24].mxu1 %vm6639_vm0, %v24520_v0 }
 0x41f   :  { %7920 = vmatprep.mubr.f32.mxu1 %v26943_v4 }
 0x422   :  { %17666 = vmatmul.mubr.msk.f32.gmra.mrb[26].mxu1 %vm6639_vm0, %v24518_v63 }
 0x423   :  { %7926 = vmatprep.mubr.f32.mxu1 %v26943_v4 }
 0x426   :  { %17667 = vmatmul.mubr.msk.f32.gmra.mrb[28].mxu1 %vm6639_vm0, %v24532_v5 }
 0x427   :  { %7932 = vmatprep.mubr.f32.mxu1 %v26943_v4 }
 0x42a   :  { %17668 = vmatmul.mubr.msk.f32.gmra.mrb[30].mxu1 %vm6639_vm0, %v24528_v1 }
 0x42b   :  { %8116 = vmatprep.mubr.f32.mxu1 %v26943_v4 }
 0x42e   :  { %17677 = vmatmul.mubr.msk.f32.vlgmr.msra.gmra.mrb[32].mxu1 %vm6639_vm0, %v24500_v60 }
 0x42f   :  { %8122 = vmatprep.mubr.f32.mxu1 %v26943_v4 }
 0x432   :  { %17678 = vmatmul.mubr.msk.f32.gmra.mrb[34].mxu1 %vm6639_vm0, %v24498_v59 }
 0x433   :  { %8128 = vmatprep.mubr.f32.mxu1 %v26943_v4 }
 0x436   :  { %17679 = vmatmul.mubr.msk.f32.gmra.mrb[36].mxu1 %vm6639_vm0, %v24510_v62 }
 0x437   :  { %8134 = vmatprep.mubr.f32.mxu1 %v26943_v4 }
 0x43a   :  { %17680 = vmatmul.mubr.msk.f32.gmra.mrb[38].mxu1 %vm6639_vm0, %v24508_v61 }
 0x43b   :  { %8140 = vmatprep.mubr.f32.mxu1 %v26943_v4 }
 0x43e   :  { %17681 = vmatmul.mubr.msk.f32.gmra.mrb[40].mxu1 %vm6639_vm0, %v24520_v0 }
 0x43f   :  { %8146 = vmatprep.mubr.f32.mxu1 %v26943_v4 }
 0x441   :  { %v24828_v60 = vpop.f32.mrb[24].mxu0 }
 0x442   :  { %v24830_v59 = vpop.f32.mrb[25].mxu0  ;;  %17682 = vmatmul.mubr.msk.f32.gmra.mrb[42].mxu1 %vm6639_vm0, %v24518_v63  ;;  %v8275_v43 = vadd.f32 %v24887_v30, %v24828_v60 }
 0x443   :  { %8152 = vmatprep.mubr.f32.mxu1 %v26943_v4  ;;  %v8276_v53 = vadd.f32 %v24890_v17, %v24830_v59 }
 0x444   :  { %v24907_v21 = vmax.f32 %v8275_v43, 0.0 }
 0x445   :  { %v8011_v62 = vpop.f32.mrb[26].mxu0  ;;  %v24911_v24 = vmax.f32 %v8276_v53, 0.0 }
 0x446   :  { %v8013_v61 = vpop.f32.mrb[27].mxu0  ;;  %17683 = vmatmul.mubr.msk.f32.gmra.mrb[44].mxu1 %vm6639_vm0, %v24532_v5  ;;  %v18801_v5 = vld [vmem:[%s22736_s29 + $0x40] sm:$0xff]   ;;  %v8283_v40 = vadd.f32 %v24887_v30, %v8011_v62  ;;  %v8525_v60 = vmul.f32 %v24907_v21, %v24907_v21 }
 0x447   :  { %8158 = vmatprep.mubr.f32.mxu1 %v26943_v4  ;;  %19689 = vmatprep.subr.bf16.mxu0 %v18801_v5  ;;  %v8284_v19 = vadd.f32 %v24890_v17, %v8013_v61  ;;  %v8526_v61 = vmul.f32 %v24911_v24, %v24911_v24 }
 0x448   :  { %19691 = vmatpush3.bf16.msra.mxu0 %v17976_v42  ;;  %v24905_v12 = vmax.f32 %v8283_v40, 0.0 }
 0x449   :  { %v24838_v0 = vpop.f32.mrb[28].mxu0  ;;  %v24909_v22 = vmax.f32 %v8284_v19, 0.0 }
 0x44a   :  { %v8019_v36 = vpop.f32.mrb[29].mxu0  ;;  %17684 = vmatmul.mubr.msk.f32.gmra.mrb[46].mxu1 %vm6639_vm0, %v24528_v1  ;;  %v18802_v1 = vld [vmem:[%s22736_s29 + $0x48] sm:$0xff]   ;;  %v8533_v32 = vmul.f32 %v24905_v12, %v24905_v12 }
 0x44b   :  { %19693 = vmatprep.subr.bf16.mxu0 %v18802_v1  ;;  %v8292_v9 = vadd.f32 %v24890_v17, %v8019_v36  ;;  %v8534_v59 = vmul.f32 %v24909_v22, %v24909_v22  ;;  %v24938_v36 = vadd.f32 %v24905_v12, %v24907_v21  ;;  %v24945_v42 = vadd.f32 %v24909_v22, %v24911_v24 }
 0x44c   :  { %19695 = vmatpush3.bf16.msra.mxu0 %v18794_v46 }
 0x44d   :  { %v24842_v37 = vpop.f32.mrb[30].mxu0  ;;  %19697 = vmatprep.subr.bf16.mxu0 %v18803_v48  ;;  %v24913_v27 = vmax.f32 %v8292_v9, 0.0 }
 0x44e   :  { %v24844_v63 = vpop.f32.mrb[31].mxu0 }
 0x44f   :  { %27038 = vst [vmem:[#allocation21_spill] sm:$0xff] %v24913_v27  ;;  %v8300_v34 = vadd.f32 %v24890_v17, %v24844_v63  ;;  %v8291_v63 = vadd.f32 %v24887_v30, %v24838_v0  ;;  %v8542_v1 = vmul.f32 %v24913_v27, %v24913_v27 }
 0x450   :  { %19699 = vmatpush3.bf16.msra.mxu0 %v18795_v51 }
 0x451   :  { %v24846_v38 = vpop.f32.mrb[32].mxu0  ;;  %19701 = vmatprep.subr.bf16.mxu0 %v18804_v54  ;;  %v24951_v54 = vadd.f32 %v8533_v32, %v8525_v60 }
 0x452   :  { %v24848_v39 = vpop.f32.mrb[33].mxu0 }
 0x453   :  { %v8308_v35 = vadd.f32 %v24890_v17, %v24848_v39 }
 0x454   :  { %19703 = vmatpush3.bf16.msra.mxu0 %v18796_v55  ;;  %v24953_v55 = vmax.f32 %v8300_v34, 0.0 }
 0x455   :  { %v24851_v41 = vpop.f32.mrb[34].mxu0  ;;  %19705 = vmatprep.subr.bf16.mxu0 %v18805_v56  ;;  %v24955_v0 = vmax.f32 %v8308_v35, 0.0 }
 0x456   :  { %v24854_v44 = vpop.f32.mrb[35].mxu0  ;;  %27039 = vst [vmem:[#allocation22_spill] sm:$0xff] %v24953_v55  ;;  %v24981_v40 = vmul.f32 %v24953_v55, %v24953_v55 }
 0x457   :  { %27040 = vst [vmem:[#allocation23_spill] sm:$0xff] %v24955_v0 }
 0x458   :  { %19707 = vmatpush3.bf16.msra.mxu0 %v18797_v25  ;;  %v8655_v25 = vadd.f32 %v8534_v59, %v8526_v61 }
 0x459   :  { %v24857_v45 = vpop.f32.mrb[36].mxu0  ;;  %19709 = vmatprep.subr.bf16.mxu0 %v18806_v57  ;;  %v8316_v57 = vadd.f32 %v24890_v17, %v24854_v44 }
 0x45a   :  { %v24860_v47 = vpop.f32.mrb[37].mxu0  ;;  %v24972_v15 = vadd.f32 %v8655_v25, %v8542_v1 }
 0x45b   :  { %v24990_v53 = vmax.f32 %v8316_v57, 0.0 }
 0x45c   :  { %19711 = vmatpush3.bf16.msra.mxu0 %v18798_v58 }
 0x45d   :  { %v24863_v49 = vpop.f32.mrb[38].mxu0  ;;  %19713 = vmatprep.subr.bf16.mxu0 %v18807_v2  ;;  %27042 = vst [vmem:[#allocation25_spill] sm:$0xff] %v24990_v53 }
 0x45e   :  { %v24866_v52 = vpop.f32.mrb[39].mxu0 }
 0x460   :  { %19715 = vmatpush3.bf16.msra.mxu0 %v18799_v23  ;;  %v24963_v23 = vmax.f32 %v8291_v63, 0.0 }
 0x461   :  { %19717 = vmatprep.subr.bf16.mxu0 %v18808_v3  ;;  %v24967_v3 = vadd.f32 %v24887_v30, %v24842_v37  ;;  %v24985_v37 = vmul.f32 %v24955_v0, %v24955_v0 }
 0x462   :  { %27041 = vst [vmem:[#allocation24_spill] sm:$0xff] %v24963_v23 }
 0x464   :  { %19719 = vmatpush3.bf16.msra.mxu0 %v18800_v6 }
 0x465   :  { %19721 = vmatprep.subr.bf16.mxu0 %v18817_v14 }
 0x4c1   :  { %v7779_v20 = vpop.f32.mrb[0].mxu1 }
 0x4c2   :  { %v7781_v33 = vpop.f32.mrb[1].mxu1  ;;  %v8271_v46 = vadd.f32 %v24917_v28, %v7779_v20 }
 0x4c3   :  { %v8272_v48 = vadd.f32 %v24921_v29, %v7781_v33 }
 0x4c4   :  { %v24974_v18 = vmax.f32 %v8271_v46, 0.0 }
 0x4c5   :  { %v7785_v8 = vpop.f32.mrb[2].mxu1  ;;  %v24976_v44 = vmax.f32 %v8272_v48, 0.0 }
 0x4c6   :  { %v7787_v11 = vpop.f32.mrb[3].mxu1  ;;  %v8279_v62 = vadd.f32 %v24917_v28, %v7785_v8  ;;  %v8521_v60 = vmul.f32 %v24974_v18, %v24974_v18 }
 0x4c7   :  { %v8280_v39 = vadd.f32 %v24921_v29, %v7787_v11  ;;  %v8522_v59 = vmul.f32 %v24976_v44, %v24976_v44 }
 0x4c8   :  { %v24960_v58 = vmax.f32 %v8279_v62, 0.0 }
 0x4c9   :  { %v7791_v26 = vpop.f32.mrb[4].mxu1  ;;  %v24969_v6 = vmax.f32 %v8280_v39, 0.0 }
 0x4ca   :  { %v7793_v31 = vpop.f32.mrb[5].mxu1  ;;  %v8287_v56 = vadd.f32 %v24917_v28, %v7791_v26  ;;  %v8529_v8 = vmul.f32 %v24960_v58, %v24960_v58  ;;  %v24999_v26 = vadd.f32 %v24890_v17, %v24860_v47 }
 0x4cb   :  { %v8288_v2 = vadd.f32 %v24921_v29, %v7793_v31  ;;  %v25003_v31 = vadd.f32 %v24890_v17, %v24866_v52  ;;  %v8530_v32 = vmul.f32 %v24969_v6, %v24969_v6  ;;  %v8399_v52 = vadd.f32 %v24960_v58, %v24974_v18 }
 0x4cc   :  { %v24987_v43 = vmax.f32 %v8287_v56, 0.0  ;;  %v8414_v1 = vadd.f32 %v24969_v6, %v24976_v44 }
 0x4cd   :  { %v7797_v5 = vpop.f32.mrb[6].mxu1  ;;  %v24994_v9 = vmax.f32 %v8288_v2, 0.0 }
 0x4ce   :  { %v7799_v51 = vpop.f32.mrb[7].mxu1  ;;  %v8295_v14 = vadd.f32 %v24917_v28, %v7797_v5  ;;  %v8537_v17 = vmul.f32 %v24987_v43, %v24987_v43  ;;  %v8585_v5 = vadd.f32 %v8529_v8, %v8521_v60  ;;  %v8400_v56 = vadd.f32 %v8399_v52, %v24987_v43 }
 0x4cf   :  { %v8296_v20 = vadd.f32 %v24921_v29, %v7799_v51  ;;  %v8538_v46 = vmul.f32 %v24994_v9, %v24994_v9  ;;  %v8599_v51 = vadd.f32 %v8530_v32, %v8522_v59 }
 0x4d0   :  { %v25007_v34 = vmax.f32 %v8295_v14, 0.0  ;;  %v8415_v14 = vadd.f32 %v8414_v1, %v24994_v9  ;;  %v8586_v8 = vadd.f32 %v8585_v5, %v8537_v17 }
 0x4d1   :  { %v7803_v7 = vpop.f32.mrb[8].mxu1  ;;  %v25013_v62 = vmax.f32 %v8296_v20, 0.0  ;;  %v8600_v60 = vadd.f32 %v8599_v51, %v8538_v46 }
 0x4d2   :  { %v7805_v33 = vpop.f32.mrb[9].mxu1  ;;  %v8303_v19 = vadd.f32 %v24917_v28, %v7803_v7  ;;  %27043 = vst [vmem:[#allocation26_spill] sm:$0xff] %v25007_v34  ;;  %v8545_v25 = vmul.f32 %v25007_v34, %v25007_v34 }
 0x4d3   :  { %v8304_v11 = vadd.f32 %v24921_v29, %v7805_v33  ;;  %27044 = vst [vmem:[#allocation27_spill] sm:$0xff] %v25013_v62  ;;  %v8546_v7 = vmul.f32 %v25013_v62, %v25013_v62  ;;  %v8416_v59 = vadd.f32 %v8415_v14, %v25013_v62 }
 0x4d4   :  { %v25020_v63 = vmax.f32 %v8303_v19, 0.0  ;;  %v8587_v52 = vadd.f32 %v8586_v8, %v8545_v25 }
 0x4d5   :  { %v7809_v35 = vpop.f32.mrb[10].mxu1  ;;  %v25027_v48 = vmax.f32 %v8304_v11, 0.0  ;;  %v8401_v11 = vadd.f32 %v8400_v56, %v25007_v34  ;;  %v8601_v56 = vadd.f32 %v8600_v60, %v8546_v7 }
 0x4d6   :  { %v8311_v47 = vadd.f32 %v24917_v28, %v7809_v35  ;;  %v7811_v61 = vpop.f32.mrb[11].mxu1  ;;  %27045 = vst [vmem:[#allocation28_spill] sm:$0xff] %v25020_v63  ;;  %v8553_v32 = vmul.f32 %v25020_v63, %v25020_v63 }
 0x4d7   :  { %v8312_v39 = vadd.f32 %v24921_v29, %v7811_v61  ;;  %27046 = vst [vmem:[#allocation29_spill] sm:$0xff] %v25027_v48 }
 0x4d8   :  { %v25032_v57 = vmax.f32 %v8311_v47, 0.0  ;;  %v8554_v47 = vmul.f32 %v25027_v48, %v25027_v48 }
 0x4d9   :  { %v7815_v2 = vpop.f32.mrb[12].mxu1  ;;  %v25037_v20 = vmax.f32 %v8312_v39, 0.0  ;;  %v8402_v39 = vadd.f32 %v8401_v11, %v25020_v63 }
 0x4da   :  { %27047 = vst [vmem:[#allocation30_spill] sm:$0xff] %v25032_v57  ;;  %v8319_v33 = vadd.f32 %v24917_v28, %v7815_v2  ;;  %v7817_v19 = vpop.f32.mrb[13].mxu1  ;;  %v8561_v17 = vmul.f32 %v25032_v57, %v25032_v57  ;;  %v8417_v2 = vadd.f32 %v8416_v59, %v25027_v48  ;;  %v8602_v11 = vadd.f32 %v8601_v56, %v8554_v47 }
 0x4db   :  { %27048 = vst [vmem:[#allocation31_spill] sm:$0xff] %v25037_v20  ;;  %v8320_v35 = vadd.f32 %v24921_v29, %v7817_v19  ;;  %v8562_v46 = vmul.f32 %v25037_v20, %v25037_v20  ;;  %v8403_v25 = vadd.f32 %v8402_v39, %v25032_v57 }
 0x4dc   :  { %v25047_v61 = vmax.f32 %v8319_v33, 0.0  ;;  %v8588_v33 = vadd.f32 %v8587_v52, %v8553_v32  ;;  %v25071_v52 = vsub.s32 3, %v24879_v13 }
 0x4dd   :  { %v25052_v5 = vmax.f32 %v8320_v35, 0.0  ;;  %v7821_v1 = vpop.f32.mrb[14].mxu1  ;;  %v8418_v35 = vadd.f32 %v8417_v2, %v25037_v20  ;;  %v8603_v39 = vadd.f32 %v8602_v11, %v8562_v46 }
 0x4de   :  { %27049 = vst [vmem:[#allocation32_spill] sm:$0xff] %v25047_v61  ;;  %v8327_v51 = vadd.f32 %v24917_v28, %v7821_v1  ;;  %v7823_v14 = vpop.f32.mrb[15].mxu1  ;;  %v8569_v19 = vmul.f32 %v25047_v61, %v25047_v61  ;;  %v8589_v59 = vadd.f32 %v8588_v33, %v8561_v17  ;;  %v8404_v28 = vadd.f32 %v8403_v25, %v25047_v61 }
 0x4df   :  { %27050 = vst [vmem:[#allocation33_spill] sm:$0xff] %v25052_v5  ;;  %v8328_v8 = vadd.f32 %v24921_v29, %v7823_v14  ;;  %v8570_v7 = vmul.f32 %v25052_v5, %v25052_v5  ;;  %27053 = vst [vmem:[#allocation36_spill] sm:$0xff] %v25071_v52  ;;  %v8419_v29 = vadd.f32 %v8418_v35, %v25052_v5  ;;  %v25083_v25 = vmax.f32 %v25003_v31, 0.0 }
 0x4e0   :  { %v25065_v60 = vmax.f32 %v8327_v51, 0.0  ;;  %v8590_v51 = vadd.f32 %v8589_v59, %v8569_v19  ;;  %v25087_v35 = vmax.f32 %v24999_v26, 0.0  ;;  %v25093_v31 = vsub.s32 2, %v24879_v13 }
 0x4e1   :  { %v25068_v1 = vmax.f32 %v8328_v8, 0.0  ;;  %v7892_v32 = vpop.f32.mrb[16].mxu1  ;;  %27054 = vst [vmem:[#allocation37_spill] sm:$0xff] %v25083_v25  ;;  %v8604_v46 = vadd.f32 %v8603_v39, %v8570_v7  ;;  %v8657_v39 = vadd.f32 %v24972_v15, %v24981_v40  ;;  %v8566_v26 = vmul.f32 %v24990_v53, %v24990_v53 }
 0x4e2   :  { %27051 = vst [vmem:[#allocation34_spill] sm:$0xff] %v25065_v60  ;;  %v8406_v47 = vsel %vm8405_vm1, %v25065_v60, 0.0  ;;  %v8577_v56 = vmul.f32 %v25065_v60, %v25065_v60  ;;  %v7894_v2 = vpop.f32.mrb[17].mxu1  ;;  %27055 = vst [vmem:[#allocation38_spill] sm:$0xff] %v25087_v35  ;;  %v8574_v15 = vmul.f32 %v25087_v35, %v25087_v35 }
 0x4e3   :  { %27052 = vst [vmem:[#allocation35_spill] sm:$0xff] %v25068_v1  ;;  %v8407_v17 = vadd.f32 %v8406_v47, %v8404_v28  ;;  %v8420_v14 = vsel %vm8405_vm1, %v25068_v1, 0.0  ;;  %v8578_v33 = vmul.f32 %v25068_v1, %v25068_v1  ;;  %v8471_v28 = vadd.f32 %v24945_v42, %v24913_v27  ;;  %27056 = vst [vmem:[#allocation39_spill] sm:$0xff] %v25093_v31 }
 0x4e4   :  { %v8591_v8 = vsel %vm8405_vm1, %v8577_v56, 0.0  ;;  %v8421_v11 = vadd.f32 %v8420_v14, %v8419_v29  ;;  %v8582_v14 = vmul.f32 %v25083_v25, %v25083_v25 }
 0x4e5   :  { %v8408_v4 = vrot.slane %v8407_v17, 4  ;;  %v8592_v10 = vadd.f32 %v8591_v8, %v8590_v51  ;;  %v8605_v19 = vsel %vm8405_vm1, %v8578_v33, 0.0  ;;  %v7898_v59 = vpop.f32.mrb[18].mxu1  ;;  %v8472_v51 = vadd.f32 %v8471_v28, %v24953_v55 }
 0x4e6   :  { %v8422_v47 = vrot.slane %v8421_v11, 4  ;;  %v8606_v1 = vadd.f32 %v8605_v19, %v8604_v46  ;;  %v7900_v7 = vpop.f32.mrb[19].mxu1  ;;  %v25104_v33 = vrot.slane %v24883_v16, %v25071_v52  ;;  %v8658_v46 = vadd.f32 %v8657_v39, %v24985_v37 }
 0x4e7   :  { %v8409_v29 = vadd.f32 %v8408_v4, %v8407_v17  ;;  %v8593_v56 = vrot.slane %v8592_v10, 4  ;;  %v25111_v4 = vmul.f32 %v24963_v23, %v24963_v23  ;;  %v25118_v52 = vmax.f32 %v24967_v3, 0.0 }
 0x4e8   :  { %v8423_v42 = vadd.f32 %v8422_v47, %v8421_v11  ;;  %v8607_v8 = vrot.slane %v8606_v1, 4  ;;  %v25115_v11 = vrot.slane %v24883_v16, %v25093_v31  ;;  %v8473_v37 = vadd.f32 %v8472_v51, %v24955_v0 }
 0x4e9   :  { %v8594_v40 = vadd.f32 %v8593_v56, %v8592_v10  ;;  %v7904_v19 = vpop.f32.mrb[20].mxu1  ;;  %v8410_v17 = vrot.slane %v8409_v29, 2  ;;  %27057 = vst [vmem:[#allocation40_spill] sm:$0xff] %v25118_v52  ;;  %v8659_v39 = vadd.f32 %v8658_v46, %v8566_v26  ;;  %v8661_v56 = vsel %vm8405_vm1, %v8582_v14, 0.0 }
 0x4ea   :  { %v7906_v28 = vpop.f32.mrb[21].mxu1  ;;  %v8424_v47 = vrot.slane %v8423_v42, 2  ;;  %v8274_v60 = vadd.f32 %v25104_v33, %v7894_v2  ;;  %v8281_v5 = vadd.f32 %v25115_v11, %v7898_v59  ;;  %v8282_v61 = vadd.f32 %v25104_v33, %v7900_v7 }
 0x4eb   :  { %v8595_v10 = vrot.slane %v8594_v40, 2  ;;  %v8660_v20 = vadd.f32 %v8659_v39, %v8574_v15  ;;  %v8608_v48 = vadd.f32 %v8607_v8, %v8606_v1  ;;  %v25127_v3 = vadd.f32 %v24887_v30, %v24846_v38 }
 0x4ec   :  { %v8425_v57 = vadd.f32 %v8424_v47, %v8423_v42  ;;  %v8474_v26 = vadd.f32 %v8473_v37, %v24990_v53  ;;  %v8411_v51 = vadd.f32 %v8410_v17, %v8409_v29  ;;  %v8273_v14 = vadd.f32 %v25115_v11, %v7892_v32 }
 0x4ed   :  { %v7910_v31 = vpop.f32.mrb[22].mxu1  ;;  %v8596_v63 = vadd.f32 %v8595_v10, %v8594_v40  ;;  %v8476_v2 = vsel %vm8405_vm1, %v25083_v25, 0.0  ;;  %v25133_v59 = vadd.f32 %v8661_v56, %v8660_v20  ;;  %v8290_v7 = vadd.f32 %v25104_v33, %v7906_v28 }
 0x4ee   :  { %v7912_v46 = vpop.f32.mrb[23].mxu1  ;;  %v8609_v1 = vrot.slane %v8608_v48, 2  ;;  %v8475_v42 = vadd.f32 %v8474_v26, %v25087_v35  ;;  %v25137_v15 = vmax.f32 %v8274_v60, 0.0  ;;  %v25139_v38 = vmax.f32 %v8281_v5, 0.0 }
 0x4ef   :  { %v25141_v40 = vmax.f32 %v8282_v61, 0.0  ;;  %v8298_v32 = vadd.f32 %v25104_v33, %v7912_v46  ;;  %v8426_v8 = vrot.slane %v8425_v57, 1  ;;  %v8597_v47 = vrot.slane %v8596_v63, 1 }
 0x4f0   :  { %v8610_v17 = vadd.f32 %v8609_v1, %v8608_v48  ;;  %v25144_v37 = vadd.f32 %v8476_v2, %v8475_v42  ;;  %v25146_v20 = vmax.f32 %v8273_v14, 0.0  ;;  %v8289_v28 = vadd.f32 %v25115_v11, %v7904_v19 }
 0x4f1   :  { %v7916_v29 = vpop.f32.mrb[24].mxu1  ;;  %v8412_v10 = vrot.slane %v8411_v51, 1  ;;  %v25150_v5 = vmax.f32 %v8290_v7, 0.0  ;;  %v8524_v26 = vmul.f32 %v25137_v15, %v25137_v15  ;;  %v8297_v14 = vadd.f32 %v25115_v11, %v7910_v31 }
 0x4f2   :  { %v7918_v39 = vpop.f32.mrb[25].mxu1  ;;  %v8611_v56 = vrot.slane %v8610_v17, 1  ;;  %v8428_v48 = vadd.f32 %v25139_v38, %v25146_v20  ;;  %v8598_v46 = vadd.f32 %v8597_v47, %v8596_v63  ;;  %v8532_v19 = vmul.f32 %v25141_v40, %v25141_v40 }
 0x4f3   :  { %27058 = vst [vmem:[#allocation41_spill] sm:$0xff] %v25150_v5  ;;  %v8306_v61 = vadd.f32 %v25104_v33, %v7918_v39  ;;  %v25160_v2 = vmax.f32 %v8298_v32, 0.0  ;;  %v8427_v1 = vadd.f32 %v8426_v8, %v8425_v57  ;;  %v8531_v39 = vmul.f32 %v25139_v38, %v25139_v38  ;;  %v18809_v8 = vld [vmem:[%s22736_s29 + $0x80] sm:$0xff]  }
 0x4f4   :  { %v8612_v42 = vadd.f32 %v8611_v56, %v8610_v17  ;;  %v25164_v60 = vmax.f32 %v8289_v28, 0.0  ;;  %v8305_v25 = vadd.f32 %v25115_v11, %v7916_v29  ;;  %v8413_v31 = vadd.f32 %v8412_v10, %v8411_v51  ;;  %v18818_v29 = vld [vmem:[%s22736_s29 + $0xc8] sm:$0xff]  }
 0x4f5   :  { %27059 = vst [vmem:[#allocation42_spill] sm:$0xff] %v25160_v2  ;;  %v7922_v7 = vpop.f32.mrb[26].mxu1  ;;  %v8540_v63 = vmul.f32 %v25150_v5, %v25150_v5  ;;  %v25169_v47 = vmax.f32 %v8306_v61, 0.0  ;;  %v8442_v17 = vadd.f32 %v25141_v40, %v25137_v15  ;;  %v25176_v56 = vmax.f32 %v8297_v14, 0.0 }
 0x4f6   :  { %27060 = vst [vmem:[#allocation43_spill] sm:$0xff] %v25164_v60  ;;  %v7924_v35 = vpop.f32.mrb[27].mxu1  ;;  %v8706_v32 = vsel %vm8704_vm2, %v8427_v1, %v8612_v42  ;;  %v8313_v28 = vadd.f32 %v25115_v11, %v7922_v7  ;;  %v8705_v51 = vsel %vm8704_vm2, %v8413_v31, %v8598_v46  ;;  %v8523_v10 = vmul.f32 %v25146_v20, %v25146_v20 }
 0x4f7   :  { %27061 = vst [vmem:[#allocation44_spill] sm:$0xff] %v25169_v47  ;;  %v8314_v57 = vadd.f32 %v25104_v33, %v7924_v35  ;;  %27062 = vst [vmem:[#allocation45_spill] sm:$0xff] %v25176_v56  ;;  %9028 = vmatprep.mubr.f32.mxu0 %v8706_v32  ;;  %v8627_v61 = vadd.f32 %v8532_v19, %v8524_v26  ;;  %v8548_v35 = vmul.f32 %v25160_v2, %v25160_v2 }
 0x4f8   :  { %9029 = vmatmul.mubr.f32.vlgmr.msra.gmra.mrb[40].mxu0 %v8705_v51  ;;  %v8429_v14 = vadd.f32 %v8428_v48, %v25164_v60  ;;  %v8443_v7 = vadd.f32 %v8442_v17, %v25150_v5  ;;  %v25189_v32 = vmax.f32 %v8305_v25, 0.0  ;;  %v8539_v26 = vmul.f32 %v25164_v60, %v25164_v60  ;;  %v18810_v48 = vld [vmem:[%s22736_s29 + $0x88] sm:$0xff]  }
 0x4f9   :  { %v25185_v1 = vmax.f32 %v8314_v57, 0.0  ;;  %v7928_v42 = vpop.f32.mrb[28].mxu1  ;;  %19723 = vmatpush3.bf16.msra.mxu0 %v18809_v8  ;;  %v8628_v19 = vadd.f32 %v8627_v61, %v8540_v63  ;;  %v8556_v57 = vmul.f32 %v25169_v47, %v25169_v47  ;;  %v8613_v53 = vadd.f32 %v8531_v39, %v8523_v10 }
 0x4fa   :  { %27064 = vst [vmem:[#allocation47_spill] sm:$0xff] %v25189_v32  ;;  %v8321_v46 = vadd.f32 %v25115_v11, %v7928_v42  ;;  %v7930_v31 = vpop.f32.mrb[29].mxu1  ;;  %19725 = vmatprep.subr.bf16.mxu0 %v18818_v29  ;;  %v8430_v17 = vadd.f32 %v8429_v14, %v25176_v56  ;;  %v8444_v25 = vadd.f32 %v8443_v7, %v25160_v2  ;;  %v25200_v8 = vmax.f32 %v8313_v28, 0.0  ;;  %v18819_v42 = vld [vmem:[%s22736_s29 + $0xd0] sm:$0xff]  }
 0x4fb   :  { %27063 = vst [vmem:[#allocation46_spill] sm:$0xff] %v25185_v1  ;;  %v8322_v51 = vadd.f32 %v25104_v33, %v7930_v31  ;;  %v8547_v0 = vmul.f32 %v25176_v56, %v25176_v56  ;;  %v8629_v63 = vadd.f32 %v8628_v19, %v8548_v35  ;;  %v8564_v61 = vmul.f32 %v25185_v1, %v25185_v1  ;;  %v18811_v2 = vld [vmem:[%s22736_s29 + $0x90] sm:$0xff]  }
 0x4fc   :  { %27065 = vst [vmem:[#allocation48_spill] sm:$0xff] %v25200_v8  ;;  %v8431_v39 = vadd.f32 %v8430_v17, %v25189_v32  ;;  %v8445_v10 = vadd.f32 %v8444_v25, %v25169_v47  ;;  %v25211_v14 = vmax.f32 %v8321_v46, 0.0  ;;  %v8614_v55 = vadd.f32 %v8613_v53, %v8539_v26  ;;  %v18824_v47 = vld [vmem:[%s22736_s29 + $0xf8] sm:$0xff]  }
 0x4fd   :  { %v25207_v29 = vmax.f32 %v8322_v51, 0.0  ;;  %v7934_v31 = vpop.f32.mrb[30].mxu1  ;;  %19727 = vmatpush3.bf16.msra.mxu0 %v18810_v48  ;;  %v8555_v35 = vmul.f32 %v25189_v32, %v25189_v32  ;;  %v8630_v19 = vadd.f32 %v8629_v63, %v8556_v57  ;;  %v8563_v53 = vmul.f32 %v25200_v8, %v25200_v8 }
 0x4fe   :  { %27067 = vst [vmem:[#allocation50_spill] sm:$0xff] %v25211_v14  ;;  %v8329_v28 = vadd.f32 %v25115_v11, %v7934_v31  ;;  %v7936_v7 = vpop.f32.mrb[31].mxu1  ;;  %19729 = vmatprep.subr.bf16.mxu0 %v18819_v42  ;;  %v8432_v17 = vadd.f32 %v8431_v39, %v25200_v8  ;;  %v8446_v56 = vadd.f32 %v8445_v10, %v25185_v1  ;;  %v18820_v11 = vld [vmem:[%s22736_s29 + $0xd8] sm:$0xff]  }
 0x4ff   :  { %27066 = vst [vmem:[#allocation49_spill] sm:$0xff] %v25207_v29  ;;  %v8330_v51 = vadd.f32 %v25104_v33, %v7936_v7  ;;  %v8572_v46 = vmul.f32 %v25207_v29, %v25207_v29  ;;  %v8615_v25 = vadd.f32 %v8614_v55, %v8547_v0  ;;  %v8631_v26 = vadd.f32 %v8630_v19, %v8564_v61 }
 0x500   :  { %v25222_v48 = vmax.f32 %v8329_v28, 0.0  ;;  %v8433_v42 = vadd.f32 %v8432_v17, %v25211_v14  ;;  %v8447_v63 = vadd.f32 %v8446_v56, %v25207_v29  ;;  %v8571_v61 = vmul.f32 %v25211_v14, %v25211_v14  ;;  %v18812_v56 = vld [vmem:[%s22736_s29 + $0x98] sm:$0xff]  }
 0x501   :  { %v25227_v57 = vmax.f32 %v8330_v51, 0.0  ;;  %v25229_v33 = vpop.f32.mrb[32].mxu1  ;;  %19731 = vmatpush3.bf16.msra.mxu0 %v18811_v2  ;;  %v8616_v39 = vadd.f32 %v8615_v25, %v8555_v35  ;;  %v8478_v7 = vrot.slane %v25144_v37, 4  ;;  %v8632_v19 = vadd.f32 %v8631_v26, %v8572_v46 }
 0x502   :  { %27068 = vst [vmem:[#allocation51_spill] sm:$0xff] %v25222_v48  ;;  %v8434_v31 = vsel %vm8405_vm1, %v25222_v48, 0.0  ;;  %v8579_v55 = vmul.f32 %v25222_v48, %v25222_v48  ;;  %v8120_v0 = vpop.f32.mrb[33].mxu1  ;;  %19733 = vmatprep.subr.bf16.mxu0 %v18820_v11  ;;  %v18821_v48 = vld [vmem:[%s22736_s29 + $0xe0] sm:$0xff]   ;;  %v8261_v25 = vsub.s32 7, %v24879_v13  ;;  %v27070_v14 = vrot.slane %v25133_v59, 4 }
 0x503   :  { %27069 = vst [vmem:[#allocation52_spill] sm:$0xff] %v25227_v57  ;;  %v8448_v10 = vsel %vm8405_vm1, %v25227_v57, 0.0  ;;  %v8580_v28 = vmul.f32 %v25227_v57, %v25227_v57  ;;  %v8435_v51 = vadd.f32 %v8434_v31, %v8433_v42  ;;  %v8617_v2 = vadd.f32 %v8616_v39, %v8563_v53 }
 0x504   :  { %v8449_v17 = vadd.f32 %v8448_v10, %v8447_v63  ;;  %v8664_v57 = vadd.f32 %v27070_v14, %v25133_v59  ;;  %v8315_v11 = vadd.f32 %v24887_v30, %v24851_v41  ;;  %v8619_v46 = vsel %vm8405_vm1, %v8579_v55, 0.0  ;;  %v18813_v14 = vld [vmem:[%s22736_s29 + $0xa0] sm:$0xff]  }
 0x505   :  { %v8633_v35 = vsel %vm8405_vm1, %v8580_v28, 0.0  ;;  %v25248_v29 = vpop.f32.mrb[34].mxu1  ;;  %19735 = vmatpush3.bf16.msra.mxu0 %v18812_v56  ;;  %v8457_v63 = vadd.f32 %v24938_v36, %v24963_v23  ;;  %v8549_v31 = vmul.f32 %v25118_v52, %v25118_v52  ;;  %v25261_v39 = vmax.f32 %v25127_v3, 0.0  ;;  %v18822_v56 = vld [vmem:[%s22736_s29 + $0xe8] sm:$0xff]  }
 0x506   :  { %v8450_v26 = vrot.slane %v8449_v17, 4  ;;  %v8634_v42 = vadd.f32 %v8633_v35, %v8632_v19  ;;  %v8126_v53 = vpop.f32.mrb[35].mxu1  ;;  %v8618_v59 = vadd.f32 %v8617_v2, %v8571_v61  ;;  %19737 = vmatprep.subr.bf16.mxu0 %v18821_v48  ;;  %v8479_v41 = vadd.f32 %v8478_v7, %v25144_v37 }
 0x507   :  { %27071 = vst [vmem:[#allocation53_spill] sm:$0xff] %v25261_v39  ;;  %v8436_v10 = vrot.slane %v8435_v51, 4  ;;  %v8642_v19 = vadd.f32 %v24951_v54, %v25111_v4  ;;  %v25269_v35 = vrot.slane %v24883_v16, %v8261_v25  ;;  %v8665_v3 = vrot.slane %v8664_v57, 2  ;;  %v18814_v16 = vld [vmem:[%s22736_s29 + $0xa8] sm:$0xff]  }
 0x508   :  { %v8451_v55 = vadd.f32 %v8450_v26, %v8449_v17  ;;  %v8635_v28 = vrot.slane %v8634_v42, 4  ;;  %v8620_v36 = vadd.f32 %v8619_v46, %v8618_v59  ;;  %v8458_v48 = vadd.f32 %v8457_v63, %v25118_v52  ;;  %v18823_v26 = vld [vmem:[%s22736_s29 + $0xf0] sm:$0xff]  }
 0x509   :  { %v25271_v1 = vpop.f32.mrb[36].mxu1  ;;  %v25274_v61 = vmax.f32 %v8315_v11, 0.0  ;;  %v8323_v37 = vadd.f32 %v24887_v30, %v24857_v45  ;;  %19739 = vmatpush3.bf16.msra.mxu0 %v18813_v14  ;;  %v8643_v17 = vadd.f32 %v8642_v19, %v8549_v31  ;;  %v8557_v54 = vmul.f32 %v25261_v39, %v25261_v39 }
 0x50a   :  { %v8132_v7 = vpop.f32.mrb[37].mxu1  ;;  %19741 = vmatprep.subr.bf16.mxu0 %v18822_v56  ;;  %v8452_v4 = vrot.slane %v8451_v55, 2  ;;  %v8636_v2 = vadd.f32 %v8635_v28, %v8634_v42  ;;  %v8331_v25 = vadd.f32 %v24887_v30, %v24863_v49  ;;  %v8437_v46 = vadd.f32 %v8436_v10, %v8435_v51  ;;  %v18815_v10 = vld [vmem:[%s22736_s29 + $0xb0] sm:$0xff]  }
 0x50b   :  { %27072 = vst [vmem:[#allocation54_spill] sm:$0xff] %v25274_v61  ;;  %v8286_v11 = vadd.f32 %v25269_v35, %v8126_v53  ;;  %v8480_v63 = vrot.slane %v8479_v41, 2  ;;  %v8621_v45 = vrot.slane %v8620_v36, 4  ;;  %v8278_v59 = vadd.f32 %v25269_v35, %v8120_v0 }
 0x50c   :  { %v8637_v14 = vrot.slane %v8636_v2, 2  ;;  %v8666_v56 = vadd.f32 %v8665_v3, %v8664_v57  ;;  %v8565_v42 = vmul.f32 %v25274_v61, %v25274_v61  ;;  %v25290_v28 = vmax.f32 %v8323_v37, 0.0 }
 0x50d   :  { %v25286_v31 = vpop.f32.mrb[38].mxu1  ;;  %v8294_v49 = vadd.f32 %v25269_v35, %v8132_v7  ;;  %19743 = vmatpush3.bf16.msra.mxu0 %v18814_v16  ;;  %v8459_v51 = vadd.f32 %v8458_v48, %v25261_v39  ;;  %v8644_v53 = vadd.f32 %v8643_v17, %v8557_v54  ;;  %v8453_v19 = vadd.f32 %v8452_v4, %v8451_v55 }
 0x50e   :  { %v8138_v30 = vpop.f32.mrb[39].mxu1  ;;  %19745 = vmatprep.subr.bf16.mxu0 %v18823_v26  ;;  %v25296_v8 = vmax.f32 %v8331_v25, 0.0  ;;  %v8438_v57 = vrot.slane %v8437_v46, 2  ;;  %v25298_v3 = vmax.f32 %v8286_v11, 0.0  ;;  %v25301_v37 = vadd.f32 %v8480_v63, %v8479_v41  ;;  %v18816_v11 = vld [vmem:[%s22736_s29 + $0xb8] sm:$0xff]  }
 0x50f   :  { %v8302_v0 = vadd.f32 %v25269_v35, %v8138_v30  ;;  %v8622_v7 = vadd.f32 %v8621_v45, %v8620_v36  ;;  %v25303_v16 = vmax.f32 %v8278_v59, 0.0  ;;  %v8638_v48 = vadd.f32 %v8637_v14, %v8636_v2  ;;  %v18833_v14 = vld [vmem:[%s22736_s29 + $0x140] sm:$0xff]  }
 0x510   :  { %v8667_v17 = vrot.slane %v8666_v56, 1  ;;  %v25308_v54 = vadd.f32 %v8459_v51, %v25274_v61  ;;  %v25310_v55 = vadd.f32 %v8644_v53, %v8565_v42  ;;  %v25314_v4 = vmul.f32 %v25290_v28, %v25290_v28 }
 0x511   :  { %v25305_v32 = vpop.f32.mrb[40].mxu1  ;;  %v25316_v41 = vmax.f32 %v8294_v49, 0.0  ;;  %19747 = vmatpush3.bf16.msra.mxu0 %v18815_v10  ;;  %v25318_v25 = vmax.f32 %v8302_v0, 0.0  ;;  %v8454_v26 = vrot.slane %v8453_v19, 1  ;;  %v8581_v63 = vmul.f32 %v25296_v8, %v25296_v8 }
 0x512   :  { %v8144_v36 = vpop.f32.mrb[41].mxu1  ;;  %19749 = vmatprep.subr.bf16.mxu0 %v18824_v47  ;;  %v8536_v45 = vmul.f32 %v25298_v3, %v25298_v3  ;;  %v8639_v59 = vrot.slane %v8638_v48, 1  ;;  %v8439_v42 = vadd.f32 %v8438_v57, %v8437_v46  ;;  %v8528_v49 = vmul.f32 %v25303_v16, %v25303_v16 }
 0x513   :  { %v8310_v2 = vadd.f32 %v25269_v35, %v8144_v36  ;;  %v8623_v51 = vrot.slane %v8622_v7, 2  ;;  %v8482_v47 = vrot.slane %v25301_v37, 1  ;;  %v8668_v53 = vadd.f32 %v8667_v17, %v8666_v56 }
 0x514   :  { %v8499_v0 = vsel %vm8498_vm3, %v25303_v16, 0.0  ;;  %v8500_v10 = vsel %vm8498_vm3, %v25298_v3, 0.0  ;;  %v8544_v36 = vmul.f32 %v25316_v41, %v25316_v41  ;;  %v8552_v57 = vmul.f32 %v25318_v25, %v25318_v25 }
 0x515   :  { %v25329_v30 = vpop.f32.mrb[42].mxu1  ;;  %v25338_v61 = vmax.f32 %v8310_v2, 0.0  ;;  %19751 = vmatpush3.bf16.msra.mxu0 %v18816_v11  ;;  %v8455_v39 = vadd.f32 %v8454_v26, %v8453_v19  ;;  %v8640_v52 = vadd.f32 %v8639_v59, %v8638_v48  ;;  %v8684_v17 = vsel %vm8498_vm3, %v8536_v45, 0.0 }
 0x516   :  { %v8150_v46 = vpop.f32.mrb[43].mxu1  ;;  %19753 = vmatprep.subr.bf16.mxu0 %v18833_v14  ;;  %v8502_v62 = vsel %vm8498_vm3, %v25316_v41, 0.0  ;;  %v8440_v34 = vrot.slane %v8439_v42, 1  ;;  %v8624_v27 = vadd.f32 %v8623_v51, %v8622_v7  ;;  %v8683_v2 = vsel %vm8498_vm3, %v8528_v49, 0.0 }
 0x517   :  { %v8318_v56 = vadd.f32 %v25269_v35, %v8150_v46  ;;  %v8501_v23 = vadd.f32 %v8500_v10, %v8499_v0  ;;  %v8708_v11 = vsel %vm8704_vm2, %v8455_v39, %v8640_v52  ;;  %v8686_v19 = vsel %vm8498_vm3, %v8544_v36, 0.0 }
 0x518   :  { %v8504_v48 = vsel %vm8498_vm3, %v25318_v25, 0.0  ;;  %v8560_v26 = vmul.f32 %v25338_v61, %v25338_v61  ;;  %9098 = vmatprep.mubr.f32.mxu0 %v8708_v11  ;;  %v8625_v7 = vrot.slane %v8624_v27, 1  ;;  %v8685_v59 = vadd.f32 %v8684_v17, %v8683_v2 }
 0x519   :  { %v25348_v5 = vmax.f32 %v8318_v56, 0.0  ;;  %v25350_v60 = vpop.f32.mrb[44].mxu1  ;;  %v8503_v14 = vadd.f32 %v8502_v62, %v8501_v23  ;;  %v8688_v52 = vsel %vm8498_vm3, %v8552_v57, 0.0  ;;  %v8506_v49 = vsel %vm8498_vm3, %v25338_v61, 0.0  ;;  %v18825_v56 = vld [vmem:[%s22736_s29 + $0x100] sm:$0xff]  }
 0x51a   :  { %v8156_v45 = vpop.f32.mrb[45].mxu1  ;;  %v8441_v0 = vadd.f32 %v8440_v34, %v8439_v42  ;;  %v8626_v10 = vadd.f32 %v8625_v7, %v8624_v27  ;;  %v8687_v36 = vadd.f32 %v8686_v19, %v8685_v59  ;;  %v8483_v11 = vadd.f32 %v8482_v47, %v25301_v37  ;;  %v18834_v34 = vld [vmem:[%s22736_s29 + $0x148] sm:$0xff]  }
 0x51b   :  { %v8326_v39 = vadd.f32 %v25269_v35, %v8156_v45  ;;  %v8568_v51 = vmul.f32 %v25348_v5, %v25348_v5  ;;  %v8505_v46 = vadd.f32 %v8504_v48, %v8503_v14  ;;  %v8647_v62 = vsel %vm8405_vm1, %v8581_v63, 0.0 }
 0x51c   :  { %v8690_v57 = vsel %vm8498_vm3, %v8560_v26, 0.0  ;;  %v8508_v2 = vsel %vm8498_vm3, %v25348_v5, 0.0  ;;  %v8707_v45 = vsel %vm8704_vm2, %v8441_v0, %v8626_v10  ;;  %v8689_v42 = vadd.f32 %v8688_v52, %v8687_v36  ;;  %v18826_v52 = vld [vmem:[%s22736_s29 + $0x108] sm:$0xff]  }
 0x51d   :  { %v25365_v17 = vmax.f32 %v8326_v39, 0.0  ;;  %v25367_v23 = vpop.f32.mrb[46].mxu1  ;;  %v8507_v19 = vadd.f32 %v8506_v49, %v8505_v46  ;;  %9099 = vmatmul.mubr.f32.vlgmr.msra.gmra.mrb[42].mxu0 %v8707_v45  ;;  %v8710_v37 = vsel %vm8704_vm2, %v8483_v11, %v8668_v53  ;;  %v8646_v63 = vadd.f32 %v25310_v55, %v25314_v4  ;;  %v18835_v49 = vld [vmem:[%s22736_s29 + $0x150] sm:$0xff]  }
 0x51e   :  { %v8162_v27 = vpop.f32.mrb[47].mxu1  ;;  %v8692_v48 = vsel %vm8498_vm3, %v8568_v51, 0.0  ;;  %19755 = vmatpush3.bf16.msra.mxu0 %v18825_v56  ;;  %9168 = vmatprep.mubr.f32.mxu0 %v8710_v37  ;;  %v8462_v59 = vsel %vm8405_vm1, %v25296_v8, 0.0  ;;  %v8691_v53 = vadd.f32 %v8690_v57, %v8689_v42  ;;  %v8461_v55 = vadd.f32 %v25308_v54, %v25290_v28  ;;  %v18827_v11 = vld [vmem:[%s22736_s29 + $0x110] sm:$0xff]  }
 0x51f   :  { %v8576_v47 = vmul.f32 %v25365_v17, %v25365_v17  ;;  %v8510_v26 = vsel %vm8498_vm3, %v25365_v17, 0.0  ;;  %v8334_v7 = vadd.f32 %v25269_v35, %v8162_v27  ;;  %v8509_v14 = vadd.f32 %v8508_v2, %v8507_v19  ;;  %19757 = vmatprep.subr.bf16.mxu0 %v18834_v34  ;;  %v18836_v2 = vld [vmem:[%s22736_s29 + $0x158] sm:$0xff]  }
 0x520   :  { %v8648_v4 = vadd.f32 %v8647_v62, %v8646_v63  ;;  %v8693_v35 = vadd.f32 %v8692_v48, %v8691_v53  ;;  %v8463_v10 = vadd.f32 %v8462_v59, %v8461_v55  ;;  %v18828_v19 = vld [vmem:[%s22736_s29 + $0x118] sm:$0xff]   ;;  %v18838_v53 = vld [vmem:[%s22736_s29 + $0x168] sm:$0xff]  }
 0x521   :  { %v8694_v39 = vsel %vm8498_vm3, %v8576_v47, 0.0  ;;  %v25391_v51 = vmax.f32 %v8334_v7, 0.0  ;;  %v8511_v0 = vadd.f32 %v8510_v26, %v8509_v14  ;;  %v18837_v47 = vld [vmem:[%s22736_s29 + $0x160] sm:$0xff]  }
 0x522   :  { %19759 = vmatpush3.bf16.msra.mxu0 %v18826_v52  ;;  %v8695_v54 = vadd.f32 %v8694_v39, %v8693_v35  ;;  %v8649_v62 = vrot.slane %v8648_v4, 4  ;;  %v8464_v27 = vrot.slane %v8463_v10, 4  ;;  %v18829_v7 = vld [vmem:[%s22736_s29 + $0x120] sm:$0xff]   ;;  %v18830_v39 = vld [vmem:[%s22736_s29 + $0x128] sm:$0xff]  }
 0x523   :  { %v8513_v36 = vsel %vm8512_vm4, %v25391_v51, 0.0  ;;  %v8584_v46 = vmul.f32 %v25391_v51, %v25391_v51  ;;  %19761 = vmatprep.subr.bf16.mxu0 %v18835_v49  ;;  %v18839_v49 = vld [vmem:[%s22736_s29 + $0x170] sm:$0xff]  }
 0x524   :  { %v8514_v56 = vadd.f32 %v8513_v36, %v8511_v0  ;;  %v8650_v37 = vadd.f32 %v8649_v62, %v8648_v4  ;;  %v8465_v26 = vadd.f32 %v8464_v27, %v8463_v10  ;;  %v18831_v36 = vld [vmem:[%s22736_s29 + $0x130] sm:$0xff]   ;;  %v8257_v27 = vsub.s32 6, %v24879_v13 }
 0x525   :  { %v8696_v57 = vsel %vm8512_vm4, %v8584_v46, 0.0 }
 0x526   :  { %v8515_v45 = vrot.slane %v8514_v56, 4  ;;  %v8697_v34 = vadd.f32 %v8696_v57, %v8695_v54  ;;  %19763 = vmatpush3.bf16.msra.mxu0 %v18827_v11  ;;  %v8651_v14 = vrot.slane %v8650_v37, 2  ;;  %v8466_v55 = vrot.slane %v8465_v26, 2  ;;  %v18840_v54 = vld [vmem:[%s22736_s29 + $0x178] sm:$0xff]  }
 0x527   :  { %19765 = vmatprep.subr.bf16.mxu0 %v18836_v2  ;;  %v18832_v57 = vld [vmem:[%s22736_s29 + $0x138] sm:$0xff]  }
 0x528   :  { %v8698_v42 = vrot.slane %v8697_v34, 4  ;;  %v8516_v63 = vadd.f32 %v8515_v45, %v8514_v56  ;;  %v8652_v35 = vadd.f32 %v8651_v14, %v8650_v37  ;;  %v8467_v10 = vadd.f32 %v8466_v55, %v8465_v26  ;;  %v18841_v37 = vld [vmem:[%s22736_s29 + $0x180] sm:$0xff]  }
 0x52a   :  { %v8699_v48 = vadd.f32 %v8698_v42, %v8697_v34  ;;  %19767 = vmatpush3.bf16.msra.mxu0 %v18828_v19  ;;  %v8517_v52 = vrot.slane %v8516_v63, 2  ;;  %v8653_v56 = vrot.slane %v8652_v35, 1  ;;  %v8468_v62 = vrot.slane %v8467_v10, 1 }
 0x52b   :  { %19769 = vmatprep.subr.bf16.mxu0 %v18837_v47  ;;  %v26983_v19 = vmov 0.0|0.0  }
 0x52c   :  { %v8700_v59 = vrot.slane %v8699_v48, 2  ;;  %v8518_v0 = vadd.f32 %v8517_v52, %v8516_v63  ;;  %v8654_v45 = vadd.f32 %v8653_v56, %v8652_v35  ;;  %v8469_v42 = vadd.f32 %v8468_v62, %v8467_v10  ;;  %v18843_v52 = vld [vmem:[%s22736_s29 + $0x190] sm:$0xff]  }
 0x52e   :  { %19771 = vmatpush3.bf16.msra.mxu0 %v18829_v7  ;;  %v8701_v4 = vadd.f32 %v8700_v59, %v8699_v48  ;;  %v8519_v11 = vrot.slane %v8518_v0, 1  ;;  %v8709_v63 = vsel %vm8704_vm2, %v8469_v42, %v8654_v45  ;;  %v22477_v48 = vld [vmem:[%s22731_s25] sm:$0xff]  ;;  %v18842_v7 = vld [vmem:[%s22736_s29 + $0x188] sm:$0xff]  }
 0x52f   :  { %19773 = vmatprep.subr.bf16.mxu0 %v18838_v53  ;;  %v8258_v26 = vrot.slane %v22477_v48, %v8257_v27  ;;  %v18846_v45 = vld [vmem:[%s22736_s29 + $0x1a8] sm:$0xff]  }
 0x530   :  { %v8702_v46 = vrot.slane %v8701_v4, 1  ;;  %v8520_v34 = vadd.f32 %v8519_v11, %v8518_v0 }
 0x531   :  { %v8285_v59 = vadd.f32 %v8258_v26, %v25248_v29  ;;  %v8277_v53 = vadd.f32 %v8258_v26, %v25229_v33  ;;  %v8293_v14 = vadd.f32 %v8258_v26, %v25271_v1  ;;  %v8309_v35 = vadd.f32 %v8258_v26, %v25305_v32  ;;  %v18844_v29 = vld [vmem:[%s22736_s29 + $0x198] sm:$0xff]  }
 0x532   :  { %19775 = vmatpush3.bf16.msra.mxu0 %v18830_v39  ;;  %v8703_v2 = vadd.f32 %v8702_v46, %v8701_v4  ;;  %v8301_v39 = vadd.f32 %v8258_v26, %v25286_v31  ;;  %v8317_v0 = vadd.f32 %v8258_v26, %v25329_v30  ;;  %v8333_v31 = vadd.f32 %v8258_v26, %v25367_v23 }
 0x533   :  { %19777 = vmatprep.subr.bf16.mxu0 %v18839_v49  ;;  %v25423_v55 = vmax.f32 %v8285_v59, 0.0  ;;  %v25426_v4 = vmax.f32 %v8277_v53, 0.0  ;;  %v25428_v49 = vmax.f32 %v8293_v14, 0.0  ;;  %v25443_v32 = vmax.f32 %v8309_v35, 0.0  ;;  %v18848_v35 = vld [vmem:[%s22736_s29 + $0x1b8] sm:$0xff]  }
 0x534   :  { %v8712_v47 = vsel %vm8704_vm2, %v8520_v34, %v8703_v2  ;;  %v25435_v33 = vmax.f32 %v8301_v39, 0.0  ;;  %v8325_v46 = vadd.f32 %v8258_v26, %v25350_v60  ;;  %v25450_v23 = vmax.f32 %v8317_v0, 0.0  ;;  %v18847_v26 = vld [vmem:[%s22736_s29 + $0x1b0] sm:$0xff]  }
 0x535   :  { %v8535_v1 = vmul.f32 %v25423_v55, %v25423_v55  ;;  %v8527_v10 = vmul.f32 %v25426_v4, %v25426_v4  ;;  %v25452_v11 = vmax.f32 %v8333_v31, 0.0  ;;  %v8484_v62 = vadd.f32 %v25423_v55, %v25426_v4  ;;  %v18849_v31 = vld [vmem:[%s22736_s29 + $0x1c0] sm:$0xff]  }
 0x536   :  { %19779 = vmatpush3.bf16.msra.mxu0 %v18831_v36  ;;  %v8543_v36 = vmul.f32 %v25428_v49, %v25428_v49  ;;  %v8551_v30 = vmul.f32 %v25435_v33, %v25435_v33  ;;  %v8559_v60 = vmul.f32 %v25443_v32, %v25443_v32  ;;  %v25458_v2 = vmax.f32 %v8325_v46, 0.0  ;;  %v18850_v46 = vld [vmem:[%s22736_s29 + $0x1c8] sm:$0xff]  }
 0x537   :  { %19781 = vmatprep.subr.bf16.mxu0 %v18840_v54  ;;  %v18845_v54 = vld [vmem:[%s22736_s29 + $0x1a0] sm:$0xff]   ;;  %v8669_v56 = vadd.f32 %v8535_v1, %v8527_v10  ;;  %27073 = vst [vmem:[#allocation55_spill] sm:$0xff] %v25452_v11  ;;  %v8485_v34 = vadd.f32 %v8484_v62, %v25428_v49  ;;  %v8567_v42 = vmul.f32 %v25450_v23, %v25450_v23  ;;  %v8490_v39 = vsel %vm8405_vm1, %v25452_v11, 0.0 }
 0x538   :  { %v8575_v48 = vmul.f32 %v25458_v2, %v25458_v2 }
 0x53a   :  { %19783 = vmatpush3.bf16.msra.mxu0 %v18832_v57  ;;  %v8670_v57 = vadd.f32 %v8669_v56, %v8543_v36 }
 0x53b   :  { %19784 = vmatprep.subr.bf16.mxu0 %v26983_v19 }
 0x53c   :  { %v8671_v27 = vadd.f32 %v8670_v57, %v8551_v30  ;;  %v18851_v30 = vld [vmem:[%s22736_s29 + $0x1d0] sm:$0xff]  }
 0x53d   :  { %9169 = vmatmul.mubr.f32.vlgmr.msra.gmra.mrb[44].mxu0 %v8709_v63 }
 0x53e   :  { %19786 = vmatpush1.bf16.msra.mxu0 %v18841_v37  ;;  %17685 = vmatprep.mubr.msk.f32.mxu0 %vm8498_vm3, %v8712_v47  ;;  %v8583_v37 = vmul.f32 %v25452_v11, %v25452_v11  ;;  %v8486_v47 = vadd.f32 %v8485_v34, %v25435_v33  ;;  %v8672_v63 = vadd.f32 %v8671_v27, %v8559_v60  ;;  %v18852_v60 = vld [vmem:[%s22736_s29 + $0x1d8] sm:$0xff]   ;;  %v18853_v27 = vld [vmem:[%s22736_s29 + $0x1e0] sm:$0xff]  }
 0x53f   :  { %19787 = vmatprep.subr.bf16.mxu0 %v26983_v19  ;;  %v27116_v11 = vld [vmem:[#allocation37_spill] sm:$0xff] }
 0x540   :  { %v8673_v59 = vadd.f32 %v8672_v63, %v8567_v42  ;;  %v8675_v53 = vsel %vm8405_vm1, %v8583_v37, 0.0 }
 0x542   :  { %19789 = vmatpush1.bf16.msra.mxu0 %v18842_v7  ;;  %v8487_v7 = vadd.f32 %v8486_v47, %v25443_v32  ;;  %v18854_v47 = vld [vmem:[%s22736_s29 + $0x1e8] sm:$0xff]  }
 0x543   :  { %19790 = vmatprep.subr.bf16.mxu0 %v26983_v19 }
 0x544   :  { %v8488_v14 = vadd.f32 %v8487_v7, %v25450_v23 }
 0x546   :  { %19792 = vmatpush1.bf16.msra.mxu0 %v18843_v52  ;;  %v8674_v52 = vadd.f32 %v8673_v59, %v8575_v48 }
 0x547   :  { %19793 = vmatprep.subr.bf16.mxu0 %v26983_v19 }
 0x548   :  { %v8676_v1 = vadd.f32 %v8675_v53, %v8674_v52 }
 0x54a   :  { %19795 = vmatpush1.bf16.msra.mxu0 %v18844_v29  ;;  %v8489_v29 = vadd.f32 %v8488_v14, %v25458_v2  ;;  %v8677_v10 = vrot.slane %v8676_v1, 4 }
 0x54b   :  { %19796 = vmatprep.subr.bf16.mxu0 %v26983_v19 }
 0x54c   :  { %v8491_v0 = vadd.f32 %v8490_v39, %v8489_v29 }
 0x54e   :  { %19798 = vmatpush1.bf16.msra.mxu0 %v18845_v54  ;;  %v8492_v36 = vrot.slane %v8491_v0, 4  ;;  %v8678_v54 = vadd.f32 %v8677_v10, %v8676_v1 }
 0x54f   :  { %19799 = vmatprep.subr.bf16.mxu0 %v26983_v19 }
 0x550   :  { %v8493_v56 = vadd.f32 %v8492_v36, %v8491_v0  ;;  %v8679_v62 = vrot.slane %v8678_v54, 2 }
 0x552   :  { %19801 = vmatpush1.bf16.msra.mxu0 %v18846_v45  ;;  %v8494_v57 = vrot.slane %v8493_v56, 2  ;;  %v8680_v45 = vadd.f32 %v8679_v62, %v8678_v54 }
 0x553   :  { %19802 = vmatprep.subr.bf16.mxu0 %v26983_v19 }
 0x554   :  { %v8495_v34 = vadd.f32 %v8494_v57, %v8493_v56  ;;  %v8681_v42 = vrot.slane %v8680_v45, 1 }
 0x556   :  { %19804 = vmatpush1.bf16.msra.mxu0 %v18847_v26  ;;  %v8496_v37 = vrot.slane %v8495_v34, 1  ;;  %v8682_v63 = vadd.f32 %v8681_v42, %v8680_v45 }
 0x557   :  { %19805 = vmatprep.subr.bf16.mxu0 %v26983_v19 }
 0x558   :  { %v8497_v48 = vadd.f32 %v8496_v37, %v8495_v34 }
 0x55a   :  { %19807 = vmatpush1.bf16.msra.mxu0 %v18848_v35  ;;  %v8711_v26 = vsel %vm8704_vm2, %v8497_v48, %v8682_v63  ;;  %v9250_v63 = vld [vmem:[%s22741_s3] sm:$0x1] }
 0x55b   :  { %19808 = vmatprep.subr.bf16.mxu0 %v26983_v19 }
 0x55e   :  { %19810 = vmatpush1.bf16.msra.mxu0 %v18849_v31 }
 0x55f   :  { %19811 = vmatprep.subr.bf16.mxu0 %v26983_v19 }
 0x562   :  { %19813 = vmatpush1.bf16.msra.mxu0 %v18850_v46 }
 0x563   :  { %19814 = vmatprep.subr.bf16.mxu0 %v26983_v19 }
 0x566   :  { %19816 = vmatpush1.bf16.msra.mxu0 %v18851_v30 }
 0x567   :  { %19817 = vmatprep.subr.bf16.mxu0 %v26983_v19 }
 0x56a   :  { %19819 = vmatpush1.bf16.msra.mxu0 %v18852_v60  ;;  %v22689_v60 = vmov 1966171168  }
 0x56b   :  { %19820 = vmatprep.subr.bf16.mxu0 %v26983_v19  ;;  %v9255_v45 = vunpack.c.l.s4 %v22689_v60 }
 0x56d   :  { %v9256_v34 = vunpack.c.0.s8 %v9255_v45 }
 0x56e   :  { %19822 = vmatpush1.bf16.msra.mxu0 %v18853_v27 }
 0x56f   :  { %19823 = vmatprep.subr.bf16.mxu0 %v26983_v19  ;;  %v25494_v27 = vsub.s32 %v9256_v34, %v24879_v13 }
 0x571   :  { %27074 = vst [vmem:[#allocation56_spill] sm:$0xff] %v25494_v27 }
 0x572   :  { %19825 = vmatpush1.bf16.msra.mxu0 %v18854_v47 }
 0x575   :  { %9239 = vmatmul.mubr.f32.vlgmr.msra.gmra.mrb[46].mxu0 %v8711_v26 }
 0x5cb   :  { %v19061_v7 = vpop.f32.mrb[40].mxu0 }
 0x5cc   :  { %v19062_v59 = vpop.f32.mrb[41].mxu0 }
 0x5cd   :  { %v19063_v53 = vadd.f32 %v19062_v59, %v19061_v7  ;;  %v9271_v7 = vld [vmem:[%s22747_s8] sm:$0x1] }
 0x5f0   :  { %v19096_v14 = vpop.f32.mrb[42].mxu0 }
 0x5f1   :  { %v19097_v52 = vpop.f32.mrb[43].mxu0 }
 0x5f2   :  { %v19098_v39 = vadd.f32 %v19097_v52, %v19096_v14 }
 0x5f4   :  { %v9101_v35 = vadd.f32 %v19098_v39, %v19063_v53 }
 0x610   :  { %v19131_v29 = vpop.f32.mrb[44].mxu0 }
 0x611   :  { %v19132_v1 = vpop.f32.mrb[45].mxu0 }
 0x612   :  { %v19133_v0 = vadd.f32 %v19132_v1, %v19131_v29 }
 0x614   :  { %v9171_v31 = vadd.f32 %v19133_v0, %v9101_v35 }
 0x648   :  { %v9240_v10 = vpop.f32.mrb[46].mxu0 }
 0x649   :  { %v9241_v36 = vadd.f32 %v9240_v10, %v9171_v31  ;;  %v9242_v46 = vpop.f32.mrb[47].mxu0 }
 0x64b   :  { %v9244_v54 = vmul.f32 0.0005202914, %v9241_v36 }
 0x64d   :  { %v9245_v56 = vmul.f32 %v9244_v54, %v9244_v54 }
 0x64f   :  { %v9247_v30 = vrot.slane %v9245_v56, 7 }
 0x651   :  { %v9249_v62 = vsub.f32 %v9244_v54, %v9247_v30 }
 0x653   :  { %v9251_v57 = vadd.f32 1e-05, %v9249_v62 }
 0x655   :  { %22475 = vrsqrt.f32 %v9251_v57 }
 0x65f   :  { %v22476_v42 = vpop.eup %22475 }
 0x660   :  { %v9260_v37 = vrot.slane %v22476_v42, %v25494_v27 }
 0x662   :  { %v9261_v47 = vcombine.high %v9260_v37, %v9260_v37 }
 0x664   :  { %v9268_v48 = vrot.slane %v9261_v47, %v25494_v27 }
 0x666   :  { %v9270_v26 = vmul.f32 %v9268_v48, %v9250_v63 }
 0x668   :  { %v9272_v59 = vmul.f32 %v9270_v26, %v9244_v54  ;;  %v9278_v53 = vrot.slane %v9270_v26, %v24900_v50 }
 0x66a   :  { %9285 = vrot.lane.b32.xlu1 %v9278_v53, %s22690_s5  ;;  %9279 = vrot.lane.b32.xlu0 %v9278_v53, %s22691_s17  ;;  %v9273_v14 = vsub.f32 %v9271_v7, %v9272_v59 }
 0x66c   :  { %v9296_v52 = vrot.slane %v9273_v14, %v24900_v50 }
 0x66e   :  { %9282 = vrot.lane.b32.xlu0 %v9278_v53, %s22692_s21  ;;  %9297 = vrot.lane.b32.xlu1 %v9296_v52, %s22691_s17 }
 0x672   :  { %9300 = vrot.lane.b32.xlu0 %v9296_v52, %s22692_s21  ;;  %9303 = vrot.lane.b32.xlu1 %v9296_v52, %s22690_s5 }
 0x6dc   :  { %v9286_v39 = vpop.permute.xlu1 %9285  ;;  %v9280_v35 = vpop.permute.xlu0 %9279 }
 0x6dd   :  { %v9289_v29 = vsel %vm9288_vm5, %v9270_v26, %v9280_v35  ;;  %v27086_v35 = vld [vmem:[#allocation41_spill] sm:$0xff] }
 0x6e0   :  { %v9283_v1 = vpop.permute.xlu0 %9282  ;;  %v9298_v36 = vpop.permute.xlu1 %9297 }
 0x6e1   :  { %v9290_v0 = vsel %vm6639_vm0, %v9289_v29, %v9283_v1  ;;  %v9306_v56 = vsel %vm9288_vm5, %v9273_v14, %v9298_v36  ;;  %v27087_v29 = vld [vmem:[#allocation24_spill] sm:$0xff]  ;;  %v27088_v1 = vld [vmem:[#allocation21_spill] sm:$0xff] }
 0x6e2   :  { %v9291_v31 = vsel %vm8498_vm3, %v9290_v0, %v9286_v39  ;;  %v9316_v10 = vrot.slane %v9290_v0, %v24900_v50  ;;  %v27085_v39 = vld [vmem:[#allocation43_spill] sm:$0xff]  ;;  %v27089_v0 = vld [vmem:[#allocation26_spill] sm:$0xff] }
 0x6e3   :  { %v25513_v46 = vrot.slane %v9291_v31, %v24900_v50  ;;  %v27090_v31 = vld [vmem:[#allocation27_spill] sm:$0xff] }
 0x6e4   :  { %v9301_v54 = vpop.permute.xlu0 %9300  ;;  %v9324_v30 = vmul.f32 %v9316_v10, %v25303_v16  ;;  %v9332_v62 = vmul.f32 %v9316_v10, %v25298_v3  ;;  %v9340_v57 = vmul.f32 %v9316_v10, %v25316_v41  ;;  %v9348_v45 = vmul.f32 %v9316_v10, %v25318_v25  ;;  %v9304_v19 = vpop.permute.xlu1 %9303 }
 0x6e5   :  { %v25520_v60 = vsel %vm6639_vm0, %v9306_v56, %v9301_v54  ;;  %v9356_v34 = vmul.f32 %v9316_v10, %v25338_v61  ;;  %v9364_v42 = vmul.f32 %v9316_v10, %v25348_v5  ;;  %v9372_v47 = vmul.f32 %v9316_v10, %v25365_v17  ;;  %v27092_v54 = vld [vmem:[#allocation42_spill] sm:$0xff] }
 0x6e6   :  { %v9388_v37 = vrot.slane %v25520_v60, %v24900_v50  ;;  %v9380_v16 = vmul.f32 %v9316_v10, %v25391_v51  ;;  %v25531_v3 = vmul.f32 %v25513_v46, %v24974_v18  ;;  %v25535_v41 = vmul.f32 %v25513_v46, %v24976_v44  ;;  %v27091_v10 = vld [vmem:[#allocation45_spill] sm:$0xff] }
 0x6e7   :  { %v9319_v44 = vmul.f32 %v25513_v46, %v25146_v20  ;;  %v9320_v26 = vmul.f32 %v25513_v46, %v25137_v15  ;;  %v9321_v7 = vmul.f32 %v25513_v46, %v24907_v21  ;;  %v9322_v59 = vmul.f32 %v25513_v46, %v24911_v24 }
 0x6e8   :  { %27075 = vst [vmem:[#allocation57_spill] sm:$0xff] %v25531_v3  ;;  %27076 = vst [vmem:[#allocation58_spill] sm:$0xff] %v25535_v41  ;;  %v25537_v25 = vadd.f32 %v9388_v37, %v9324_v30  ;;  %v25539_v61 = vadd.f32 %v9388_v37, %v9332_v62  ;;  %v25541_v5 = vadd.f32 %v9388_v37, %v9340_v57  ;;  %v27093_v30 = vld [vmem:[#allocation40_spill] sm:$0xff]  ;;  %v27094_v57 = vld [vmem:[#allocation22_spill] sm:$0xff] }
 0x6e9   :  { %v25543_v63 = vadd.f32 %v9388_v37, %v9348_v45  ;;  %v25545_v48 = vadd.f32 %v9388_v37, %v9356_v34  ;;  %v25547_v17 = vadd.f32 %v9388_v37, %v9364_v42  ;;  %v25549_v51 = vadd.f32 %v9388_v37, %v9372_v47  ;;  %v27095_v34 = vld [vmem:[#allocation28_spill] sm:$0xff]  ;;  %v27114_v41 = vld [vmem:[#allocation51_spill] sm:$0xff] }
 0x6ea   :  { %27077 = vst [vmem:[#allocation59_spill] sm:$0xff] %v25537_v25  ;;  %27078 = vst [vmem:[#allocation60_spill] sm:$0xff] %v25539_v61  ;;  %v25551_v18 = vadd.f32 %v9388_v37, %v9380_v16  ;;  %v9323_v53 = vmul.f32 %v25513_v46, %v25426_v4  ;;  %v9325_v14 = vmul.f32 %v25513_v46, %v24960_v58  ;;  %v27096_v37 = vld [vmem:[#allocation29_spill] sm:$0xff]  ;;  %v27097_v16 = vld [vmem:[#allocation47_spill] sm:$0xff] }
 0x6eb   :  { %27079 = vst [vmem:[#allocation61_spill] sm:$0xff] %v25541_v5  ;;  %27080 = vst [vmem:[#allocation62_spill] sm:$0xff] %v25543_v63  ;;  %v9326_v52 = vmul.f32 %v25513_v46, %v24969_v6  ;;  %v9327_v20 = vmul.f32 %v25513_v46, %v25139_v38  ;;  %v9328_v15 = vmul.f32 %v25513_v46, %v25141_v40  ;;  %v27110_v63 = vld [vmem:[#allocation49_spill] sm:$0xff]  ;;  %v27111_v5 = vld [vmem:[#allocation38_spill] sm:$0xff] }
 0x6ec   :  { %27081 = vst [vmem:[#allocation63_spill] sm:$0xff] %v25545_v48  ;;  %27082 = vst [vmem:[#allocation64_spill] sm:$0xff] %v25547_v17  ;;  %v9329_v21 = vmul.f32 %v25513_v46, %v24905_v12  ;;  %v9330_v24 = vmul.f32 %v25513_v46, %v24909_v22  ;;  %v9331_v4 = vmul.f32 %v25513_v46, %v25423_v55  ;;  %v27112_v61 = vld [vmem:[#allocation34_spill] sm:$0xff]  ;;  %v27113_v25 = vld [vmem:[#allocation35_spill] sm:$0xff] }
 0x6ed   :  { %27083 = vst [vmem:[#allocation65_spill] sm:$0xff] %v25549_v51  ;;  %27084 = vst [vmem:[#allocation66_spill] sm:$0xff] %v25551_v18  ;;  %v9333_v58 = vmul.f32 %v25513_v46, %v24987_v43  ;;  %v9334_v6 = vmul.f32 %v25513_v46, %v24994_v9  ;;  %v9335_v38 = vmul.f32 %v25513_v46, %v27085_v39  ;;  %v27115_v3 = vld [vmem:[#allocation52_spill] sm:$0xff] }
 0x6ee   :  { %v9336_v40 = vmul.f32 %v25513_v46, %v27086_v35  ;;  %v9337_v12 = vmul.f32 %v25513_v46, %v27087_v29  ;;  %v9338_v22 = vmul.f32 %v25513_v46, %v27088_v1  ;;  %v9339_v55 = vmul.f32 %v25513_v46, %v25428_v49  ;;  %v27098_v35 = vld [vmem:[#allocation44_spill] sm:$0xff]  ;;  %v27099_v1 = vld [vmem:[#allocation53_spill] sm:$0xff] }
 0x6ef   :  { %v9341_v43 = vmul.f32 %v25513_v46, %v27089_v0  ;;  %v9342_v9 = vmul.f32 %v25513_v46, %v27090_v31  ;;  %v9343_v36 = vmul.f32 %v25513_v46, %v27091_v10  ;;  %v9344_v56 = vmul.f32 %v25513_v46, %v27092_v54  ;;  %v27100_v31 = vld [vmem:[#allocation23_spill] sm:$0xff]  ;;  %v27101_v54 = vld [vmem:[#allocation30_spill] sm:$0xff] }
 0x6f0   :  { %v9345_v62 = vmul.f32 %v25513_v46, %v27093_v30  ;;  %v9346_v45 = vmul.f32 %v25513_v46, %v27094_v57  ;;  %v9347_v49 = vmul.f32 %v25513_v46, %v25435_v33  ;;  %v9349_v42 = vmul.f32 %v25513_v46, %v27095_v34  ;;  %v27102_v57 = vld [vmem:[#allocation31_spill] sm:$0xff] }
 0x6f1   :  { %v9350_v47 = vmul.f32 %v25513_v46, %v27096_v37  ;;  %v9351_v39 = vmul.f32 %v25513_v46, %v27097_v16  ;;  %v9352_v29 = vmul.f32 %v25513_v46, %v27098_v35  ;;  %v9353_v0 = vmul.f32 %v25513_v46, %v27099_v1  ;;  %v27103_v37 = vld [vmem:[#allocation48_spill] sm:$0xff]  ;;  %v27104_v35 = vld [vmem:[#allocation46_spill] sm:$0xff] }
 0x6f2   :  { %v9354_v10 = vmul.f32 %v25513_v46, %v27100_v31  ;;  %v9355_v33 = vmul.f32 %v25513_v46, %v25443_v32  ;;  %v9357_v30 = vmul.f32 %v25513_v46, %v27101_v54  ;;  %v9358_v34 = vmul.f32 %v25513_v46, %v27102_v57  ;;  %v27105_v1 = vld [vmem:[#allocation54_spill] sm:$0xff]  ;;  %v27106_v31 = vld [vmem:[#allocation25_spill] sm:$0xff]  ;;  %v27107_v54 = vld [vmem:[#allocation32_spill] sm:$0xff] }
 0x6f3   :  { %v9359_v16 = vmul.f32 %v25513_v46, %v27103_v37  ;;  %v9360_v13 = vmul.f32 %v25513_v46, %v27104_v35  ;;  %v9361_v27 = vmul.f32 %v25513_v46, %v27105_v1  ;;  %v9362_v18 = vmul.f32 %v25513_v46, %v27106_v31  ;;  %v27108_v57 = vld [vmem:[#allocation33_spill] sm:$0xff]  ;;  %v27109_v37 = vld [vmem:[#allocation50_spill] sm:$0xff] }
 0x6f4   :  { %v9363_v32 = vmul.f32 %v25513_v46, %v25450_v23  ;;  %v9365_v51 = vmul.f32 %v25513_v46, %v27107_v54  ;;  %v9366_v17 = vmul.f32 %v25513_v46, %v27108_v57  ;;  %v9367_v48 = vmul.f32 %v25513_v46, %v27109_v37 }
 0x6f5   :  { %v9368_v35 = vmul.f32 %v25513_v46, %v27110_v63  ;;  %v9369_v1 = vmul.f32 %v25513_v46, %v25290_v28  ;;  %v9370_v31 = vmul.f32 %v25513_v46, %v27111_v5  ;;  %v9371_v23 = vmul.f32 %v25513_v46, %v25458_v2 }
 0x6f6   :  { %v9308_v54 = vsel %vm8498_vm3, %v25520_v60, %v9304_v19  ;;  %v9373_v57 = vmul.f32 %v25513_v46, %v27112_v61  ;;  %v9374_v37 = vmul.f32 %v25513_v46, %v27113_v25  ;;  %v9375_v63 = vmul.f32 %v25513_v46, %v27114_v41  ;;  %v27117_v60 = vld [vmem:[#allocation55_spill] sm:$0xff]  ;;  %v27118_v25 = vld [vmem:[#allocation57_spill] sm:$0xff] }
 0x6f7   :  { %v9384_v28 = vrot.slane %v9308_v54, %v24900_v50  ;;  %v9376_v5 = vmul.f32 %v25513_v46, %v27115_v3  ;;  %v9377_v2 = vmul.f32 %v25513_v46, %v25296_v8  ;;  %v9378_v19 = vmul.f32 %v25513_v46, %v27116_v11  ;;  %v27120_v50 = vld [vmem:[#allocation58_spill] sm:$0xff] }
 0x6f8   :  { %v9379_v61 = vmul.f32 %v25513_v46, %v27117_v60 }
 0x6f9   :  { %v25665_v41 = vadd.f32 %v9384_v28, %v27118_v25  ;;  %v9390_v54 = vadd.f32 %v9384_v28, %v27120_v50  ;;  %v25668_v3 = vadd.f32 %v9384_v28, %v9319_v44  ;;  %v25670_v8 = vadd.f32 %v9384_v28, %v9320_v26 }
 0x6fa   :  { %v25672_v11 = vadd.f32 %v9384_v28, %v9321_v7  ;;  %v25674_v46 = vadd.f32 %v9384_v28, %v9322_v59  ;;  %v25676_v60 = vadd.f32 %v9384_v28, %v9323_v53  ;;  %v9397_v25 = vadd.f32 %v9384_v28, %v9325_v14 }
 0x6fb   :  { %27119 = vst [vmem:[#allocation43_spill] sm:$0xff] %v25665_v41  ;;  %27121 = vst [vmem:[#allocation41_spill] sm:$0xff] %v25668_v3  ;;  %v9398_v41 = vadd.f32 %v9384_v28, %v9326_v52  ;;  %v25678_v50 = vadd.f32 %v9384_v28, %v9327_v20  ;;  %v9400_v44 = vadd.f32 %v9384_v28, %v9328_v15 }
 0x6fc   :  { %27122 = vst [vmem:[#allocation24_spill] sm:$0xff] %v25670_v8  ;;  %27123 = vst [vmem:[#allocation21_spill] sm:$0xff] %v25672_v11  ;;  %v25680_v3 = vadd.f32 %v9384_v28, %v9329_v21  ;;  %v25682_v26 = vadd.f32 %v9384_v28, %v9330_v24  ;;  %v25684_v8 = vadd.f32 %v9384_v28, %v9331_v4 }
 0x6fd   :  { %27124 = vst [vmem:[#allocation26_spill] sm:$0xff] %v25674_v46  ;;  %27125 = vst [vmem:[#allocation27_spill] sm:$0xff] %v25676_v60  ;;  %v9405_v7 = vadd.f32 %v9384_v28, %v9333_v58  ;;  %v9406_v11 = vadd.f32 %v9384_v28, %v9334_v6  ;;  %v25686_v59 = vadd.f32 %v9384_v28, %v9335_v38 }
 0x6fe   :  { %27126 = vst [vmem:[#allocation45_spill] sm:$0xff] %v25680_v3  ;;  %v9408_v46 = vadd.f32 %v9384_v28, %v9336_v40  ;;  %v25688_v53 = vadd.f32 %v9384_v28, %v9337_v12  ;;  %v25690_v60 = vadd.f32 %v9384_v28, %v9338_v22  ;;  %v25692_v14 = vadd.f32 %v9384_v28, %v9339_v55 }
 0x6ff   :  { %v9413_v52 = vadd.f32 %v9384_v28, %v9341_v43  ;;  %v9414_v20 = vadd.f32 %v9384_v28, %v9342_v9  ;;  %v9415_v15 = vadd.f32 %v9384_v28, %v9343_v36  ;;  %v9416_v21 = vadd.f32 %v9384_v28, %v9344_v56 }
 0x700   :  { %v25694_v3 = vadd.f32 %v9384_v28, %v9345_v62  ;;  %v25696_v24 = vadd.f32 %v9384_v28, %v9346_v45  ;;  %v25698_v4 = vadd.f32 %v9384_v28, %v9347_v49  ;;  %v9421_v58 = vadd.f32 %v9384_v28, %v9349_v42 }
 0x701   :  { %v9422_v6 = vadd.f32 %v9384_v28, %v9350_v47  ;;  %v9423_v38 = vadd.f32 %v9384_v28, %v9351_v39  ;;  %v9424_v40 = vadd.f32 %v9384_v28, %v9352_v29  ;;  %v25700_v12 = vadd.f32 %v9384_v28, %v9353_v0 }
 0x702   :  { %v25702_v22 = vadd.f32 %v9384_v28, %v9354_v10  ;;  %v25704_v55 = vadd.f32 %v9384_v28, %v9355_v33  ;;  %v9429_v43 = vadd.f32 %v9384_v28, %v9357_v30  ;;  %v9430_v9 = vadd.f32 %v9384_v28, %v9358_v34 }
 0x703   :  { %v9431_v36 = vadd.f32 %v9384_v28, %v9359_v16  ;;  %v9432_v56 = vadd.f32 %v9384_v28, %v9360_v13  ;;  %v25706_v62 = vadd.f32 %v9384_v28, %v9361_v27  ;;  %v25708_v45 = vadd.f32 %v9384_v28, %v9362_v18 }
 0x704   :  { %v25710_v49 = vadd.f32 %v9384_v28, %v9363_v32  ;;  %v9437_v42 = vadd.f32 %v9384_v28, %v9365_v51  ;;  %v9438_v47 = vadd.f32 %v9384_v28, %v9366_v17  ;;  %v9439_v39 = vadd.f32 %v9384_v28, %v9367_v48  ;;  %v27127_v17 = vld [vmem:[#allocation43_spill] sm:$0xff] }
 0x705   :  { %v9440_v29 = vadd.f32 %v9384_v28, %v9368_v35  ;;  %v25712_v0 = vadd.f32 %v9384_v28, %v9369_v1  ;;  %v25714_v10 = vadd.f32 %v9384_v28, %v9370_v31  ;;  %v25716_v33 = vadd.f32 %v9384_v28, %v9371_v23 }
 0x706   :  { %v9445_v30 = vadd.f32 %v9384_v28, %v9373_v57  ;;  %v9446_v34 = vadd.f32 %v9384_v28, %v9374_v37  ;;  %v9447_v16 = vadd.f32 %v9384_v28, %v9375_v63  ;;  %v9448_v13 = vadd.f32 %v9384_v28, %v9376_v5 }
 0x707   :  { %v25718_v27 = vadd.f32 %v9384_v28, %v9377_v2  ;;  %v25720_v18 = vadd.f32 %v9384_v28, %v9378_v19  ;;  %v25722_v32 = vadd.f32 %v9384_v28, %v9379_v61  ;;  %v19826_v51 = vpack.c.bf16 %v9398_v41, %v9390_v54 }
 0x708   :  { %v19828_v48 = vpack.c.bf16 %v9397_v25, %v27127_v17  ;;  %v19830_v35 = vpack.c.bf16 %v9414_v20, %v9406_v11 }
 0x709   :  { %22640 = dma.done.wait [#allocation3], 95232 }
 0x70a   :  { %22641 = vsyncadd [#allocation3], 4294872064  ;;  %v27128_v1 = vmov 0.0   ;;  %19827 = vmatprep.subr.bf16.mxu1 %v19826_v51  ;;  %v27129_v31 = vld [vmem:[#allocation24_spill] sm:$0xff]  ;;  %v27130_v57 = vld [vmem:[#allocation41_spill] sm:$0xff]  ;;  %v19832_v63 = vpack.c.bf16 %v9413_v52, %v9405_v7  ;;  %v19848_v28 = vpack.c.bf16 %v9416_v21, %v9408_v46  ;;  %v19834_v5 = vpack.c.bf16 %v9430_v9, %v9422_v6  ;;  %s27207_s25 = sld [smem:[#allocation8_spill]] }
 0x70b   :  { %9607 = vmatprep.mubr.f32.mxu1 %v27128_v1  ;;  %9744 = vmatprep.mubr.f32.mxu0 %v27128_v1  ;;  %v19844_v23 = vpack.c.bf16 %v9400_v44, %v27129_v31  ;;  %v19846_v37 = vpack.c.bf16 %v25678_v50, %v27130_v57  ;;  %v19850_v2 = vpack.c.bf16 %v9415_v15, %v25686_v59  ;;  %vm22693_vm6 = vmmov 1   ;;  %v18224_v50 = vld [vmem:[%s22752_s14] sm:$0xff]   ;;  %v27135_v20 = vld [vmem:[#allocation59_spill] sm:$0xff]  ;;  %v27136_v15 = vld [vmem:[#allocation60_spill] sm:$0xff]  ;;  %s27209_s29 = sld [smem:[#allocation10_spill]]  ;;  %s27210_s3 = sld [smem:[#allocation9_spill]] }
 0x70c   :  { %19829 = vmatpush1.bf16.msra.mxu1 %v19828_v48  ;;  %v19852_v19 = vpack.c.bf16 %v9432_v56, %v9424_v40  ;;  %v19836_v61 = vpack.c.bf16 %v9429_v43, %v9421_v58  ;;  %v19838_v41 = vpack.c.bf16 %v9446_v34, %v9438_v47  ;;  %vm25732_vm7 = vmpackc.low %vm8405_vm1, %vm22693_vm6  ;;  %v27131_v54 = vmov 0  ;;  %v27134_v44 = vld [vmem:[#allocation26_spill] sm:$0xff]  ;;  %v27137_v58 = vld [vmem:[#allocation21_spill] sm:$0xff]  ;;  %s27211_s8 = sld [smem:[#allocation11_spill]]  ;;  %s27213_s19 = sld [smem:[#allocation12_spill]] }
 0x70d   :  { %19831 = vmatprep.subr.bf16.mxu1 %v19830_v35  ;;  %19845 = vmatprep.subr.bf16.mxu0 %v19844_v23  ;;  %v27132_v54 = vsel %vm25732_vm7, 4294967295, %v27131_v54  ;;  %v19854_v11 = vpack.c.bf16 %v9431_v36, %v9423_v38  ;;  %v19856_v46 = vpack.c.bf16 %v9448_v13, %v9440_v29  ;;  %v19841_v25 = vpack.c.bf16 %v9445_v30, %v9437_v42  ;;  %v27138_v6 = vld [vmem:[#allocation45_spill] sm:$0xff]  ;;  %v27139_v40 = vld [vmem:[#allocation27_spill] sm:$0xff]  ;;  %v27141_v56 = vld [vmem:[#allocation62_spill] sm:$0xff]  ;;  %s27217_s20 = sld [smem:[#allocation17_spill]]  ;;  %s27218_s26 = sld [smem:[#allocation14_spill]] }
 0x70e   :  { %19847 = vmatpush1.bf16.msra.mxu0 %v19846_v37  ;;  %27133 = vst [vmem:[#allocation42_spill] sm:$0xff] %v27132_v54  ;;  %v19862_v7 = vpack.c.bf16 %v25682_v26, %v27134_v44  ;;  %v19859_v59 = vpack.c.bf16 %v9447_v16, %v9439_v39  ;;  %v25741_v52 = vunpack.c.l.bf16 %v18224_v50  ;;  %v19880_v21 = vpack.c.bf16 %v27136_v15, %v27135_v20  ;;  %v27140_v36 = vld [vmem:[#allocation61_spill] sm:$0xff]  ;;  %v18855_v47 = vld [vmem:[%s22752_s14 + $0x8] sm:$0xff]   ;;  %v10836_v23 = vld [vmem:[#allocation2 + $0x7c0] sm:$0xff]  ;;  %s27219_s27 = sld [smem:[#allocation15_spill]]  ;;  %s27220_s22 = sld [smem:[#allocation6_spill]] }
 0x70f   :  { %19849 = vmatprep.subr.bf16.mxu0 %v19848_v28  ;;  %vm9482_vm8 = vcmask 506880   ;;  %v19864_v38 = vpack.c.bf16 %v27138_v6, %v27137_v58  ;;  %v19866_v26 = vpack.c.bf16 %v25696_v24, %v25690_v60  ;;  %v19882_v43 = vpack.c.bf16 %v25684_v8, %v27139_v40  ;;  %v10837_v16 = vld [vmem:[#allocation2 + $0x7c8] sm:$0xff]  ;;  %v10838_v37 = vld [vmem:[#allocation2 + $0x7d0] sm:$0xff]  ;;  %v10840_v28 = vld [vmem:[#allocation2 + $0x7e0] sm:$0xff]  ;;  %s27221_s1 = sld [smem:[#allocation16_spill]]  ;;  %s27222_s6 = sld [smem:[#allocation7_spill]] }
 0x710   :  { %19833 = vmatpush1.bf16.msra.mxu1 %v19832_v63  ;;  %v25759_v9 = vunpack.c.h.bf16 %v18224_v50  ;;  %v19884_v42 = vpack.c.bf16 %v27141_v56, %v27140_v36  ;;  %v19868_v60 = vpack.c.bf16 %v25694_v3, %v25688_v53  ;;  %v19870_v8 = vpack.c.bf16 %v25708_v45, %v25702_v22  ;;  %v27142_v3 = vld [vmem:[#allocation63_spill] sm:$0xff]  ;;  %v27143_v53 = vld [vmem:[#allocation64_spill] sm:$0xff]  ;;  %v10843_v63 = vld [vmem:[#allocation2 + $0x7f8] sm:$0xff] }
 0x711   :  { %19835 = vmatprep.subr.bf16.mxu1 %v19834_v5  ;;  %v19886_v24 = vpack.c.bf16 %v25698_v4, %v25692_v14  ;;  %v25776_v39 = vunpack.c.l.bf16 %v18855_v47  ;;  %v19888_v29 = vpack.c.bf16 %v27143_v53, %v27142_v3  ;;  %v19872_v22 = vpack.c.bf16 %v25706_v62, %v25700_v12  ;;  %v18856_v4 = vld [vmem:[%s22752_s14 + $0x10] sm:$0xff]   ;;  %v27144_v12 = vld [vmem:[#allocation65_spill] sm:$0xff]  ;;  %v27145_v62 = vld [vmem:[#allocation66_spill] sm:$0xff] }
 0x712   :  { %19851 = vmatpush1.bf16.msra.mxu0 %v19850_v2  ;;  %v19874_v14 = vpack.c.bf16 %v25720_v18, %v25714_v10  ;;  %v19890_v45 = vpack.c.bf16 %v25710_v49, %v25704_v55  ;;  %v25793_v30 = vunpack.c.h.bf16 %v18855_v47  ;;  %v19892_v34 = vpack.c.bf16 %v27145_v62, %v27144_v12  ;;  %v10839_v49 = vld [vmem:[#allocation2 + $0x7d8] sm:$0xff]  ;;  %v18858_v18 = vld [vmem:[%s22752_s14 + $0x20] sm:$0xff]   ;;  %v18859_v17 = vld [vmem:[%s22752_s14 + $0x28] sm:$0xff]  }
 0x713   :  { %19853 = vmatprep.subr.bf16.mxu0 %v19852_v19  ;;  %v19877_v10 = vpack.c.bf16 %v25718_v27, %v25712_v0  ;;  %v19895_v55 = vpack.c.bf16 %v25722_v32, %v25716_v33  ;;  %v25809_v13 = vunpack.c.l.bf16 %v18856_v4  ;;  %v18857_v0 = vld [vmem:[%s22752_s14 + $0x18] sm:$0xff]   ;;  %v25824_v33 = vunpack.c.h.bf16 %v18856_v4  ;;  %v10841_v57 = vld [vmem:[#allocation2 + $0x7e8] sm:$0xff]  ;;  %v10842_v2 = vld [vmem:[#allocation2 + $0x7f0] sm:$0xff]  ;;  %s27212_s14 = sld [smem:[#allocation13_spill]] }
 0x714   :  { %19837 = vmatpush1.bf16.msra.mxu1 %v19836_v61  ;;  %v25832_v27 = vunpack.c.l.bf16 %v18857_v0  ;;  %v25841_v32 = vunpack.c.h.bf16 %v18857_v0  ;;  %v25849_v51 = vunpack.c.l.bf16 %v18858_v18  ;;  %v25858_v48 = vunpack.c.h.bf16 %v18858_v18  ;;  %v10845_v5 = vld [vmem:[#allocation2 + $0x808] sm:$0xff]  ;;  %v10847_v19 = vld [vmem:[#allocation2 + $0x818] sm:$0xff]  ;;  %v10844_v61 = vld [vmem:[#allocation2 + $0x800] sm:$0xff] }
 0x715   :  { %19840 = vmatprep.subr.msk.bf16.mxu1 %vm25732_vm7, %v19838_v41  ;;  %v25866_v35 = vunpack.c.l.bf16 %v18859_v17  ;;  %v25874_v31 = vunpack.c.h.bf16 %v18859_v17  ;;  %v10849_v41 = vld [vmem:[#allocation2 + $0x828] sm:$0xff]  ;;  %v10850_v44 = vld [vmem:[#allocation2 + $0x830] sm:$0xff]  ;;  %v10859_v15 = vld [vmem:[#allocation2 + $0x878] sm:$0xff]  ;;  %vm15060_vm9 = vcmask 244736   ;;  %vm22694_vm10 = vmmov 0  }
 0x716   :  { %19855 = vmatpush1.bf16.msra.mxu0 %v19854_v11  ;;  %v10846_v11 = vld [vmem:[#allocation2 + $0x810] sm:$0xff]  ;;  %v10853_v50 = vld [vmem:[#allocation2 + $0x848] sm:$0xff]  ;;  %v10864_v36 = vld [vmem:[#allocation2 + $0x8a0] sm:$0xff]  ;;  %vm16136_vm11 = vcmask 457728   ;;  %vm16138_vm12 = vcmask 455680   ;;  %vm16299_vm13 = vcmask 64512  }
 0x717   :  { %19858 = vmatprep.subr.msk.bf16.mxu0 %vm25732_vm7, %v19856_v46  ;;  %v10851_v46 = vld [vmem:[#allocation2 + $0x838] sm:$0xff]  ;;  %v10854_v20 = vld [vmem:[#allocation2 + $0x850] sm:$0xff]  ;;  %v10861_v58 = vld [vmem:[#allocation2 + $0x888] sm:$0xff]  ;;  %vm16301_vm14 = vcmask 130048   ;;  %vm16303_vm15 = vcmask 195584  }
 0x718   :  { %19843 = vmatpush1.bf16.msk.msra.mxu1 %vm25732_vm7, %v19841_v25  ;;  %v10848_v25 = vld [vmem:[#allocation2 + $0x820] sm:$0xff]  ;;  %v10858_v6 = vld [vmem:[#allocation2 + $0x870] sm:$0xff]  ;;  %v10865_v40 = vld [vmem:[#allocation2 + $0x8a8] sm:$0xff] }
 0x719   :  { %19863 = vmatprep.subr.bf16.mxu1 %v19862_v7  ;;  %v10855_v7 = vld [vmem:[#allocation2 + $0x858] sm:$0xff]  ;;  %v10869_v56 = vld [vmem:[#allocation2 + $0x8c8] sm:$0xff]  ;;  %v10872_v3 = vld [vmem:[#allocation2 + $0x8e0] sm:$0xff] }
 0x71a   :  { %19861 = vmatpush1.bf16.msk.msra.mxu0 %vm25732_vm7, %v19859_v59  ;;  %v10852_v59 = vld [vmem:[#allocation2 + $0x840] sm:$0xff]  ;;  %v10871_v47 = vld [vmem:[#allocation2 + $0x8d8] sm:$0xff]  ;;  %v10877_v53 = vld [vmem:[#allocation2 + $0x908] sm:$0xff] }
 0x71b   :  { %17688 = vmatmul.mubr.msk.f32.vlgmr.msra.gmra.mrb[48].mxu1 %vm9482_vm8, %v25741_v52  ;;  %19881 = vmatprep.subr.bf16.mxu0 %v19880_v21  ;;  %v10856_v21 = vld [vmem:[#allocation2 + $0x860] sm:$0xff]  ;;  %v10881_v4 = vld [vmem:[#allocation2 + $0x928] sm:$0xff]  ;;  %v10895_v18 = vld [vmem:[#allocation2 + $0x998] sm:$0xff] }
 0x71c   :  { %9613 = vmatprep.mubr.f32.mxu1 %v27128_v1  ;;  %19865 = vmatpush1.bf16.msra.mxu1 %v19864_v38  ;;  %v10863_v38 = vld [vmem:[#allocation2 + $0x898] sm:$0xff]  ;;  %v10880_v12 = vld [vmem:[#allocation2 + $0x920] sm:$0xff]  ;;  %v10885_v62 = vld [vmem:[#allocation2 + $0x948] sm:$0xff] }
 0x71d   :  { %17702 = vmatmul.mubr.msk.f32.vlgmr.msra.gmra.mrb[48].mxu0 %vm9482_vm8, %v25741_v52  ;;  %19867 = vmatprep.subr.bf16.mxu1 %v19866_v26  ;;  %v10860_v26 = vld [vmem:[#allocation2 + $0x880] sm:$0xff]  ;;  %v10894_v17 = vld [vmem:[#allocation2 + $0x990] sm:$0xff]  ;;  %v10953_v54 = vld [vmem:[#allocation2 + $0xb68] sm:$0xff] }
 0x71e   :  { %9750 = vmatprep.mubr.f32.mxu0 %v27128_v1  ;;  %19883 = vmatpush1.bf16.msra.mxu0 %v19882_v43  ;;  %v10862_v43 = vld [vmem:[#allocation2 + $0x890] sm:$0xff]  ;;  %v10888_v0 = vld [vmem:[#allocation2 + $0x960] sm:$0xff] }
 0x71f   :  { %17689 = vmatmul.mubr.msk.f32.gmra.mrb[50].mxu1 %vm9482_vm8, %v25759_v9  ;;  %19885 = vmatprep.subr.bf16.mxu0 %v19884_v42  ;;  %v10866_v42 = vld [vmem:[#allocation2 + $0x8b0] sm:$0xff] }
 0x720   :  { %9619 = vmatprep.mubr.f32.mxu1 %v27128_v1  ;;  %19869 = vmatpush1.bf16.msra.mxu1 %v19868_v60  ;;  %v10868_v60 = vld [vmem:[#allocation2 + $0x8c0] sm:$0xff] }
 0x721   :  { %17703 = vmatmul.mubr.msk.f32.gmra.mrb[50].mxu0 %vm9482_vm8, %v25759_v9  ;;  %19871 = vmatprep.subr.bf16.mxu1 %v19870_v8  ;;  %v10873_v8 = vld [vmem:[#allocation2 + $0x8e8] sm:$0xff] }
 0x722   :  { %9756 = vmatprep.mubr.f32.mxu0 %v27128_v1  ;;  %19887 = vmatpush1.bf16.msra.mxu0 %v19886_v24  ;;  %v10870_v24 = vld [vmem:[#allocation2 + $0x8d0] sm:$0xff] }
 0x723   :  { %17690 = vmatmul.mubr.msk.f32.gmra.mrb[52].mxu1 %vm9482_vm8, %v25776_v39  ;;  %19889 = vmatprep.subr.bf16.mxu0 %v19888_v29  ;;  %v10874_v29 = vld [vmem:[#allocation2 + $0x8f0] sm:$0xff] }
 0x724   :  { %9625 = vmatprep.mubr.f32.mxu1 %v27128_v1  ;;  %19873 = vmatpush1.bf16.msra.mxu1 %v19872_v22  ;;  %v10879_v22 = vld [vmem:[#allocation2 + $0x918] sm:$0xff] }
 0x725   :  { %17704 = vmatmul.mubr.msk.f32.gmra.mrb[52].mxu0 %vm9482_vm8, %v25776_v39  ;;  %19876 = vmatprep.subr.msk.bf16.mxu1 %vm25732_vm7, %v19874_v14  ;;  %v10876_v14 = vld [vmem:[#allocation2 + $0x900] sm:$0xff] }
 0x726   :  { %9762 = vmatprep.mubr.f32.mxu0 %v27128_v1  ;;  %19891 = vmatpush1.bf16.msra.mxu0 %v19890_v45  ;;  %v10878_v45 = vld [vmem:[#allocation2 + $0x910] sm:$0xff] }
 0x727   :  { %17691 = vmatmul.mubr.msk.f32.gmra.mrb[54].mxu1 %vm9482_vm8, %v25793_v30  ;;  %19894 = vmatprep.subr.msk.bf16.mxu0 %vm25732_vm7, %v19892_v34  ;;  %v10882_v34 = vld [vmem:[#allocation2 + $0x930] sm:$0xff] }
 0x728   :  { %9631 = vmatprep.mubr.f32.mxu1 %v27128_v1  ;;  %19879 = vmatpush1.bf16.msk.msra.mxu1 %vm25732_vm7, %v19877_v10  ;;  %v10887_v10 = vld [vmem:[#allocation2 + $0x958] sm:$0xff] }
 0x729   :  { %17705 = vmatmul.mubr.msk.f32.gmra.mrb[54].mxu0 %vm9482_vm8, %v25793_v30  ;;  %19899 = vmatprep.subr.bf16.mxu1 %v10837_v16  ;;  %v10884_v16 = vld [vmem:[#allocation2 + $0x940] sm:$0xff] }
 0x72a   :  { %9768 = vmatprep.mubr.f32.mxu0 %v27128_v1  ;;  %19897 = vmatpush1.bf16.msk.msra.mxu0 %vm25732_vm7, %v19895_v55  ;;  %v10889_v55 = vld [vmem:[#allocation2 + $0x968] sm:$0xff] }
 0x72b   :  { %17692 = vmatmul.mubr.msk.f32.gmra.mrb[56].mxu1 %vm9482_vm8, %v25809_v13  ;;  %20147 = vmatprep.subr.bf16.mxu0 %v10839_v49  ;;  %v10886_v49 = vld [vmem:[#allocation2 + $0x950] sm:$0xff] }
 0x72c   :  { %9637 = vmatprep.mubr.f32.mxu1 %v27128_v1 }
 0x72d   :  { %17706 = vmatmul.mubr.msk.f32.gmra.mrb[56].mxu0 %vm9482_vm8, %v25809_v13 }
 0x72e   :  { %9774 = vmatprep.mubr.f32.mxu0 %v27128_v1 }
 0x72f   :  { %17693 = vmatmul.mubr.msk.f32.gmra.mrb[58].mxu1 %vm9482_vm8, %v25824_v33 }
 0x730   :  { %9643 = vmatprep.mubr.f32.mxu1 %v27128_v1 }
 0x731   :  { %17707 = vmatmul.mubr.msk.f32.gmra.mrb[58].mxu0 %vm9482_vm8, %v25824_v33 }
 0x732   :  { %9780 = vmatprep.mubr.f32.mxu0 %v27128_v1 }
 0x733   :  { %17694 = vmatmul.mubr.msk.f32.gmra.mrb[60].mxu1 %vm9482_vm8, %v25832_v27 }
 0x734   :  { %9649 = vmatprep.mubr.f32.mxu1 %v27128_v1 }
 0x735   :  { %17708 = vmatmul.mubr.msk.f32.gmra.mrb[60].mxu0 %vm9482_vm8, %v25832_v27 }
 0x736   :  { %9786 = vmatprep.mubr.f32.mxu0 %v27128_v1 }
 0x737   :  { %17695 = vmatmul.mubr.msk.f32.gmra.mrb[62].mxu1 %vm9482_vm8, %v25841_v32 }
 0x738   :  { %9655 = vmatprep.mubr.f32.mxu1 %v27128_v1 }
 0x739   :  { %17709 = vmatmul.mubr.msk.f32.gmra.mrb[62].mxu0 %vm9482_vm8, %v25841_v32 }
 0x73a   :  { %9792 = vmatprep.mubr.f32.mxu0 %v27128_v1 }
 0x73b   :  { %17696 = vmatmul.mubr.msk.f32.gmra.mrb[64].mxu1 %vm9482_vm8, %v25849_v51 }
 0x73c   :  { %9661 = vmatprep.mubr.f32.mxu1 %v27128_v1 }
 0x73d   :  { %17710 = vmatmul.mubr.msk.f32.gmra.mrb[64].mxu0 %vm9482_vm8, %v25849_v51 }
 0x73e   :  { %9798 = vmatprep.mubr.f32.mxu0 %v27128_v1 }
 0x73f   :  { %17697 = vmatmul.mubr.msk.f32.gmra.mrb[66].mxu1 %vm9482_vm8, %v25858_v48 }
 0x740   :  { %9667 = vmatprep.mubr.f32.mxu1 %v27128_v1 }
 0x741   :  { %17711 = vmatmul.mubr.msk.f32.gmra.mrb[66].mxu0 %vm9482_vm8, %v25858_v48 }
 0x742   :  { %9804 = vmatprep.mubr.f32.mxu0 %v27128_v1 }
 0x743   :  { %17698 = vmatmul.mubr.msk.f32.gmra.mrb[68].mxu1 %vm9482_vm8, %v25866_v35 }
 0x744   :  { %9673 = vmatprep.mubr.f32.mxu1 %v27128_v1 }
 0x745   :  { %17712 = vmatmul.mubr.msk.f32.gmra.mrb[68].mxu0 %vm9482_vm8, %v25866_v35 }
 0x746   :  { %9810 = vmatprep.mubr.f32.mxu0 %v27128_v1 }
 0x747   :  { %17699 = vmatmul.mubr.msk.f32.gmra.mrb[70].mxu1 %vm9482_vm8, %v25874_v31 }
 0x748   :  { %9881 = vmatprep.mubr.f32.mxu1 %v27128_v1 }
 0x749   :  { %17713 = vmatmul.mubr.msk.f32.gmra.mrb[70].mxu0 %vm9482_vm8, %v25874_v31 }
 0x74a   :  { %10018 = vmatprep.mubr.f32.mxu0 %v27128_v1 }
 0x74b   :  { %17716 = vmatmul.mubr.msk.f32.vlgmr.msra.gmra.mrb[72].mxu1 %vm9482_vm8, %v25741_v52 }
 0x74c   :  { %9887 = vmatprep.mubr.f32.mxu1 %v27128_v1  ;;  %19901 = vmatpush1.bf16.msra.mxu1 %v10836_v23  ;;  %v10898_v23 = vld [vmem:[#allocation2 + $0x9b0] sm:$0xff] }
 0x74d   :  { %17730 = vmatmul.mubr.msk.f32.vlgmr.msra.gmra.mrb[72].mxu0 %vm9482_vm8, %v25741_v52  ;;  %19903 = vmatprep.subr.bf16.mxu1 %v10841_v57  ;;  %v10857_v52 = vld [vmem:[#allocation2 + $0x868] sm:$0xff]  ;;  %v10903_v57 = vld [vmem:[#allocation2 + $0x9d8] sm:$0xff] }
 0x74e   :  { %20149 = vmatpush1.bf16.msra.mxu0 %v10838_v37  ;;  %10024 = vmatprep.mubr.f32.mxu0 %v27128_v1 }
 0x74f   :  { %17717 = vmatmul.mubr.msk.f32.gmra.mrb[74].mxu1 %vm9482_vm8, %v25759_v9  ;;  %20151 = vmatprep.subr.bf16.mxu0 %v10843_v63 }
 0x750   :  { %9893 = vmatprep.mubr.f32.mxu1 %v27128_v1  ;;  %19905 = vmatpush1.bf16.msra.mxu1 %v10840_v28 }
 0x751   :  { %19907 = vmatprep.subr.bf16.mxu1 %v10845_v5  ;;  %17731 = vmatmul.mubr.msk.f32.gmra.mrb[74].mxu0 %vm9482_vm8, %v25759_v9  ;;  %v10867_v9 = vld [vmem:[#allocation2 + $0x8b8] sm:$0xff] }
 0x752   :  { %20153 = vmatpush1.bf16.msra.mxu0 %v10842_v2  ;;  %10030 = vmatprep.mubr.f32.mxu0 %v27128_v1 }
 0x753   :  { %17718 = vmatmul.mubr.msk.f32.gmra.mrb[76].mxu1 %vm9482_vm8, %v25776_v39  ;;  %20155 = vmatprep.subr.bf16.mxu0 %v10847_v19 }
 0x754   :  { %9899 = vmatprep.mubr.f32.mxu1 %v27128_v1  ;;  %19909 = vmatpush1.bf16.msra.mxu1 %v10844_v61 }
 0x755   :  { %19911 = vmatprep.subr.bf16.mxu1 %v10849_v41  ;;  %17732 = vmatmul.mubr.msk.f32.gmra.mrb[76].mxu0 %vm9482_vm8, %v25776_v39  ;;  %v10875_v39 = vld [vmem:[#allocation2 + $0x8f8] sm:$0xff] }
 0x756   :  { %20157 = vmatpush1.bf16.msra.mxu0 %v10846_v11  ;;  %10036 = vmatprep.mubr.f32.mxu0 %v27128_v1 }
 0x757   :  { %17719 = vmatmul.mubr.msk.f32.gmra.mrb[78].mxu1 %vm9482_vm8, %v25793_v30  ;;  %20159 = vmatprep.subr.bf16.mxu0 %v10851_v46 }
 0x758   :  { %9905 = vmatprep.mubr.f32.mxu1 %v27128_v1  ;;  %19913 = vmatpush1.bf16.msra.mxu1 %v10848_v25 }
 0x759   :  { %19915 = vmatprep.subr.bf16.mxu1 %v10853_v50  ;;  %17733 = vmatmul.mubr.msk.f32.gmra.mrb[78].mxu0 %vm9482_vm8, %v25793_v30  ;;  %v10883_v30 = vld [vmem:[#allocation2 + $0x938] sm:$0xff] }
 0x75a   :  { %20161 = vmatpush1.bf16.msra.mxu0 %v10850_v44  ;;  %10042 = vmatprep.mubr.f32.mxu0 %v27128_v1 }
 0x75b   :  { %17720 = vmatmul.mubr.msk.f32.gmra.mrb[80].mxu1 %vm9482_vm8, %v25809_v13  ;;  %20163 = vmatprep.subr.bf16.mxu0 %v10855_v7 }
 0x75c   :  { %19917 = vmatpush1.bf16.msra.mxu1 %v10852_v59  ;;  %9911 = vmatprep.mubr.f32.mxu1 %v27128_v1 }
 0x75d   :  { %19919 = vmatprep.subr.bf16.mxu1 %v10857_v52  ;;  %17734 = vmatmul.mubr.msk.f32.gmra.mrb[80].mxu0 %vm9482_vm8, %v25809_v13  ;;  %v10891_v13 = vld [vmem:[#allocation2 + $0x978] sm:$0xff] }
 0x75e   :  { %20165 = vmatpush1.bf16.msra.mxu0 %v10854_v20  ;;  %10048 = vmatprep.mubr.f32.mxu0 %v27128_v1 }
 0x75f   :  { %20167 = vmatprep.subr.bf16.mxu0 %v10859_v15  ;;  %17721 = vmatmul.mubr.msk.f32.gmra.mrb[82].mxu1 %vm9482_vm8, %v25824_v33 }
 0x760   :  { %19921 = vmatpush1.bf16.msra.mxu1 %v10856_v21  ;;  %9917 = vmatprep.mubr.f32.mxu1 %v27128_v1  ;;  %v10900_v21 = vld [vmem:[#allocation2 + $0x9c0] sm:$0xff] }
 0x761   :  { %19923 = vmatprep.subr.bf16.mxu1 %v10861_v58  ;;  %17735 = vmatmul.mubr.msk.f32.gmra.mrb[82].mxu0 %vm9482_vm8, %v25824_v33  ;;  %v10893_v33 = vld [vmem:[#allocation2 + $0x988] sm:$0xff]  ;;  %v10902_v58 = vld [vmem:[#allocation2 + $0x9d0] sm:$0xff] }
 0x762   :  { %20169 = vmatpush1.bf16.msra.mxu0 %v10858_v6  ;;  %10054 = vmatprep.mubr.f32.mxu0 %v27128_v1  ;;  %v10905_v6 = vld [vmem:[#allocation2 + $0x9e8] sm:$0xff] }
 0x763   :  { %20171 = vmatprep.subr.bf16.mxu0 %v10863_v38  ;;  %17722 = vmatmul.mubr.msk.f32.gmra.mrb[84].mxu1 %vm9482_vm8, %v25832_v27  ;;  %v10907_v38 = vld [vmem:[#allocation2 + $0x9f8] sm:$0xff] }
 0x764   :  { %19925 = vmatpush1.bf16.msra.mxu1 %v10860_v26  ;;  %9923 = vmatprep.mubr.f32.mxu1 %v27128_v1 }
 0x765   :  { %19927 = vmatprep.subr.bf16.mxu1 %v10865_v40  ;;  %17736 = vmatmul.mubr.msk.f32.gmra.mrb[84].mxu0 %vm9482_vm8, %v25832_v27  ;;  %v10890_v27 = vld [vmem:[#allocation2 + $0x970] sm:$0xff] }
 0x766   :  { %20173 = vmatpush1.bf16.msra.mxu0 %v10862_v43  ;;  %10060 = vmatprep.mubr.f32.mxu0 %v27128_v1 }
 0x767   :  { %20175 = vmatprep.subr.bf16.mxu0 %v10867_v9  ;;  %17723 = vmatmul.mubr.msk.f32.gmra.mrb[86].mxu1 %vm9482_vm8, %v25841_v32  ;;  %v10904_v9 = vld [vmem:[#allocation2 + $0x9e0] sm:$0xff] }
 0x768   :  { %19929 = vmatpush1.bf16.msra.mxu1 %v10864_v36  ;;  %9929 = vmatprep.mubr.f32.mxu1 %v27128_v1  ;;  %v10906_v36 = vld [vmem:[#allocation2 + $0x9f0] sm:$0xff] }
 0x769   :  { %19931 = vmatprep.subr.bf16.mxu1 %v10869_v56  ;;  %17737 = vmatmul.mubr.msk.f32.gmra.mrb[86].mxu0 %vm9482_vm8, %v25841_v32  ;;  %v10892_v32 = vld [vmem:[#allocation2 + $0x980] sm:$0xff] }
 0x76a   :  { %20177 = vmatpush1.bf16.msra.mxu0 %v10866_v42  ;;  %10066 = vmatprep.mubr.f32.mxu0 %v27128_v1  ;;  %v10909_v42 = vld [vmem:[#allocation2 + $0xa08] sm:$0xff] }
 0x76b   :  { %20179 = vmatprep.subr.bf16.mxu0 %v10871_v47  ;;  %17724 = vmatmul.mubr.msk.f32.gmra.mrb[88].mxu1 %vm9482_vm8, %v25849_v51  ;;  %v10911_v47 = vld [vmem:[#allocation2 + $0xa18] sm:$0xff] }
 0x76c   :  { %19933 = vmatpush1.bf16.msra.mxu1 %v10868_v60  ;;  %9935 = vmatprep.mubr.f32.mxu1 %v27128_v1 }
 0x76d   :  { %19935 = vmatprep.subr.bf16.mxu1 %v10873_v8  ;;  %17738 = vmatmul.mubr.msk.f32.gmra.mrb[88].mxu0 %vm9482_vm8, %v25849_v51  ;;  %v10897_v51 = vld [vmem:[#allocation2 + $0x9a8] sm:$0xff] }
 0x76e   :  { %20181 = vmatpush1.bf16.msra.mxu0 %v10870_v24  ;;  %10072 = vmatprep.mubr.f32.mxu0 %v27128_v1 }
 0x76f   :  { %20183 = vmatprep.subr.bf16.mxu0 %v10875_v39  ;;  %17725 = vmatmul.mubr.msk.f32.gmra.mrb[90].mxu1 %vm9482_vm8, %v25858_v48  ;;  %v10908_v39 = vld [vmem:[#allocation2 + $0xa00] sm:$0xff] }
 0x770   :  { %19937 = vmatpush1.bf16.msra.mxu1 %v10872_v3  ;;  %9941 = vmatprep.mubr.f32.mxu1 %v27128_v1  ;;  %v10910_v3 = vld [vmem:[#allocation2 + $0xa10] sm:$0xff] }
 0x771   :  { %19939 = vmatprep.subr.bf16.mxu1 %v10877_v53  ;;  %17739 = vmatmul.mubr.msk.f32.gmra.mrb[90].mxu0 %vm9482_vm8, %v25858_v48  ;;  %v10899_v48 = vld [vmem:[#allocation2 + $0x9b8] sm:$0xff] }
 0x772   :  { %20185 = vmatpush1.bf16.msra.mxu0 %v10874_v29  ;;  %10078 = vmatprep.mubr.f32.mxu0 %v27128_v1  ;;  %v10913_v29 = vld [vmem:[#allocation2 + $0xa28] sm:$0xff] }
 0x773   :  { %20187 = vmatprep.subr.bf16.mxu0 %v10879_v22  ;;  %17726 = vmatmul.mubr.msk.f32.gmra.mrb[92].mxu1 %vm9482_vm8, %v25866_v35  ;;  %v10915_v22 = vld [vmem:[#allocation2 + $0xa38] sm:$0xff] }
 0x774   :  { %19941 = vmatpush1.bf16.msra.mxu1 %v10876_v14  ;;  %9947 = vmatprep.mubr.f32.mxu1 %v27128_v1 }
 0x775   :  { %19943 = vmatprep.subr.bf16.mxu1 %v10881_v4  ;;  %17740 = vmatmul.mubr.msk.f32.gmra.mrb[92].mxu0 %vm9482_vm8, %v25866_v35  ;;  %v10896_v35 = vld [vmem:[#allocation2 + $0x9a0] sm:$0xff] }
 0x776   :  { %20189 = vmatpush1.bf16.msra.mxu0 %v10878_v45  ;;  %10084 = vmatprep.mubr.f32.mxu0 %v27128_v1  ;;  %v10955_v1 = vld [vmem:[#allocation2 + $0xb78] sm:$0xff] }
 0x777   :  { %20191 = vmatprep.subr.bf16.mxu0 %v10883_v30  ;;  %17727 = vmatmul.mubr.msk.f32.gmra.mrb[94].mxu1 %vm9482_vm8, %v25874_v31  ;;  %v10912_v30 = vld [vmem:[#allocation2 + $0xa20] sm:$0xff] }
 0x778   :  { %19945 = vmatpush1.bf16.msra.mxu1 %v10880_v12  ;;  %v10914_v12 = vld [vmem:[#allocation2 + $0xa30] sm:$0xff] }
 0x779   :  { %19947 = vmatprep.subr.bf16.mxu1 %v10885_v62  ;;  %17741 = vmatmul.mubr.msk.f32.gmra.mrb[94].mxu0 %vm9482_vm8, %v25874_v31  ;;  %v10901_v31 = vld [vmem:[#allocation2 + $0x9c8] sm:$0xff] }
 0x77a   :  { %20193 = vmatpush1.bf16.msra.mxu0 %v10882_v34  ;;  %v10917_v34 = vld [vmem:[#allocation2 + $0xa48] sm:$0xff] }
 0x77b   :  { %20195 = vmatprep.subr.bf16.mxu0 %v10887_v10  ;;  %v10919_v10 = vld [vmem:[#allocation2 + $0xa58] sm:$0xff] }
 0x77c   :  { %19949 = vmatpush1.bf16.msra.mxu1 %v10884_v16 }
 0x77d   :  { %19951 = vmatprep.subr.bf16.mxu1 %v10889_v55 }
 0x77e   :  { %20197 = vmatpush1.bf16.msra.mxu0 %v10886_v49 }
 0x77f   :  { %20199 = vmatprep.subr.bf16.mxu0 %v10891_v13  ;;  %v10916_v13 = vld [vmem:[#allocation2 + $0xa40] sm:$0xff] }
 0x780   :  { %19953 = vmatpush1.bf16.msra.mxu1 %v10888_v0  ;;  %v10918_v0 = vld [vmem:[#allocation2 + $0xa50] sm:$0xff] }
 0x781   :  { %19955 = vmatprep.subr.bf16.mxu1 %v10893_v33 }
 0x782   :  { %20201 = vmatpush1.bf16.msra.mxu0 %v10890_v27  ;;  %v10921_v27 = vld [vmem:[#allocation2 + $0xa68] sm:$0xff] }
 0x783   :  { %20203 = vmatprep.subr.bf16.mxu0 %v10895_v18  ;;  %v10923_v18 = vld [vmem:[#allocation2 + $0xa78] sm:$0xff] }
 0x784   :  { %19957 = vmatpush1.bf16.msra.mxu1 %v10892_v32 }
 0x785   :  { %19959 = vmatprep.subr.bf16.mxu1 %v10897_v51 }
 0x786   :  { %20205 = vmatpush1.bf16.msra.mxu0 %v10894_v17 }
 0x787   :  { %20207 = vmatprep.subr.bf16.mxu0 %v10899_v48  ;;  %v10920_v48 = vld [vmem:[#allocation2 + $0xa60] sm:$0xff] }
 0x788   :  { %19961 = vmatpush1.bf16.msra.mxu1 %v10896_v35  ;;  %v10922_v35 = vld [vmem:[#allocation2 + $0xa70] sm:$0xff] }
 0x789   :  { %19963 = vmatprep.subr.bf16.mxu1 %v10901_v31 }
 0x78a   :  { %20209 = vmatpush1.bf16.msra.mxu0 %v10898_v23  ;;  %v10925_v23 = vld [vmem:[#allocation2 + $0xa88] sm:$0xff] }
 0x78b   :  { %20211 = vmatprep.subr.bf16.mxu0 %v10903_v57  ;;  %v10927_v57 = vld [vmem:[#allocation2 + $0xa98] sm:$0xff] }
 0x7ee   :  { %v25956_v37 = vpop.f32.mrb[48].mxu1 }
 0x7ef   :  { %v25958_v63 = vpop.f32.mrb[49].mxu1 }
 0x7f0   :  { %v25960_v28 = vpop.f32.mrb[48].mxu0 }
 0x7f1   :  { %v25962_v5 = vpop.f32.mrb[49].mxu0 }
 0x7f2   :  { %v25964_v2 = vpop.f32.mrb[50].mxu1 }
 0x7f3   :  { %v25966_v19 = vpop.f32.mrb[51].mxu1 }
 0x7f4   :  { %v25968_v61 = vpop.f32.mrb[50].mxu0 }
 0x7f5   :  { %v25970_v41 = vpop.f32.mrb[51].mxu0 }
 0x7f6   :  { %v25972_v11 = vpop.f32.mrb[52].mxu1 }
 0x7f7   :  { %v25974_v46 = vpop.f32.mrb[53].mxu1 }
 0x7f8   :  { %v25976_v25 = vpop.f32.mrb[52].mxu0 }
 0x7f9   :  { %v25978_v50 = vpop.f32.mrb[53].mxu0 }
 0x7fa   :  { %v25980_v44 = vpop.f32.mrb[54].mxu1 }
 0x7fb   :  { %v25982_v7 = vpop.f32.mrb[55].mxu1 }
 0x7fc   :  { %v25984_v59 = vpop.f32.mrb[54].mxu0 }
 0x7fd   :  { %v25986_v52 = vpop.f32.mrb[55].mxu0 }
 0x7fe   :  { %v9633_v20 = vpop.f32.mrb[56].mxu1 }
 0x7ff   :  { %v9635_v15 = vpop.f32.mrb[57].mxu1 }
 0x800   :  { %11656 = vmatprep.mubr.f32.mxu1 %v9635_v15  ;;  %12012 = vmatprep.mubr.f32.mxu0 %v9635_v15  ;;  %v25988_v26 = vpop.f32.mrb[56].mxu0 }
 0x801   :  { %11657 = vmatmul.mubr.f32.vlgmr.msra.gmra.mrb[96].mxu1 %v9633_v20  ;;  %12013 = vmatmul.mubr.f32.vlgmr.msra.gmra.mrb[96].mxu0 %v9633_v20  ;;  %v9772_v40 = vpop.f32.mrb[57].mxu0 }
 0x802   :  { %19965 = vmatpush1.bf16.msra.mxu1 %v10900_v21  ;;  %20213 = vmatpush1.bf16.msra.mxu0 %v10902_v58  ;;  %v9639_v43 = vpop.f32.mrb[58].mxu1  ;;  %v10924_v58 = vld [vmem:[#allocation2 + $0xa80] sm:$0xff] }
 0x803   :  { %19967 = vmatprep.subr.bf16.mxu1 %v10905_v6  ;;  %20215 = vmatprep.subr.bf16.mxu0 %v10907_v38  ;;  %v9641_v56 = vpop.f32.mrb[59].mxu1  ;;  %v10926_v6 = vld [vmem:[#allocation2 + $0xa90] sm:$0xff] }
 0x804   :  { %11662 = vmatprep.mubr.f32.mxu1 %v9641_v56  ;;  %12018 = vmatprep.mubr.f32.mxu0 %v9641_v56  ;;  %v25990_v60 = vpop.f32.mrb[58].mxu0 }
 0x805   :  { %11663 = vmatmul.mubr.f32.gmra.mrb[98].mxu1 %v9639_v43  ;;  %12019 = vmatmul.mubr.f32.gmra.mrb[98].mxu0 %v9639_v43  ;;  %v25992_v8 = vpop.f32.mrb[59].mxu0  ;;  %v10931_v43 = vld [vmem:[#allocation2 + $0xab8] sm:$0xff] }
 0x806   :  { %19969 = vmatpush1.bf16.msra.mxu1 %v10904_v9  ;;  %20217 = vmatpush1.bf16.msra.mxu0 %v10906_v36  ;;  %v9645_v24 = vpop.f32.mrb[60].mxu1 }
 0x807   :  { %19971 = vmatprep.subr.bf16.mxu1 %v10909_v42  ;;  %20219 = vmatprep.subr.bf16.mxu0 %v10911_v47  ;;  %v9647_v53 = vpop.f32.mrb[61].mxu1  ;;  %v10928_v42 = vld [vmem:[#allocation2 + $0xaa0] sm:$0xff]  ;;  %v10930_v47 = vld [vmem:[#allocation2 + $0xab0] sm:$0xff] }
 0x808   :  { %11668 = vmatprep.mubr.f32.mxu1 %v9647_v53  ;;  %12024 = vmatprep.mubr.f32.mxu0 %v9647_v53  ;;  %v25994_v14 = vpop.f32.mrb[60].mxu0 }
 0x809   :  { %11669 = vmatmul.mubr.f32.gmra.mrb[100].mxu1 %v9645_v24  ;;  %12025 = vmatmul.mubr.f32.gmra.mrb[100].mxu0 %v9645_v24  ;;  %v25996_v4 = vpop.f32.mrb[61].mxu0 }
 0x80a   :  { %19973 = vmatpush1.bf16.msra.mxu1 %v10908_v39  ;;  %20221 = vmatpush1.bf16.msra.mxu0 %v10910_v3  ;;  %v9651_v45 = vpop.f32.mrb[62].mxu1  ;;  %v10933_v39 = vld [vmem:[#allocation2 + $0xac8] sm:$0xff]  ;;  %v10935_v3 = vld [vmem:[#allocation2 + $0xad8] sm:$0xff] }
 0x80b   :  { %19975 = vmatprep.subr.bf16.mxu1 %v10913_v29  ;;  %20223 = vmatprep.subr.bf16.mxu0 %v10915_v22  ;;  %v9653_v62 = vpop.f32.mrb[63].mxu1 }
 0x80c   :  { %11674 = vmatprep.mubr.f32.mxu1 %v9653_v62  ;;  %12030 = vmatprep.mubr.f32.mxu0 %v9653_v62  ;;  %v25998_v16 = vpop.f32.mrb[62].mxu0  ;;  %v10937_v62 = vld [vmem:[#allocation2 + $0xae8] sm:$0xff] }
 0x80d   :  { %11675 = vmatmul.mubr.f32.gmra.mrb[102].mxu1 %v9651_v45  ;;  %12031 = vmatmul.mubr.f32.gmra.mrb[102].mxu0 %v9651_v45  ;;  %v26000_v55 = vpop.f32.mrb[63].mxu0  ;;  %v10932_v45 = vld [vmem:[#allocation2 + $0xac0] sm:$0xff] }
 0x80e   :  { %19977 = vmatpush1.bf16.msra.mxu1 %v10912_v30  ;;  %20225 = vmatpush1.bf16.msra.mxu0 %v10914_v12  ;;  %v26002_v49 = vpop.f32.mrb[64].mxu1  ;;  %v10934_v30 = vld [vmem:[#allocation2 + $0xad0] sm:$0xff] }
 0x80f   :  { %27146 = vst [vmem:[#allocation40_spill] sm:$0xff] %v26002_v49  ;;  %19979 = vmatprep.subr.bf16.mxu1 %v10917_v34  ;;  %20227 = vmatprep.subr.bf16.mxu0 %v10919_v10  ;;  %v26004_v33 = vpop.f32.mrb[65].mxu1  ;;  %v10939_v34 = vld [vmem:[#allocation2 + $0xaf8] sm:$0xff] }
 0x810   :  { %27147 = vst [vmem:[#allocation22_spill] sm:$0xff] %v26004_v33  ;;  %11745 = vmatprep.mubr.f32.mxu1 %v9772_v40  ;;  %12101 = vmatprep.mubr.f32.mxu0 %v9772_v40  ;;  %v26006_v32 = vpop.f32.mrb[64].mxu0  ;;  %v10929_v40 = vld [vmem:[#allocation2 + $0xaa8] sm:$0xff]  ;;  %v10971_v49 = vld [vmem:[#allocation2 + $0xbf8] sm:$0xff] }
 0x811   :  { %27148 = vst [vmem:[#allocation28_spill] sm:$0xff] %v26006_v32  ;;  %v26008_v51 = vpop.f32.mrb[65].mxu0  ;;  %v10963_v32 = vld [vmem:[#allocation2 + $0xbb8] sm:$0xff]  ;;  %v10973_v33 = vld [vmem:[#allocation2 + $0xc08] sm:$0xff] }
 0x812   :  { %27149 = vst [vmem:[#allocation29_spill] sm:$0xff] %v26008_v51  ;;  %19981 = vmatpush1.bf16.msra.mxu1 %v10916_v13  ;;  %20229 = vmatpush1.bf16.msra.mxu0 %v10918_v0  ;;  %v26010_v17 = vpop.f32.mrb[66].mxu1 }
 0x813   :  { %27150 = vst [vmem:[#allocation47_spill] sm:$0xff] %v26010_v17  ;;  %19983 = vmatprep.subr.bf16.mxu1 %v10921_v27  ;;  %20231 = vmatprep.subr.bf16.mxu0 %v10923_v18  ;;  %v26012_v31 = vpop.f32.mrb[67].mxu1  ;;  %v10936_v27 = vld [vmem:[#allocation2 + $0xae0] sm:$0xff]  ;;  %v10938_v18 = vld [vmem:[#allocation2 + $0xaf0] sm:$0xff] }
 0x814   :  { %27151 = vst [vmem:[#allocation44_spill] sm:$0xff] %v26012_v31  ;;  %v26014_v20 = vpop.f32.mrb[66].mxu0  ;;  %v10969_v31 = vld [vmem:[#allocation2 + $0xbe8] sm:$0xff] }
 0x815   :  { %27152 = vst [vmem:[#allocation53_spill] sm:$0xff] %v26014_v20  ;;  %v26016_v15 = vpop.f32.mrb[67].mxu0 }
 0x816   :  { %27153 = vst [vmem:[#allocation23_spill] sm:$0xff] %v26016_v15  ;;  %19985 = vmatpush1.bf16.msra.mxu1 %v10920_v48  ;;  %20233 = vmatpush1.bf16.msra.mxu0 %v10922_v35  ;;  %v26018_v21 = vpop.f32.mrb[68].mxu1  ;;  %v10941_v35 = vld [vmem:[#allocation2 + $0xb08] sm:$0xff]  ;;  %v10958_v15 = vld [vmem:[#allocation2 + $0xb90] sm:$0xff] }
 0x817   :  { %27154 = vst [vmem:[#allocation30_spill] sm:$0xff] %v26018_v21  ;;  %19987 = vmatprep.subr.bf16.mxu1 %v10925_v23  ;;  %20235 = vmatprep.subr.bf16.mxu0 %v10927_v57  ;;  %v26020_v38 = vpop.f32.mrb[69].mxu1  ;;  %v10943_v23 = vld [vmem:[#allocation2 + $0xb18] sm:$0xff] }
 0x818   :  { %27155 = vst [vmem:[#allocation31_spill] sm:$0xff] %v26020_v38  ;;  %v26022_v9 = vpop.f32.mrb[68].mxu0  ;;  %v10967_v21 = vld [vmem:[#allocation2 + $0xbd8] sm:$0xff] }
 0x819   :  { %27156 = vst [vmem:[#allocation48_spill] sm:$0xff] %v26022_v9  ;;  %v26024_v36 = vpop.f32.mrb[69].mxu0  ;;  %v10957_v9 = vld [vmem:[#allocation2 + $0xb88] sm:$0xff] }
 0x81a   :  { %27157 = vst [vmem:[#allocation46_spill] sm:$0xff] %v26024_v36  ;;  %19989 = vmatpush1.bf16.msra.mxu1 %v10924_v58  ;;  %20237 = vmatpush1.bf16.msra.mxu0 %v10926_v6  ;;  %v26026_v56 = vpop.f32.mrb[70].mxu1  ;;  %v10940_v58 = vld [vmem:[#allocation2 + $0xb00] sm:$0xff]  ;;  %v10942_v6 = vld [vmem:[#allocation2 + $0xb10] sm:$0xff]  ;;  %v10959_v36 = vld [vmem:[#allocation2 + $0xb98] sm:$0xff] }
 0x81b   :  { %27158 = vst [vmem:[#allocation54_spill] sm:$0xff] %v26026_v56  ;;  %19991 = vmatprep.subr.bf16.mxu1 %v10929_v40  ;;  %20239 = vmatprep.subr.bf16.mxu0 %v10931_v43  ;;  %v26028_v24 = vpop.f32.mrb[71].mxu1 }
 0x81c   :  { %27159 = vst [vmem:[#allocation25_spill] sm:$0xff] %v26028_v24  ;;  %v26030_v53 = vpop.f32.mrb[70].mxu0  ;;  %v10962_v24 = vld [vmem:[#allocation2 + $0xbb0] sm:$0xff] }
 0x81d   :  { %27160 = vst [vmem:[#allocation32_spill] sm:$0xff] %v26030_v53  ;;  %v26032_v29 = vpop.f32.mrb[71].mxu0 }
 0x81e   :  { %27161 = vst [vmem:[#allocation33_spill] sm:$0xff] %v26032_v29  ;;  %19993 = vmatpush1.bf16.msra.mxu1 %v10928_v42  ;;  %20241 = vmatpush1.bf16.msra.mxu0 %v10930_v47  ;;  %v26034_v22 = vpop.f32.mrb[72].mxu1  ;;  %v10945_v42 = vld [vmem:[#allocation2 + $0xb28] sm:$0xff]  ;;  %v10947_v47 = vld [vmem:[#allocation2 + $0xb38] sm:$0xff]  ;;  %v10954_v29 = vld [vmem:[#allocation2 + $0xb70] sm:$0xff] }
 0x81f   :  { %19995 = vmatprep.subr.bf16.mxu1 %v10933_v39  ;;  %20243 = vmatprep.subr.bf16.mxu0 %v10935_v3  ;;  %v26036_v12 = vpop.f32.mrb[73].mxu1 }
 0x820   :  { %v26038_v10 = vpop.f32.mrb[72].mxu0 }
 0x821   :  { %v26040_v13 = vpop.f32.mrb[73].mxu0 }
 0x822   :  { %19997 = vmatpush1.bf16.msra.mxu1 %v10932_v45  ;;  %20245 = vmatpush1.bf16.msra.mxu0 %v10934_v30  ;;  %v26042_v0 = vpop.f32.mrb[74].mxu1  ;;  %v10944_v45 = vld [vmem:[#allocation2 + $0xb20] sm:$0xff]  ;;  %v10946_v30 = vld [vmem:[#allocation2 + $0xb30] sm:$0xff] }
 0x823   :  { %19999 = vmatprep.subr.bf16.mxu1 %v10937_v62  ;;  %20247 = vmatprep.subr.bf16.mxu0 %v10939_v34  ;;  %v26044_v48 = vpop.f32.mrb[75].mxu1 }
 0x824   :  { %v26050_v43 = vpop.f32.mrb[74].mxu0 }
 0x825   :  { %v26054_v3 = vpop.f32.mrb[75].mxu0 }
 0x826   :  { %20001 = vmatpush1.bf16.msra.mxu1 %v10936_v27  ;;  %20249 = vmatpush1.bf16.msra.mxu0 %v10938_v18  ;;  %v26046_v57 = vpop.f32.mrb[76].mxu1  ;;  %v10949_v27 = vld [vmem:[#allocation2 + $0xb48] sm:$0xff]  ;;  %v10951_v18 = vld [vmem:[#allocation2 + $0xb58] sm:$0xff] }
 0x827   :  { %20003 = vmatprep.subr.bf16.mxu1 %v10941_v35  ;;  %20251 = vmatprep.subr.bf16.mxu0 %v10943_v23  ;;  %v26048_v40 = vpop.f32.mrb[77].mxu1 }
 0x828   :  { %v26058_v34 = vpop.f32.mrb[76].mxu0 }
 0x829   :  { %v26062_v23 = vpop.f32.mrb[77].mxu0 }
 0x82a   :  { %20005 = vmatpush1.bf16.msra.mxu1 %v10940_v58  ;;  %20253 = vmatpush1.bf16.msra.mxu0 %v10942_v6  ;;  %v26052_v39 = vpop.f32.mrb[78].mxu1  ;;  %v10948_v58 = vld [vmem:[#allocation2 + $0xb40] sm:$0xff]  ;;  %v10950_v6 = vld [vmem:[#allocation2 + $0xb50] sm:$0xff] }
 0x82b   :  { %20007 = vmatprep.subr.bf16.mxu1 %v10945_v42  ;;  %20255 = vmatprep.subr.bf16.mxu0 %v10947_v47  ;;  %v26056_v62 = vpop.f32.mrb[79].mxu1 }
 0x82c   :  { %v26066_v47 = vpop.f32.mrb[78].mxu0 }
 0x82d   :  { %27162 = vst [vmem:[#allocation50_spill] sm:$0xff] %v26066_v47  ;;  %v10975_v47 = vld [vmem:[#allocation2 + $0xc18] sm:$0xff] }
 0x82e   :  { %20009 = vmatpush1.bf16.msra.mxu1 %v10944_v45  ;;  %20257 = vmatpush1.bf16.msra.mxu0 %v10946_v30  ;;  %v26060_v35 = vpop.f32.mrb[80].mxu1  ;;  %v26070_v45 = vpop.f32.mrb[79].mxu0  ;;  %v10952_v30 = vld [vmem:[#allocation2 + $0xb60] sm:$0xff] }
 0x82f   :  { %20011 = vmatprep.subr.bf16.mxu1 %v10949_v27  ;;  %20259 = vmatprep.subr.bf16.mxu0 %v10951_v18  ;;  %v26064_v42 = vpop.f32.mrb[81].mxu1 }
 0x830   :  { %v26074_v18 = vpop.f32.mrb[80].mxu0 }
 0x832   :  { %20013 = vmatpush1.bf16.msra.mxu1 %v10948_v58  ;;  %20261 = vmatpush1.bf16.msra.mxu0 %v10950_v6  ;;  %v26068_v53 = vpop.f32.mrb[82].mxu1  ;;  %v26078_v58 = vpop.f32.mrb[81].mxu0  ;;  %v10956_v6 = vld [vmem:[#allocation2 + $0xb80] sm:$0xff] }
 0x833   :  { %20015 = vmatprep.subr.bf16.mxu1 %v10953_v54  ;;  %20263 = vmatprep.subr.bf16.mxu0 %v10955_v1  ;;  %v26072_v27 = vpop.f32.mrb[83].mxu1  ;;  %v10961_v1 = vld [vmem:[#allocation2 + $0xba8] sm:$0xff] }
 0x834   :  { %v26082_v51 = vpop.f32.mrb[82].mxu0 }
 0x836   :  { %20017 = vmatpush1.bf16.msra.mxu1 %v10952_v30  ;;  %20265 = vmatpush1.bf16.msra.mxu0 %v10954_v29  ;;  %v26076_v20 = vpop.f32.mrb[84].mxu1  ;;  %v26086_v30 = vpop.f32.mrb[83].mxu0  ;;  %v10960_v29 = vld [vmem:[#allocation2 + $0xba0] sm:$0xff] }
 0x837   :  { %20019 = vmatprep.subr.bf16.mxu1 %v10957_v9  ;;  %20267 = vmatprep.subr.bf16.mxu0 %v10959_v36  ;;  %v26080_v54 = vpop.f32.mrb[85].mxu1  ;;  %v10965_v36 = vld [vmem:[#allocation2 + $0xbc8] sm:$0xff] }
 0x838   :  { %v26090_v38 = vpop.f32.mrb[84].mxu0 }
 0x839   :  { %v26092_v17 = vpop.f32.mrb[85].mxu0 }
 0x83a   :  { %20021 = vmatpush1.bf16.msra.mxu1 %v10956_v6  ;;  %20269 = vmatpush1.bf16.msra.mxu0 %v10958_v15  ;;  %v26084_v56 = vpop.f32.mrb[86].mxu1  ;;  %v10964_v15 = vld [vmem:[#allocation2 + $0xbc0] sm:$0xff]  ;;  %v10966_v6 = vld [vmem:[#allocation2 + $0xbd0] sm:$0xff] }
 0x83b   :  { %20023 = vmatprep.subr.bf16.mxu1 %v10961_v1  ;;  %20271 = vmatprep.subr.bf16.mxu0 %v10963_v32  ;;  %v26088_v9 = vpop.f32.mrb[87].mxu1 }
 0x83c   :  { %v26096_v32 = vpop.f32.mrb[86].mxu0 }
 0x83d   :  { %v26098_v1 = vpop.f32.mrb[87].mxu0 }
 0x83e   :  { %20025 = vmatpush1.bf16.msra.mxu1 %v10960_v29  ;;  %20273 = vmatpush1.bf16.msra.mxu0 %v10962_v24  ;;  %v26100_v29 = vpop.f32.mrb[88].mxu1  ;;  %v10968_v24 = vld [vmem:[#allocation2 + $0xbe0] sm:$0xff] }
 0x83f   :  { %20027 = vmatprep.subr.bf16.mxu1 %v10965_v36  ;;  %20275 = vmatprep.subr.bf16.mxu0 %v10967_v21  ;;  %27163 = vst [vmem:[#allocation49_spill] sm:$0xff] %v26100_v29  ;;  %v10970_v21 = vld [vmem:[#allocation2 + $0xbf0] sm:$0xff]  ;;  %v26102_v36 = vpop.f32.mrb[89].mxu1  ;;  %v10979_v29 = vld [vmem:[#allocation2 + $0xc38] sm:$0xff] }
 0x840   :  { %27164 = vst [vmem:[#allocation38_spill] sm:$0xff] %v26102_v36 }
 0x841   :  { %11746 = vmatmul.mubr.f32.vlgmr.msra.gmra.mrb[96].mxu1 %v25988_v26  ;;  %12102 = vmatmul.mubr.f32.vlgmr.msra.gmra.mrb[96].mxu0 %v25988_v26  ;;  %v10972_v26 = vld [vmem:[#allocation2 + $0xc00] sm:$0xff] }
 0x842   :  { %20029 = vmatpush1.bf16.msra.mxu1 %v10964_v15  ;;  %20277 = vmatpush1.bf16.msra.mxu0 %v10966_v6  ;;  %v26110_v15 = vpop.f32.mrb[90].mxu1  ;;  %v10977_v6 = vld [vmem:[#allocation2 + $0xc28] sm:$0xff] }
 0x843   :  { %20031 = vmatprep.subr.bf16.mxu1 %v10969_v31  ;;  %20279 = vmatprep.subr.bf16.mxu0 %v10971_v49  ;;  %v10974_v49 = vld [vmem:[#allocation2 + $0xc10] sm:$0xff]  ;;  %v26108_v31 = vpop.f32.mrb[88].mxu0  ;;  %v26116_v36 = vpop.f32.mrb[91].mxu1 }
 0x844   :  { %11751 = vmatprep.mubr.f32.mxu1 %v25992_v8  ;;  %12107 = vmatprep.mubr.f32.mxu0 %v25992_v8  ;;  %27165 = vst [vmem:[#allocation34_spill] sm:$0xff] %v26108_v31  ;;  %v26114_v8 = vpop.f32.mrb[89].mxu0 }
 0x845   :  { %11752 = vmatmul.mubr.f32.gmra.mrb[98].mxu1 %v25990_v60  ;;  %12108 = vmatmul.mubr.f32.gmra.mrb[98].mxu0 %v25990_v60  ;;  %27166 = vst [vmem:[#allocation35_spill] sm:$0xff] %v26114_v8  ;;  %v10976_v60 = vld [vmem:[#allocation2 + $0xc20] sm:$0xff] }
 0x846   :  { %20033 = vmatpush1.bf16.msra.mxu1 %v10968_v24  ;;  %20281 = vmatpush1.bf16.msra.mxu0 %v10970_v21  ;;  %v26122_v24 = vpop.f32.mrb[92].mxu1  ;;  %v10981_v21 = vld [vmem:[#allocation2 + $0xc48] sm:$0xff] }
 0x847   :  { %20035 = vmatprep.subr.bf16.mxu1 %v10973_v33  ;;  %20283 = vmatprep.subr.bf16.mxu0 %v10975_v47  ;;  %v10978_v33 = vld [vmem:[#allocation2 + $0xc30] sm:$0xff]  ;;  %v26120_v47 = vpop.f32.mrb[90].mxu0  ;;  %v26128_v8 = vpop.f32.mrb[93].mxu1 }
 0x848   :  { %11757 = vmatprep.mubr.f32.mxu1 %v25996_v4  ;;  %12113 = vmatprep.mubr.f32.mxu0 %v25996_v4  ;;  %27167 = vst [vmem:[#allocation51_spill] sm:$0xff] %v26120_v47  ;;  %v10983_v4 = vld [vmem:[#allocation2 + $0xc58] sm:$0xff]  ;;  %v26126_v31 = vpop.f32.mrb[91].mxu0 }
 0x849   :  { %11758 = vmatmul.mubr.f32.gmra.mrb[100].mxu1 %v25994_v14  ;;  %12114 = vmatmul.mubr.f32.gmra.mrb[100].mxu0 %v25994_v14  ;;  %27168 = vst [vmem:[#allocation52_spill] sm:$0xff] %v26126_v31  ;;  %v10980_v14 = vld [vmem:[#allocation2 + $0xc40] sm:$0xff] }
 0x84a   :  { %20037 = vmatpush1.bf16.msra.mxu1 %v10972_v26  ;;  %20285 = vmatpush1.bf16.msra.mxu0 %v10974_v49  ;;  %v26132_v26 = vpop.f32.mrb[92].mxu0  ;;  %v26134_v49 = vpop.f32.mrb[94].mxu1 }
 0x84b   :  { %20039 = vmatprep.subr.bf16.mxu1 %v10977_v6  ;;  %20287 = vmatprep.subr.bf16.mxu0 %v10979_v29  ;;  %v10982_v29 = vld [vmem:[#allocation2 + $0xc50] sm:$0xff]  ;;  %27169 = vst [vmem:[#allocation37_spill] sm:$0xff] %v26132_v26  ;;  %27170 = vst [vmem:[#allocation55_spill] sm:$0xff] %v26134_v49  ;;  %v10985_v6 = vld [vmem:[#allocation2 + $0xc68] sm:$0xff]  ;;  %v26138_v47 = vpop.f32.mrb[93].mxu0  ;;  %v26140_v31 = vpop.f32.mrb[95].mxu1 }
 0x84c   :  { %11763 = vmatprep.mubr.f32.mxu1 %v26000_v55  ;;  %12119 = vmatprep.mubr.f32.mxu0 %v26000_v55  ;;  %v10987_v55 = vld [vmem:[#allocation2 + $0xc78] sm:$0xff]  ;;  %27171 = vst [vmem:[#allocation57_spill] sm:$0xff] %v26138_v47  ;;  %27172 = vst [vmem:[#allocation58_spill] sm:$0xff] %v26140_v31  ;;  %v10990_v47 = vld [vmem:[#allocation2 + $0xc90] sm:$0xff] }
 0x84d   :  { %11764 = vmatmul.mubr.f32.gmra.mrb[102].mxu1 %v25998_v16  ;;  %12120 = vmatmul.mubr.f32.gmra.mrb[102].mxu0 %v25998_v16  ;;  %v10984_v16 = vld [vmem:[#allocation2 + $0xc60] sm:$0xff]  ;;  %v10993_v49 = vld [vmem:[#allocation2 + $0xca8] sm:$0xff]  ;;  %v10995_v31 = vld [vmem:[#allocation2 + $0xcb8] sm:$0xff] }
 0x84e   :  { %20041 = vmatpush1.bf16.msra.mxu1 %v10976_v60  ;;  %20289 = vmatpush1.bf16.msra.mxu0 %v10978_v33  ;;  %v10986_v60 = vld [vmem:[#allocation2 + $0xc70] sm:$0xff]  ;;  %v26142_v33 = vpop.f32.mrb[94].mxu0 }
 0x84f   :  { %20043 = vmatprep.subr.bf16.mxu1 %v10981_v21  ;;  %20291 = vmatprep.subr.bf16.mxu0 %v10983_v4  ;;  %v10989_v21 = vld [vmem:[#allocation2 + $0xc88] sm:$0xff]  ;;  %v10991_v4 = vld [vmem:[#allocation2 + $0xc98] sm:$0xff]  ;;  %v26144_v26 = vpop.f32.mrb[95].mxu0 }
 0x850   :  { %11834 = vmatprep.mubr.f32.mxu1 %v26064_v42  ;;  %12190 = vmatprep.mubr.f32.mxu0 %v26064_v42  ;;  %v10988_v42 = vld [vmem:[#allocation2 + $0xc80] sm:$0xff] }
 0x852   :  { %20045 = vmatpush1.bf16.msra.mxu1 %v10980_v14  ;;  %20293 = vmatpush1.bf16.msra.mxu0 %v10982_v29  ;;  %v10992_v14 = vld [vmem:[#allocation2 + $0xca0] sm:$0xff]  ;;  %v10994_v29 = vld [vmem:[#allocation2 + $0xcb0] sm:$0xff] }
 0x853   :  { %20047 = vmatprep.subr.bf16.mxu1 %v10985_v6  ;;  %20295 = vmatprep.subr.bf16.mxu0 %v10987_v55  ;;  %v10997_v6 = vld [vmem:[#allocation2 + $0xcc8] sm:$0xff]  ;;  %v10999_v55 = vld [vmem:[#allocation2 + $0xcd8] sm:$0xff] }
 0x856   :  { %20049 = vmatpush1.bf16.msra.mxu1 %v10984_v16  ;;  %20297 = vmatpush1.bf16.msra.mxu0 %v10986_v60  ;;  %v10996_v16 = vld [vmem:[#allocation2 + $0xcc0] sm:$0xff]  ;;  %v10998_v60 = vld [vmem:[#allocation2 + $0xcd0] sm:$0xff] }
 0x857   :  { %20051 = vmatprep.subr.bf16.mxu1 %v10989_v21  ;;  %20299 = vmatprep.subr.bf16.mxu0 %v10991_v4  ;;  %v11001_v21 = vld [vmem:[#allocation2 + $0xce8] sm:$0xff]  ;;  %v11003_v4 = vld [vmem:[#allocation2 + $0xcf8] sm:$0xff] }
 0x85a   :  { %20053 = vmatpush1.bf16.msra.mxu1 %v10988_v42  ;;  %20301 = vmatpush1.bf16.msra.mxu0 %v10990_v47  ;;  %v11000_v42 = vld [vmem:[#allocation2 + $0xce0] sm:$0xff]  ;;  %v11002_v47 = vld [vmem:[#allocation2 + $0xcf0] sm:$0xff] }
 0x85b   :  { %20055 = vmatprep.subr.bf16.mxu1 %v10993_v49  ;;  %20303 = vmatprep.subr.bf16.mxu0 %v10995_v31  ;;  %v11005_v49 = vld [vmem:[#allocation2 + $0xd08] sm:$0xff]  ;;  %v11007_v31 = vld [vmem:[#allocation2 + $0xd18] sm:$0xff] }
 0x85e   :  { %20057 = vmatpush1.bf16.msra.mxu1 %v10992_v14  ;;  %20305 = vmatpush1.bf16.msra.mxu0 %v10994_v29  ;;  %v11004_v14 = vld [vmem:[#allocation2 + $0xd00] sm:$0xff]  ;;  %v11006_v29 = vld [vmem:[#allocation2 + $0xd10] sm:$0xff] }
 0x85f   :  { %20059 = vmatprep.subr.bf16.mxu1 %v10997_v6  ;;  %20307 = vmatprep.subr.bf16.mxu0 %v10999_v55  ;;  %v11009_v6 = vld [vmem:[#allocation2 + $0xd28] sm:$0xff]  ;;  %v11011_v55 = vld [vmem:[#allocation2 + $0xd38] sm:$0xff] }
 0x862   :  { %20061 = vmatpush1.bf16.msra.mxu1 %v10996_v16  ;;  %20309 = vmatpush1.bf16.msra.mxu0 %v10998_v60  ;;  %v11008_v16 = vld [vmem:[#allocation2 + $0xd20] sm:$0xff]  ;;  %v11010_v60 = vld [vmem:[#allocation2 + $0xd30] sm:$0xff] }
 0x863   :  { %20063 = vmatprep.subr.bf16.mxu1 %v11001_v21  ;;  %20311 = vmatprep.subr.bf16.mxu0 %v11003_v4  ;;  %v11013_v21 = vld [vmem:[#allocation2 + $0xd48] sm:$0xff]  ;;  %v11015_v4 = vld [vmem:[#allocation2 + $0xd58] sm:$0xff] }
 0x866   :  { %20065 = vmatpush1.bf16.msra.mxu1 %v11000_v42  ;;  %20313 = vmatpush1.bf16.msra.mxu0 %v11002_v47  ;;  %v11012_v42 = vld [vmem:[#allocation2 + $0xd40] sm:$0xff]  ;;  %v11014_v47 = vld [vmem:[#allocation2 + $0xd50] sm:$0xff] }
 0x867   :  { %20067 = vmatprep.subr.bf16.mxu1 %v11005_v49  ;;  %20315 = vmatprep.subr.bf16.mxu0 %v11007_v31  ;;  %v11017_v49 = vld [vmem:[#allocation2 + $0xd68] sm:$0xff]  ;;  %v11019_v31 = vld [vmem:[#allocation2 + $0xd78] sm:$0xff] }
 0x86a   :  { %20069 = vmatpush1.bf16.msra.mxu1 %v11004_v14  ;;  %20317 = vmatpush1.bf16.msra.mxu0 %v11006_v29  ;;  %v11016_v14 = vld [vmem:[#allocation2 + $0xd60] sm:$0xff]  ;;  %v11018_v29 = vld [vmem:[#allocation2 + $0xd70] sm:$0xff] }
 0x86b   :  { %20071 = vmatprep.subr.bf16.mxu1 %v11009_v6  ;;  %20319 = vmatprep.subr.bf16.mxu0 %v11011_v55  ;;  %v11021_v6 = vld [vmem:[#allocation2 + $0xd88] sm:$0xff]  ;;  %v11023_v55 = vld [vmem:[#allocation2 + $0xd98] sm:$0xff] }
 0x86e   :  { %20073 = vmatpush1.bf16.msra.mxu1 %v11008_v16  ;;  %20321 = vmatpush1.bf16.msra.mxu0 %v11010_v60  ;;  %v11020_v16 = vld [vmem:[#allocation2 + $0xd80] sm:$0xff]  ;;  %v11022_v60 = vld [vmem:[#allocation2 + $0xd90] sm:$0xff] }
 0x86f   :  { %20075 = vmatprep.subr.bf16.mxu1 %v11013_v21  ;;  %20323 = vmatprep.subr.bf16.mxu0 %v11015_v4  ;;  %v11025_v21 = vld [vmem:[#allocation2 + $0xda8] sm:$0xff]  ;;  %v11027_v4 = vld [vmem:[#allocation2 + $0xdb8] sm:$0xff] }
 0x872   :  { %20077 = vmatpush1.bf16.msra.mxu1 %v11012_v42  ;;  %20325 = vmatpush1.bf16.msra.mxu0 %v11014_v47  ;;  %v11024_v42 = vld [vmem:[#allocation2 + $0xda0] sm:$0xff]  ;;  %v11026_v47 = vld [vmem:[#allocation2 + $0xdb0] sm:$0xff] }
 0x873   :  { %20079 = vmatprep.subr.bf16.mxu1 %v11017_v49  ;;  %20327 = vmatprep.subr.bf16.mxu0 %v11019_v31  ;;  %v11029_v49 = vld [vmem:[#allocation2 + $0xdc8] sm:$0xff]  ;;  %v11031_v31 = vld [vmem:[#allocation2 + $0xdd8] sm:$0xff] }
 0x876   :  { %20081 = vmatpush1.bf16.msra.mxu1 %v11016_v14  ;;  %20329 = vmatpush1.bf16.msra.mxu0 %v11018_v29  ;;  %v11028_v14 = vld [vmem:[#allocation2 + $0xdc0] sm:$0xff]  ;;  %v11030_v29 = vld [vmem:[#allocation2 + $0xdd0] sm:$0xff] }
 0x877   :  { %20083 = vmatprep.subr.bf16.mxu1 %v11021_v6  ;;  %20331 = vmatprep.subr.bf16.mxu0 %v11023_v55  ;;  %v11033_v6 = vld [vmem:[#allocation2 + $0xde8] sm:$0xff]  ;;  %v11035_v55 = vld [vmem:[#allocation2 + $0xdf8] sm:$0xff] }
 0x87a   :  { %20085 = vmatpush1.bf16.msra.mxu1 %v11020_v16  ;;  %20333 = vmatpush1.bf16.msra.mxu0 %v11022_v60  ;;  %v11032_v16 = vld [vmem:[#allocation2 + $0xde0] sm:$0xff]  ;;  %v11034_v60 = vld [vmem:[#allocation2 + $0xdf0] sm:$0xff] }
 0x87b   :  { %20087 = vmatprep.subr.bf16.mxu1 %v11025_v21  ;;  %20335 = vmatprep.subr.bf16.mxu0 %v11027_v4  ;;  %v11037_v21 = vld [vmem:[#allocation2 + $0xe08] sm:$0xff]  ;;  %v11039_v4 = vld [vmem:[#allocation2 + $0xe18] sm:$0xff] }
 0x87e   :  { %20089 = vmatpush1.bf16.msra.mxu1 %v11024_v42  ;;  %20337 = vmatpush1.bf16.msra.mxu0 %v11026_v47  ;;  %v11038_v42 = vld [vmem:[#allocation2 + $0xe10] sm:$0xff]  ;;  %v11041_v47 = vld [vmem:[#allocation2 + $0xe28] sm:$0xff] }
 0x87f   :  { %20091 = vmatprep.subr.bf16.mxu1 %v11029_v49  ;;  %20339 = vmatprep.subr.bf16.mxu0 %v11031_v31  ;;  %v11043_v49 = vld [vmem:[#allocation2 + $0xe38] sm:$0xff]  ;;  %v11045_v31 = vld [vmem:[#allocation2 + $0xe48] sm:$0xff] }
 0x881   :  { %11835 = vmatmul.mubr.f32.vlgmr.msra.gmra.mrb[96].mxu1 %v26060_v35  ;;  %12191 = vmatmul.mubr.f32.vlgmr.msra.gmra.mrb[96].mxu0 %v26060_v35  ;;  %v11036_v35 = vld [vmem:[#allocation2 + $0xe00] sm:$0xff] }
 0x882   :  { %20093 = vmatpush1.bf16.msra.mxu1 %v11028_v14  ;;  %20341 = vmatpush1.bf16.msra.mxu0 %v11030_v29  ;;  %v11047_v14 = vld [vmem:[#allocation2 + $0xe58] sm:$0xff]  ;;  %v11049_v29 = vld [vmem:[#allocation2 + $0xe68] sm:$0xff] }
 0x883   :  { %20095 = vmatprep.subr.bf16.mxu1 %v11033_v6  ;;  %20343 = vmatprep.subr.bf16.mxu0 %v11035_v55  ;;  %v11051_v6 = vld [vmem:[#allocation2 + $0xe78] sm:$0xff]  ;;  %v11053_v55 = vld [vmem:[#allocation2 + $0xe88] sm:$0xff] }
 0x884   :  { %11840 = vmatprep.mubr.f32.mxu1 %v26072_v27  ;;  %12196 = vmatprep.mubr.f32.mxu0 %v26072_v27  ;;  %v11042_v27 = vld [vmem:[#allocation2 + $0xe30] sm:$0xff] }
 0x885   :  { %11841 = vmatmul.mubr.f32.gmra.mrb[98].mxu1 %v26068_v53  ;;  %12197 = vmatmul.mubr.f32.gmra.mrb[98].mxu0 %v26068_v53  ;;  %v11040_v53 = vld [vmem:[#allocation2 + $0xe20] sm:$0xff] }
 0x886   :  { %20097 = vmatpush1.bf16.msra.mxu1 %v11032_v16  ;;  %20345 = vmatpush1.bf16.msra.mxu0 %v11034_v60  ;;  %v11055_v16 = vld [vmem:[#allocation2 + $0xe98] sm:$0xff]  ;;  %v11052_v60 = vld [vmem:[#allocation2 + $0xe80] sm:$0xff] }
 0x887   :  { %20099 = vmatprep.subr.bf16.mxu1 %v11037_v21  ;;  %20347 = vmatprep.subr.bf16.mxu0 %v11039_v4  ;;  %v11054_v21 = vld [vmem:[#allocation2 + $0xe90] sm:$0xff]  ;;  %v11057_v4 = vld [vmem:[#allocation2 + $0xea8] sm:$0xff] }
 0x888   :  { %11846 = vmatprep.mubr.f32.mxu1 %v26080_v54  ;;  %12202 = vmatprep.mubr.f32.mxu0 %v26080_v54  ;;  %v11046_v54 = vld [vmem:[#allocation2 + $0xe50] sm:$0xff] }
 0x889   :  { %11847 = vmatmul.mubr.f32.gmra.mrb[100].mxu1 %v26076_v20  ;;  %12203 = vmatmul.mubr.f32.gmra.mrb[100].mxu0 %v26076_v20  ;;  %v11044_v20 = vld [vmem:[#allocation2 + $0xe40] sm:$0xff] }
 0x88a   :  { %20101 = vmatpush1.bf16.msra.mxu1 %v11036_v35  ;;  %20349 = vmatpush1.bf16.msra.mxu0 %v11038_v42  ;;  %v11059_v35 = vld [vmem:[#allocation2 + $0xeb8] sm:$0xff]  ;;  %v11058_v42 = vld [vmem:[#allocation2 + $0xeb0] sm:$0xff] }
 0x88b   :  { %20103 = vmatprep.subr.bf16.mxu1 %v11041_v47  ;;  %20351 = vmatprep.subr.bf16.mxu0 %v11043_v49  ;;  %v11061_v47 = vld [vmem:[#allocation2 + $0xec8] sm:$0xff]  ;;  %v11063_v49 = vld [vmem:[#allocation2 + $0xed8] sm:$0xff] }
 0x88c   :  { %11852 = vmatprep.mubr.f32.mxu1 %v26088_v9  ;;  %12208 = vmatprep.mubr.f32.mxu0 %v26088_v9  ;;  %v11048_v9 = vld [vmem:[#allocation2 + $0xe60] sm:$0xff] }
 0x88d   :  { %11853 = vmatmul.mubr.f32.gmra.mrb[102].mxu1 %v26084_v56  ;;  %12209 = vmatmul.mubr.f32.gmra.mrb[102].mxu0 %v26084_v56  ;;  %v11050_v56 = vld [vmem:[#allocation2 + $0xe70] sm:$0xff] }
 0x88e   :  { %20105 = vmatpush1.bf16.msra.mxu1 %v11040_v53  ;;  %20353 = vmatpush1.bf16.msra.mxu0 %v11042_v27  ;;  %v11060_v53 = vld [vmem:[#allocation2 + $0xec0] sm:$0xff]  ;;  %v11062_v27 = vld [vmem:[#allocation2 + $0xed0] sm:$0xff] }
 0x88f   :  { %20107 = vmatprep.subr.bf16.mxu1 %v11045_v31  ;;  %20355 = vmatprep.subr.bf16.mxu0 %v11047_v14  ;;  %v11065_v31 = vld [vmem:[#allocation2 + $0xee8] sm:$0xff]  ;;  %v11067_v14 = vld [vmem:[#allocation2 + $0xef8] sm:$0xff] }
 0x890   :  { %17742 = vmatprep.mubr.msk.f32.mxu1 %vm8498_vm3, %v26078_v58  ;;  %17746 = vmatprep.mubr.msk.f32.mxu0 %vm8498_vm3, %v26078_v58  ;;  %v11056_v58 = vld [vmem:[#allocation2 + $0xea0] sm:$0xff] }
 0x892   :  { %20109 = vmatpush1.bf16.msra.mxu1 %v11044_v20  ;;  %20357 = vmatpush1.bf16.msra.mxu0 %v11046_v54  ;;  %v11064_v20 = vld [vmem:[#allocation2 + $0xee0] sm:$0xff]  ;;  %v11066_v54 = vld [vmem:[#allocation2 + $0xef0] sm:$0xff] }
 0x893   :  { %20111 = vmatprep.subr.bf16.mxu1 %v11049_v29  ;;  %20359 = vmatprep.subr.bf16.mxu0 %v11051_v6  ;;  %v11069_v29 = vld [vmem:[#allocation2 + $0xf08] sm:$0xff]  ;;  %v11071_v6 = vld [vmem:[#allocation2 + $0xf18] sm:$0xff] }
 0x896   :  { %20113 = vmatpush1.bf16.msra.mxu1 %v11048_v9  ;;  %20361 = vmatpush1.bf16.msra.mxu0 %v11050_v56  ;;  %v11068_v9 = vld [vmem:[#allocation2 + $0xf00] sm:$0xff]  ;;  %v11070_v56 = vld [vmem:[#allocation2 + $0xf10] sm:$0xff] }
 0x897   :  { %20115 = vmatprep.subr.bf16.mxu1 %v11053_v55  ;;  %20363 = vmatprep.subr.bf16.mxu0 %v11055_v16  ;;  %v11073_v55 = vld [vmem:[#allocation2 + $0xf28] sm:$0xff]  ;;  %v11075_v16 = vld [vmem:[#allocation2 + $0xf38] sm:$0xff] }
 0x89a   :  { %20117 = vmatpush1.bf16.msra.mxu1 %v11052_v60  ;;  %20365 = vmatpush1.bf16.msra.mxu0 %v11054_v21  ;;  %v11072_v60 = vld [vmem:[#allocation2 + $0xf20] sm:$0xff]  ;;  %v11074_v21 = vld [vmem:[#allocation2 + $0xf30] sm:$0xff] }
 0x89b   :  { %20119 = vmatprep.subr.bf16.mxu1 %v11057_v4  ;;  %20367 = vmatprep.subr.bf16.mxu0 %v11059_v35  ;;  %v11077_v4 = vld [vmem:[#allocation2 + $0xf48] sm:$0xff]  ;;  %v11079_v35 = vld [vmem:[#allocation2 + $0xf58] sm:$0xff] }
 0x89e   :  { %20121 = vmatpush1.bf16.msra.mxu1 %v11056_v58  ;;  %20369 = vmatpush1.bf16.msra.mxu0 %v11058_v42  ;;  %v11076_v58 = vld [vmem:[#allocation2 + $0xf40] sm:$0xff]  ;;  %v11078_v42 = vld [vmem:[#allocation2 + $0xf50] sm:$0xff] }
 0x89f   :  { %20123 = vmatprep.subr.bf16.mxu1 %v11061_v47  ;;  %20371 = vmatprep.subr.bf16.mxu0 %v11063_v49  ;;  %v11081_v47 = vld [vmem:[#allocation2 + $0xf68] sm:$0xff]  ;;  %v11083_v49 = vld [vmem:[#allocation2 + $0xf78] sm:$0xff] }
 0x8a2   :  { %20125 = vmatpush1.bf16.msra.mxu1 %v11060_v53  ;;  %20373 = vmatpush1.bf16.msra.mxu0 %v11062_v27  ;;  %v11080_v53 = vld [vmem:[#allocation2 + $0xf60] sm:$0xff]  ;;  %v11082_v27 = vld [vmem:[#allocation2 + $0xf70] sm:$0xff] }
 0x8a3   :  { %20127 = vmatprep.subr.bf16.mxu1 %v11065_v31  ;;  %20375 = vmatprep.subr.bf16.mxu0 %v11067_v14  ;;  %v10092_v31 = vld [vmem:[#allocation2 + $0x8] sm:$0xff]  ;;  %v10094_v14 = vld [vmem:[#allocation2 + $0x18] sm:$0xff] }
 0x8a6   :  { %20129 = vmatpush1.bf16.msra.mxu1 %v11064_v20  ;;  %20377 = vmatpush1.bf16.msra.mxu0 %v11066_v54  ;;  %v10091_v20 = vld [vmem:[#allocation2] sm:$0xff]  ;;  %v10093_v54 = vld [vmem:[#allocation2 + $0x10] sm:$0xff] }
 0x8a7   :  { %20131 = vmatprep.subr.bf16.mxu1 %v11069_v29  ;;  %20379 = vmatprep.subr.bf16.mxu0 %v11071_v6  ;;  %v10096_v29 = vld [vmem:[#allocation2 + $0x28] sm:$0xff]  ;;  %v10098_v6 = vld [vmem:[#allocation2 + $0x38] sm:$0xff] }
 0x8aa   :  { %20133 = vmatpush1.bf16.msra.mxu1 %v11068_v9  ;;  %20381 = vmatpush1.bf16.msra.mxu0 %v11070_v56  ;;  %v10095_v9 = vld [vmem:[#allocation2 + $0x20] sm:$0xff]  ;;  %v10097_v56 = vld [vmem:[#allocation2 + $0x30] sm:$0xff] }
 0x8ab   :  { %20135 = vmatprep.subr.bf16.mxu1 %v11073_v55  ;;  %20383 = vmatprep.subr.bf16.mxu0 %v11075_v16  ;;  %v10100_v55 = vld [vmem:[#allocation2 + $0x48] sm:$0xff]  ;;  %v10099_v16 = vld [vmem:[#allocation2 + $0x40] sm:$0xff] }
 0x8ae   :  { %20137 = vmatpush1.bf16.msra.mxu1 %v11072_v60  ;;  %20385 = vmatpush1.bf16.msra.mxu0 %v11074_v21  ;;  %v10104_v60 = vld [vmem:[#allocation2 + $0x68] sm:$0xff]  ;;  %v10103_v21 = vld [vmem:[#allocation2 + $0x60] sm:$0xff] }
 0x8af   :  { %20139 = vmatprep.subr.bf16.mxu1 %v11077_v4  ;;  %20387 = vmatprep.subr.bf16.mxu0 %v11079_v35  ;;  %v10108_v4 = vld [vmem:[#allocation2 + $0x88] sm:$0xff]  ;;  %v10107_v35 = vld [vmem:[#allocation2 + $0x80] sm:$0xff] }
 0x8b2   :  { %20141 = vmatpush1.bf16.msra.mxu1 %v11076_v58  ;;  %20389 = vmatpush1.bf16.msra.mxu0 %v11078_v42  ;;  %v10112_v58 = vld [vmem:[#allocation2 + $0xa8] sm:$0xff]  ;;  %v10114_v42 = vld [vmem:[#allocation2 + $0xb8] sm:$0xff] }
 0x8b3   :  { %20143 = vmatprep.subr.bf16.mxu1 %v11081_v47  ;;  %20391 = vmatprep.subr.bf16.mxu0 %v11083_v49  ;;  %v10111_v47 = vld [vmem:[#allocation2 + $0xa0] sm:$0xff]  ;;  %v10116_v49 = vld [vmem:[#allocation2 + $0xc8] sm:$0xff] }
 0x8b6   :  { %20145 = vmatpush1.bf16.msra.mxu1 %v11080_v53  ;;  %20393 = vmatpush1.bf16.msra.mxu0 %v11082_v27  ;;  %v10118_v53 = vld [vmem:[#allocation2 + $0xd8] sm:$0xff]  ;;  %v10115_v27 = vld [vmem:[#allocation2 + $0xc0] sm:$0xff] }
 0x8b7   :  { %20395 = vmatprep.subr.bf16.mxu1 %v10092_v31  ;;  %20643 = vmatprep.subr.bf16.mxu0 %v10094_v14  ;;  %v10120_v31 = vld [vmem:[#allocation2 + $0xe8] sm:$0xff]  ;;  %v10122_v14 = vld [vmem:[#allocation2 + $0xf8] sm:$0xff] }
 0x8b9   :  { %11924 = vmatmul.mubr.f32.vlgmr.msra.gmra.mrb[96].mxu1 %v26074_v18  ;;  %12280 = vmatmul.mubr.f32.vlgmr.msra.gmra.mrb[96].mxu0 %v26074_v18  ;;  %v10102_v18 = vld [vmem:[#allocation2 + $0x58] sm:$0xff] }
 0x8ba   :  { %20397 = vmatpush1.bf16.msra.mxu1 %v10091_v20  ;;  %20645 = vmatpush1.bf16.msra.mxu0 %v10093_v54  ;;  %v10119_v20 = vld [vmem:[#allocation2 + $0xe0] sm:$0xff]  ;;  %v10121_v54 = vld [vmem:[#allocation2 + $0xf0] sm:$0xff] }
 0x8bb   :  { %17743 = vmatprep.mubr.msk.f32.mxu1 %vm8498_vm3, %v26086_v30  ;;  %17747 = vmatprep.mubr.msk.f32.mxu0 %vm8498_vm3, %v26086_v30  ;;  %v10101_v30 = vld [vmem:[#allocation2 + $0x50] sm:$0xff] }
 0x8bc   :  { %20399 = vmatprep.subr.bf16.mxu1 %v10096_v29  ;;  %20647 = vmatprep.subr.bf16.mxu0 %v10098_v6  ;;  %v10124_v29 = vld [vmem:[#allocation2 + $0x108] sm:$0xff]  ;;  %v10126_v6 = vld [vmem:[#allocation2 + $0x118] sm:$0xff] }
 0x8bd   :  { %11930 = vmatmul.mubr.f32.gmra.mrb[98].mxu1 %v26082_v51  ;;  %12286 = vmatmul.mubr.f32.gmra.mrb[98].mxu0 %v26082_v51  ;;  %v10106_v51 = vld [vmem:[#allocation2 + $0x78] sm:$0xff] }
 0x8be   :  { %20401 = vmatpush1.bf16.msra.mxu1 %v10095_v9  ;;  %20649 = vmatpush1.bf16.msra.mxu0 %v10097_v56  ;;  %v10123_v9 = vld [vmem:[#allocation2 + $0x100] sm:$0xff]  ;;  %v10125_v56 = vld [vmem:[#allocation2 + $0x110] sm:$0xff] }
 0x8bf   :  { %17744 = vmatprep.mubr.msk.f32.mxu1 %vm8498_vm3, %v26092_v17  ;;  %17748 = vmatprep.mubr.msk.f32.mxu0 %vm8498_vm3, %v26092_v17  ;;  %v10105_v17 = vld [vmem:[#allocation2 + $0x70] sm:$0xff] }
 0x8c0   :  { %20403 = vmatprep.subr.bf16.mxu1 %v10100_v55  ;;  %20651 = vmatprep.subr.bf16.mxu0 %v10102_v18  ;;  %v10128_v55 = vld [vmem:[#allocation2 + $0x128] sm:$0xff]  ;;  %v10130_v18 = vld [vmem:[#allocation2 + $0x138] sm:$0xff] }
 0x8c1   :  { %11936 = vmatmul.mubr.f32.gmra.mrb[100].mxu1 %v26090_v38  ;;  %12292 = vmatmul.mubr.f32.gmra.mrb[100].mxu0 %v26090_v38  ;;  %v10110_v38 = vld [vmem:[#allocation2 + $0x98] sm:$0xff] }
 0x8c2   :  { %20405 = vmatpush1.bf16.msra.mxu1 %v10099_v16  ;;  %20653 = vmatpush1.bf16.msra.mxu0 %v10101_v30  ;;  %v10127_v16 = vld [vmem:[#allocation2 + $0x120] sm:$0xff]  ;;  %v10129_v30 = vld [vmem:[#allocation2 + $0x130] sm:$0xff] }
 0x8c3   :  { %17745 = vmatprep.mubr.msk.f32.mxu1 %vm8498_vm3, %v26098_v1  ;;  %17749 = vmatprep.mubr.msk.f32.mxu0 %vm8498_vm3, %v26098_v1  ;;  %v10109_v1 = vld [vmem:[#allocation2 + $0x90] sm:$0xff] }
 0x8c4   :  { %20407 = vmatprep.subr.bf16.mxu1 %v10104_v60  ;;  %20655 = vmatprep.subr.bf16.mxu0 %v10106_v51  ;;  %v10132_v60 = vld [vmem:[#allocation2 + $0x148] sm:$0xff]  ;;  %v10134_v51 = vld [vmem:[#allocation2 + $0x158] sm:$0xff] }
 0x8c5   :  { %11942 = vmatmul.mubr.f32.gmra.mrb[102].mxu1 %v26096_v32  ;;  %12298 = vmatmul.mubr.f32.gmra.mrb[102].mxu0 %v26096_v32  ;;  %v10113_v32 = vld [vmem:[#allocation2 + $0xb0] sm:$0xff] }
 0x8c6   :  { %20409 = vmatpush1.bf16.msra.mxu1 %v10103_v21  ;;  %12380 = vmatprep.mubr.f32.mxu1 %v25958_v63  ;;  %v10131_v21 = vld [vmem:[#allocation2 + $0x140] sm:$0xff] }
 0x8c7   :  { %20657 = vmatpush1.bf16.msra.mxu0 %v10105_v17  ;;  %12736 = vmatprep.mubr.f32.mxu0 %v25958_v63  ;;  %v10117_v63 = vld [vmem:[#allocation2 + $0xd0] sm:$0xff] }
 0x8c8   :  { %20411 = vmatprep.subr.bf16.mxu1 %v10108_v4  ;;  %20659 = vmatprep.subr.bf16.mxu0 %v10110_v38  ;;  %v10133_v17 = vld [vmem:[#allocation2 + $0x150] sm:$0xff]  ;;  %v10136_v4 = vld [vmem:[#allocation2 + $0x168] sm:$0xff]  ;;  %v10138_v38 = vld [vmem:[#allocation2 + $0x178] sm:$0xff] }
 0x8ca   :  { %20413 = vmatpush1.bf16.msra.mxu1 %v10107_v35  ;;  %v10135_v35 = vld [vmem:[#allocation2 + $0x160] sm:$0xff] }
 0x8cb   :  { %20661 = vmatpush1.bf16.msra.mxu0 %v10109_v1  ;;  %20415 = vmatprep.subr.bf16.mxu1 %v10112_v58  ;;  %v10137_v1 = vld [vmem:[#allocation2 + $0x170] sm:$0xff]  ;;  %v10140_v58 = vld [vmem:[#allocation2 + $0x188] sm:$0xff] }
 0x8cc   :  { %20663 = vmatprep.subr.bf16.mxu0 %v10114_v42  ;;  %v10142_v42 = vld [vmem:[#allocation2 + $0x198] sm:$0xff] }
 0x8ce   :  { %20417 = vmatpush1.bf16.msra.mxu1 %v10111_v47  ;;  %v10139_v47 = vld [vmem:[#allocation2 + $0x180] sm:$0xff] }
 0x8cf   :  { %20665 = vmatpush1.bf16.msra.mxu0 %v10113_v32  ;;  %20419 = vmatprep.subr.bf16.mxu1 %v10116_v49  ;;  %v10141_v32 = vld [vmem:[#allocation2 + $0x190] sm:$0xff]  ;;  %v10144_v49 = vld [vmem:[#allocation2 + $0x1a8] sm:$0xff] }
 0x8d0   :  { %20667 = vmatprep.subr.bf16.mxu0 %v10118_v53  ;;  %v10146_v53 = vld [vmem:[#allocation2 + $0x1b8] sm:$0xff] }
 0x8d2   :  { %20421 = vmatpush1.bf16.msra.mxu1 %v10115_v27  ;;  %v10143_v27 = vld [vmem:[#allocation2 + $0x1a0] sm:$0xff] }
 0x8d3   :  { %20669 = vmatpush1.bf16.msra.mxu0 %v10117_v63  ;;  %20423 = vmatprep.subr.bf16.mxu1 %v10120_v31  ;;  %v10145_v63 = vld [vmem:[#allocation2 + $0x1b0] sm:$0xff]  ;;  %v10148_v31 = vld [vmem:[#allocation2 + $0x1c8] sm:$0xff] }
 0x8d4   :  { %20671 = vmatprep.subr.bf16.mxu0 %v10122_v14  ;;  %v10150_v14 = vld [vmem:[#allocation2 + $0x1d8] sm:$0xff] }
 0x8d6   :  { %20425 = vmatpush1.bf16.msra.mxu1 %v10119_v20  ;;  %v10147_v20 = vld [vmem:[#allocation2 + $0x1c0] sm:$0xff] }
 0x8d7   :  { %20673 = vmatpush1.bf16.msra.mxu0 %v10121_v54  ;;  %20427 = vmatprep.subr.bf16.mxu1 %v10124_v29  ;;  %v10149_v54 = vld [vmem:[#allocation2 + $0x1d0] sm:$0xff]  ;;  %v10152_v29 = vld [vmem:[#allocation2 + $0x1e8] sm:$0xff] }
 0x8d8   :  { %20675 = vmatprep.subr.bf16.mxu0 %v10126_v6  ;;  %v10154_v6 = vld [vmem:[#allocation2 + $0x1f8] sm:$0xff] }
 0x8da   :  { %20429 = vmatpush1.bf16.msra.mxu1 %v10123_v9  ;;  %v10151_v9 = vld [vmem:[#allocation2 + $0x1e0] sm:$0xff] }
 0x8db   :  { %20677 = vmatpush1.bf16.msra.mxu0 %v10125_v56  ;;  %20431 = vmatprep.subr.bf16.mxu1 %v10128_v55  ;;  %v10153_v56 = vld [vmem:[#allocation2 + $0x1f0] sm:$0xff]  ;;  %v10156_v55 = vld [vmem:[#allocation2 + $0x208] sm:$0xff] }
 0x8dc   :  { %20679 = vmatprep.subr.bf16.mxu0 %v10130_v18  ;;  %v10158_v18 = vld [vmem:[#allocation2 + $0x218] sm:$0xff] }
 0x8de   :  { %20433 = vmatpush1.bf16.msra.mxu1 %v10127_v16  ;;  %v10155_v16 = vld [vmem:[#allocation2 + $0x200] sm:$0xff] }
 0x8df   :  { %20681 = vmatpush1.bf16.msra.mxu0 %v10129_v30  ;;  %20435 = vmatprep.subr.bf16.mxu1 %v10132_v60  ;;  %v10157_v30 = vld [vmem:[#allocation2 + $0x210] sm:$0xff]  ;;  %v10160_v60 = vld [vmem:[#allocation2 + $0x228] sm:$0xff] }
 0x8e0   :  { %20683 = vmatprep.subr.bf16.mxu0 %v10134_v51  ;;  %v10162_v51 = vld [vmem:[#allocation2 + $0x238] sm:$0xff] }
 0x8e2   :  { %20437 = vmatpush1.bf16.msra.mxu1 %v10131_v21  ;;  %v10159_v21 = vld [vmem:[#allocation2 + $0x220] sm:$0xff] }
 0x8e3   :  { %20685 = vmatpush1.bf16.msra.mxu0 %v10133_v17  ;;  %20439 = vmatprep.subr.bf16.mxu1 %v10136_v4  ;;  %v10161_v17 = vld [vmem:[#allocation2 + $0x230] sm:$0xff]  ;;  %v10164_v4 = vld [vmem:[#allocation2 + $0x248] sm:$0xff] }
 0x8e4   :  { %20687 = vmatprep.subr.bf16.mxu0 %v10138_v38  ;;  %v10166_v38 = vld [vmem:[#allocation2 + $0x258] sm:$0xff] }
 0x8e6   :  { %20441 = vmatpush1.bf16.msra.mxu1 %v10135_v35  ;;  %v10168_v35 = vld [vmem:[#allocation2 + $0x268] sm:$0xff] }
 0x8e7   :  { %20689 = vmatpush1.bf16.msra.mxu0 %v10137_v1  ;;  %20443 = vmatprep.subr.bf16.mxu1 %v10140_v58  ;;  %v10170_v1 = vld [vmem:[#allocation2 + $0x278] sm:$0xff]  ;;  %v10172_v58 = vld [vmem:[#allocation2 + $0x288] sm:$0xff] }
 0x8e8   :  { %20691 = vmatprep.subr.bf16.mxu0 %v10142_v42  ;;  %v10174_v42 = vld [vmem:[#allocation2 + $0x298] sm:$0xff] }
 0x8ea   :  { %20445 = vmatpush1.bf16.msra.mxu1 %v10139_v47  ;;  %v10176_v47 = vld [vmem:[#allocation2 + $0x2a8] sm:$0xff] }
 0x8eb   :  { %20693 = vmatpush1.bf16.msra.mxu0 %v10141_v32  ;;  %20447 = vmatprep.subr.bf16.mxu1 %v10144_v49  ;;  %v10178_v32 = vld [vmem:[#allocation2 + $0x2b8] sm:$0xff]  ;;  %v10175_v49 = vld [vmem:[#allocation2 + $0x2a0] sm:$0xff] }
 0x8ec   :  { %20695 = vmatprep.subr.bf16.mxu0 %v10146_v53  ;;  %v10177_v53 = vld [vmem:[#allocation2 + $0x2b0] sm:$0xff] }
 0x8ee   :  { %20449 = vmatpush1.bf16.msra.mxu1 %v10143_v27  ;;  %v10182_v27 = vld [vmem:[#allocation2 + $0x2d8] sm:$0xff] }
 0x8ef   :  { %20697 = vmatpush1.bf16.msra.mxu0 %v10145_v63  ;;  %20451 = vmatprep.subr.bf16.mxu1 %v10148_v31  ;;  %v10179_v63 = vld [vmem:[#allocation2 + $0x2c0] sm:$0xff]  ;;  %v10184_v31 = vld [vmem:[#allocation2 + $0x2e8] sm:$0xff] }
 0x8f0   :  { %20699 = vmatprep.subr.bf16.mxu0 %v10150_v14  ;;  %v10186_v14 = vld [vmem:[#allocation2 + $0x2f8] sm:$0xff] }
 0x8f2   :  { %20453 = vmatpush1.bf16.msra.mxu1 %v10147_v20  ;;  %v10183_v20 = vld [vmem:[#allocation2 + $0x2e0] sm:$0xff] }
 0x8f3   :  { %20701 = vmatpush1.bf16.msra.mxu0 %v10149_v54  ;;  %20455 = vmatprep.subr.bf16.mxu1 %v10152_v29  ;;  %v10185_v54 = vld [vmem:[#allocation2 + $0x2f0] sm:$0xff]  ;;  %v10188_v29 = vld [vmem:[#allocation2 + $0x308] sm:$0xff] }
 0x8f4   :  { %20703 = vmatprep.subr.bf16.mxu0 %v10154_v6  ;;  %v10190_v6 = vld [vmem:[#allocation2 + $0x318] sm:$0xff] }
 0x8f6   :  { %20457 = vmatpush1.bf16.msra.mxu1 %v10151_v9  ;;  %v10187_v9 = vld [vmem:[#allocation2 + $0x300] sm:$0xff] }
 0x8f7   :  { %20705 = vmatpush1.bf16.msra.mxu0 %v10153_v56  ;;  %20459 = vmatprep.subr.bf16.mxu1 %v10156_v55  ;;  %v10189_v56 = vld [vmem:[#allocation2 + $0x310] sm:$0xff]  ;;  %v10192_v55 = vld [vmem:[#allocation2 + $0x328] sm:$0xff] }
 0x8f8   :  { %20707 = vmatprep.subr.bf16.mxu0 %v10158_v18  ;;  %v10194_v18 = vld [vmem:[#allocation2 + $0x338] sm:$0xff] }
 0x8f9   :  { %12381 = vmatmul.mubr.f32.vlgmr.msra.gmra.mrb[96].mxu1 %v25956_v37 }
 0x8fa   :  { %12737 = vmatmul.mubr.f32.vlgmr.msra.gmra.mrb[96].mxu0 %v25956_v37  ;;  %12386 = vmatprep.mubr.f32.mxu1 %v25966_v19  ;;  %v10163_v37 = vld [vmem:[#allocation2 + $0x240] sm:$0xff] }
 0x8fb   :  { %20461 = vmatpush1.bf16.msra.mxu1 %v10155_v16  ;;  %12742 = vmatprep.mubr.f32.mxu0 %v25966_v19  ;;  %v10165_v19 = vld [vmem:[#allocation2 + $0x250] sm:$0xff]  ;;  %v10191_v16 = vld [vmem:[#allocation2 + $0x320] sm:$0xff] }
 0x8fc   :  { %20709 = vmatpush1.bf16.msra.mxu0 %v10157_v30  ;;  %20463 = vmatprep.subr.bf16.mxu1 %v10160_v60  ;;  %v10193_v30 = vld [vmem:[#allocation2 + $0x330] sm:$0xff]  ;;  %v10196_v60 = vld [vmem:[#allocation2 + $0x348] sm:$0xff] }
 0x8fd   :  { %12387 = vmatmul.mubr.f32.gmra.mrb[98].mxu1 %v25964_v2  ;;  %20711 = vmatprep.subr.bf16.mxu0 %v10162_v51  ;;  %v10198_v51 = vld [vmem:[#allocation2 + $0x358] sm:$0xff] }
 0x8fe   :  { %12743 = vmatmul.mubr.f32.gmra.mrb[98].mxu0 %v25964_v2  ;;  %12392 = vmatprep.mubr.f32.mxu1 %v25974_v46  ;;  %v10167_v2 = vld [vmem:[#allocation2 + $0x260] sm:$0xff] }
 0x8ff   :  { %20465 = vmatpush1.bf16.msra.mxu1 %v10159_v21  ;;  %12748 = vmatprep.mubr.f32.mxu0 %v25974_v46  ;;  %v10169_v46 = vld [vmem:[#allocation2 + $0x270] sm:$0xff]  ;;  %v10195_v21 = vld [vmem:[#allocation2 + $0x340] sm:$0xff] }
 0x900   :  { %20713 = vmatpush1.bf16.msra.mxu0 %v10161_v17  ;;  %20467 = vmatprep.subr.bf16.mxu1 %v10164_v4  ;;  %v10197_v17 = vld [vmem:[#allocation2 + $0x350] sm:$0xff]  ;;  %v10200_v4 = vld [vmem:[#allocation2 + $0x368] sm:$0xff] }
 0x901   :  { %12393 = vmatmul.mubr.f32.gmra.mrb[100].mxu1 %v25972_v11  ;;  %20715 = vmatprep.subr.bf16.mxu0 %v10166_v38  ;;  %v10202_v38 = vld [vmem:[#allocation2 + $0x378] sm:$0xff] }
 0x902   :  { %12749 = vmatmul.mubr.f32.gmra.mrb[100].mxu0 %v25972_v11  ;;  %12398 = vmatprep.mubr.f32.mxu1 %v25982_v7  ;;  %v10171_v11 = vld [vmem:[#allocation2 + $0x280] sm:$0xff] }
 0x903   :  { %20469 = vmatpush1.bf16.msra.mxu1 %v10163_v37  ;;  %12754 = vmatprep.mubr.f32.mxu0 %v25982_v7  ;;  %v10173_v7 = vld [vmem:[#allocation2 + $0x290] sm:$0xff]  ;;  %v10199_v37 = vld [vmem:[#allocation2 + $0x360] sm:$0xff] }
 0x904   :  { %20717 = vmatpush1.bf16.msra.mxu0 %v10165_v19  ;;  %20471 = vmatprep.subr.bf16.mxu1 %v10168_v35  ;;  %v10201_v19 = vld [vmem:[#allocation2 + $0x370] sm:$0xff]  ;;  %v10204_v35 = vld [vmem:[#allocation2 + $0x388] sm:$0xff] }
 0x905   :  { %12399 = vmatmul.mubr.f32.gmra.mrb[102].mxu1 %v25980_v44  ;;  %20719 = vmatprep.subr.bf16.mxu0 %v10170_v1  ;;  %v10206_v1 = vld [vmem:[#allocation2 + $0x398] sm:$0xff] }
 0x906   :  { %12755 = vmatmul.mubr.f32.gmra.mrb[102].mxu0 %v25980_v44  ;;  %12469 = vmatprep.mubr.f32.mxu1 %v25962_v5  ;;  %v10180_v44 = vld [vmem:[#allocation2 + $0x2c8] sm:$0xff] }
 0x907   :  { %20473 = vmatpush1.bf16.msra.mxu1 %v10167_v2  ;;  %12825 = vmatprep.mubr.f32.mxu0 %v25962_v5  ;;  %v10181_v5 = vld [vmem:[#allocation2 + $0x2d0] sm:$0xff]  ;;  %v10203_v2 = vld [vmem:[#allocation2 + $0x380] sm:$0xff] }
 0x908   :  { %20721 = vmatpush1.bf16.msra.mxu0 %v10169_v46  ;;  %20475 = vmatprep.subr.bf16.mxu1 %v10172_v58  ;;  %v10205_v46 = vld [vmem:[#allocation2 + $0x390] sm:$0xff]  ;;  %v10208_v58 = vld [vmem:[#allocation2 + $0x3a8] sm:$0xff] }
 0x909   :  { %20723 = vmatprep.subr.bf16.mxu0 %v10174_v42  ;;  %v10210_v42 = vld [vmem:[#allocation2 + $0x3b8] sm:$0xff] }
 0x90b   :  { %20477 = vmatpush1.bf16.msra.mxu1 %v10171_v11  ;;  %v10207_v11 = vld [vmem:[#allocation2 + $0x3a0] sm:$0xff] }
 0x90c   :  { %20725 = vmatpush1.bf16.msra.mxu0 %v10173_v7  ;;  %20479 = vmatprep.subr.bf16.mxu1 %v10176_v47  ;;  %v10209_v7 = vld [vmem:[#allocation2 + $0x3b0] sm:$0xff]  ;;  %v10212_v47 = vld [vmem:[#allocation2 + $0x3c8] sm:$0xff] }
 0x90d   :  { %20727 = vmatprep.subr.bf16.mxu0 %v10178_v32  ;;  %v10214_v32 = vld [vmem:[#allocation2 + $0x3d8] sm:$0xff] }
 0x90f   :  { %20481 = vmatpush1.bf16.msra.mxu1 %v10175_v49  ;;  %v10211_v49 = vld [vmem:[#allocation2 + $0x3c0] sm:$0xff] }
 0x910   :  { %20729 = vmatpush1.bf16.msra.mxu0 %v10177_v53  ;;  %20483 = vmatprep.subr.bf16.mxu1 %v10180_v44  ;;  %v10213_v53 = vld [vmem:[#allocation2 + $0x3d0] sm:$0xff]  ;;  %v10216_v44 = vld [vmem:[#allocation2 + $0x3e8] sm:$0xff] }
 0x911   :  { %20731 = vmatprep.subr.bf16.mxu0 %v10182_v27  ;;  %v10218_v27 = vld [vmem:[#allocation2 + $0x3f8] sm:$0xff] }
 0x913   :  { %20485 = vmatpush1.bf16.msra.mxu1 %v10179_v63  ;;  %v10215_v63 = vld [vmem:[#allocation2 + $0x3e0] sm:$0xff] }
 0x914   :  { %20733 = vmatpush1.bf16.msra.mxu0 %v10181_v5  ;;  %20487 = vmatprep.subr.bf16.mxu1 %v10184_v31  ;;  %v10217_v5 = vld [vmem:[#allocation2 + $0x3f0] sm:$0xff]  ;;  %v10220_v31 = vld [vmem:[#allocation2 + $0x408] sm:$0xff] }
 0x915   :  { %20735 = vmatprep.subr.bf16.mxu0 %v10186_v14  ;;  %v10222_v14 = vld [vmem:[#allocation2 + $0x418] sm:$0xff] }
 0x917   :  { %20489 = vmatpush1.bf16.msra.mxu1 %v10183_v20  ;;  %v10219_v20 = vld [vmem:[#allocation2 + $0x400] sm:$0xff] }
 0x918   :  { %20737 = vmatpush1.bf16.msra.mxu0 %v10185_v54  ;;  %20491 = vmatprep.subr.bf16.mxu1 %v10188_v29  ;;  %v10221_v54 = vld [vmem:[#allocation2 + $0x410] sm:$0xff]  ;;  %v10224_v29 = vld [vmem:[#allocation2 + $0x428] sm:$0xff] }
 0x919   :  { %20739 = vmatprep.subr.bf16.mxu0 %v10190_v6  ;;  %v10226_v6 = vld [vmem:[#allocation2 + $0x438] sm:$0xff] }
 0x91b   :  { %20493 = vmatpush1.bf16.msra.mxu1 %v10187_v9  ;;  %v10223_v9 = vld [vmem:[#allocation2 + $0x420] sm:$0xff] }
 0x91c   :  { %20741 = vmatpush1.bf16.msra.mxu0 %v10189_v56  ;;  %20495 = vmatprep.subr.bf16.mxu1 %v10192_v55  ;;  %v10225_v56 = vld [vmem:[#allocation2 + $0x430] sm:$0xff]  ;;  %v10228_v55 = vld [vmem:[#allocation2 + $0x448] sm:$0xff] }
 0x91d   :  { %20743 = vmatprep.subr.bf16.mxu0 %v10194_v18  ;;  %v10230_v18 = vld [vmem:[#allocation2 + $0x458] sm:$0xff] }
 0x91f   :  { %20497 = vmatpush1.bf16.msra.mxu1 %v10191_v16  ;;  %v10232_v16 = vld [vmem:[#allocation2 + $0x468] sm:$0xff] }
 0x920   :  { %20745 = vmatpush1.bf16.msra.mxu0 %v10193_v30  ;;  %20499 = vmatprep.subr.bf16.mxu1 %v10196_v60  ;;  %v10234_v30 = vld [vmem:[#allocation2 + $0x478] sm:$0xff]  ;;  %v10236_v60 = vld [vmem:[#allocation2 + $0x488] sm:$0xff] }
 0x921   :  { %20747 = vmatprep.subr.bf16.mxu0 %v10198_v51  ;;  %v10238_v51 = vld [vmem:[#allocation2 + $0x498] sm:$0xff] }
 0x923   :  { %20501 = vmatpush1.bf16.msra.mxu1 %v10195_v21  ;;  %v10240_v21 = vld [vmem:[#allocation2 + $0x4a8] sm:$0xff] }
 0x924   :  { %20749 = vmatpush1.bf16.msra.mxu0 %v10197_v17  ;;  %20503 = vmatprep.subr.bf16.mxu1 %v10200_v4  ;;  %v10242_v17 = vld [vmem:[#allocation2 + $0x4b8] sm:$0xff]  ;;  %v10239_v4 = vld [vmem:[#allocation2 + $0x4a0] sm:$0xff] }
 0x925   :  { %20751 = vmatprep.subr.bf16.mxu0 %v10202_v38  ;;  %v10241_v38 = vld [vmem:[#allocation2 + $0x4b0] sm:$0xff] }
 0x927   :  { %20505 = vmatpush1.bf16.msra.mxu1 %v10199_v37  ;;  %v10246_v37 = vld [vmem:[#allocation2 + $0x4d8] sm:$0xff] }
 0x928   :  { %20753 = vmatpush1.bf16.msra.mxu0 %v10201_v19  ;;  %20507 = vmatprep.subr.bf16.mxu1 %v10204_v35  ;;  %v10243_v19 = vld [vmem:[#allocation2 + $0x4c0] sm:$0xff]  ;;  %v10248_v35 = vld [vmem:[#allocation2 + $0x4e8] sm:$0xff] }
 0x929   :  { %20755 = vmatprep.subr.bf16.mxu0 %v10206_v1  ;;  %v10250_v1 = vld [vmem:[#allocation2 + $0x4f8] sm:$0xff] }
 0x92b   :  { %20509 = vmatpush1.bf16.msra.mxu1 %v10203_v2  ;;  %v10247_v2 = vld [vmem:[#allocation2 + $0x4e0] sm:$0xff] }
 0x92c   :  { %20757 = vmatpush1.bf16.msra.mxu0 %v10205_v46  ;;  %20511 = vmatprep.subr.bf16.mxu1 %v10208_v58  ;;  %v10249_v46 = vld [vmem:[#allocation2 + $0x4f0] sm:$0xff]  ;;  %v10252_v58 = vld [vmem:[#allocation2 + $0x508] sm:$0xff] }
 0x92d   :  { %20759 = vmatprep.subr.bf16.mxu0 %v10210_v42  ;;  %v10254_v42 = vld [vmem:[#allocation2 + $0x518] sm:$0xff] }
 0x92f   :  { %20513 = vmatpush1.bf16.msra.mxu1 %v10207_v11  ;;  %v10251_v11 = vld [vmem:[#allocation2 + $0x500] sm:$0xff] }
 0x930   :  { %20761 = vmatpush1.bf16.msra.mxu0 %v10209_v7  ;;  %20515 = vmatprep.subr.bf16.mxu1 %v10212_v47  ;;  %v10253_v7 = vld [vmem:[#allocation2 + $0x510] sm:$0xff]  ;;  %v10256_v47 = vld [vmem:[#allocation2 + $0x528] sm:$0xff] }
 0x931   :  { %20763 = vmatprep.subr.bf16.mxu0 %v10214_v32  ;;  %v10258_v32 = vld [vmem:[#allocation2 + $0x538] sm:$0xff] }
 0x933   :  { %20517 = vmatpush1.bf16.msra.mxu1 %v10211_v49  ;;  %v10255_v49 = vld [vmem:[#allocation2 + $0x520] sm:$0xff] }
 0x934   :  { %20765 = vmatpush1.bf16.msra.mxu0 %v10213_v53  ;;  %20519 = vmatprep.subr.bf16.mxu1 %v10216_v44  ;;  %v10257_v53 = vld [vmem:[#allocation2 + $0x530] sm:$0xff]  ;;  %v10260_v44 = vld [vmem:[#allocation2 + $0x548] sm:$0xff] }
 0x935   :  { %20767 = vmatprep.subr.bf16.mxu0 %v10218_v27  ;;  %v10262_v27 = vld [vmem:[#allocation2 + $0x558] sm:$0xff] }
 0x937   :  { %20521 = vmatpush1.bf16.msra.mxu1 %v10215_v63  ;;  %v10259_v63 = vld [vmem:[#allocation2 + $0x540] sm:$0xff] }
 0x938   :  { %20769 = vmatpush1.bf16.msra.mxu0 %v10217_v5  ;;  %20523 = vmatprep.subr.bf16.mxu1 %v10220_v31  ;;  %v10261_v5 = vld [vmem:[#allocation2 + $0x550] sm:$0xff]  ;;  %v10264_v31 = vld [vmem:[#allocation2 + $0x568] sm:$0xff] }
 0x939   :  { %20771 = vmatprep.subr.bf16.mxu0 %v10222_v14  ;;  %v10266_v14 = vld [vmem:[#allocation2 + $0x578] sm:$0xff] }
 0x93a   :  { %12470 = vmatmul.mubr.f32.vlgmr.msra.gmra.mrb[96].mxu1 %v25960_v28 }
 0x93b   :  { %12826 = vmatmul.mubr.f32.vlgmr.msra.gmra.mrb[96].mxu0 %v25960_v28  ;;  %12475 = vmatprep.mubr.f32.mxu1 %v25970_v41  ;;  %v10227_v28 = vld [vmem:[#allocation2 + $0x440] sm:$0xff] }
 0x93c   :  { %20525 = vmatpush1.bf16.msra.mxu1 %v10219_v20  ;;  %12831 = vmatprep.mubr.f32.mxu0 %v25970_v41  ;;  %v10229_v41 = vld [vmem:[#allocation2 + $0x450] sm:$0xff]  ;;  %v10263_v20 = vld [vmem:[#allocation2 + $0x560] sm:$0xff] }
 0x93d   :  { %20773 = vmatpush1.bf16.msra.mxu0 %v10221_v54  ;;  %20527 = vmatprep.subr.bf16.mxu1 %v10224_v29  ;;  %v10265_v54 = vld [vmem:[#allocation2 + $0x570] sm:$0xff]  ;;  %v10268_v29 = vld [vmem:[#allocation2 + $0x588] sm:$0xff] }
 0x93e   :  { %12476 = vmatmul.mubr.f32.gmra.mrb[98].mxu1 %v25968_v61  ;;  %20775 = vmatprep.subr.bf16.mxu0 %v10226_v6  ;;  %v10270_v6 = vld [vmem:[#allocation2 + $0x598] sm:$0xff] }
 0x93f   :  { %12832 = vmatmul.mubr.f32.gmra.mrb[98].mxu0 %v25968_v61  ;;  %12481 = vmatprep.mubr.f32.mxu1 %v25978_v50  ;;  %v10231_v61 = vld [vmem:[#allocation2 + $0x460] sm:$0xff] }
 0x940   :  { %20529 = vmatpush1.bf16.msra.mxu1 %v10223_v9  ;;  %12837 = vmatprep.mubr.f32.mxu0 %v25978_v50  ;;  %v10233_v50 = vld [vmem:[#allocation2 + $0x470] sm:$0xff]  ;;  %v10267_v9 = vld [vmem:[#allocation2 + $0x580] sm:$0xff] }
 0x941   :  { %20777 = vmatpush1.bf16.msra.mxu0 %v10225_v56  ;;  %20531 = vmatprep.subr.bf16.mxu1 %v10228_v55  ;;  %v10269_v56 = vld [vmem:[#allocation2 + $0x590] sm:$0xff]  ;;  %v10272_v55 = vld [vmem:[#allocation2 + $0x5a8] sm:$0xff] }
 0x942   :  { %12482 = vmatmul.mubr.f32.gmra.mrb[100].mxu1 %v25976_v25  ;;  %20779 = vmatprep.subr.bf16.mxu0 %v10230_v18  ;;  %v10274_v18 = vld [vmem:[#allocation2 + $0x5b8] sm:$0xff] }
 0x943   :  { %12838 = vmatmul.mubr.f32.gmra.mrb[100].mxu0 %v25976_v25  ;;  %12487 = vmatprep.mubr.f32.mxu1 %v25986_v52  ;;  %v10235_v25 = vld [vmem:[#allocation2 + $0x480] sm:$0xff] }
 0x944   :  { %20533 = vmatpush1.bf16.msra.mxu1 %v10227_v28  ;;  %12843 = vmatprep.mubr.f32.mxu0 %v25986_v52  ;;  %v10237_v52 = vld [vmem:[#allocation2 + $0x490] sm:$0xff]  ;;  %v10271_v28 = vld [vmem:[#allocation2 + $0x5a0] sm:$0xff] }
 0x945   :  { %20781 = vmatpush1.bf16.msra.mxu0 %v10229_v41  ;;  %20535 = vmatprep.subr.bf16.mxu1 %v10232_v16  ;;  %v10273_v41 = vld [vmem:[#allocation2 + $0x5b0] sm:$0xff]  ;;  %v10276_v16 = vld [vmem:[#allocation2 + $0x5c8] sm:$0xff] }
 0x946   :  { %12488 = vmatmul.mubr.f32.gmra.mrb[102].mxu1 %v25984_v59  ;;  %20783 = vmatprep.subr.bf16.mxu0 %v10234_v30  ;;  %v10278_v30 = vld [vmem:[#allocation2 + $0x5d8] sm:$0xff] }
 0x947   :  { %12844 = vmatmul.mubr.f32.gmra.mrb[102].mxu0 %v25984_v59  ;;  %12558 = vmatprep.mubr.f32.mxu1 %v26036_v12  ;;  %v10244_v59 = vld [vmem:[#allocation2 + $0x4c8] sm:$0xff] }
 0x948   :  { %20537 = vmatpush1.bf16.msra.mxu1 %v10231_v61  ;;  %12914 = vmatprep.mubr.f32.mxu0 %v26036_v12  ;;  %v10245_v12 = vld [vmem:[#allocation2 + $0x4d0] sm:$0xff]  ;;  %v10275_v61 = vld [vmem:[#allocation2 + $0x5c0] sm:$0xff] }
 0x949   :  { %20785 = vmatpush1.bf16.msra.mxu0 %v10233_v50  ;;  %20539 = vmatprep.subr.bf16.mxu1 %v10236_v60  ;;  %v10277_v50 = vld [vmem:[#allocation2 + $0x5d0] sm:$0xff]  ;;  %v10280_v60 = vld [vmem:[#allocation2 + $0x5e8] sm:$0xff] }
 0x94a   :  { %20787 = vmatprep.subr.bf16.mxu0 %v10238_v51  ;;  %v10282_v51 = vld [vmem:[#allocation2 + $0x5f8] sm:$0xff] }
 0x94c   :  { %20541 = vmatpush1.bf16.msra.mxu1 %v10235_v25  ;;  %v10279_v25 = vld [vmem:[#allocation2 + $0x5e0] sm:$0xff] }
 0x94d   :  { %20789 = vmatpush1.bf16.msra.mxu0 %v10237_v52  ;;  %20543 = vmatprep.subr.bf16.mxu1 %v10240_v21  ;;  %v10281_v52 = vld [vmem:[#allocation2 + $0x5f0] sm:$0xff]  ;;  %v10284_v21 = vld [vmem:[#allocation2 + $0x608] sm:$0xff] }
 0x94e   :  { %20791 = vmatprep.subr.bf16.mxu0 %v10242_v17  ;;  %v10286_v17 = vld [vmem:[#allocation2 + $0x618] sm:$0xff] }
 0x950   :  { %20545 = vmatpush1.bf16.msra.mxu1 %v10239_v4  ;;  %v10283_v4 = vld [vmem:[#allocation2 + $0x600] sm:$0xff] }
 0x951   :  { %20793 = vmatpush1.bf16.msra.mxu0 %v10241_v38  ;;  %20547 = vmatprep.subr.bf16.mxu1 %v10244_v59  ;;  %v10285_v38 = vld [vmem:[#allocation2 + $0x610] sm:$0xff]  ;;  %v10288_v59 = vld [vmem:[#allocation2 + $0x628] sm:$0xff] }
 0x952   :  { %20795 = vmatprep.subr.bf16.mxu0 %v10246_v37  ;;  %v10290_v37 = vld [vmem:[#allocation2 + $0x638] sm:$0xff] }
 0x954   :  { %20549 = vmatpush1.bf16.msra.mxu1 %v10243_v19  ;;  %v10287_v19 = vld [vmem:[#allocation2 + $0x620] sm:$0xff] }
 0x955   :  { %20797 = vmatpush1.bf16.msra.mxu0 %v10245_v12  ;;  %20551 = vmatprep.subr.bf16.mxu1 %v10248_v35  ;;  %v10289_v12 = vld [vmem:[#allocation2 + $0x630] sm:$0xff]  ;;  %v10292_v35 = vld [vmem:[#allocation2 + $0x648] sm:$0xff] }
 0x956   :  { %20799 = vmatprep.subr.bf16.mxu0 %v10250_v1  ;;  %v10294_v1 = vld [vmem:[#allocation2 + $0x658] sm:$0xff] }
 0x958   :  { %20553 = vmatpush1.bf16.msra.mxu1 %v10247_v2  ;;  %v10296_v2 = vld [vmem:[#allocation2 + $0x668] sm:$0xff] }
 0x959   :  { %20801 = vmatpush1.bf16.msra.mxu0 %v10249_v46  ;;  %20555 = vmatprep.subr.bf16.mxu1 %v10252_v58  ;;  %v10298_v46 = vld [vmem:[#allocation2 + $0x678] sm:$0xff]  ;;  %v10300_v58 = vld [vmem:[#allocation2 + $0x688] sm:$0xff] }
 0x95a   :  { %20803 = vmatprep.subr.bf16.mxu0 %v10254_v42  ;;  %v10301_v42 = vld [vmem:[#allocation2 + $0x690] sm:$0xff] }
 0x95c   :  { %20557 = vmatpush1.bf16.msra.mxu1 %v10251_v11  ;;  %v10304_v11 = vld [vmem:[#allocation2 + $0x6a8] sm:$0xff] }
 0x95d   :  { %20805 = vmatpush1.bf16.msra.mxu0 %v10253_v7  ;;  %20559 = vmatprep.subr.bf16.mxu1 %v10256_v47  ;;  %v10306_v7 = vld [vmem:[#allocation2 + $0x6b8] sm:$0xff]  ;;  %v10303_v47 = vld [vmem:[#allocation2 + $0x6a0] sm:$0xff] }
 0x95e   :  { %20807 = vmatprep.subr.bf16.mxu0 %v10258_v32  ;;  %v10308_v32 = vld [vmem:[#allocation2 + $0x6c8] sm:$0xff] }
 0x960   :  { %20561 = vmatpush1.bf16.msra.mxu1 %v10255_v49  ;;  %v10310_v49 = vld [vmem:[#allocation2 + $0x6d8] sm:$0xff] }
 0x961   :  { %20809 = vmatpush1.bf16.msra.mxu0 %v10257_v53  ;;  %20563 = vmatprep.subr.bf16.mxu1 %v10260_v44  ;;  %v10307_v53 = vld [vmem:[#allocation2 + $0x6c0] sm:$0xff]  ;;  %v10312_v44 = vld [vmem:[#allocation2 + $0x6e8] sm:$0xff] }
 0x962   :  { %20811 = vmatprep.subr.bf16.mxu0 %v10262_v27  ;;  %v10314_v27 = vld [vmem:[#allocation2 + $0x6f8] sm:$0xff] }
 0x964   :  { %20565 = vmatpush1.bf16.msra.mxu1 %v10259_v63  ;;  %v10311_v63 = vld [vmem:[#allocation2 + $0x6e0] sm:$0xff] }
 0x965   :  { %20813 = vmatpush1.bf16.msra.mxu0 %v10261_v5  ;;  %20567 = vmatprep.subr.bf16.mxu1 %v10264_v31  ;;  %v10313_v5 = vld [vmem:[#allocation2 + $0x6f0] sm:$0xff]  ;;  %v10316_v31 = vld [vmem:[#allocation2 + $0x708] sm:$0xff] }
 0x966   :  { %20815 = vmatprep.subr.bf16.mxu0 %v10266_v14  ;;  %v10318_v14 = vld [vmem:[#allocation2 + $0x718] sm:$0xff] }
 0x968   :  { %20569 = vmatpush1.bf16.msra.mxu1 %v10263_v20  ;;  %v10315_v20 = vld [vmem:[#allocation2 + $0x700] sm:$0xff] }
 0x969   :  { %20817 = vmatpush1.bf16.msra.mxu0 %v10265_v54  ;;  %20571 = vmatprep.subr.bf16.mxu1 %v10268_v29  ;;  %v10317_v54 = vld [vmem:[#allocation2 + $0x710] sm:$0xff]  ;;  %v10320_v29 = vld [vmem:[#allocation2 + $0x728] sm:$0xff] }
 0x96a   :  { %20819 = vmatprep.subr.bf16.mxu0 %v10270_v6  ;;  %v10322_v6 = vld [vmem:[#allocation2 + $0x738] sm:$0xff] }
 0x96c   :  { %20573 = vmatpush1.bf16.msra.mxu1 %v10267_v9  ;;  %v10319_v9 = vld [vmem:[#allocation2 + $0x720] sm:$0xff] }
 0x96d   :  { %20821 = vmatpush1.bf16.msra.mxu0 %v10269_v56  ;;  %20575 = vmatprep.subr.bf16.mxu1 %v10272_v55  ;;  %v10321_v56 = vld [vmem:[#allocation2 + $0x730] sm:$0xff]  ;;  %v10324_v55 = vld [vmem:[#allocation2 + $0x748] sm:$0xff] }
 0x96e   :  { %20823 = vmatprep.subr.bf16.mxu0 %v10274_v18  ;;  %v10326_v18 = vld [vmem:[#allocation2 + $0x758] sm:$0xff] }
 0x970   :  { %20577 = vmatpush1.bf16.msra.mxu1 %v10271_v28  ;;  %v10323_v28 = vld [vmem:[#allocation2 + $0x740] sm:$0xff] }
 0x971   :  { %20825 = vmatpush1.bf16.msra.mxu0 %v10273_v41  ;;  %20579 = vmatprep.subr.bf16.mxu1 %v10276_v16  ;;  %v10325_v41 = vld [vmem:[#allocation2 + $0x750] sm:$0xff]  ;;  %v10328_v16 = vld [vmem:[#allocation2 + $0x768] sm:$0xff] }
 0x972   :  { %20827 = vmatprep.subr.bf16.mxu0 %v10278_v30  ;;  %v10330_v30 = vld [vmem:[#allocation2 + $0x778] sm:$0xff] }
 0x974   :  { %20581 = vmatpush1.bf16.msra.mxu1 %v10275_v61  ;;  %v10327_v61 = vld [vmem:[#allocation2 + $0x760] sm:$0xff] }
 0x975   :  { %20829 = vmatpush1.bf16.msra.mxu0 %v10277_v50  ;;  %20583 = vmatprep.subr.bf16.mxu1 %v10280_v60  ;;  %v10329_v50 = vld [vmem:[#allocation2 + $0x770] sm:$0xff]  ;;  %v10332_v60 = vld [vmem:[#allocation2 + $0x788] sm:$0xff] }
 0x976   :  { %20831 = vmatprep.subr.bf16.mxu0 %v10282_v51  ;;  %v10334_v51 = vld [vmem:[#allocation2 + $0x798] sm:$0xff] }
 0x978   :  { %20585 = vmatpush1.bf16.msra.mxu1 %v10279_v25  ;;  %v10331_v25 = vld [vmem:[#allocation2 + $0x780] sm:$0xff] }
 0x979   :  { %20833 = vmatpush1.bf16.msra.mxu0 %v10281_v52  ;;  %20587 = vmatprep.subr.bf16.mxu1 %v10284_v21  ;;  %v10333_v52 = vld [vmem:[#allocation2 + $0x790] sm:$0xff]  ;;  %v10336_v21 = vld [vmem:[#allocation2 + $0x7a8] sm:$0xff] }
 0x97a   :  { %20835 = vmatprep.subr.bf16.mxu0 %v10286_v17  ;;  %v10338_v17 = vld [vmem:[#allocation2 + $0x7b8] sm:$0xff] }
 0x97b   :  { %12559 = vmatmul.mubr.f32.vlgmr.msra.gmra.mrb[96].mxu1 %v26034_v22 }
 0x97c   :  { %12915 = vmatmul.mubr.f32.vlgmr.msra.gmra.mrb[96].mxu0 %v26034_v22  ;;  %12564 = vmatprep.mubr.f32.mxu1 %v26044_v48  ;;  %v10291_v22 = vld [vmem:[#allocation2 + $0x640] sm:$0xff] }
 0x97d   :  { %20589 = vmatpush1.bf16.msra.mxu1 %v10283_v4  ;;  %12920 = vmatprep.mubr.f32.mxu0 %v26044_v48  ;;  %v10293_v48 = vld [vmem:[#allocation2 + $0x650] sm:$0xff]  ;;  %v10335_v4 = vld [vmem:[#allocation2 + $0x7a0] sm:$0xff] }
 0x97e   :  { %20837 = vmatpush1.bf16.msra.mxu0 %v10285_v38  ;;  %20591 = vmatprep.subr.bf16.mxu1 %v10288_v59  ;;  %v10337_v38 = vld [vmem:[#allocation2 + $0x7b0] sm:$0xff]  ;;  %v13030_v59 = vld [vmem:[#allocation2 + $0xf88] sm:$0xff] }
 0x97f   :  { %12565 = vmatmul.mubr.f32.gmra.mrb[98].mxu1 %v26042_v0  ;;  %20839 = vmatprep.subr.bf16.mxu0 %v10290_v37  ;;  %v13032_v37 = vld [vmem:[#allocation2 + $0xf98] sm:$0xff] }
 0x980   :  { %12921 = vmatmul.mubr.f32.gmra.mrb[98].mxu0 %v26042_v0  ;;  %12570 = vmatprep.mubr.f32.mxu1 %v26048_v40  ;;  %v10295_v0 = vld [vmem:[#allocation2 + $0x660] sm:$0xff] }
 0x981   :  { %20593 = vmatpush1.bf16.msra.mxu1 %v10287_v19  ;;  %12926 = vmatprep.mubr.f32.mxu0 %v26048_v40  ;;  %v10297_v40 = vld [vmem:[#allocation2 + $0x670] sm:$0xff]  ;;  %v13029_v19 = vld [vmem:[#allocation2 + $0xf80] sm:$0xff] }
 0x982   :  { %20841 = vmatpush1.bf16.msra.mxu0 %v10289_v12  ;;  %20595 = vmatprep.subr.bf16.mxu1 %v10292_v35  ;;  %v13031_v12 = vld [vmem:[#allocation2 + $0xf90] sm:$0xff]  ;;  %v13034_v35 = vld [vmem:[#allocation2 + $0xfa8] sm:$0xff] }
 0x983   :  { %12571 = vmatmul.mubr.f32.gmra.mrb[100].mxu1 %v26046_v57  ;;  %20843 = vmatprep.subr.bf16.mxu0 %v10294_v1  ;;  %v13036_v1 = vld [vmem:[#allocation2 + $0xfb8] sm:$0xff] }
 0x984   :  { %12927 = vmatmul.mubr.f32.gmra.mrb[100].mxu0 %v26046_v57  ;;  %12576 = vmatprep.mubr.f32.mxu1 %v26056_v62  ;;  %v10302_v57 = vld [vmem:[#allocation2 + $0x698] sm:$0xff] }
 0x985   :  { %20597 = vmatpush1.bf16.msra.mxu1 %v10291_v22  ;;  %12932 = vmatprep.mubr.f32.mxu0 %v26056_v62  ;;  %v10299_v62 = vld [vmem:[#allocation2 + $0x680] sm:$0xff] }
 0x986   :  { %20845 = vmatpush1.bf16.msra.mxu0 %v10293_v48  ;;  %20599 = vmatprep.subr.bf16.mxu1 %v10296_v2  ;;  %v13033_v22 = vld [vmem:[#allocation2 + $0xfa0] sm:$0xff]  ;;  %v13035_v48 = vld [vmem:[#allocation2 + $0xfb0] sm:$0xff]  ;;  %v13038_v2 = vld [vmem:[#allocation2 + $0xfc8] sm:$0xff] }
 0x987   :  { %12577 = vmatmul.mubr.f32.gmra.mrb[102].mxu1 %v26052_v39  ;;  %20847 = vmatprep.subr.bf16.mxu0 %v10298_v46  ;;  %v13039_v46 = vld [vmem:[#allocation2 + $0xfd0] sm:$0xff] }
 0x988   :  { %12933 = vmatmul.mubr.f32.gmra.mrb[102].mxu0 %v26052_v39  ;;  %17750 = vmatprep.mubr.msk.f32.mxu1 %vm8498_vm3, %v26040_v13  ;;  %v10305_v39 = vld [vmem:[#allocation2 + $0x6b0] sm:$0xff] }
 0x989   :  { %20601 = vmatpush1.bf16.msra.mxu1 %v10295_v0  ;;  %17754 = vmatprep.mubr.msk.f32.mxu0 %vm8498_vm3, %v26040_v13  ;;  %v10309_v13 = vld [vmem:[#allocation2 + $0x6d0] sm:$0xff]  ;;  %v13042_v0 = vld [vmem:[#allocation2 + $0xfe8] sm:$0xff] }
 0x98a   :  { %20849 = vmatpush1.bf16.msra.mxu0 %v10297_v40  ;;  %20603 = vmatprep.subr.bf16.mxu1 %v10300_v58  ;;  %v27173_v40 = vld [vmem:[#allocation50_spill] sm:$0xff]  ;;  %v13043_v58 = vld [vmem:[#allocation2 + $0xff0] sm:$0xff] }
 0x98b   :  { %20851 = vmatprep.subr.bf16.mxu0 %v10302_v57  ;;  %v13046_v57 = vld [vmem:[#allocation2 + $0x1008] sm:$0xff] }
 0x98d   :  { %20605 = vmatpush1.bf16.msra.mxu1 %v10299_v62  ;;  %v27174_v62 = vld [vmem:[#allocation22_spill] sm:$0xff] }
 0x98e   :  { %20853 = vmatpush1.bf16.msra.mxu0 %v10301_v42  ;;  %20607 = vmatprep.subr.bf16.mxu1 %v10304_v11  ;;  %v13047_v42 = vld [vmem:[#allocation2 + $0x1010] sm:$0xff]  ;;  %v13050_v11 = vld [vmem:[#allocation2 + $0x1028] sm:$0xff] }
 0x98f   :  { %20855 = vmatprep.subr.bf16.mxu0 %v10306_v7  ;;  %v13052_v7 = vld [vmem:[#allocation2 + $0x1038] sm:$0xff] }
 0x991   :  { %20609 = vmatpush1.bf16.msra.mxu1 %v10303_v47  ;;  %v13049_v47 = vld [vmem:[#allocation2 + $0x1020] sm:$0xff] }
 0x992   :  { %20857 = vmatpush1.bf16.msra.mxu0 %v10305_v39  ;;  %20611 = vmatprep.subr.bf16.mxu1 %v10308_v32  ;;  %v13051_v39 = vld [vmem:[#allocation2 + $0x1030] sm:$0xff]  ;;  %v13054_v32 = vld [vmem:[#allocation2 + $0x1048] sm:$0xff] }
 0x993   :  { %20859 = vmatprep.subr.bf16.mxu0 %v10310_v49  ;;  %v13056_v49 = vld [vmem:[#allocation2 + $0x1058] sm:$0xff] }
 0x995   :  { %20613 = vmatpush1.bf16.msra.mxu1 %v10307_v53  ;;  %v13053_v53 = vld [vmem:[#allocation2 + $0x1040] sm:$0xff] }
 0x996   :  { %20861 = vmatpush1.bf16.msra.mxu0 %v10309_v13  ;;  %20615 = vmatprep.subr.bf16.mxu1 %v10312_v44  ;;  %v13055_v13 = vld [vmem:[#allocation2 + $0x1050] sm:$0xff]  ;;  %v13058_v44 = vld [vmem:[#allocation2 + $0x1068] sm:$0xff] }
 0x997   :  { %20863 = vmatprep.subr.bf16.mxu0 %v10314_v27  ;;  %v13060_v27 = vld [vmem:[#allocation2 + $0x1078] sm:$0xff] }
 0x999   :  { %20617 = vmatpush1.bf16.msra.mxu1 %v10311_v63  ;;  %v13057_v63 = vld [vmem:[#allocation2 + $0x1060] sm:$0xff] }
 0x99a   :  { %20865 = vmatpush1.bf16.msra.mxu0 %v10313_v5  ;;  %20619 = vmatprep.subr.bf16.mxu1 %v10316_v31  ;;  %v13059_v5 = vld [vmem:[#allocation2 + $0x1070] sm:$0xff]  ;;  %v13062_v31 = vld [vmem:[#allocation2 + $0x1088] sm:$0xff] }
 0x99b   :  { %20867 = vmatprep.subr.bf16.mxu0 %v10318_v14  ;;  %v13064_v14 = vld [vmem:[#allocation2 + $0x1098] sm:$0xff] }
 0x99d   :  { %20621 = vmatpush1.bf16.msra.mxu1 %v10315_v20  ;;  %v13061_v20 = vld [vmem:[#allocation2 + $0x1080] sm:$0xff] }
 0x99e   :  { %20869 = vmatpush1.bf16.msra.mxu0 %v10317_v54  ;;  %20623 = vmatprep.subr.bf16.mxu1 %v10320_v29  ;;  %v13063_v54 = vld [vmem:[#allocation2 + $0x1090] sm:$0xff]  ;;  %v13066_v29 = vld [vmem:[#allocation2 + $0x10a8] sm:$0xff] }
 0x99f   :  { %20871 = vmatprep.subr.bf16.mxu0 %v10322_v6  ;;  %v13068_v6 = vld [vmem:[#allocation2 + $0x10b8] sm:$0xff] }
 0x9a1   :  { %20625 = vmatpush1.bf16.msra.mxu1 %v10319_v9  ;;  %v13065_v9 = vld [vmem:[#allocation2 + $0x10a0] sm:$0xff] }
 0x9a2   :  { %20873 = vmatpush1.bf16.msra.mxu0 %v10321_v56  ;;  %20627 = vmatprep.subr.bf16.mxu1 %v10324_v55  ;;  %v13067_v56 = vld [vmem:[#allocation2 + $0x10b0] sm:$0xff]  ;;  %v13070_v55 = vld [vmem:[#allocation2 + $0x10c8] sm:$0xff] }
 0x9a3   :  { %20875 = vmatprep.subr.bf16.mxu0 %v10326_v18  ;;  %v13072_v18 = vld [vmem:[#allocation2 + $0x10d8] sm:$0xff] }
 0x9a5   :  { %20629 = vmatpush1.bf16.msra.mxu1 %v10323_v28  ;;  %v13069_v28 = vld [vmem:[#allocation2 + $0x10c0] sm:$0xff] }
 0x9a6   :  { %20877 = vmatpush1.bf16.msra.mxu0 %v10325_v41  ;;  %20631 = vmatprep.subr.bf16.mxu1 %v10328_v16  ;;  %v13071_v41 = vld [vmem:[#allocation2 + $0x10d0] sm:$0xff]  ;;  %v13074_v16 = vld [vmem:[#allocation2 + $0x10e8] sm:$0xff] }
 0x9a7   :  { %20879 = vmatprep.subr.bf16.mxu0 %v10330_v30  ;;  %v13076_v30 = vld [vmem:[#allocation2 + $0x10f8] sm:$0xff] }
 0x9a9   :  { %20633 = vmatpush1.bf16.msra.mxu1 %v10327_v61  ;;  %v13073_v61 = vld [vmem:[#allocation2 + $0x10e0] sm:$0xff] }
 0x9aa   :  { %20881 = vmatpush1.bf16.msra.mxu0 %v10329_v50  ;;  %20635 = vmatprep.subr.bf16.mxu1 %v10332_v60  ;;  %v13075_v50 = vld [vmem:[#allocation2 + $0x10f0] sm:$0xff]  ;;  %v13078_v60 = vld [vmem:[#allocation2 + $0x1108] sm:$0xff] }
 0x9ab   :  { %20883 = vmatprep.subr.bf16.mxu0 %v10334_v51  ;;  %v13080_v51 = vld [vmem:[#allocation2 + $0x1118] sm:$0xff] }
 0x9ad   :  { %20637 = vmatpush1.bf16.msra.mxu1 %v10331_v25  ;;  %v13077_v25 = vld [vmem:[#allocation2 + $0x1100] sm:$0xff] }
 0x9ae   :  { %20885 = vmatpush1.bf16.msra.mxu0 %v10333_v52  ;;  %20639 = vmatprep.subr.bf16.mxu1 %v10336_v21  ;;  %v13079_v52 = vld [vmem:[#allocation2 + $0x1110] sm:$0xff]  ;;  %v13082_v21 = vld [vmem:[#allocation2 + $0x1128] sm:$0xff] }
 0x9af   :  { %20887 = vmatprep.subr.bf16.mxu0 %v10338_v17  ;;  %v13084_v17 = vld [vmem:[#allocation2 + $0x1138] sm:$0xff] }
 0x9b1   :  { %20641 = vmatpush1.bf16.msra.mxu1 %v10335_v4  ;;  %v13081_v4 = vld [vmem:[#allocation2 + $0x1120] sm:$0xff] }
 0x9b2   :  { %20889 = vmatpush1.bf16.msra.mxu0 %v10337_v38  ;;  %20891 = vmatprep.subr.bf16.mxu1 %v13030_v59  ;;  %v13083_v38 = vld [vmem:[#allocation2 + $0x1130] sm:$0xff]  ;;  %v13086_v59 = vld [vmem:[#allocation2 + $0x1148] sm:$0xff] }
 0x9b3   :  { %21139 = vmatprep.subr.bf16.mxu0 %v13032_v37  ;;  %v13088_v37 = vld [vmem:[#allocation2 + $0x1158] sm:$0xff] }
 0x9b4   :  { %12648 = vmatmul.mubr.f32.vlgmr.msra.gmra.mrb[96].mxu1 %v26038_v10 }
 0x9b5   :  { %13004 = vmatmul.mubr.f32.vlgmr.msra.gmra.mrb[96].mxu0 %v26038_v10  ;;  %17751 = vmatprep.mubr.msk.f32.mxu1 %vm8498_vm3, %v26054_v3  ;;  %v13040_v10 = vld [vmem:[#allocation2 + $0xfd8] sm:$0xff] }
 0x9b6   :  { %17755 = vmatprep.mubr.msk.f32.mxu0 %vm8498_vm3, %v26054_v3  ;;  %20893 = vmatpush1.bf16.msra.mxu1 %v13029_v19  ;;  %v13037_v3 = vld [vmem:[#allocation2 + $0xfc0] sm:$0xff] }
 0x9b7   :  { %21141 = vmatpush1.bf16.msra.mxu0 %v13031_v12  ;;  %20895 = vmatprep.subr.bf16.mxu1 %v13034_v35  ;;  %v13085_v19 = vld [vmem:[#allocation2 + $0x1140] sm:$0xff]  ;;  %v13087_v12 = vld [vmem:[#allocation2 + $0x1150] sm:$0xff]  ;;  %v13090_v35 = vld [vmem:[#allocation2 + $0x1168] sm:$0xff] }
 0x9b8   :  { %12654 = vmatmul.mubr.f32.gmra.mrb[98].mxu1 %v26050_v43  ;;  %21143 = vmatprep.subr.bf16.mxu0 %v13036_v1  ;;  %v13092_v1 = vld [vmem:[#allocation2 + $0x1178] sm:$0xff] }
 0x9b9   :  { %13010 = vmatmul.mubr.f32.gmra.mrb[98].mxu0 %v26050_v43  ;;  %17752 = vmatprep.mubr.msk.f32.mxu1 %vm8498_vm3, %v26062_v23  ;;  %v13044_v43 = vld [vmem:[#allocation2 + $0xff8] sm:$0xff] }
 0x9ba   :  { %17756 = vmatprep.mubr.msk.f32.mxu0 %vm8498_vm3, %v26062_v23  ;;  %20897 = vmatpush1.bf16.msra.mxu1 %v13033_v22  ;;  %v13041_v23 = vld [vmem:[#allocation2 + $0xfe0] sm:$0xff] }
 0x9bb   :  { %21145 = vmatpush1.bf16.msra.mxu0 %v13035_v48  ;;  %20899 = vmatprep.subr.bf16.mxu1 %v13038_v2  ;;  %v13089_v22 = vld [vmem:[#allocation2 + $0x1160] sm:$0xff]  ;;  %v13091_v48 = vld [vmem:[#allocation2 + $0x1170] sm:$0xff]  ;;  %v13094_v2 = vld [vmem:[#allocation2 + $0x1188] sm:$0xff] }
 0x9bc   :  { %12660 = vmatmul.mubr.f32.gmra.mrb[100].mxu1 %v26058_v34  ;;  %21147 = vmatprep.subr.bf16.mxu0 %v13040_v10  ;;  %v13096_v10 = vld [vmem:[#allocation2 + $0x1198] sm:$0xff] }
 0x9bd   :  { %13016 = vmatmul.mubr.f32.gmra.mrb[100].mxu0 %v26058_v34  ;;  %17753 = vmatprep.mubr.msk.f32.mxu1 %vm8498_vm3, %v26070_v45  ;;  %v13048_v34 = vld [vmem:[#allocation2 + $0x1018] sm:$0xff] }
 0x9be   :  { %17757 = vmatprep.mubr.msk.f32.mxu0 %vm8498_vm3, %v26070_v45  ;;  %20901 = vmatpush1.bf16.msra.mxu1 %v13037_v3  ;;  %v13045_v45 = vld [vmem:[#allocation2 + $0x1000] sm:$0xff] }
 0x9bf   :  { %21149 = vmatpush1.bf16.msra.mxu0 %v13039_v46  ;;  %20903 = vmatprep.subr.bf16.mxu1 %v13042_v0  ;;  %v13093_v3 = vld [vmem:[#allocation2 + $0x1180] sm:$0xff]  ;;  %v27175_v46 = vld [vmem:[#allocation40_spill] sm:$0xff] }
 0x9c0   :  { %12666 = vmatmul.mubr.f32.gmra.mrb[102].mxu1 %v27173_v40  ;;  %21151 = vmatprep.subr.bf16.mxu0 %v13044_v43  ;;  %v13095_v0 = vld [vmem:[#allocation2 + $0x1190] sm:$0xff]  ;;  %v13098_v43 = vld [vmem:[#allocation2 + $0x11a8] sm:$0xff] }
 0x9c1   :  { %13022 = vmatmul.mubr.f32.gmra.mrb[102].mxu0 %v27173_v40  ;;  %13849 = vmatprep.mubr.f32.mxu1 %v27174_v62  ;;  %v13100_v40 = vld [vmem:[#allocation2 + $0x11b8] sm:$0xff] }
 0x9c2   :  { %20905 = vmatpush1.bf16.msra.mxu1 %v13041_v23  ;;  %14205 = vmatprep.mubr.f32.mxu0 %v27174_v62  ;;  %v27176_v23 = vld [vmem:[#allocation44_spill] sm:$0xff] }
 0x9c3   :  { %21153 = vmatpush1.bf16.msra.mxu0 %v13043_v58  ;;  %20907 = vmatprep.subr.bf16.mxu1 %v13046_v57  ;;  %v13097_v58 = vld [vmem:[#allocation2 + $0x11a0] sm:$0xff]  ;;  %v27177_v57 = vld [vmem:[#allocation47_spill] sm:$0xff]  ;;  %v13099_v62 = vld [vmem:[#allocation2 + $0x11b0] sm:$0xff] }
 0x9c4   :  { %21155 = vmatprep.subr.bf16.mxu0 %v13048_v34  ;;  %v13102_v34 = vld [vmem:[#allocation2 + $0x11c8] sm:$0xff] }
 0x9c6   :  { %20909 = vmatpush1.bf16.msra.mxu1 %v13045_v45  ;;  %v27178_v45 = vld [vmem:[#allocation31_spill] sm:$0xff] }
 0x9c7   :  { %21157 = vmatpush1.bf16.msra.mxu0 %v13047_v42  ;;  %20911 = vmatprep.subr.bf16.mxu1 %v13050_v11  ;;  %v13104_v42 = vld [vmem:[#allocation2 + $0x11d8] sm:$0xff]  ;;  %v13101_v11 = vld [vmem:[#allocation2 + $0x11c0] sm:$0xff] }
 0x9c8   :  { %21159 = vmatprep.subr.bf16.mxu0 %v13052_v7  ;;  %v27179_v7 = vld [vmem:[#allocation30_spill] sm:$0xff] }
 0x9ca   :  { %20913 = vmatpush1.bf16.msra.mxu1 %v13049_v47  ;;  %v13103_v47 = vld [vmem:[#allocation2 + $0x11d0] sm:$0xff] }
 0x9cb   :  { %21161 = vmatpush1.bf16.msra.mxu0 %v13051_v39  ;;  %20915 = vmatprep.subr.bf16.mxu1 %v13054_v32  ;;  %v13106_v39 = vld [vmem:[#allocation2 + $0x11e8] sm:$0xff]  ;;  %v27180_v32 = vld [vmem:[#allocation25_spill] sm:$0xff] }
 0x9cc   :  { %21163 = vmatprep.subr.bf16.mxu0 %v13056_v49  ;;  %v13108_v49 = vld [vmem:[#allocation2 + $0x11f8] sm:$0xff] }
 0x9ce   :  { %20917 = vmatpush1.bf16.msra.mxu1 %v13053_v53  ;;  %v13105_v53 = vld [vmem:[#allocation2 + $0x11e0] sm:$0xff] }
 0x9cf   :  { %21165 = vmatpush1.bf16.msra.mxu0 %v13055_v13  ;;  %20919 = vmatprep.subr.bf16.mxu1 %v13058_v44  ;;  %v27181_v13 = vld [vmem:[#allocation54_spill] sm:$0xff]  ;;  %v13107_v44 = vld [vmem:[#allocation2 + $0x11f0] sm:$0xff] }
 0x9d0   :  { %21167 = vmatprep.subr.bf16.mxu0 %v13060_v27  ;;  %v13110_v27 = vld [vmem:[#allocation2 + $0x1208] sm:$0xff] }
 0x9d2   :  { %20921 = vmatpush1.bf16.msra.mxu1 %v13057_v63  ;;  %v27182_v63 = vld [vmem:[#allocation29_spill] sm:$0xff] }
 0x9d3   :  { %21169 = vmatpush1.bf16.msra.mxu0 %v13059_v5  ;;  %20923 = vmatprep.subr.bf16.mxu1 %v13062_v31  ;;  %v13112_v5 = vld [vmem:[#allocation2 + $0x1218] sm:$0xff]  ;;  %v13109_v31 = vld [vmem:[#allocation2 + $0x1200] sm:$0xff] }
 0x9d4   :  { %21171 = vmatprep.subr.bf16.mxu0 %v13064_v14  ;;  %v13111_v14 = vld [vmem:[#allocation2 + $0x1210] sm:$0xff] }
 0x9d6   :  { %20925 = vmatpush1.bf16.msra.mxu1 %v13061_v20  ;;  %v13114_v20 = vld [vmem:[#allocation2 + $0x1228] sm:$0xff] }
 0x9d7   :  { %21173 = vmatpush1.bf16.msra.mxu0 %v13063_v54  ;;  %20927 = vmatprep.subr.bf16.mxu1 %v13066_v29  ;;  %v13116_v54 = vld [vmem:[#allocation2 + $0x1238] sm:$0xff]  ;;  %v13113_v29 = vld [vmem:[#allocation2 + $0x1220] sm:$0xff] }
 0x9d8   :  { %21175 = vmatprep.subr.bf16.mxu0 %v13068_v6  ;;  %v13115_v6 = vld [vmem:[#allocation2 + $0x1230] sm:$0xff] }
 0x9da   :  { %20929 = vmatpush1.bf16.msra.mxu1 %v13065_v9  ;;  %v13118_v9 = vld [vmem:[#allocation2 + $0x1248] sm:$0xff] }
 0x9db   :  { %21177 = vmatpush1.bf16.msra.mxu0 %v13067_v56  ;;  %20931 = vmatprep.subr.bf16.mxu1 %v13070_v55  ;;  %v13120_v56 = vld [vmem:[#allocation2 + $0x1258] sm:$0xff]  ;;  %v13117_v55 = vld [vmem:[#allocation2 + $0x1240] sm:$0xff] }
 0x9dc   :  { %21179 = vmatprep.subr.bf16.mxu0 %v13072_v18  ;;  %v13119_v18 = vld [vmem:[#allocation2 + $0x1250] sm:$0xff] }
 0x9de   :  { %20933 = vmatpush1.bf16.msra.mxu1 %v13069_v28  ;;  %v13122_v28 = vld [vmem:[#allocation2 + $0x1268] sm:$0xff] }
 0x9df   :  { %21181 = vmatpush1.bf16.msra.mxu0 %v13071_v41  ;;  %20935 = vmatprep.subr.bf16.mxu1 %v13074_v16  ;;  %v13124_v41 = vld [vmem:[#allocation2 + $0x1278] sm:$0xff]  ;;  %v13121_v16 = vld [vmem:[#allocation2 + $0x1260] sm:$0xff] }
 0x9e0   :  { %21183 = vmatprep.subr.bf16.mxu0 %v13076_v30  ;;  %v13123_v30 = vld [vmem:[#allocation2 + $0x1270] sm:$0xff] }
 0x9e2   :  { %20937 = vmatpush1.bf16.msra.mxu1 %v13073_v61  ;;  %v13126_v61 = vld [vmem:[#allocation2 + $0x1288] sm:$0xff] }
 0x9e3   :  { %21185 = vmatpush1.bf16.msra.mxu0 %v13075_v50  ;;  %20939 = vmatprep.subr.bf16.mxu1 %v13078_v60  ;;  %v13128_v50 = vld [vmem:[#allocation2 + $0x1298] sm:$0xff]  ;;  %v13125_v60 = vld [vmem:[#allocation2 + $0x1280] sm:$0xff] }
 0x9e4   :  { %21187 = vmatprep.subr.bf16.mxu0 %v13080_v51  ;;  %v13127_v51 = vld [vmem:[#allocation2 + $0x1290] sm:$0xff] }
 0x9e6   :  { %20941 = vmatpush1.bf16.msra.mxu1 %v13077_v25  ;;  %v13130_v25 = vld [vmem:[#allocation2 + $0x12a8] sm:$0xff] }
 0x9e7   :  { %21189 = vmatpush1.bf16.msra.mxu0 %v13079_v52  ;;  %20943 = vmatprep.subr.bf16.mxu1 %v13082_v21  ;;  %v13132_v52 = vld [vmem:[#allocation2 + $0x12b8] sm:$0xff]  ;;  %v13129_v21 = vld [vmem:[#allocation2 + $0x12a0] sm:$0xff] }
 0x9e8   :  { %21191 = vmatprep.subr.bf16.mxu0 %v13084_v17  ;;  %v13131_v17 = vld [vmem:[#allocation2 + $0x12b0] sm:$0xff] }
 0x9ea   :  { %20945 = vmatpush1.bf16.msra.mxu1 %v13081_v4  ;;  %v13134_v4 = vld [vmem:[#allocation2 + $0x12c8] sm:$0xff] }
 0x9eb   :  { %21193 = vmatpush1.bf16.msra.mxu0 %v13083_v38  ;;  %20947 = vmatprep.subr.bf16.mxu1 %v13086_v59  ;;  %v13136_v38 = vld [vmem:[#allocation2 + $0x12d8] sm:$0xff]  ;;  %v13133_v59 = vld [vmem:[#allocation2 + $0x12c0] sm:$0xff] }
 0x9ec   :  { %21195 = vmatprep.subr.bf16.mxu0 %v13088_v37  ;;  %v13135_v37 = vld [vmem:[#allocation2 + $0x12d0] sm:$0xff] }
 0x9ee   :  { %20949 = vmatpush1.bf16.msra.mxu1 %v13085_v19  ;;  %v13138_v19 = vld [vmem:[#allocation2 + $0x12e8] sm:$0xff] }
 0x9ef   :  { %21197 = vmatpush1.bf16.msra.mxu0 %v13087_v12  ;;  %20951 = vmatprep.subr.bf16.mxu1 %v13090_v35  ;;  %v13140_v12 = vld [vmem:[#allocation2 + $0x12f8] sm:$0xff]  ;;  %v13137_v35 = vld [vmem:[#allocation2 + $0x12e0] sm:$0xff] }
 0x9f0   :  { %21199 = vmatprep.subr.bf16.mxu0 %v13092_v1  ;;  %v13139_v1 = vld [vmem:[#allocation2 + $0x12f0] sm:$0xff] }
 0x9f2   :  { %20953 = vmatpush1.bf16.msra.mxu1 %v13089_v22  ;;  %v13142_v22 = vld [vmem:[#allocation2 + $0x1308] sm:$0xff] }
 0x9f3   :  { %21201 = vmatpush1.bf16.msra.mxu0 %v13091_v48  ;;  %20955 = vmatprep.subr.bf16.mxu1 %v13094_v2  ;;  %v13144_v48 = vld [vmem:[#allocation2 + $0x1318] sm:$0xff]  ;;  %v13141_v2 = vld [vmem:[#allocation2 + $0x1300] sm:$0xff] }
 0x9f4   :  { %21203 = vmatprep.subr.bf16.mxu0 %v13096_v10  ;;  %v13143_v10 = vld [vmem:[#allocation2 + $0x1310] sm:$0xff] }
 0x9f5   :  { %13850 = vmatmul.mubr.f32.vlgmr.msra.gmra.mrb[96].mxu1 %v27175_v46 }
 0x9f6   :  { %14206 = vmatmul.mubr.f32.vlgmr.msra.gmra.mrb[96].mxu0 %v27175_v46  ;;  %13855 = vmatprep.mubr.f32.mxu1 %v27176_v23  ;;  %v13148_v46 = vld [vmem:[#allocation2 + $0x1338] sm:$0xff] }
 0x9f7   :  { %20957 = vmatpush1.bf16.msra.mxu1 %v13093_v3  ;;  %14211 = vmatprep.mubr.f32.mxu0 %v27176_v23  ;;  %v13146_v3 = vld [vmem:[#allocation2 + $0x1328] sm:$0xff] }
 0x9f8   :  { %21205 = vmatpush1.bf16.msra.mxu0 %v13095_v0  ;;  %20959 = vmatprep.subr.bf16.mxu1 %v13098_v43  ;;  %v13145_v0 = vld [vmem:[#allocation2 + $0x1320] sm:$0xff]  ;;  %v13147_v43 = vld [vmem:[#allocation2 + $0x1330] sm:$0xff]  ;;  %v13150_v23 = vld [vmem:[#allocation2 + $0x1348] sm:$0xff] }
 0x9f9   :  { %13856 = vmatmul.mubr.f32.gmra.mrb[98].mxu1 %v27177_v57  ;;  %21207 = vmatprep.subr.bf16.mxu0 %v13100_v40  ;;  %v13152_v40 = vld [vmem:[#allocation2 + $0x1358] sm:$0xff] }
 0x9fa   :  { %14212 = vmatmul.mubr.f32.gmra.mrb[98].mxu0 %v27177_v57  ;;  %13861 = vmatprep.mubr.f32.mxu1 %v27178_v45  ;;  %v13151_v57 = vld [vmem:[#allocation2 + $0x1350] sm:$0xff] }
 0x9fb   :  { %20961 = vmatpush1.bf16.msra.mxu1 %v13097_v58  ;;  %14217 = vmatprep.mubr.f32.mxu0 %v27178_v45  ;;  %v13149_v58 = vld [vmem:[#allocation2 + $0x1340] sm:$0xff] }
 0x9fc   :  { %21209 = vmatpush1.bf16.msra.mxu0 %v13099_v62  ;;  %20963 = vmatprep.subr.bf16.mxu1 %v13102_v34  ;;  %v13154_v62 = vld [vmem:[#allocation2 + $0x1368] sm:$0xff]  ;;  %v13156_v34 = vld [vmem:[#allocation2 + $0x1378] sm:$0xff]  ;;  %v13153_v45 = vld [vmem:[#allocation2 + $0x1360] sm:$0xff] }
 0x9fd   :  { %13862 = vmatmul.mubr.f32.gmra.mrb[100].mxu1 %v27179_v7  ;;  %21211 = vmatprep.subr.bf16.mxu0 %v13104_v42  ;;  %v13155_v42 = vld [vmem:[#allocation2 + $0x1370] sm:$0xff] }
 0x9fe   :  { %14218 = vmatmul.mubr.f32.gmra.mrb[100].mxu0 %v27179_v7  ;;  %13867 = vmatprep.mubr.f32.mxu1 %v27180_v32  ;;  %v13160_v7 = vld [vmem:[#allocation2 + $0x1398] sm:$0xff] }
 0x9ff   :  { %20965 = vmatpush1.bf16.msra.mxu1 %v13101_v11  ;;  %14223 = vmatprep.mubr.f32.mxu0 %v27180_v32  ;;  %v13158_v11 = vld [vmem:[#allocation2 + $0x1388] sm:$0xff]  ;;  %v13159_v32 = vld [vmem:[#allocation2 + $0x1390] sm:$0xff] }
 0xa00   :  { %21213 = vmatpush1.bf16.msra.mxu0 %v13103_v47  ;;  %20967 = vmatprep.subr.bf16.mxu1 %v13106_v39  ;;  %v13157_v47 = vld [vmem:[#allocation2 + $0x1380] sm:$0xff]  ;;  %v27183_v39 = vld [vmem:[#allocation28_spill] sm:$0xff] }
 0xa01   :  { %13868 = vmatmul.mubr.f32.gmra.mrb[102].mxu1 %v27181_v13  ;;  %21215 = vmatprep.subr.bf16.mxu0 %v13108_v49  ;;  %v13162_v49 = vld [vmem:[#allocation2 + $0x13a8] sm:$0xff] }
 0xa02   :  { %14224 = vmatmul.mubr.f32.gmra.mrb[102].mxu0 %v27181_v13  ;;  %13938 = vmatprep.mubr.f32.mxu1 %v27182_v63  ;;  %v13164_v13 = vld [vmem:[#allocation2 + $0x13b8] sm:$0xff] }
 0xa03   :  { %20969 = vmatpush1.bf16.msra.mxu1 %v13105_v53  ;;  %14294 = vmatprep.mubr.f32.mxu0 %v27182_v63  ;;  %v27184_v53 = vld [vmem:[#allocation23_spill] sm:$0xff]  ;;  %v13163_v63 = vld [vmem:[#allocation2 + $0x13b0] sm:$0xff] }
 0xa04   :  { %21217 = vmatpush1.bf16.msra.mxu0 %v13107_v44  ;;  %20971 = vmatprep.subr.bf16.mxu1 %v13110_v27  ;;  %v13161_v44 = vld [vmem:[#allocation2 + $0x13a0] sm:$0xff]  ;;  %v27185_v27 = vld [vmem:[#allocation53_spill] sm:$0xff] }
 0xa05   :  { %21219 = vmatprep.subr.bf16.mxu0 %v13112_v5  ;;  %v13166_v5 = vld [vmem:[#allocation2 + $0x13c8] sm:$0xff] }
 0xa07   :  { %20973 = vmatpush1.bf16.msra.mxu1 %v13109_v31  ;;  %v27186_v31 = vld [vmem:[#allocation46_spill] sm:$0xff] }
 0xa08   :  { %21221 = vmatpush1.bf16.msra.mxu0 %v13111_v14  ;;  %20975 = vmatprep.subr.bf16.mxu1 %v13114_v20  ;;  %v13168_v14 = vld [vmem:[#allocation2 + $0x13d8] sm:$0xff]  ;;  %v13165_v20 = vld [vmem:[#allocation2 + $0x13c0] sm:$0xff] }
 0xa09   :  { %21223 = vmatprep.subr.bf16.mxu0 %v13116_v54  ;;  %v27187_v54 = vld [vmem:[#allocation48_spill] sm:$0xff] }
 0xa0b   :  { %20977 = vmatpush1.bf16.msra.mxu1 %v13113_v29  ;;  %v13167_v29 = vld [vmem:[#allocation2 + $0x13d0] sm:$0xff] }
 0xa0c   :  { %21225 = vmatpush1.bf16.msra.mxu0 %v13115_v6  ;;  %20979 = vmatprep.subr.bf16.mxu1 %v13118_v9  ;;  %v13170_v6 = vld [vmem:[#allocation2 + $0x13e8] sm:$0xff]  ;;  %v27188_v9 = vld [vmem:[#allocation33_spill] sm:$0xff] }
 0xa0d   :  { %21227 = vmatprep.subr.bf16.mxu0 %v13120_v56  ;;  %v13172_v56 = vld [vmem:[#allocation2 + $0x13f8] sm:$0xff] }
 0xa0f   :  { %20981 = vmatpush1.bf16.msra.mxu1 %v13117_v55  ;;  %v13169_v55 = vld [vmem:[#allocation2 + $0x13e0] sm:$0xff] }
 0xa10   :  { %21229 = vmatpush1.bf16.msra.mxu0 %v13119_v18  ;;  %20983 = vmatprep.subr.bf16.mxu1 %v13122_v28  ;;  %v27189_v18 = vld [vmem:[#allocation32_spill] sm:$0xff] }
 0xa11   :  { %21231 = vmatprep.subr.bf16.mxu0 %v13124_v41  ;;  %v13171_v28 = vld [vmem:[#allocation2 + $0x13f0] sm:$0xff]  ;;  %v13174_v41 = vld [vmem:[#allocation2 + $0x1408] sm:$0xff] }
 0xa13   :  { %20985 = vmatpush1.bf16.msra.mxu1 %v13121_v16  ;;  %v27190_v16 = vld [vmem:[#allocation38_spill] sm:$0xff] }
 0xa14   :  { %21233 = vmatpush1.bf16.msra.mxu0 %v13123_v30  ;;  %20987 = vmatprep.subr.bf16.mxu1 %v13126_v61  ;;  %v13176_v30 = vld [vmem:[#allocation2 + $0x1418] sm:$0xff]  ;;  %v13173_v61 = vld [vmem:[#allocation2 + $0x1400] sm:$0xff] }
 0xa15   :  { %21235 = vmatprep.subr.bf16.mxu0 %v13128_v50  ;;  %v13175_v50 = vld [vmem:[#allocation2 + $0x1410] sm:$0xff] }
 0xa17   :  { %20989 = vmatpush1.bf16.msra.mxu1 %v13125_v60  ;;  %v13178_v60 = vld [vmem:[#allocation2 + $0x1428] sm:$0xff] }
 0xa18   :  { %21237 = vmatpush1.bf16.msra.mxu0 %v13127_v51  ;;  %20991 = vmatprep.subr.bf16.mxu1 %v13130_v25  ;;  %v13180_v51 = vld [vmem:[#allocation2 + $0x1438] sm:$0xff]  ;;  %v13177_v25 = vld [vmem:[#allocation2 + $0x1420] sm:$0xff] }
 0xa19   :  { %21239 = vmatprep.subr.bf16.mxu0 %v13132_v52  ;;  %v13179_v52 = vld [vmem:[#allocation2 + $0x1430] sm:$0xff] }
 0xa1b   :  { %20993 = vmatpush1.bf16.msra.mxu1 %v13129_v21  ;;  %v13182_v21 = vld [vmem:[#allocation2 + $0x1448] sm:$0xff] }
 0xa1c   :  { %21241 = vmatpush1.bf16.msra.mxu0 %v13131_v17  ;;  %20995 = vmatprep.subr.bf16.mxu1 %v13134_v4  ;;  %v13184_v17 = vld [vmem:[#allocation2 + $0x1458] sm:$0xff]  ;;  %v13181_v4 = vld [vmem:[#allocation2 + $0x1440] sm:$0xff] }
 0xa1d   :  { %21243 = vmatprep.subr.bf16.mxu0 %v13136_v38  ;;  %v13183_v38 = vld [vmem:[#allocation2 + $0x1450] sm:$0xff] }
 0xa1f   :  { %20997 = vmatpush1.bf16.msra.mxu1 %v13133_v59  ;;  %v13186_v59 = vld [vmem:[#allocation2 + $0x1468] sm:$0xff] }
 0xa20   :  { %21245 = vmatpush1.bf16.msra.mxu0 %v13135_v37  ;;  %20999 = vmatprep.subr.bf16.mxu1 %v13138_v19  ;;  %v13188_v37 = vld [vmem:[#allocation2 + $0x1478] sm:$0xff]  ;;  %v13185_v19 = vld [vmem:[#allocation2 + $0x1460] sm:$0xff] }
 0xa21   :  { %21247 = vmatprep.subr.bf16.mxu0 %v13140_v12  ;;  %v13187_v12 = vld [vmem:[#allocation2 + $0x1470] sm:$0xff] }
 0xa23   :  { %21001 = vmatpush1.bf16.msra.mxu1 %v13137_v35  ;;  %v13190_v35 = vld [vmem:[#allocation2 + $0x1488] sm:$0xff] }
 0xa24   :  { %21249 = vmatpush1.bf16.msra.mxu0 %v13139_v1  ;;  %21003 = vmatprep.subr.bf16.mxu1 %v13142_v22  ;;  %v13192_v1 = vld [vmem:[#allocation2 + $0x1498] sm:$0xff]  ;;  %v13189_v22 = vld [vmem:[#allocation2 + $0x1480] sm:$0xff] }
 0xa25   :  { %21251 = vmatprep.subr.bf16.mxu0 %v13144_v48  ;;  %v13191_v48 = vld [vmem:[#allocation2 + $0x1490] sm:$0xff] }
 0xa27   :  { %21005 = vmatpush1.bf16.msra.mxu1 %v13141_v2  ;;  %v13194_v2 = vld [vmem:[#allocation2 + $0x14a8] sm:$0xff] }
 0xa28   :  { %21253 = vmatpush1.bf16.msra.mxu0 %v13143_v10  ;;  %21007 = vmatprep.subr.bf16.mxu1 %v13146_v3  ;;  %v13196_v10 = vld [vmem:[#allocation2 + $0x14b8] sm:$0xff]  ;;  %v13193_v3 = vld [vmem:[#allocation2 + $0x14a0] sm:$0xff] }
 0xa29   :  { %21255 = vmatprep.subr.bf16.mxu0 %v13148_v46  ;;  %v13195_v46 = vld [vmem:[#allocation2 + $0x14b0] sm:$0xff] }
 0xa2b   :  { %21009 = vmatpush1.bf16.msra.mxu1 %v13145_v0  ;;  %v13198_v0 = vld [vmem:[#allocation2 + $0x14c8] sm:$0xff] }
 0xa2c   :  { %21257 = vmatpush1.bf16.msra.mxu0 %v13147_v43  ;;  %21011 = vmatprep.subr.bf16.mxu1 %v13150_v23  ;;  %v13200_v43 = vld [vmem:[#allocation2 + $0x14d8] sm:$0xff]  ;;  %v13197_v23 = vld [vmem:[#allocation2 + $0x14c0] sm:$0xff] }
 0xa2d   :  { %21259 = vmatprep.subr.bf16.mxu0 %v13152_v40  ;;  %v13199_v40 = vld [vmem:[#allocation2 + $0x14d0] sm:$0xff] }
 0xa2f   :  { %21013 = vmatpush1.bf16.msra.mxu1 %v13149_v58  ;;  %v13202_v58 = vld [vmem:[#allocation2 + $0x14e8] sm:$0xff] }
 0xa30   :  { %21261 = vmatpush1.bf16.msra.mxu0 %v13151_v57  ;;  %21015 = vmatprep.subr.bf16.mxu1 %v13154_v62  ;;  %v13204_v57 = vld [vmem:[#allocation2 + $0x14f8] sm:$0xff]  ;;  %v13201_v62 = vld [vmem:[#allocation2 + $0x14e0] sm:$0xff] }
 0xa31   :  { %21263 = vmatprep.subr.bf16.mxu0 %v13156_v34  ;;  %v13203_v34 = vld [vmem:[#allocation2 + $0x14f0] sm:$0xff] }
 0xa33   :  { %21017 = vmatpush1.bf16.msra.mxu1 %v13153_v45  ;;  %v13206_v45 = vld [vmem:[#allocation2 + $0x1508] sm:$0xff] }
 0xa34   :  { %21265 = vmatpush1.bf16.msra.mxu0 %v13155_v42  ;;  %21019 = vmatprep.subr.bf16.mxu1 %v13158_v11  ;;  %v13208_v42 = vld [vmem:[#allocation2 + $0x1518] sm:$0xff]  ;;  %v13205_v11 = vld [vmem:[#allocation2 + $0x1500] sm:$0xff] }
 0xa35   :  { %21267 = vmatprep.subr.bf16.mxu0 %v13160_v7  ;;  %v13207_v7 = vld [vmem:[#allocation2 + $0x1510] sm:$0xff] }
 0xa36   :  { %13939 = vmatmul.mubr.f32.vlgmr.msra.gmra.mrb[96].mxu1 %v27183_v39 }
 0xa37   :  { %14295 = vmatmul.mubr.f32.vlgmr.msra.gmra.mrb[96].mxu0 %v27183_v39  ;;  %13944 = vmatprep.mubr.f32.mxu1 %v27184_v53  ;;  %v13212_v39 = vld [vmem:[#allocation2 + $0x1538] sm:$0xff] }
 0xa38   :  { %21021 = vmatpush1.bf16.msra.mxu1 %v13157_v47  ;;  %14300 = vmatprep.mubr.f32.mxu0 %v27184_v53  ;;  %v13210_v47 = vld [vmem:[#allocation2 + $0x1528] sm:$0xff] }
 0xa39   :  { %21269 = vmatpush1.bf16.msra.mxu0 %v13159_v32  ;;  %21023 = vmatprep.subr.bf16.mxu1 %v13162_v49  ;;  %v13209_v32 = vld [vmem:[#allocation2 + $0x1520] sm:$0xff]  ;;  %v13211_v49 = vld [vmem:[#allocation2 + $0x1530] sm:$0xff]  ;;  %v13214_v53 = vld [vmem:[#allocation2 + $0x1548] sm:$0xff] }
 0xa3a   :  { %13945 = vmatmul.mubr.f32.gmra.mrb[98].mxu1 %v27185_v27  ;;  %21271 = vmatprep.subr.bf16.mxu0 %v13164_v13  ;;  %v13216_v13 = vld [vmem:[#allocation2 + $0x1558] sm:$0xff] }
 0xa3b   :  { %14301 = vmatmul.mubr.f32.gmra.mrb[98].mxu0 %v27185_v27  ;;  %13950 = vmatprep.mubr.f32.mxu1 %v27186_v31  ;;  %v13215_v27 = vld [vmem:[#allocation2 + $0x1550] sm:$0xff] }
 0xa3c   :  { %21025 = vmatpush1.bf16.msra.mxu1 %v13161_v44  ;;  %14306 = vmatprep.mubr.f32.mxu0 %v27186_v31  ;;  %v13213_v44 = vld [vmem:[#allocation2 + $0x1540] sm:$0xff] }
 0xa3d   :  { %21273 = vmatpush1.bf16.msra.mxu0 %v13163_v63  ;;  %21027 = vmatprep.subr.bf16.mxu1 %v13166_v5  ;;  %v13218_v63 = vld [vmem:[#allocation2 + $0x1568] sm:$0xff]  ;;  %v13220_v5 = vld [vmem:[#allocation2 + $0x1578] sm:$0xff]  ;;  %v13217_v31 = vld [vmem:[#allocation2 + $0x1560] sm:$0xff] }
 0xa3e   :  { %13951 = vmatmul.mubr.f32.gmra.mrb[100].mxu1 %v27187_v54  ;;  %21275 = vmatprep.subr.bf16.mxu0 %v13168_v14  ;;  %v13219_v14 = vld [vmem:[#allocation2 + $0x1570] sm:$0xff] }
 0xa3f   :  { %14307 = vmatmul.mubr.f32.gmra.mrb[100].mxu0 %v27187_v54  ;;  %13956 = vmatprep.mubr.f32.mxu1 %v27188_v9  ;;  %v13224_v54 = vld [vmem:[#allocation2 + $0x1598] sm:$0xff] }
 0xa40   :  { %21029 = vmatpush1.bf16.msra.mxu1 %v13165_v20  ;;  %14312 = vmatprep.mubr.f32.mxu0 %v27188_v9  ;;  %v13222_v20 = vld [vmem:[#allocation2 + $0x1588] sm:$0xff]  ;;  %v13223_v9 = vld [vmem:[#allocation2 + $0x1590] sm:$0xff] }
 0xa41   :  { %21277 = vmatpush1.bf16.msra.mxu0 %v13167_v29  ;;  %21031 = vmatprep.subr.bf16.mxu1 %v13170_v6  ;;  %v13221_v29 = vld [vmem:[#allocation2 + $0x1580] sm:$0xff]  ;;  %v27191_v6 = vld [vmem:[#allocation49_spill] sm:$0xff] }
 0xa42   :  { %13957 = vmatmul.mubr.f32.gmra.mrb[102].mxu1 %v27189_v18  ;;  %21279 = vmatprep.subr.bf16.mxu0 %v13172_v56  ;;  %v13226_v56 = vld [vmem:[#allocation2 + $0x15a8] sm:$0xff] }
 0xa43   :  { %14313 = vmatmul.mubr.f32.gmra.mrb[102].mxu0 %v27189_v18  ;;  %14027 = vmatprep.mubr.f32.mxu1 %v27190_v16  ;;  %v13225_v18 = vld [vmem:[#allocation2 + $0x15a0] sm:$0xff] }
 0xa44   :  { %21033 = vmatpush1.bf16.msra.mxu1 %v13169_v55  ;;  %14383 = vmatprep.mubr.f32.mxu0 %v27190_v16  ;;  %v13228_v55 = vld [vmem:[#allocation2 + $0x15b8] sm:$0xff] }
 0xa45   :  { %21281 = vmatpush1.bf16.msra.mxu0 %v13171_v28  ;;  %21035 = vmatprep.subr.bf16.mxu1 %v13174_v41  ;;  %v13227_v28 = vld [vmem:[#allocation2 + $0x15b0] sm:$0xff]  ;;  %v13230_v41 = vld [vmem:[#allocation2 + $0x15c8] sm:$0xff]  ;;  %v13232_v16 = vld [vmem:[#allocation2 + $0x15d8] sm:$0xff] }
 0xa46   :  { %21283 = vmatprep.subr.bf16.mxu0 %v13176_v30  ;;  %v13229_v30 = vld [vmem:[#allocation2 + $0x15c0] sm:$0xff] }
 0xa48   :  { %21037 = vmatpush1.bf16.msra.mxu1 %v13173_v61  ;;  %v13234_v61 = vld [vmem:[#allocation2 + $0x15e8] sm:$0xff] }
 0xa49   :  { %21285 = vmatpush1.bf16.msra.mxu0 %v13175_v50  ;;  %21039 = vmatprep.subr.bf16.mxu1 %v13178_v60  ;;  %v27192_v50 = vld [vmem:[#allocation58_spill] sm:$0xff]  ;;  %v13236_v60 = vld [vmem:[#allocation2 + $0x15f8] sm:$0xff] }
 0xa4a   :  { %21287 = vmatprep.subr.bf16.mxu0 %v13180_v51  ;;  %v13235_v51 = vld [vmem:[#allocation2 + $0x15f0] sm:$0xff] }
 0xa4c   :  { %21041 = vmatpush1.bf16.msra.mxu1 %v13177_v25  ;;  %v13238_v25 = vld [vmem:[#allocation2 + $0x1608] sm:$0xff] }
 0xa4d   :  { %21289 = vmatpush1.bf16.msra.mxu0 %v13179_v52  ;;  %21043 = vmatprep.subr.bf16.mxu1 %v13182_v21  ;;  %v27194_v52 = vld [vmem:[#allocation35_spill] sm:$0xff]  ;;  %v13237_v21 = vld [vmem:[#allocation2 + $0x1600] sm:$0xff] }
 0xa4e   :  { %21291 = vmatprep.subr.bf16.mxu0 %v13184_v17  ;;  %v13239_v17 = vld [vmem:[#allocation2 + $0x1610] sm:$0xff] }
 0xa50   :  { %21045 = vmatpush1.bf16.msra.mxu1 %v13181_v4  ;;  %v13242_v4 = vld [vmem:[#allocation2 + $0x1628] sm:$0xff] }
 0xa51   :  { %21293 = vmatpush1.bf16.msra.mxu0 %v13183_v38  ;;  %21047 = vmatprep.subr.bf16.mxu1 %v13186_v59  ;;  %v13244_v38 = vld [vmem:[#allocation2 + $0x1638] sm:$0xff]  ;;  %v13241_v59 = vld [vmem:[#allocation2 + $0x1620] sm:$0xff] }
 0xa52   :  { %21295 = vmatprep.subr.bf16.mxu0 %v13188_v37  ;;  %v13243_v37 = vld [vmem:[#allocation2 + $0x1630] sm:$0xff] }
 0xa54   :  { %21049 = vmatpush1.bf16.msra.mxu1 %v13185_v19  ;;  %v13246_v19 = vld [vmem:[#allocation2 + $0x1648] sm:$0xff] }
 0xa55   :  { %21297 = vmatpush1.bf16.msra.mxu0 %v13187_v12  ;;  %21051 = vmatprep.subr.bf16.mxu1 %v13190_v35  ;;  %v13248_v12 = vld [vmem:[#allocation2 + $0x1658] sm:$0xff]  ;;  %v13245_v35 = vld [vmem:[#allocation2 + $0x1640] sm:$0xff] }
 0xa56   :  { %21299 = vmatprep.subr.bf16.mxu0 %v13192_v1  ;;  %v13247_v1 = vld [vmem:[#allocation2 + $0x1650] sm:$0xff] }
 0xa58   :  { %21053 = vmatpush1.bf16.msra.mxu1 %v13189_v22  ;;  %v13250_v22 = vld [vmem:[#allocation2 + $0x1668] sm:$0xff] }
 0xa59   :  { %21301 = vmatpush1.bf16.msra.mxu0 %v13191_v48  ;;  %21055 = vmatprep.subr.bf16.mxu1 %v13194_v2  ;;  %v13252_v48 = vld [vmem:[#allocation2 + $0x1678] sm:$0xff]  ;;  %v13249_v2 = vld [vmem:[#allocation2 + $0x1660] sm:$0xff] }
 0xa5a   :  { %21303 = vmatprep.subr.bf16.mxu0 %v13196_v10  ;;  %v13251_v10 = vld [vmem:[#allocation2 + $0x1670] sm:$0xff] }
 0xa5c   :  { %21057 = vmatpush1.bf16.msra.mxu1 %v13193_v3  ;;  %v13254_v3 = vld [vmem:[#allocation2 + $0x1688] sm:$0xff] }
 0xa5d   :  { %21305 = vmatpush1.bf16.msra.mxu0 %v13195_v46  ;;  %21059 = vmatprep.subr.bf16.mxu1 %v13198_v0  ;;  %v13256_v46 = vld [vmem:[#allocation2 + $0x1698] sm:$0xff]  ;;  %v13253_v0 = vld [vmem:[#allocation2 + $0x1680] sm:$0xff] }
 0xa5e   :  { %21307 = vmatprep.subr.bf16.mxu0 %v13200_v43  ;;  %v13255_v43 = vld [vmem:[#allocation2 + $0x1690] sm:$0xff] }
 0xa60   :  { %21061 = vmatpush1.bf16.msra.mxu1 %v13197_v23  ;;  %v13258_v23 = vld [vmem:[#allocation2 + $0x16a8] sm:$0xff] }
 0xa61   :  { %21309 = vmatpush1.bf16.msra.mxu0 %v13199_v40  ;;  %21063 = vmatprep.subr.bf16.mxu1 %v13202_v58  ;;  %v13260_v40 = vld [vmem:[#allocation2 + $0x16b8] sm:$0xff]  ;;  %v13257_v58 = vld [vmem:[#allocation2 + $0x16a0] sm:$0xff] }
 0xa62   :  { %21311 = vmatprep.subr.bf16.mxu0 %v13204_v57  ;;  %v13259_v57 = vld [vmem:[#allocation2 + $0x16b0] sm:$0xff] }
 0xa64   :  { %21065 = vmatpush1.bf16.msra.mxu1 %v13201_v62  ;;  %v13262_v62 = vld [vmem:[#allocation2 + $0x16c8] sm:$0xff] }
 0xa65   :  { %21313 = vmatpush1.bf16.msra.mxu0 %v13203_v34  ;;  %21067 = vmatprep.subr.bf16.mxu1 %v13206_v45  ;;  %v13264_v34 = vld [vmem:[#allocation2 + $0x16d8] sm:$0xff]  ;;  %v13261_v45 = vld [vmem:[#allocation2 + $0x16c0] sm:$0xff] }
 0xa66   :  { %21315 = vmatprep.subr.bf16.mxu0 %v13208_v42  ;;  %v13263_v42 = vld [vmem:[#allocation2 + $0x16d0] sm:$0xff] }
 0xa68   :  { %21069 = vmatpush1.bf16.msra.mxu1 %v13205_v11  ;;  %v13266_v11 = vld [vmem:[#allocation2 + $0x16e8] sm:$0xff] }
 0xa69   :  { %21317 = vmatpush1.bf16.msra.mxu0 %v13207_v7  ;;  %21071 = vmatprep.subr.bf16.mxu1 %v13210_v47  ;;  %v13268_v7 = vld [vmem:[#allocation2 + $0x16f8] sm:$0xff]  ;;  %v13265_v47 = vld [vmem:[#allocation2 + $0x16e0] sm:$0xff] }
 0xa6a   :  { %21319 = vmatprep.subr.bf16.mxu0 %v13212_v39  ;;  %v13267_v39 = vld [vmem:[#allocation2 + $0x16f0] sm:$0xff] }
 0xa6c   :  { %21073 = vmatpush1.bf16.msra.mxu1 %v13209_v32  ;;  %v13270_v32 = vld [vmem:[#allocation2 + $0x1708] sm:$0xff] }
 0xa6d   :  { %21321 = vmatpush1.bf16.msra.mxu0 %v13211_v49  ;;  %21075 = vmatprep.subr.bf16.mxu1 %v13214_v53  ;;  %v13272_v49 = vld [vmem:[#allocation2 + $0x1718] sm:$0xff]  ;;  %v13269_v53 = vld [vmem:[#allocation2 + $0x1700] sm:$0xff] }
 0xa6e   :  { %21323 = vmatprep.subr.bf16.mxu0 %v13216_v13  ;;  %v13271_v13 = vld [vmem:[#allocation2 + $0x1710] sm:$0xff] }
 0xa70   :  { %21077 = vmatpush1.bf16.msra.mxu1 %v13213_v44  ;;  %v13274_v44 = vld [vmem:[#allocation2 + $0x1728] sm:$0xff] }
 0xa71   :  { %21325 = vmatpush1.bf16.msra.mxu0 %v13215_v27  ;;  %21079 = vmatprep.subr.bf16.mxu1 %v13218_v63  ;;  %v13276_v27 = vld [vmem:[#allocation2 + $0x1738] sm:$0xff]  ;;  %v13273_v63 = vld [vmem:[#allocation2 + $0x1720] sm:$0xff] }
 0xa72   :  { %21327 = vmatprep.subr.bf16.mxu0 %v13220_v5  ;;  %v13275_v5 = vld [vmem:[#allocation2 + $0x1730] sm:$0xff] }
 0xa74   :  { %21081 = vmatpush1.bf16.msra.mxu1 %v13217_v31  ;;  %v27195_v31 = vmov 0.0|0.0  }
 0xa75   :  { %21329 = vmatpush1.bf16.msra.mxu0 %v13219_v14  ;;  %21083 = vmatprep.subr.bf16.mxu1 %v13222_v20  ;;  %v18875_v14 = vld [vmem:[%s22767_s30 + $0x80] sm:$0xff]  }
 0xa76   :  { %21331 = vmatprep.subr.bf16.mxu0 %v13224_v54  ;;  %v27196_v20 = vld [vmem:[#allocation34_spill] sm:$0xff]  ;;  %v27197_v54 = vld [vmem:[#allocation52_spill] sm:$0xff] }
 0xa77   :  { %14028 = vmatmul.mubr.f32.vlgmr.msra.gmra.mrb[96].mxu1 %v27191_v6 }
 0xa78   :  { %14384 = vmatmul.mubr.f32.vlgmr.msra.gmra.mrb[96].mxu0 %v27191_v6  ;;  %14033 = vmatprep.mubr.f32.mxu1 %v26116_v36  ;;  %v27198_v6 = vld [vmem:[#allocation51_spill] sm:$0xff] }
 0xa79   :  { %21085 = vmatpush1.bf16.msra.mxu1 %v13221_v29  ;;  %14389 = vmatprep.mubr.f32.mxu0 %v26116_v36  ;;  %v13231_v36 = vld [vmem:[#allocation2 + $0x15d0] sm:$0xff]  ;;  %v18876_v29 = vld [vmem:[%s22767_s30 + $0x88] sm:$0xff]  }
 0xa7a   :  { %21333 = vmatpush1.bf16.msra.mxu0 %v13223_v9  ;;  %21087 = vmatprep.subr.bf16.mxu1 %v13226_v56  ;;  %v27199_v9 = vld [vmem:[#allocation57_spill] sm:$0xff]  ;;  %v18877_v56 = vld [vmem:[%s22767_s30 + $0x90] sm:$0xff]  }
 0xa7b   :  { %14034 = vmatmul.mubr.f32.gmra.mrb[98].mxu1 %v26110_v15  ;;  %21335 = vmatprep.subr.bf16.mxu0 %v13228_v55  ;;  %v27200_v55 = vld [vmem:[#allocation37_spill] sm:$0xff] }
 0xa7c   :  { %14390 = vmatmul.mubr.f32.gmra.mrb[98].mxu0 %v26110_v15  ;;  %14039 = vmatprep.mubr.f32.mxu1 %v26128_v8  ;;  %v13233_v15 = vld [vmem:[#allocation2 + $0x15e0] sm:$0xff] }
 0xa7d   :  { %21089 = vmatpush1.bf16.msra.mxu1 %v13225_v18  ;;  %14395 = vmatprep.mubr.f32.mxu0 %v26128_v8  ;;  %v27193_v8 = vld [vmem:[#allocation55_spill] sm:$0xff]  ;;  %v18878_v18 = vld [vmem:[%s22767_s30 + $0x98] sm:$0xff]  }
 0xa7e   :  { %21337 = vmatpush1.bf16.msra.mxu0 %v13227_v28  ;;  %21091 = vmatprep.subr.bf16.mxu1 %v13230_v41  ;;  %v18879_v28 = vld [vmem:[%s22767_s30 + $0xa0] sm:$0xff]  }
 0xa7f   :  { %14040 = vmatmul.mubr.f32.gmra.mrb[100].mxu1 %v26122_v24  ;;  %21339 = vmatprep.subr.bf16.mxu0 %v13232_v16  ;;  %v18867_v41 = vld [vmem:[%s22767_s30 + $0x40] sm:$0xff]   ;;  %v18881_v16 = vld [vmem:[%s22767_s30 + $0xb0] sm:$0xff]  }
 0xa80   :  { %14396 = vmatmul.mubr.f32.gmra.mrb[100].mxu0 %v26122_v24  ;;  %14045 = vmatprep.mubr.f32.mxu1 %v27192_v50  ;;  %v13240_v24 = vld [vmem:[#allocation2 + $0x1618] sm:$0xff] }
 0xa81   :  { %21093 = vmatpush1.bf16.msra.mxu1 %v13229_v30  ;;  %14401 = vmatprep.mubr.f32.mxu0 %v27192_v50  ;;  %v18868_v30 = vld [vmem:[%s22767_s30 + $0x48] sm:$0xff]   ;;  %v18869_v50 = vld [vmem:[%s22767_s30 + $0x50] sm:$0xff]  }
 0xa82   :  { %21341 = vmatpush1.bf16.msra.mxu0 %v13231_v36  ;;  %21095 = vmatprep.subr.bf16.mxu1 %v13234_v61  ;;  %v18860_v36 = vld [vmem:[%s22767_s30 + $0x8] sm:$0xff]   ;;  %v18882_v61 = vld [vmem:[%s22767_s30 + $0xb8] sm:$0xff]  }
 0xa83   :  { %14046 = vmatmul.mubr.f32.gmra.mrb[102].mxu1 %v27193_v8  ;;  %21343 = vmatprep.subr.bf16.mxu0 %v13236_v60  ;;  %v18861_v60 = vld [vmem:[%s22767_s30 + $0x10] sm:$0xff]  }
 0xa84   :  { %14402 = vmatmul.mubr.f32.gmra.mrb[102].mxu0 %v27193_v8  ;;  %17758 = vmatprep.mubr.msk.f32.mxu1 %vm8498_vm3, %v27194_v52  ;;  %v18870_v8 = vld [vmem:[%s22767_s30 + $0x58] sm:$0xff]  }
 0xa85   :  { %21097 = vmatpush1.bf16.msra.mxu1 %v13233_v15  ;;  %17762 = vmatprep.mubr.msk.f32.mxu0 %vm8498_vm3, %v27194_v52  ;;  %v18883_v15 = vld [vmem:[%s22767_s30 + $0xc0] sm:$0xff]  }
 0xa86   :  { %21345 = vmatpush1.bf16.msra.mxu0 %v13235_v51  ;;  %21099 = vmatprep.subr.bf16.mxu1 %v13238_v25  ;;  %v18862_v51 = vld [vmem:[%s22767_s30 + $0x18] sm:$0xff]   ;;  %v18884_v25 = vld [vmem:[%s22767_s30 + $0xc8] sm:$0xff]   ;;  %v18871_v52 = vld [vmem:[%s22767_s30 + $0x60] sm:$0xff]  }
 0xa87   :  { %21347 = vmatprep.subr.bf16.mxu0 %v13240_v24  ;;  %v18863_v24 = vld [vmem:[%s22767_s30 + $0x20] sm:$0xff]  }
 0xa89   :  { %21101 = vmatpush1.bf16.msra.mxu1 %v13237_v21  ;;  %v18885_v21 = vld [vmem:[%s22767_s30 + $0xd0] sm:$0xff]  }
 0xa8a   :  { %21349 = vmatpush1.bf16.msra.mxu0 %v13239_v17  ;;  %21103 = vmatprep.subr.bf16.mxu1 %v13242_v4  ;;  %v18872_v17 = vld [vmem:[%s22767_s30 + $0x68] sm:$0xff]  }
 0xa8b   :  { %21351 = vmatprep.subr.bf16.mxu0 %v13244_v38  ;;  %v18864_v4 = vld [vmem:[%s22767_s30 + $0x28] sm:$0xff]   ;;  %v18886_v38 = vld [vmem:[%s22767_s30 + $0xd8] sm:$0xff]  }
 0xa8d   :  { %21105 = vmatpush1.bf16.msra.mxu1 %v13241_v59  ;;  %v18873_v59 = vld [vmem:[%s22767_s30 + $0x70] sm:$0xff]  }
 0xa8e   :  { %21353 = vmatpush1.bf16.msra.mxu0 %v13243_v37  ;;  %21107 = vmatprep.subr.bf16.mxu1 %v13246_v19  ;;  %v18865_v37 = vld [vmem:[%s22767_s30 + $0x30] sm:$0xff]   ;;  %v18887_v19 = vld [vmem:[%s22767_s30 + $0xe0] sm:$0xff]  }
 0xa8f   :  { %21355 = vmatprep.subr.bf16.mxu0 %v13248_v12  ;;  %v18874_v12 = vld [vmem:[%s22767_s30 + $0x78] sm:$0xff]  }
 0xa91   :  { %21109 = vmatpush1.bf16.msra.mxu1 %v13245_v35  ;;  %v18866_v35 = vld [vmem:[%s22767_s30 + $0x38] sm:$0xff]  }
 0xa92   :  { %21357 = vmatpush1.bf16.msra.mxu0 %v13247_v1  ;;  %21111 = vmatprep.subr.bf16.mxu1 %v13250_v22  ;;  %v18888_v1 = vld [vmem:[%s22767_s30 + $0xe8] sm:$0xff]   ;;  %v14513_v22 = vld [vmem:[%s22762_s24] sm:$0xf]  ;;  %s27214_s24 = smov 16  }
 0xa93   :  { %21359 = vmatprep.subr.bf16.mxu0 %v13252_v48  ;;  %v27201_v48 = vld [vmem:[#allocation19_spill] sm:$0xff] }
 0xa95   :  { %21113 = vmatpush1.bf16.msra.mxu1 %v13249_v2  ;;  %v14518_v2 = vrot.slane %v14513_v22, %v27201_v48 }
 0xa96   :  { %21361 = vmatpush1.bf16.msra.mxu0 %v13251_v10  ;;  %21115 = vmatprep.subr.bf16.mxu1 %v13254_v3  ;;  %v27202_v10 = vld [vmem:[#allocation39_spill] sm:$0xff] }
 0xa97   :  { %21363 = vmatprep.subr.bf16.mxu0 %v13256_v46  ;;  %v14526_v3 = vrot.slane %v14513_v22, %v27202_v10  ;;  %v27203_v46 = vld [vmem:[#allocation20_spill] sm:$0xff] }
 0xa99   :  { %21117 = vmatpush1.bf16.msra.mxu1 %v13253_v0  ;;  %v26376_v0 = vrot.slane %v14513_v22, %v27203_v46 }
 0xa9a   :  { %21365 = vmatpush1.bf16.msra.mxu0 %v13255_v43  ;;  %21119 = vmatprep.subr.bf16.mxu1 %v13258_v23  ;;  %v27204_v43 = vld [vmem:[#allocation36_spill] sm:$0xff] }
 0xa9b   :  { %21367 = vmatprep.subr.bf16.mxu0 %v13260_v40  ;;  %v26379_v23 = vrot.slane %v14513_v22, %v27204_v43 }
 0xa9d   :  { %21121 = vmatpush1.bf16.msra.mxu1 %v13257_v58 }
 0xa9e   :  { %21369 = vmatpush1.bf16.msra.mxu0 %v13259_v57  ;;  %21123 = vmatprep.subr.bf16.mxu1 %v13262_v62 }
 0xa9f   :  { %21371 = vmatprep.subr.bf16.mxu0 %v13264_v34 }
 0xaa1   :  { %21125 = vmatpush1.bf16.msra.mxu1 %v13261_v45 }
 0xaa2   :  { %21373 = vmatpush1.bf16.msra.mxu0 %v13263_v42  ;;  %21127 = vmatprep.subr.bf16.mxu1 %v13266_v11 }
 0xaa3   :  { %21375 = vmatprep.subr.bf16.mxu0 %v13268_v7 }
 0xaa5   :  { %21129 = vmatpush1.bf16.msra.mxu1 %v13265_v47 }
 0xaa6   :  { %21377 = vmatpush1.bf16.msra.mxu0 %v13267_v39  ;;  %21131 = vmatprep.subr.bf16.mxu1 %v13270_v32 }
 0xaa7   :  { %21379 = vmatprep.subr.bf16.mxu0 %v13272_v49 }
 0xaa9   :  { %21133 = vmatpush1.bf16.msra.mxu1 %v13269_v53 }
 0xaaa   :  { %21381 = vmatpush1.bf16.msra.mxu0 %v13271_v13  ;;  %21135 = vmatprep.subr.bf16.mxu1 %v13274_v44 }
 0xaab   :  { %21383 = vmatprep.subr.bf16.mxu0 %v13276_v27 }
 0xaad   :  { %21137 = vmatpush1.bf16.msra.mxu1 %v13273_v63 }
 0xaae   :  { %21385 = vmatpush1.bf16.msra.mxu0 %v13275_v5  ;;  %21387 = vmatprep.subr.bf16.mxu1 %v18867_v41 }
 0xaaf   :  { %21418 = vmatprep.subr.bf16.mxu0 %v27195_v31 }
 0xab0   :  { %14117 = vmatmul.mubr.f32.vlgmr.msra.gmra.mrb[96].mxu1 %v27196_v20 }
 0xab1   :  { %14473 = vmatmul.mubr.f32.vlgmr.msra.gmra.mrb[96].mxu0 %v27196_v20  ;;  %17759 = vmatprep.mubr.msk.f32.mxu1 %vm8498_vm3, %v27197_v54 }
 0xab2   :  { %17763 = vmatprep.mubr.msk.f32.mxu0 %vm8498_vm3, %v27197_v54  ;;  %21420 = vmatpush1.bf16.msra.mxu0 %v18875_v14 }
 0xab3   :  { %21421 = vmatprep.subr.bf16.mxu0 %v27195_v31 }
 0xab4   :  { %14123 = vmatmul.mubr.f32.gmra.mrb[98].mxu1 %v27198_v6 }
 0xab5   :  { %14479 = vmatmul.mubr.f32.gmra.mrb[98].mxu0 %v27198_v6  ;;  %17760 = vmatprep.mubr.msk.f32.mxu1 %vm8498_vm3, %v27199_v9 }
 0xab6   :  { %17764 = vmatprep.mubr.msk.f32.mxu0 %vm8498_vm3, %v27199_v9  ;;  %21423 = vmatpush1.bf16.msra.mxu0 %v18876_v29 }
 0xab7   :  { %21424 = vmatprep.subr.bf16.mxu0 %v27195_v31 }
 0xab8   :  { %14129 = vmatmul.mubr.f32.gmra.mrb[100].mxu1 %v27200_v55 }
 0xab9   :  { %14485 = vmatmul.mubr.f32.gmra.mrb[100].mxu0 %v27200_v55  ;;  %17761 = vmatprep.mubr.msk.f32.mxu1 %vm8498_vm3, %v26144_v26 }
 0xaba   :  { %17765 = vmatprep.mubr.msk.f32.mxu0 %vm8498_vm3, %v26144_v26  ;;  %21426 = vmatpush1.bf16.msra.mxu0 %v18877_v56  ;;  %v18880_v26 = vld [vmem:[%s22767_s30 + $0xa8] sm:$0xff]  }
 0xabb   :  { %21427 = vmatprep.subr.bf16.mxu0 %v27195_v31 }
 0xabc   :  { %14135 = vmatmul.mubr.f32.gmra.mrb[102].mxu1 %v26142_v33 }
 0xabd   :  { %14491 = vmatmul.mubr.f32.gmra.mrb[102].mxu0 %v26142_v33  ;;  %v18248_v33 = vld [vmem:[%s22767_s30] sm:$0xff]   ;;  %s27215_s30 = smov 8  }
 0xabe   :  { %21429 = vmatpush1.bf16.msra.mxu0 %v18878_v18  ;;  %21389 = vmatpush3.bf16.msra.mxu1 %v18248_v33 }
 0xabf   :  { %21430 = vmatprep.subr.bf16.mxu0 %v27195_v31  ;;  %21391 = vmatprep.subr.bf16.mxu1 %v18868_v30 }
 0xac2   :  { %21432 = vmatpush1.bf16.msra.mxu0 %v18879_v28  ;;  %21393 = vmatpush3.bf16.msra.mxu1 %v18860_v36 }
 0xac3   :  { %21433 = vmatprep.subr.bf16.mxu0 %v27195_v31  ;;  %21395 = vmatprep.subr.bf16.mxu1 %v18869_v50 }
 0xac6   :  { %21435 = vmatpush1.bf16.msra.mxu0 %v18880_v26  ;;  %21397 = vmatpush3.bf16.msra.mxu1 %v18861_v60 }
 0xac7   :  { %21436 = vmatprep.subr.bf16.mxu0 %v27195_v31  ;;  %21399 = vmatprep.subr.bf16.mxu1 %v18870_v8 }
 0xaca   :  { %21438 = vmatpush1.bf16.msra.mxu0 %v18881_v16  ;;  %21401 = vmatpush3.bf16.msra.mxu1 %v18862_v51 }
 0xacb   :  { %21439 = vmatprep.subr.bf16.mxu0 %v27195_v31  ;;  %21403 = vmatprep.subr.bf16.mxu1 %v18871_v52 }
 0xace   :  { %21441 = vmatpush1.bf16.msra.mxu0 %v18882_v61  ;;  %21405 = vmatpush3.bf16.msra.mxu1 %v18863_v24 }
 0xacf   :  { %21442 = vmatprep.subr.bf16.mxu0 %v27195_v31  ;;  %21407 = vmatprep.subr.bf16.mxu1 %v18872_v17 }
 0xad2   :  { %21444 = vmatpush1.bf16.msra.mxu0 %v18883_v15  ;;  %21409 = vmatpush3.bf16.msra.mxu1 %v18864_v4 }
 0xad3   :  { %21445 = vmatprep.subr.bf16.mxu0 %v27195_v31  ;;  %21411 = vmatprep.subr.bf16.mxu1 %v18873_v59 }
 0xad6   :  { %21447 = vmatpush1.bf16.msra.mxu0 %v18884_v25  ;;  %21413 = vmatpush3.bf16.msra.mxu1 %v18865_v37 }
 0xad7   :  { %21448 = vmatprep.subr.bf16.mxu0 %v27195_v31  ;;  %21415 = vmatprep.subr.bf16.mxu1 %v18874_v12 }
 0xada   :  { %21450 = vmatpush1.bf16.msra.mxu0 %v18885_v21  ;;  %21417 = vmatpush3.bf16.msra.mxu1 %v18866_v35 }
 0xadb   :  { %21451 = vmatprep.subr.bf16.mxu0 %v27195_v31 }
 0xade   :  { %21453 = vmatpush1.bf16.msra.mxu0 %v18886_v38 }
 0xadf   :  { %21454 = vmatprep.subr.bf16.mxu0 %v27195_v31 }
 0xae2   :  { %21456 = vmatpush1.bf16.msra.mxu0 %v18887_v19 }
 0xae3   :  { %21457 = vmatprep.subr.bf16.mxu0 %v27195_v31 }
 0xae6   :  { %21459 = vmatpush1.bf16.msra.mxu0 %v18888_v1 }
 0xb83   :  { %v14118_v40 = vpop.f32.mrb[96].mxu1 }
 0xb84   :  { %v14535_v58 = vadd.f32 %v14518_v2, %v14118_v40  ;;  %v14474_v57 = vpop.f32.mrb[96].mxu0  ;;  %v14120_v62 = vpop.f32.mrb[97].mxu1 }
 0xb85   :  { %v14537_v34 = vadd.f32 %v14526_v3, %v14474_v57  ;;  %v14536_v45 = vadd.f32 %v26376_v0, %v14120_v62  ;;  %v14476_v42 = vpop.f32.mrb[97].mxu0 }
 0xb86   :  { %v14538_v11 = vadd.f32 %v26379_v23, %v14476_v42  ;;  %v26383_v47 = vmax.f32 %v14535_v58, 0.0 }
 0xb87   :  { %v14124_v7 = vpop.f32.mrb[98].mxu1  ;;  %v26385_v39 = vmax.f32 %v14537_v34, 0.0  ;;  %v26389_v44 = vmax.f32 %v14536_v45, 0.0 }
 0xb88   :  { %v26387_v32 = vmax.f32 %v14538_v11, 0.0  ;;  %v14539_v49 = vadd.f32 %v14518_v2, %v14124_v7  ;;  %v14480_v53 = vpop.f32.mrb[98].mxu0  ;;  %v14126_v13 = vpop.f32.mrb[99].mxu1  ;;  %v14610_v56 = vmul.f32 %v26383_v47, %v26383_v47 }
 0xb89   :  { %v14541_v27 = vadd.f32 %v14526_v3, %v14480_v53  ;;  %v14540_v63 = vadd.f32 %v26376_v0, %v14126_v13  ;;  %v14482_v5 = vpop.f32.mrb[99].mxu0  ;;  %v14612_v55 = vmul.f32 %v26385_v39, %v26385_v39  ;;  %v14611_v33 = vmul.f32 %v26389_v44, %v26389_v44 }
 0xb8a   :  { %v14613_v14 = vmul.f32 %v26387_v32, %v26387_v32  ;;  %v26394_v20 = vmax.f32 %v14539_v49, 0.0  ;;  %v14542_v54 = vadd.f32 %v26379_v23, %v14482_v5  ;;  %v14597_v16 = vsel %vm8498_vm3, %v26387_v32, 0.0 }
 0xb8b   :  { %v26397_v29 = vmax.f32 %v14541_v27, 0.0  ;;  %v26399_v6 = vmax.f32 %v14540_v63, 0.0  ;;  %v14130_v9 = vpop.f32.mrb[100].mxu1 }
 0xb8c   :  { %v14614_v18 = vmul.f32 %v26394_v20, %v26394_v20  ;;  %v26407_v28 = vmax.f32 %v14542_v54, 0.0  ;;  %v14486_v26 = vpop.f32.mrb[100].mxu0  ;;  %v14132_v41 = vpop.f32.mrb[101].mxu1  ;;  %v14656_v30 = vsel %vm8498_vm3, %v14613_v14, 0.0  ;;  %v14567_v36 = vadd.f32 %v26394_v20, %v26383_v47 }
 0xb8d   :  { %v14488_v61 = vpop.f32.mrb[101].mxu0  ;;  %v14587_v50 = vadd.f32 %v26397_v29, %v26385_v39  ;;  %v14616_v60 = vmul.f32 %v26397_v29, %v26397_v29  ;;  %v14543_v8 = vadd.f32 %v14518_v2, %v14130_v9  ;;  %v14577_v25 = vadd.f32 %v26399_v6, %v26389_v44 }
 0xb8e   :  { %v14617_v15 = vmul.f32 %v26407_v28, %v26407_v28  ;;  %v14626_v51 = vadd.f32 %v14614_v18, %v14610_v56  ;;  %v14615_v52 = vmul.f32 %v26399_v6, %v26399_v6  ;;  %v14545_v24 = vadd.f32 %v14526_v3, %v14486_v26 }
 0xb8f   :  { %v14136_v21 = vpop.f32.mrb[102].mxu1  ;;  %v14598_v17 = vsel %vm8498_vm3, %v26407_v28, 0.0  ;;  %v26428_v4 = vmax.f32 %v14543_v8, 0.0  ;;  %v14544_v38 = vadd.f32 %v26376_v0, %v14132_v41  ;;  %v14546_v59 = vadd.f32 %v26379_v23, %v14488_v61 }
 0xb90   :  { %v14492_v37 = vpop.f32.mrb[102].mxu0  ;;  %v14138_v19 = vpop.f32.mrb[103].mxu1  ;;  %v14657_v12 = vsel %vm8498_vm3, %v14617_v15, 0.0  ;;  %v26433_v35 = vmax.f32 %v14545_v24, 0.0  ;;  %v14547_v1 = vadd.f32 %v14518_v2, %v14136_v21  ;;  %v14646_v58 = vadd.f32 %v14616_v60, %v14612_v55 }
 0xb91   :  { %v14549_v22 = vadd.f32 %v14526_v3, %v14492_v37  ;;  %v14494_v40 = vpop.f32.mrb[103].mxu0  ;;  %v14618_v57 = vmul.f32 %v26428_v4, %v26428_v4  ;;  %v26437_v62 = vmax.f32 %v14544_v38, 0.0  ;;  %v26439_v34 = vmax.f32 %v14546_v59, 0.0 }
 0xb92   :  { %v14636_v45 = vadd.f32 %v14615_v52, %v14611_v33  ;;  %v14620_v42 = vmul.f32 %v26433_v35, %v26433_v35  ;;  %v26443_v11 = vmax.f32 %v14547_v1, 0.0  ;;  %v14599_v49 = vadd.f32 %v14598_v17, %v14597_v16 }
 0xb93   :  { %v26445_v7 = vmax.f32 %v14549_v22, 0.0  ;;  %v14658_v2 = vadd.f32 %v14657_v12, %v14656_v30  ;;  %v14568_v3 = vadd.f32 %v14567_v36, %v26428_v4  ;;  %v14588_v53 = vadd.f32 %v14587_v50, %v26433_v35 }
 0xb94   :  { %v14627_v13 = vadd.f32 %v14626_v51, %v14618_v57  ;;  %v14578_v27 = vadd.f32 %v14577_v25, %v26437_v62  ;;  %v14619_v63 = vmul.f32 %v26437_v62, %v26437_v62  ;;  %v14569_v5 = vsel %vm8405_vm1, %v26443_v11, 0.0 }
 0xb95   :  { %v14600_v14 = vsel %vm8498_vm3, %v26439_v34, 0.0  ;;  %v14570_v54 = vadd.f32 %v14569_v5, %v14568_v3  ;;  %v14622_v9 = vmul.f32 %v26443_v11, %v26443_v11  ;;  %v14589_v56 = vsel %vm8405_vm1, %v26445_v7, 0.0 }
 0xb96   :  { %v14647_v55 = vadd.f32 %v14646_v58, %v14620_v42  ;;  %v14590_v18 = vadd.f32 %v14589_v56, %v14588_v53  ;;  %v14624_v26 = vmul.f32 %v26445_v7, %v26445_v7  ;;  %v14548_v41 = vadd.f32 %v26376_v0, %v14138_v19 }
 0xb97   :  { %v14621_v33 = vmul.f32 %v26439_v34, %v26439_v34  ;;  %v14571_v16 = vrot.slane %v14570_v54, 4  ;;  %v14628_v30 = vsel %vm8405_vm1, %v14622_v9, 0.0  ;;  %v14550_v36 = vadd.f32 %v26379_v23, %v14494_v40 }
 0xb98   :  { %v14629_v61 = vadd.f32 %v14628_v30, %v14627_v13  ;;  %v14591_v50 = vrot.slane %v14590_v18, 4  ;;  %v14648_v60 = vsel %vm8405_vm1, %v14624_v26, 0.0  ;;  %v26468_v15 = vmax.f32 %v14548_v41, 0.0 }
 0xb99   :  { %v14637_v8 = vadd.f32 %v14636_v45, %v14619_v63  ;;  %v14601_v51 = vadd.f32 %v14600_v14, %v14599_v49  ;;  %v14649_v25 = vadd.f32 %v14648_v60, %v14647_v55  ;;  %v26470_v52 = vmax.f32 %v14550_v36, 0.0 }
 0xb9a   :  { %v14572_v0 = vadd.f32 %v14571_v16, %v14570_v54  ;;  %v14630_v24 = vrot.slane %v14629_v61, 4  ;;  %v14579_v21 = vsel %vm8405_vm1, %v26468_v15, 0.0  ;;  %v14623_v17 = vmul.f32 %v26468_v15, %v26468_v15 }
 0xb9b   :  { %v14659_v23 = vsel %vm8498_vm3, %v14621_v33, 0.0  ;;  %v14650_v38 = vrot.slane %v14649_v25, 4  ;;  %v14580_v59 = vadd.f32 %v14579_v21, %v14578_v27  ;;  %v14602_v37 = vsel %vm8512_vm4, %v26470_v52, 0.0 }
 0xb9c   :  { %v14631_v19 = vadd.f32 %v14630_v24, %v14629_v61  ;;  %v14592_v12 = vadd.f32 %v14591_v50, %v14590_v18  ;;  %v14638_v1 = vsel %vm8405_vm1, %v14623_v17, 0.0  ;;  %v14603_v22 = vadd.f32 %v14602_v37, %v14601_v51 }
 0xb9d   :  { %v14651_v40 = vadd.f32 %v14650_v38, %v14649_v25  ;;  %v14581_v58 = vrot.slane %v14580_v59, 4  ;;  %v14639_v57 = vadd.f32 %v14638_v1, %v14637_v8  ;;  %v14625_v45 = vmul.f32 %v26470_v52, %v26470_v52 }
 0xb9e   :  { %v14660_v42 = vadd.f32 %v14659_v23, %v14658_v2  ;;  %v14573_v49 = vrot.slane %v14572_v0, 2  ;;  %v14632_v3 = vrot.slane %v14631_v19, 2  ;;  %v14604_v53 = vrot.slane %v14603_v22, 4 }
 0xb9f   :  { %v14652_v13 = vrot.slane %v14651_v40, 2  ;;  %v14640_v27 = vrot.slane %v14639_v57, 4  ;;  %v14661_v63 = vsel %vm8512_vm4, %v14625_v45, 0.0  ;;  %v14582_v5 = vadd.f32 %v14581_v58, %v14580_v59 }
 0xba0   :  { %v14662_v14 = vadd.f32 %v14661_v63, %v14660_v42  ;;  %v14605_v54 = vadd.f32 %v14604_v53, %v14603_v22  ;;  %v14633_v9 = vadd.f32 %v14632_v3, %v14631_v19  ;;  %v14593_v56 = vrot.slane %v14592_v12, 2 }
 0xba1   :  { %v14583_v55 = vrot.slane %v14582_v5, 2  ;;  %v14641_v18 = vadd.f32 %v14640_v27, %v14639_v57  ;;  %v14574_v33 = vadd.f32 %v14573_v49, %v14572_v0  ;;  %v14653_v2 = vadd.f32 %v14652_v13, %v14651_v40 }
 0xba2   :  { %v14663_v26 = vrot.slane %v14662_v14, 4  ;;  %v14606_v41 = vrot.slane %v14605_v54, 2  ;;  %v14634_v50 = vrot.slane %v14633_v9, 1  ;;  %v14594_v51 = vadd.f32 %v14593_v56, %v14592_v12 }
 0xba3   :  { %v14584_v16 = vadd.f32 %v14583_v55, %v14582_v5  ;;  %v14642_v30 = vrot.slane %v14641_v18, 2  ;;  %v14575_v24 = vrot.slane %v14574_v33, 1  ;;  %v14654_v17 = vrot.slane %v14653_v2, 1 }
 0xba4   :  { %v14607_v36 = vadd.f32 %v14606_v41, %v14605_v54  ;;  %v14664_v61 = vadd.f32 %v14663_v26, %v14662_v14  ;;  %v14635_v59 = vadd.f32 %v14634_v50, %v14633_v9  ;;  %v14595_v1 = vrot.slane %v14594_v51, 1  ;;  %v14963_v50 = vld [vmem:[%s22777_s15] sm:$0x1]  ;;  %s22695_s15 = smov 40  }
 0xba5   :  { %v14585_v60 = vrot.slane %v14584_v16, 1  ;;  %v14643_v8 = vadd.f32 %v14642_v30, %v14641_v18  ;;  %v14576_v22 = vadd.f32 %v14575_v24, %v14574_v33  ;;  %v14655_v58 = vadd.f32 %v14654_v17, %v14653_v2  ;;  %v27206_v33 = vld [vmem:[#allocation56_spill] sm:$0xff]  ;;  %v14942_v2 = vld [vmem:[%s22772_s7] sm:$0x1]  ;;  %v18929_v17 = vld [vmem:[%s22788_s28 + $0x138] sm:$0xff]   ;;  %s27216_s7 = smov 24  }
 0xba6   :  { %v14665_v25 = vrot.slane %v14664_v61, 2  ;;  %v14608_v23 = vrot.slane %v14607_v36, 1  ;;  %v14596_v42 = vadd.f32 %v14595_v1, %v14594_v51  ;;  %v27205_v3 = vmov 0.0   ;;  %v18928_v24 = vld [vmem:[%s22788_s28 + $0x130] sm:$0xff]  }
 0xba7   :  { %v14644_v21 = vrot.slane %v14643_v8, 1  ;;  %v14586_v37 = vadd.f32 %v14585_v60, %v14584_v16  ;;  %v14669_v12 = vsel %vm8704_vm2, %v14576_v22, %v14635_v59  ;;  %21481 = vmatprep.subr.bf16.mxu0 %v18928_v24  ;;  %v18922_v59 = vld [vmem:[%s22788_s28 + $0x100] sm:$0xff]   ;;  %v18932_v1 = vld [vmem:[%s22788_s28 + $0x150] sm:$0xff]   ;;  %v18933_v22 = vld [vmem:[%s22788_s28 + $0x158] sm:$0xff]   ;;  %vm16308_vm1 = vcmask 392192  }
 0xba8   :  { %v14666_v38 = vadd.f32 %v14665_v25, %v14664_v61  ;;  %v14609_v57 = vadd.f32 %v14608_v23, %v14607_v36  ;;  %v14671_v53 = vsel %vm8704_vm2, %v14596_v42, %v14655_v58  ;;  %v18921_v23 = vld [vmem:[%s22788_s28 + $0xf8] sm:$0xff]  }
 0xba9   :  { %v14645_v19 = vadd.f32 %v14644_v21, %v14643_v8  ;;  %v18920_v21 = vld [vmem:[%s22788_s28 + $0xf0] sm:$0xff]  }
 0xbaa   :  { %v14667_v0 = vrot.slane %v14666_v38, 1 }
 0xbab   :  { %v14670_v40 = vsel %vm8704_vm2, %v14586_v37, %v14645_v19  ;;  %v18931_v37 = vld [vmem:[%s22788_s28 + $0x148] sm:$0xff]  }
 0xbac   :  { %14860 = vmatprep.mubr.f32.mxu1 %v14670_v40  ;;  %v14668_v45 = vadd.f32 %v14667_v0, %v14666_v38  ;;  %v18930_v38 = vld [vmem:[%s22788_s28 + $0x140] sm:$0xff]   ;;  %v18923_v19 = vld [vmem:[%s22788_s28 + $0x108] sm:$0xff]   ;;  %v18924_v0 = vld [vmem:[%s22788_s28 + $0x110] sm:$0xff]  }
 0xbad   :  { %14861 = vmatmul.mubr.f32.vlgmr.msra.gmra.mrb[104].mxu1 %v14669_v12  ;;  %v18925_v40 = vld [vmem:[%s22788_s28 + $0x118] sm:$0xff]  }
 0xbae   :  { %v14672_v49 = vsel %vm8704_vm2, %v14609_v57, %v14668_v45  ;;  %15155 = vmatprep.mubr.f32.mxu1 %v27205_v3 }
 0xbaf   :  { %17766 = vmatprep.mubr.msk.f32.mxu0 %vm8498_vm3, %v14672_v49 }
 0xbb0   :  { %14931 = vmatmul.mubr.f32.vlgmr.msra.gmra.mrb[104].mxu0 %v14671_v53 }
 0xbb1   :  { %21483 = vmatpush3.bf16.msra.mxu0 %v18920_v21 }
 0xbb2   :  { %21485 = vmatprep.subr.bf16.mxu0 %v18929_v17 }
 0xbb5   :  { %21487 = vmatpush3.bf16.msra.mxu0 %v18921_v23 }
 0xbb6   :  { %21489 = vmatprep.subr.bf16.mxu0 %v18930_v38  ;;  %v18368_v38 = vld [vmem:[%s27207_s25] sm:$0xff]  }
 0xbb9   :  { %21491 = vmatpush3.bf16.msra.mxu0 %v18922_v59 }
 0xbba   :  { %21493 = vmatprep.subr.bf16.mxu0 %v18931_v37 }
 0xbbd   :  { %21495 = vmatpush3.bf16.msra.mxu0 %v18923_v19  ;;  %v22529_v19 = vld [vmem:[%s27217_s20 + $0x6c] ss:$16 sps:$4 sm:$0xff]  }
 0xbbe   :  { %21497 = vmatprep.subr.bf16.mxu0 %v18932_v1 }
 0xbc1   :  { %21499 = vmatpush3.bf16.msra.mxu0 %v18924_v0 }
 0xbc2   :  { %21501 = vmatprep.subr.bf16.mxu0 %v18933_v22  ;;  %v18369_v22 = vunpack.c.l.bf16 %v18368_v38 }
 0xbc5   :  { %21503 = vmatpush3.bf16.msra.mxu0 %v18925_v40 }
 0xc80   :  { %v19166_v13 = vpop.f32.mrb[104].mxu1 }
 0xc81   :  { %v19167_v27 = vpop.f32.mrb[105].mxu1 }
 0xc82   :  { %v19168_v63 = vadd.f32 %v19167_v27, %v19166_v13 }
 0xc83   :  { %v14932_v5 = vpop.f32.mrb[104].mxu0 }
 0xc84   :  { %v14933_v14 = vadd.f32 %v19168_v63, %v14932_v5  ;;  %v14934_v54 = vpop.f32.mrb[105].mxu0 }
 0xc86   :  { %v14936_v9 = vmul.f32 0.0022222223, %v14933_v14 }
 0xc88   :  { %v14937_v56 = vmul.f32 %v14936_v9, %v14936_v9 }
 0xc8a   :  { %v14939_v55 = vrot.slane %v14937_v56, 7 }
 0xc8c   :  { %v14941_v18 = vsub.f32 %v14936_v9, %v14939_v55 }
 0xc8e   :  { %v14943_v26 = vadd.f32 1e-05, %v14941_v18 }
 0xc90   :  { %22604 = vrsqrt.f32 %v14943_v26 }
 0xc9a   :  { %v22605_v41 = vpop.eup %22604 }
 0xc9b   :  { %v14952_v16 = vrot.slane %v22605_v41, %v27206_v33 }
 0xc9d   :  { %v14953_v30 = vcombine.high %v14952_v16, %v14952_v16 }
 0xc9f   :  { %v14960_v36 = vrot.slane %v14953_v30, %v27206_v33 }
 0xca1   :  { %v14962_v61 = vmul.f32 %v14960_v36, %v14942_v2 }
 0xca3   :  { %v14964_v60 = vmul.f32 %v14962_v61, %v14936_v9  ;;  %v14970_v8 = vrot.slane %v14962_v61, %v27201_v48 }
 0xca5   :  { %14977 = vrot.lane.b32.xlu1 %v14970_v8, %s22690_s5  ;;  %14971 = vrot.lane.b32.xlu0 %v14970_v8, %s22691_s17  ;;  %v14965_v51 = vsub.f32 %v14963_v50, %v14964_v60 }
 0xca7   :  { %v14987_v25 = vrot.slane %v14965_v51, %v27201_v48 }
 0xca9   :  { %14974 = vrot.lane.b32.xlu0 %v14970_v8, %s22692_s21  ;;  %14988 = vrot.lane.b32.xlu1 %v14987_v25, %s22691_s17 }
 0xcad   :  { %14991 = vrot.lane.b32.xlu0 %v14987_v25, %s22692_s21  ;;  %14994 = vrot.lane.b32.xlu1 %v14987_v25, %s22690_s5 }
 0xd17   :  { %v14978_v58 = vpop.permute.xlu1 %14977  ;;  %v14972_v57 = vpop.permute.xlu0 %14971 }
 0xd18   :  { %v14980_v45 = vsel %vm9288_vm5, %v14962_v61, %v14972_v57 }
 0xd1b   :  { %v14975_v12 = vpop.permute.xlu0 %14974  ;;  %v14989_v42 = vpop.permute.xlu1 %14988 }
 0xd1c   :  { %v14981_v49 = vsel %vm6639_vm0, %v14980_v45, %v14975_v12  ;;  %v14997_v27 = vsel %vm9288_vm5, %v14965_v51, %v14989_v42  ;;  %v18370_v12 = vunpack.c.h.bf16 %v18368_v38  ;;  %v18889_v42 = vld [vmem:[%s27207_s25 + $0x8] sm:$0xff]   ;;  %v18900_v38 = vld [vmem:[%s22788_s28 + $0x50] sm:$0xff]  }
 0xd1d   :  { %v14982_v53 = vsel %vm8498_vm3, %v14981_v49, %v14978_v58  ;;  %v15007_v54 = vrot.slane %v14981_v49, %v27201_v48 }
 0xd1e   :  { %v15003_v13 = vrot.slane %v14982_v53, %v27201_v48  ;;  %v18890_v53 = vld [vmem:[%s27207_s25 + $0x10] sm:$0xff]  }
 0xd1f   :  { %v14992_v63 = vpop.permute.xlu0 %14991  ;;  %v14995_v5 = vpop.permute.xlu1 %14994  ;;  %v15015_v24 = vmul.f32 %v15007_v54, %v26407_v28  ;;  %v15023_v37 = vmul.f32 %v15007_v54, %v26470_v52 }
 0xd20   :  { %v14998_v14 = vsel %vm6639_vm0, %v14997_v27, %v14992_v63  ;;  %v15009_v56 = vmul.f32 %v15003_v13, %v26389_v44  ;;  %v15013_v18 = vmul.f32 %v15003_v13, %v26399_v6  ;;  %v15008_v26 = vmul.f32 %v15003_v13, %v26383_v47  ;;  %v18936_v63 = vld [vmem:[%s22788_s28 + $0x170] sm:$0xff]  }
 0xd21   :  { %v14999_v9 = vsel %vm8498_vm3, %v14998_v14, %v14995_v5  ;;  %v15012_v41 = vmul.f32 %v15003_v13, %v26394_v20  ;;  %v15031_v16 = vrot.slane %v14998_v14, %v27201_v48  ;;  %v15017_v30 = vmul.f32 %v15003_v13, %v26437_v62  ;;  %v18937_v5 = vld [vmem:[%s22788_s28 + $0x178] sm:$0xff]   ;;  %v18938_v14 = vld [vmem:[%s22788_s28 + $0x180] sm:$0xff]  }
 0xd22   :  { %v15027_v55 = vrot.slane %v14999_v9, %v27201_v48  ;;  %v15021_v2 = vmul.f32 %v15003_v13, %v26468_v15  ;;  %v15016_v51 = vmul.f32 %v15003_v13, %v26428_v4  ;;  %v15020_v6 = vmul.f32 %v15003_v13, %v26443_v11  ;;  %v18940_v9 = vld [vmem:[%s22788_s28 + $0x190] sm:$0xff]  }
 0xd23   :  { %v15011_v20 = vmul.f32 %v15007_v54, %v26387_v32  ;;  %v15039_v23 = vadd.f32 %v15031_v16, %v15015_v24  ;;  %v15010_v59 = vmul.f32 %v15003_v13, %v26385_v39  ;;  %v15014_v4 = vmul.f32 %v15003_v13, %v26397_v29 }
 0xd24   :  { %v15033_v36 = vadd.f32 %v15027_v55, %v15009_v56  ;;  %v15037_v61 = vadd.f32 %v15027_v55, %v15013_v18  ;;  %v15032_v50 = vadd.f32 %v15027_v55, %v15008_v26  ;;  %v15036_v60 = vadd.f32 %v15027_v55, %v15012_v41  ;;  %v18941_v56 = vld [vmem:[%s22788_s28 + $0x198] sm:$0xff]   ;;  %v18926_v18 = vld [vmem:[%s22788_s28 + $0x120] sm:$0xff]   ;;  %v18935_v41 = vld [vmem:[%s22788_s28 + $0x168] sm:$0xff]  }
 0xd25   :  { %v15041_v44 = vadd.f32 %v15027_v55, %v15017_v30  ;;  %v15045_v8 = vadd.f32 %v15027_v55, %v15021_v2  ;;  %v15040_v62 = vadd.f32 %v15027_v55, %v15016_v51  ;;  %v15044_v21 = vadd.f32 %v15027_v55, %v15020_v6  ;;  %v18942_v26 = vld [vmem:[%s22788_s28 + $0x1a0] sm:$0xff]   ;;  %v18943_v30 = vld [vmem:[%s22788_s28 + $0x1a8] sm:$0xff]  }
 0xd26   :  { %v21460_v47 = vpack.c.bf16 %v15037_v61, %v15033_v36  ;;  %v21462_v25 = vpack.c.bf16 %v15036_v60, %v15032_v50  ;;  %v15035_v17 = vadd.f32 %v15031_v16, %v15011_v20  ;;  %v15019_v11 = vmul.f32 %v15007_v54, %v26439_v34  ;;  %v18939_v54 = vld [vmem:[%s22788_s28 + $0x188] sm:$0xff]   ;;  %v18898_v2 = vld [vmem:[%s22788_s28 + $0x40] sm:$0xff]   ;;  %v18944_v36 = vld [vmem:[%s22788_s28 + $0x1b0] sm:$0xff]  }
 0xd27   :  { %v21464_v15 = vpack.c.bf16 %v15045_v8, %v15041_v44  ;;  %v21467_v32 = vpack.c.bf16 %v15044_v21, %v15040_v62  ;;  %v15034_v28 = vadd.f32 %v15027_v55, %v15010_v59  ;;  %v15038_v1 = vadd.f32 %v15027_v55, %v15014_v4  ;;  %v18945_v61 = vld [vmem:[%s22788_s28 + $0x1b8] sm:$0xff]   ;;  %v18946_v50 = vld [vmem:[%s22788_s28 + $0x1c0] sm:$0xff]   ;;  %v18947_v60 = vld [vmem:[%s22788_s28 + $0x1c8] sm:$0xff]  }
 0xd28   :  { %21461 = vmatprep.subr.bf16.mxu1 %v21460_v47  ;;  %v21470_v0 = vpack.c.bf16 %v15039_v23, %v15035_v17  ;;  %v15043_v40 = vadd.f32 %v15031_v16, %v15019_v11  ;;  %v15047_v58 = vadd.f32 %v15031_v16, %v15023_v37  ;;  %v15018_v39 = vmul.f32 %v15003_v13, %v26433_v35  ;;  %v18927_v16 = vld [vmem:[%s22788_s28 + $0x128] sm:$0xff]   ;;  %v18948_v44 = vld [vmem:[%s22788_s28 + $0x1d0] sm:$0xff]   ;;  %v18949_v8 = vld [vmem:[%s22788_s28 + $0x1d8] sm:$0xff]  }
 0xd29   :  { %21463 = vmatpush1.bf16.msra.mxu1 %v21462_v25  ;;  %v15022_v29 = vmul.f32 %v15003_v13, %v26445_v7  ;;  %v21472_v34 = vpack.c.bf16 %v15038_v1, %v15034_v28  ;;  %v18373_v35 = vunpack.c.l.bf16 %v18889_v42  ;;  %v18374_v7 = vunpack.c.h.bf16 %v18889_v42  ;;  %v18380_v62 = vld [vmem:[%s22788_s28] sm:$0xff]   ;;  %v18899_v21 = vld [vmem:[%s22788_s28 + $0x48] sm:$0xff]   ;;  %v18892_v4 = vld [vmem:[%s22788_s28 + $0x10] sm:$0xff]  }
 0xd2a   :  { %21466 = vmatprep.subr.msk.bf16.mxu1 %vm25732_vm7, %v21464_v15  ;;  %v15042_v52 = vadd.f32 %v15027_v55, %v15018_v39  ;;  %v21474_v45 = vpack.c.bf16 %v15047_v58, %v15043_v40  ;;  %v18377_v13 = vunpack.c.l.bf16 %v18890_v53  ;;  %v18378_v27 = vunpack.c.h.bf16 %v18890_v53  ;;  %v18891_v23 = vld [vmem:[%s22788_s28 + $0x8] sm:$0xff]   ;;  %v18901_v37 = vld [vmem:[%s22788_s28 + $0x58] sm:$0xff]   ;;  %v18894_v40 = vld [vmem:[%s22788_s28 + $0x20] sm:$0xff]  }
 0xd2b   :  { %v15046_v57 = vadd.f32 %v15027_v55, %v15022_v29  ;;  %v18934_v55 = vld [vmem:[%s22788_s28 + $0x160] sm:$0xff]   ;;  %v18893_v28 = vld [vmem:[%s22788_s28 + $0x18] sm:$0xff]   ;;  %v18903_v39 = vld [vmem:[%s22788_s28 + $0x68] sm:$0xff]   ;;  %vm16306_vm0 = vcmask 326656  }
 0xd2c   :  { %21505 = vmatprep.subr.bf16.mxu0 %v18934_v55  ;;  %v18896_v42 = vld [vmem:[%s22788_s28 + $0x30] sm:$0xff]  }
 0xd2d   :  { %21469 = vmatpush1.bf16.msk.msra.mxu1 %vm25732_vm7, %v21467_v32  ;;  %v21477_v49 = vpack.c.bf16 %v15046_v57, %v15042_v52  ;;  %21507 = vmatpush3.bf16.msra.mxu0 %v18926_v18  ;;  %v18895_v52 = vld [vmem:[%s22788_s28 + $0x28] sm:$0xff]   ;;  %v18904_v57 = vld [vmem:[%s22788_s28 + $0x70] sm:$0xff]   ;;  %v18909_v18 = vld [vmem:[%s22788_s28 + $0x98] sm:$0xff]  }
 0xd2e   :  { %21471 = vmatprep.subr.bf16.mxu1 %v21470_v0  ;;  %21509 = vmatprep.subr.bf16.mxu0 %v18935_v41  ;;  %v18902_v0 = vld [vmem:[%s22788_s28 + $0x60] sm:$0xff]   ;;  %v18951_v41 = vld [vmem:[%s22788_s28 + $0x1e8] sm:$0xff]  }
 0xd30   :  { %17769 = vmatmul.mubr.msk.f32.vlgmr.msra.gmra.mrb[106].mxu1 %vm15060_vm9, %v18369_v22 }
 0xd31   :  { %21473 = vmatpush1.bf16.msra.mxu1 %v21472_v34  ;;  %15161 = vmatprep.mubr.f32.mxu1 %v27205_v3 }
 0xd32   :  { %21476 = vmatprep.subr.msk.bf16.mxu1 %vm25732_vm7, %v21474_v45  ;;  %21511 = vmatpush3.bf16.msra.mxu0 %v18927_v16  ;;  %v18960_v16 = vld [vmem:[%s22788_s28 + $0x230] sm:$0xff]  }
 0xd33   :  { %21555 = vmatprep.subr.bf16.mxu0 %v18898_v2  ;;  %v18952_v2 = vld [vmem:[%s22788_s28 + $0x1f0] sm:$0xff]  }
 0xd34   :  { %17770 = vmatmul.mubr.msk.f32.gmra.mrb[108].mxu1 %vm15060_vm9, %v18370_v12 }
 0xd35   :  { %21479 = vmatpush1.bf16.msk.msra.mxu1 %vm25732_vm7, %v21477_v49  ;;  %15167 = vmatprep.mubr.f32.mxu1 %v27205_v3  ;;  %v18906_v49 = vld [vmem:[%s22788_s28 + $0x80] sm:$0xff]  }
 0xd36   :  { %21512 = vmatprep.subr.bf16.mxu1 %v27195_v31 }
 0xd38   :  { %17771 = vmatmul.mubr.msk.f32.gmra.mrb[110].mxu1 %vm15060_vm9, %v18373_v35 }
 0xd39   :  { %15173 = vmatprep.mubr.f32.mxu1 %v27205_v3 }
 0xd3c   :  { %17772 = vmatmul.mubr.msk.f32.gmra.mrb[112].mxu1 %vm15060_vm9, %v18374_v7 }
 0xd3d   :  { %15179 = vmatprep.mubr.f32.mxu1 %v27205_v3 }
 0xd40   :  { %17773 = vmatmul.mubr.msk.f32.gmra.mrb[114].mxu1 %vm15060_vm9, %v18377_v13 }
 0xd41   :  { %15185 = vmatprep.mubr.f32.mxu1 %v27205_v3 }
 0xd44   :  { %17774 = vmatmul.mubr.msk.f32.gmra.mrb[116].mxu1 %vm15060_vm9, %v18378_v27 }
 0xd45   :  { %15256 = vmatprep.mubr.f32.mxu1 %v27205_v3 }
 0xd48   :  { %17777 = vmatmul.mubr.msk.f32.vlgmr.msra.gmra.mrb[118].mxu1 %vm15060_vm9, %v18369_v22 }
 0xd49   :  { %15262 = vmatprep.mubr.f32.mxu1 %v27205_v3  ;;  %21514 = vmatpush1.bf16.msra.mxu1 %v18936_v63  ;;  %v18958_v63 = vld [vmem:[%s22788_s28 + $0x220] sm:$0xff]  }
 0xd4a   :  { %21515 = vmatprep.subr.bf16.mxu1 %v27195_v31 }
 0xd4c   :  { %17778 = vmatmul.mubr.msk.f32.gmra.mrb[120].mxu1 %vm15060_vm9, %v18370_v12 }
 0xd4d   :  { %15268 = vmatprep.mubr.f32.mxu1 %v27205_v3  ;;  %21517 = vmatpush1.bf16.msra.mxu1 %v18937_v5 }
 0xd4e   :  { %21518 = vmatprep.subr.bf16.mxu1 %v27195_v31 }
 0xd50   :  { %17779 = vmatmul.mubr.msk.f32.gmra.mrb[122].mxu1 %vm15060_vm9, %v18373_v35  ;;  %v18905_v35 = vld [vmem:[%s22788_s28 + $0x78] sm:$0xff]  }
 0xd51   :  { %15274 = vmatprep.mubr.f32.mxu1 %v27205_v3  ;;  %21520 = vmatpush1.bf16.msra.mxu1 %v18938_v14  ;;  %v18908_v14 = vld [vmem:[%s22788_s28 + $0x90] sm:$0xff]  }
 0xd52   :  { %21521 = vmatprep.subr.bf16.mxu1 %v27195_v31 }
 0xd54   :  { %17780 = vmatmul.mubr.msk.f32.gmra.mrb[124].mxu1 %vm15060_vm9, %v18374_v7 }
 0xd55   :  { %15280 = vmatprep.mubr.f32.mxu1 %v27205_v3  ;;  %21523 = vmatpush1.bf16.msra.mxu1 %v18939_v54 }
 0xd56   :  { %21524 = vmatprep.subr.bf16.mxu1 %v27195_v31 }
 0xd58   :  { %17781 = vmatmul.mubr.msk.f32.gmra.mrb[126].mxu1 %vm15060_vm9, %v18377_v13  ;;  %v18897_v13 = vld [vmem:[%s22788_s28 + $0x38] sm:$0xff]  }
 0xd59   :  { %15286 = vmatprep.mubr.f32.mxu1 %v27205_v3  ;;  %21526 = vmatpush1.bf16.msra.mxu1 %v18940_v9  ;;  %v18950_v9 = vld [vmem:[%s22788_s28 + $0x1e0] sm:$0xff]  }
 0xd5a   :  { %21527 = vmatprep.subr.bf16.mxu1 %v27195_v31 }
 0xd5c   :  { %17782 = vmatmul.mubr.msk.f32.gmra.mrb[128].mxu1 %vm15060_vm9, %v18378_v27  ;;  %v18907_v27 = vld [vmem:[%s22788_s28 + $0x88] sm:$0xff]  }
 0xd5d   :  { %21529 = vmatpush1.bf16.msra.mxu1 %v18941_v56  ;;  %v18959_v56 = vld [vmem:[%s22788_s28 + $0x228] sm:$0xff]  }
 0xd5e   :  { %21530 = vmatprep.subr.bf16.mxu1 %v27195_v31 }
 0xd61   :  { %21532 = vmatpush1.bf16.msra.mxu1 %v18942_v26 }
 0xd62   :  { %21533 = vmatprep.subr.bf16.mxu1 %v27195_v31 }
 0xd65   :  { %21535 = vmatpush1.bf16.msra.mxu1 %v18943_v30  ;;  %v18910_v30 = vld [vmem:[%s22788_s28 + $0xa0] sm:$0xff]  }
 0xd66   :  { %21536 = vmatprep.subr.bf16.mxu1 %v27195_v31 }
 0xd69   :  { %21538 = vmatpush1.bf16.msra.mxu1 %v18944_v36  ;;  %v18961_v36 = vld [vmem:[%s22788_s28 + $0x238] sm:$0xff]  }
 0xd6a   :  { %21539 = vmatprep.subr.bf16.mxu1 %v27195_v31 }
 0xd6d   :  { %21541 = vmatpush1.bf16.msra.mxu1 %v18945_v61  ;;  %v18911_v61 = vld [vmem:[%s22788_s28 + $0xa8] sm:$0xff]  }
 0xd6e   :  { %21542 = vmatprep.subr.bf16.mxu1 %v27195_v31 }
 0xd71   :  { %21544 = vmatpush1.bf16.msra.mxu1 %v18946_v50  ;;  %v18953_v50 = vld [vmem:[%s22788_s28 + $0x1f8] sm:$0xff]  }
 0xd72   :  { %21545 = vmatprep.subr.bf16.mxu1 %v27195_v31 }
 0xd75   :  { %21547 = vmatpush1.bf16.msra.mxu1 %v18947_v60  ;;  %v18962_v60 = vld [vmem:[%s22788_s28 + $0x240] sm:$0xff]  }
 0xd76   :  { %21548 = vmatprep.subr.bf16.mxu1 %v27195_v31 }
 0xd79   :  { %21550 = vmatpush1.bf16.msra.mxu1 %v18948_v44  ;;  %v18912_v44 = vld [vmem:[%s22788_s28 + $0xb0] sm:$0xff]  }
 0xd7a   :  { %21551 = vmatprep.subr.bf16.mxu1 %v27195_v31 }
 0xd7d   :  { %21553 = vmatpush1.bf16.msra.mxu1 %v18949_v8  ;;  %v18954_v8 = vld [vmem:[%s22788_s28 + $0x200] sm:$0xff]  }
 0xd7e   :  { %21586 = vmatprep.subr.bf16.mxu1 %v27195_v31 }
 0xe03   :  { %v26607_v51 = vpop.f32.mrb[106].mxu1 }
 0xe04   :  { %v15159_v6 = vpop.f32.mrb[107].mxu1 }
 0xe07   :  { %v26609_v47 = vpop.f32.mrb[108].mxu1 }
 0xe08   :  { %v26611_v25 = vpop.f32.mrb[109].mxu1 }
 0xe0b   :  { %v15169_v20 = vpop.f32.mrb[110].mxu1 }
 0xe0c   :  { %v15171_v24 = vpop.f32.mrb[111].mxu1 }
 0xe0d   :  { %15604 = vmatprep.mubr.f32.mxu0 %v15171_v24  ;;  %v18956_v24 = vld [vmem:[%s22788_s28 + $0x210] sm:$0xff]  }
 0xe0e   :  { %15605 = vmatmul.mubr.f32.vlgmr.msra.gmra.mrb[106].mxu0 %v15169_v20  ;;  %v18914_v20 = vld [vmem:[%s22788_s28 + $0xc0] sm:$0xff]  }
 0xe0f   :  { %21557 = vmatpush3.bf16.msra.mxu0 %v18380_v62  ;;  %v15175_v15 = vpop.f32.mrb[112].mxu1  ;;  %v18965_v62 = vld [vmem:[%s22788_s28 + $0x258] sm:$0xff]  }
 0xe10   :  { %v15177_v17 = vpop.f32.mrb[113].mxu1  ;;  %21559 = vmatprep.subr.bf16.mxu0 %v18899_v21  ;;  %v18915_v21 = vld [vmem:[%s22788_s28 + $0xc8] sm:$0xff]  }
 0xe11   :  { %15609 = vmatprep.mubr.f32.mxu0 %v15177_v17  ;;  %v18916_v17 = vld [vmem:[%s22788_s28 + $0xd0] sm:$0xff]  }
 0xe12   :  { %15610 = vmatmul.mubr.f32.gmra.mrb[108].mxu0 %v15175_v15  ;;  %v18957_v15 = vld [vmem:[%s22788_s28 + $0x218] sm:$0xff]  }
 0xe13   :  { %21561 = vmatpush3.bf16.msra.mxu0 %v18891_v23  ;;  %15760 = vmatprep.mubr.f32.mxu0 %v15159_v6  ;;  %v26617_v59 = vpop.f32.mrb[114].mxu1  ;;  %v18913_v6 = vld [vmem:[%s22788_s28 + $0xb8] sm:$0xff]   ;;  %v18966_v23 = vld [vmem:[%s22788_s28 + $0x260] sm:$0xff]  }
 0xe14   :  { %21563 = vmatprep.subr.bf16.mxu0 %v18900_v38  ;;  %v15183_v11 = vpop.f32.mrb[115].mxu1  ;;  %v18917_v38 = vld [vmem:[%s22788_s28 + $0xd8] sm:$0xff]  }
 0xe17   :  { %21565 = vmatpush3.bf16.msra.mxu0 %v18892_v4  ;;  %v26621_v32 = vpop.f32.mrb[116].mxu1  ;;  %v18967_v4 = vld [vmem:[%s22788_s28 + $0x268] sm:$0xff]  }
 0xe18   :  { %21567 = vmatprep.subr.bf16.mxu0 %v18901_v37  ;;  %v26624_v1 = vpop.f32.mrb[117].mxu1  ;;  %v18919_v37 = vld [vmem:[%s22788_s28 + $0xe8] sm:$0xff]  }
 0xe1b   :  { %21569 = vmatpush3.bf16.msra.mxu0 %v18893_v28  ;;  %v26627_v22 = vpop.f32.mrb[118].mxu1  ;;  %v18970_v28 = vld [vmem:[%s22788_s28 + $0x280] sm:$0xff]  }
 0xe1c   :  { %21571 = vmatprep.subr.bf16.mxu0 %v18902_v0  ;;  %v15260_v58 = vpop.f32.mrb[119].mxu1  ;;  %v18972_v0 = vld [vmem:[%s22788_s28 + $0x290] sm:$0xff]  }
 0xe1f   :  { %21573 = vmatpush3.bf16.msra.mxu0 %v18894_v40  ;;  %v26631_v29 = vpop.f32.mrb[120].mxu1  ;;  %v18974_v40 = vld [vmem:[%s22788_s28 + $0x2a0] sm:$0xff]  }
 0xe20   :  { %21575 = vmatprep.subr.bf16.mxu0 %v18903_v39  ;;  %v26633_v34 = vpop.f32.mrb[121].mxu1  ;;  %v18976_v39 = vld [vmem:[%s22788_s28 + $0x2b0] sm:$0xff]  }
 0xe23   :  { %21577 = vmatpush3.bf16.msra.mxu0 %v18895_v52  ;;  %v15270_v45 = vpop.f32.mrb[122].mxu1  ;;  %v18979_v52 = vld [vmem:[%s22788_s28 + $0x2c8] sm:$0xff]  }
 0xe24   :  { %v15272_v12 = vpop.f32.mrb[123].mxu1  ;;  %21579 = vmatprep.subr.bf16.mxu0 %v18904_v57 }
 0xe25   :  { %17843 = vmatprep.mubr.msk.f32.mxu1 %vm8498_vm3, %v15272_v12 }
 0xe26   :  { %15680 = vmatmul.mubr.f32.vlgmr.msra.gmra.mrb[130].mxu1 %v15270_v45 }
 0xe27   :  { %21581 = vmatpush3.bf16.msra.mxu0 %v18896_v42  ;;  %21588 = vmatpush1.bf16.msra.mxu1 %v18906_v49  ;;  %v15276_v7 = vpop.f32.mrb[124].mxu1 }
 0xe28   :  { %v15278_v53 = vpop.f32.mrb[125].mxu1  ;;  %21583 = vmatprep.subr.bf16.mxu0 %v18905_v35  ;;  %21589 = vmatprep.subr.bf16.mxu1 %v27195_v31 }
 0xe29   :  { %17844 = vmatprep.mubr.msk.f32.mxu1 %vm8498_vm3, %v15278_v53  ;;  %v18980_v53 = vld [vmem:[%s27209_s29 + $0x8] sm:$0xff]  }
 0xe2a   :  { %15685 = vmatmul.mubr.f32.gmra.mrb[132].mxu1 %v15276_v7  ;;  %v18740_v7 = vld [vmem:[%s27209_s29] sm:$0xff]  }
 0xe2b   :  { %21585 = vmatpush3.bf16.msra.mxu0 %v18897_v13  ;;  %21591 = vmatpush1.bf16.msra.mxu1 %v18907_v27  ;;  %v26646_v5 = vpop.f32.mrb[126].mxu1  ;;  %v18981_v13 = vld [vmem:[%s27209_s29 + $0x10] sm:$0xff]   ;;  %v16165_v27 = vld [vmem:[%s27209_s29 + $0x18] sm:$0xf] }
 0xe2c   :  { %21592 = vmatprep.subr.bf16.mxu1 %v27195_v31  ;;  %21629 = vmatprep.subr.bf16.mxu0 %v18958_v63  ;;  %v26650_v54 = vpop.f32.mrb[127].mxu1  ;;  %v16172_v63 = vunpack.c.l.bf16 %v16165_v27 }
 0xe2d   :  { %17845 = vmatprep.mubr.msk.f32.mxu1 %vm8498_vm3, %v15260_v58  ;;  %v18975_v58 = vld [vmem:[%s22788_s28 + $0x2a8] sm:$0xff]  }
 0xe2e   :  { %15761 = vmatmul.mubr.f32.vlgmr.msra.gmra.mrb[110].mxu0 %v26607_v51  ;;  %v18963_v51 = vld [vmem:[%s22788_s28 + $0x248] sm:$0xff]  }
 0xe2f   :  { %15765 = vmatprep.mubr.f32.mxu0 %v26611_v25  ;;  %21594 = vmatpush1.bf16.msra.mxu1 %v18908_v14  ;;  %v26657_v55 = vpop.f32.mrb[128].mxu1  ;;  %v18964_v25 = vld [vmem:[%s22788_s28 + $0x250] sm:$0xff]  }
 0xe30   :  { %21631 = vmatpush3.bf16.msra.mxu0 %v18950_v9  ;;  %21595 = vmatprep.subr.bf16.mxu1 %v27195_v31  ;;  %v26661_v26 = vpop.f32.mrb[129].mxu1 }
 0xe31   :  { %21633 = vmatprep.subr.bf16.mxu0 %v18959_v56 }
 0xe32   :  { %15766 = vmatmul.mubr.f32.gmra.mrb[112].mxu0 %v26609_v47  ;;  %v18955_v47 = vld [vmem:[%s22788_s28 + $0x208] sm:$0xff]  }
 0xe33   :  { %21597 = vmatpush1.bf16.msra.mxu1 %v18909_v18  ;;  %16037 = vmatprep.mubr.f32.mxu0 %v15183_v11  ;;  %v18968_v11 = vld [vmem:[%s22788_s28 + $0x270] sm:$0xff]  }
 0xe34   :  { %21635 = vmatpush3.bf16.msra.mxu0 %v18951_v41  ;;  %21598 = vmatprep.subr.bf16.mxu1 %v27195_v31 }
 0xe35   :  { %21637 = vmatprep.subr.bf16.mxu0 %v18960_v16 }
 0xe37   :  { %21600 = vmatpush1.bf16.msra.mxu1 %v18910_v30 }
 0xe38   :  { %21639 = vmatpush3.bf16.msra.mxu0 %v18952_v2  ;;  %21601 = vmatprep.subr.bf16.mxu1 %v27195_v31 }
 0xe39   :  { %21641 = vmatprep.subr.bf16.mxu0 %v18961_v36 }
 0xe3b   :  { %21603 = vmatpush1.bf16.msra.mxu1 %v18911_v61 }
 0xe3c   :  { %21643 = vmatpush3.bf16.msra.mxu0 %v18953_v50  ;;  %21604 = vmatprep.subr.bf16.mxu1 %v27195_v31 }
 0xe3d   :  { %21645 = vmatprep.subr.bf16.mxu0 %v18962_v60 }
 0xe3f   :  { %21606 = vmatpush1.bf16.msra.mxu1 %v18912_v44 }
 0xe40   :  { %21647 = vmatpush3.bf16.msra.mxu0 %v18954_v8  ;;  %21607 = vmatprep.subr.bf16.mxu1 %v27195_v31 }
 0xe41   :  { %21649 = vmatprep.subr.bf16.mxu0 %v18963_v51 }
 0xe43   :  { %21609 = vmatpush1.bf16.msra.mxu1 %v18913_v6 }
 0xe44   :  { %21651 = vmatpush3.bf16.msra.mxu0 %v18955_v47  ;;  %21610 = vmatprep.subr.bf16.mxu1 %v27195_v31 }
 0xe45   :  { %21653 = vmatprep.subr.bf16.mxu0 %v18964_v25 }
 0xe47   :  { %21612 = vmatpush1.bf16.msra.mxu1 %v18914_v20 }
 0xe48   :  { %21655 = vmatpush3.bf16.msra.mxu0 %v18956_v24  ;;  %21613 = vmatprep.subr.bf16.mxu1 %v27195_v31 }
 0xe49   :  { %21657 = vmatprep.subr.bf16.mxu0 %v18965_v62 }
 0xe4b   :  { %21615 = vmatpush1.bf16.msra.mxu1 %v18915_v21 }
 0xe4c   :  { %21659 = vmatpush3.bf16.msra.mxu0 %v18957_v15  ;;  %21616 = vmatprep.subr.bf16.mxu1 %v27195_v31 }
 0xe4d   :  { %21660 = vmatprep.subr.bf16.mxu0 %v27195_v31 }
 0xe4f   :  { %16038 = vmatmul.mubr.f32.vlgmr.msra.gmra.mrb[114].mxu0 %v26617_v59  ;;  %21618 = vmatpush1.bf16.msra.mxu1 %v18916_v17  ;;  %v18918_v59 = vld [vmem:[%s22788_s28 + $0xe0] sm:$0xff]  }
 0xe50   :  { %16042 = vmatprep.mubr.f32.mxu0 %v26624_v1  ;;  %21662 = vmatpush1.bf16.msra.mxu0 %v18966_v23  ;;  %v18971_v1 = vld [vmem:[%s22788_s28 + $0x288] sm:$0xff]  }
 0xe51   :  { %21619 = vmatprep.subr.bf16.mxu1 %v27195_v31  ;;  %21663 = vmatprep.subr.bf16.mxu0 %v27195_v31 }
 0xe53   :  { %16043 = vmatmul.mubr.f32.gmra.mrb[116].mxu0 %v26621_v32  ;;  %21621 = vmatpush1.bf16.msra.mxu1 %v18917_v38  ;;  %v18969_v32 = vld [vmem:[%s22788_s28 + $0x278] sm:$0xff]   ;;  %v17909_v38 = vld [vmem:[%s27210_s3] ss:$0 sm:$0xff] }
 0xe54   :  { %21665 = vmatpush1.bf16.msra.mxu0 %v18967_v4  ;;  %21622 = vmatprep.subr.bf16.mxu1 %v27195_v31 }
 0xe55   :  { %21666 = vmatprep.subr.bf16.mxu0 %v27195_v31  ;;  %17907 = vmatprep.mubr.msk.f32.mxu0 %vm8498_vm3, %v26650_v54 }
 0xe57   :  { %21624 = vmatpush1.bf16.msra.mxu1 %v18918_v59 }
 0xe58   :  { %21668 = vmatpush1.bf16.msra.mxu0 %v18968_v11  ;;  %21625 = vmatprep.subr.bf16.mxu1 %v27195_v31 }
 0xe59   :  { %21669 = vmatprep.subr.bf16.mxu0 %v27195_v31 }
 0xe5b   :  { %21627 = vmatpush1.bf16.msra.mxu1 %v18919_v37 }
 0xe5c   :  { %21671 = vmatpush1.bf16.msra.mxu0 %v18969_v32  ;;  %21702 = vmatprep.subr.bf16.mxu1 %v27195_v31 }
 0xe5d   :  { %21672 = vmatprep.subr.bf16.mxu0 %v27195_v31 }
 0xe5e   :  { %15836 = vmatmul.mubr.f32.vlgmr.msra.gmra.mrb[134].mxu1 %v26627_v22  ;;  %v18973_v22 = vld [vmem:[%s22788_s28 + $0x298] sm:$0xff]  }
 0xe5f   :  { %17846 = vmatprep.mubr.msk.f32.mxu1 %vm8498_vm3, %v26633_v34  ;;  %v18978_v34 = vld [vmem:[%s22788_s28 + $0x2c0] sm:$0xff]   ;;  %21704 = vmatpush3.bf16.msra.mxu1 %v18740_v7 }
 0xe60   :  { %21674 = vmatpush1.bf16.msra.mxu0 %v18970_v28  ;;  %21705 = vmatprep.subr.bf16.mxu1 %v27195_v31 }
 0xe61   :  { %21675 = vmatprep.subr.bf16.mxu0 %v27195_v31 }
 0xe62   :  { %15841 = vmatmul.mubr.f32.gmra.mrb[136].mxu1 %v26631_v29  ;;  %v18977_v29 = vld [vmem:[%s22788_s28 + $0x2b8] sm:$0xff]   ;;  %s22696_s28 = smov 48  }
 0xe63   :  { %19402 = vmatprep.mubr.msk.f32.mxu1 %vm22694_vm10, %v27205_v3  ;;  %21707 = vmatpush3.bf16.msra.mxu1 %v18980_v53 }
 0xe64   :  { %21677 = vmatpush1.bf16.msra.mxu0 %v18971_v1  ;;  %21708 = vmatprep.subr.bf16.mxu1 %v27195_v31 }
 0xe65   :  { %21678 = vmatprep.subr.bf16.mxu0 %v27195_v31 }
 0xe67   :  { %21710 = vmatpush3.bf16.msra.mxu1 %v18981_v13 }
 0xe68   :  { %21680 = vmatpush1.bf16.msra.mxu0 %v18972_v0  ;;  %19400 = vmatprep.subr.mxu1 %v27205_v3 }
 0xe69   :  { %21681 = vmatprep.subr.bf16.mxu0 %v27195_v31 }
 0xe6b   :  { %19401 = vmatpush3.msra.mxu1 %v16172_v63 }
 0xe6c   :  { %21683 = vmatpush1.bf16.msra.mxu0 %v18973_v22 }
 0xe6d   :  { %21684 = vmatprep.subr.bf16.mxu0 %v27195_v31 }
 0xe70   :  { %21686 = vmatpush1.bf16.msra.mxu0 %v18974_v40 }
 0xe71   :  { %21687 = vmatprep.subr.bf16.mxu0 %v27195_v31 }
 0xe74   :  { %21689 = vmatpush1.bf16.msra.mxu0 %v18975_v58 }
 0xe75   :  { %21690 = vmatprep.subr.bf16.mxu0 %v27195_v31 }
 0xe78   :  { %21692 = vmatpush1.bf16.msra.mxu0 %v18976_v39 }
 0xe79   :  { %21693 = vmatprep.subr.bf16.mxu0 %v27195_v31 }
 0xe7c   :  { %21695 = vmatpush1.bf16.msra.mxu0 %v18977_v29 }
 0xe7d   :  { %21696 = vmatprep.subr.bf16.mxu0 %v27195_v31 }
 0xe80   :  { %21698 = vmatpush1.bf16.msra.mxu0 %v18978_v34 }
 0xe81   :  { %21699 = vmatprep.subr.bf16.mxu0 %v27195_v31 }
 0xe84   :  { %21701 = vmatpush1.bf16.msra.mxu0 %v18979_v52 }
 0xe87   :  { %16113 = vmatmul.mubr.f32.vlgmr.msra.gmra.mrb[118].mxu0 %v26646_v5 }
 0xe88   :  { %17908 = vmatprep.mubr.msk.f32.mxu0 %vm8498_vm3, %v26661_v26 }
 0xe8b   :  { %16118 = vmatmul.mubr.f32.gmra.mrb[120].mxu0 %v26657_v55 }
 0xee1   :  { %v19201_v57 = vpop.f32.mrb[106].mxu0 }
 0xee2   :  { %v19202_v45 = vpop.f32.mrb[107].mxu0 }
 0xee3   :  { %v19203_v12 = vadd.f32 %v19202_v45, %v19201_v57 }
 0xee5   :  { %v19204_v42 = vpop.f32.mrb[108].mxu0 }
 0xee6   :  { %v19205_v49 = vpop.f32.mrb[109].mxu0 }
 0xee7   :  { %v19206_v35 = vadd.f32 %v19205_v49, %v19204_v42 }
 0xef9   :  { %v15681_v5 = vpop.f32.mrb[130].mxu1 }
 0xefa   :  { %v15682_v14 = vadd.f32 %v19203_v12, %v15681_v5  ;;  %v15683_v54 = vpop.f32.mrb[131].mxu1 }
 0xefd   :  { %v15686_v9 = vpop.f32.mrb[132].mxu1 }
 0xefe   :  { %v15687_v56 = vadd.f32 %v19206_v35, %v15686_v9  ;;  %v15688_v55 = vpop.f32.mrb[133].mxu1 }
 0xf01   :  { %v19239_v18 = vpop.f32.mrb[110].mxu0 }
 0xf02   :  { %v19240_v26 = vpop.f32.mrb[111].mxu0 }
 0xf03   :  { %v19241_v41 = vadd.f32 %v19240_v26, %v19239_v18 }
 0xf05   :  { %v19242_v16 = vpop.f32.mrb[112].mxu0  ;;  %v15763_v30 = vadd.f32 %v19241_v41, %v15682_v14 }
 0xf06   :  { %v19243_v2 = vpop.f32.mrb[113].mxu0 }
 0xf07   :  { %v19244_v36 = vadd.f32 %v19243_v2, %v19242_v16 }
 0xf09   :  { %v15768_v61 = vadd.f32 %v19244_v36, %v15687_v56 }
 0xf22   :  { %v19277_v50 = vpop.f32.mrb[114].mxu0 }
 0xf23   :  { %v19278_v60 = vpop.f32.mrb[115].mxu0 }
 0xf24   :  { %v19279_v44 = vadd.f32 %v19278_v60, %v19277_v50  ;;  %v16252_v50 = vld [vmem:[%s27211_s8] sm:$0x1] }
 0xf26   :  { %v19280_v8 = vpop.f32.mrb[116].mxu0 }
 0xf27   :  { %v19281_v51 = vpop.f32.mrb[117].mxu0 }
 0xf28   :  { %v19282_v6 = vadd.f32 %v19281_v51, %v19280_v8  ;;  %v22480_v8 = vld [vmem:[%s27212_s14] ss:$28 sps:$4 sm:$0xff]  }
 0xf31   :  { %v15837_v47 = vpop.f32.mrb[134].mxu1 }
 0xf32   :  { %v15838_v25 = vadd.f32 %v15837_v47, %v15763_v30  ;;  %v15839_v20 = vpop.f32.mrb[135].mxu1 }
 0xf33   :  { %v22481_v20 = vld [vmem:[%s27212_s14 + $0x3c] ss:$28 sps:$4 sm:$0xff]  }
 0xf35   :  { %v15842_v24 = vpop.f32.mrb[136].mxu1 }
 0xf36   :  { %v15843_v62 = vadd.f32 %v15842_v24, %v15768_v61  ;;  %v15844_v21 = vpop.f32.mrb[137].mxu1  ;;  %v22483_v24 = vld [vmem:[%s27212_s14 + $0x38] ss:$28 sps:$4 sm:$0xff]  }
 0xf37   :  { %v22484_v21 = vld [vmem:[%s27212_s14 + $0x74] ss:$28 sps:$4 sm:$0xff]  }
 0xf5a   :  { %v16114_v15 = vpop.f32.mrb[118].mxu0 }
 0xf5b   :  { %v16115_v17 = vadd.f32 %v19279_v44, %v16114_v15  ;;  %v16116_v23 = vpop.f32.mrb[119].mxu0  ;;  %v22478_v44 = vld [vmem:[%s27212_s14 + $0x4] ss:$28 sps:$4 sm:$0xff]   ;;  %v22486_v15 = vld [vmem:[%s27212_s14 + $0x70] ss:$28 sps:$4 sm:$0xff]  }
 0xf5c   :  { %21712 = vmatprep.subr.bf16.mxu1 %v22478_v44  ;;  %v22501_v44 = vld [vmem:[%s27212_s14 + $0x48] ss:$28 sps:$4 sm:$0xff]  }
 0xf5d   :  { %v16123_v4 = vadd.f32 %v16115_v17, %v15838_v25  ;;  %v16375_v17 = vld [vmem:[%s27212_s14 + $0xa8] sm:$0xff] }
 0xf5e   :  { %v16119_v59 = vpop.f32.mrb[120].mxu0  ;;  %v16421_v23 = vunpack.c.l.bf16 %v16375_v17 }
 0xf5f   :  { %v16132_v11 = vadd.f32 %v17909_v38, %v16123_v4  ;;  %v16120_v37 = vadd.f32 %v19282_v6, %v16119_v59  ;;  %v16121_v32 = vpop.f32.mrb[121].mxu0  ;;  %v16273_v6 = vld [vmem:[%s27213_s19] sm:$0x1]  ;;  %v22487_v4 = vld [vmem:[%s27212_s14 + $0xc] ss:$28 sps:$4 sm:$0xff]  }
 0xf61   :  { %v26749_v28 = vmax.f32 %v16132_v11, 0.0  ;;  %v16124_v1 = vadd.f32 %v16120_v37, %v15843_v62 }
 0xf63   :  { %v16133_v0 = vadd.f32 %v17909_v38, %v16124_v1  ;;  %v16147_v22 = vmul.f32 %v26749_v28, %v26749_v28  ;;  %v16137_v58 = vsel %vm16136_vm11, %v26749_v28, 0.0  ;;  %v16422_v38 = vunpack.c.h.bf16 %v16375_v17  ;;  %v22510_v17 = vld [vmem:[%s27217_s20] ss:$16 sps:$4 sm:$0xff]  }
 0xf65   :  { %v26753_v40 = vmax.f32 %v16133_v0, 0.0  ;;  %v16149_v52 = vsel %vm16136_vm11, %v16147_v22, 0.0 }
 0xf67   :  { %v16139_v39 = vsel %vm16138_vm12, %v26753_v40, 0.0  ;;  %v16148_v29 = vmul.f32 %v26753_v40, %v26753_v40 }
 0xf68   :  { %v16140_v34 = vadd.f32 %v16139_v39, %v16137_v58 }
 0xf69   :  { %v16150_v57 = vsel %vm16138_vm12, %v16148_v29, 0.0 }
 0xf6a   :  { %v16141_v45 = vrot.slane %v16140_v34, 4  ;;  %v16151_v12 = vadd.f32 %v16150_v57, %v16149_v52 }
 0xf6c   :  { %v16142_v42 = vadd.f32 %v16141_v45, %v16140_v34  ;;  %v16152_v49 = vrot.slane %v16151_v12, 4 }
 0xf6e   :  { %v16143_v35 = vrot.slane %v16142_v42, 2  ;;  %v16153_v7 = vadd.f32 %v16152_v49, %v16151_v12 }
 0xf70   :  { %v16144_v53 = vadd.f32 %v16143_v35, %v16142_v42  ;;  %v16154_v13 = vrot.slane %v16153_v7, 2 }
 0xf72   :  { %v16145_v27 = vrot.slane %v16144_v53, 1  ;;  %v16155_v63 = vadd.f32 %v16154_v13, %v16153_v7 }
 0xf74   :  { %v16156_v5 = vrot.slane %v16155_v63, 1  ;;  %v16146_v14 = vadd.f32 %v16145_v27, %v16144_v53 }
 0xf76   :  { %v16157_v54 = vadd.f32 %v16156_v5, %v16155_v63 }
 0xf78   :  { %v16158_v9 = vsel %vm8704_vm2, %v16146_v14, %v16157_v54  ;;  %vm16797_vm2 = vcmask 113664  }
 0xf79   :  { %19403 = vmatmul.mubr.msk.f32.vlgmr.msra.gmra.mrb[138].mxu1 %vm16136_vm11, %v16158_v9 }
 0xf7a   :  { %16498 = vmatprep.mubr.f32.mxu1 %v27205_v3  ;;  %21714 = vmatpush1.bf16.msra.mxu1 %v22480_v8  ;;  %v22502_v8 = vld [vmem:[%s27212_s14 + $0x84] ss:$28 sps:$4 sm:$0xff]  }
 0xf7b   :  { %21716 = vmatprep.subr.bf16.mxu1 %v22481_v20  ;;  %v22505_v20 = vld [vmem:[%s27212_s14 + $0x18] ss:$28 sps:$4 sm:$0xff]  }
 0xf7e   :  { %21718 = vmatpush1.bf16.msra.mxu1 %v22483_v24  ;;  %v22506_v24 = vld [vmem:[%s27212_s14 + $0x50] ss:$28 sps:$4 sm:$0xff]  }
 0xf7f   :  { %21720 = vmatprep.subr.bf16.mxu1 %v22484_v21 }
 0xf82   :  { %21722 = vmatpush1.bf16.msra.mxu1 %v22486_v15  ;;  %v22508_v15 = vld [vmem:[%s27217_s20 + $0x4] ss:$16 sps:$4 sm:$0xff]  }
 0xf83   :  { %16446 = vmatprep.subr.mxu1 %v16422_v38  ;;  %21764 = vmatprep.subr.bf16.mxu0 %v22508_v15  ;;  %v22516_v38 = vld [vmem:[%s27217_s20 + $0x20] ss:$16 sps:$4 sm:$0xff]  }
 0xf84   :  { %21766 = vmatpush1.bf16.msra.mxu0 %v22510_v17 }
 0xf86   :  { %16447 = vmatpush1.msra.mxu1 %v16421_v23  ;;  %v22514_v23 = vld [vmem:[%s27217_s20 + $0x24] ss:$16 sps:$4 sm:$0xff]  }
 0xf87   :  { %21724 = vmatprep.subr.bf16.mxu1 %v22487_v4  ;;  %21768 = vmatprep.subr.bf16.mxu0 %v22514_v23  ;;  %v22520_v4 = vld [vmem:[%s27217_s20 + $0x44] ss:$16 sps:$4 sm:$0xff]  }
 0xf88   :  { %21770 = vmatpush1.bf16.msra.mxu0 %v22516_v38 }
 0xf89   :  { %21772 = vmatprep.subr.bf16.mxu0 %v22520_v4 }
0x104c   :  { %v16242_v56 = vpop.f32.mrb[138].mxu1 }
0x104d   :  { %v16246_v55 = vmul.f32 0.010204081, %v16242_v56  ;;  %v19404_v18 = vpop.f32.mrb[139].mxu1  ;;  %v22489_v56 = vld [vmem:[%s27212_s14 + $0x8] ss:$28 sps:$4 sm:$0xff]  }
0x104e   :  { %v22490_v18 = vld [vmem:[%s27212_s14 + $0x44] ss:$28 sps:$4 sm:$0xff]  }
0x104f   :  { %v16247_v26 = vmul.f32 %v16246_v55, %v16246_v55 }
0x1051   :  { %v16249_v41 = vrot.slane %v16247_v26, 7 }
0x1053   :  { %v16251_v16 = vsub.f32 %v16246_v55, %v16249_v41  ;;  %v22492_v41 = vld [vmem:[%s27212_s14 + $0x40] ss:$28 sps:$4 sm:$0xff]  }
0x1055   :  { %v16253_v30 = vadd.f32 1e-05, %v16251_v16 }
0x1057   :  { %22606 = vrsqrt.f32 %v16253_v30  ;;  %v16376_v30 = vld [vmem:[%s27212_s14 + $0xb0] sm:$0xff] }
0x1061   :  { %v22607_v2 = vpop.eup %22606 }
0x1062   :  { %v16262_v36 = vrot.slane %v22607_v2, %v27206_v33  ;;  %v22495_v2 = vld [vmem:[%s27212_s14 + $0x78] ss:$28 sps:$4 sm:$0xff]  }
0x1064   :  { %v16263_v61 = vcombine.high %v16262_v36, %v16262_v36  ;;  %v16423_v36 = vunpack.c.l.bf16 %v16376_v30 }
0x1066   :  { %v16270_v60 = vrot.slane %v16263_v61, %v27206_v33  ;;  %v22496_v61 = vld [vmem:[%s27212_s14 + $0x14] ss:$28 sps:$4 sm:$0xff]  }
0x1068   :  { %v16272_v51 = vmul.f32 %v16270_v60, %v16252_v50  ;;  %v22498_v50 = vld [vmem:[%s27212_s14 + $0x10] ss:$28 sps:$4 sm:$0xff]  }
0x1069   :  { %v22499_v60 = vld [vmem:[%s27212_s14 + $0x4c] ss:$28 sps:$4 sm:$0xff]  }
0x106a   :  { %v16274_v47 = vmul.f32 %v16272_v51, %v16246_v55  ;;  %v16280_v25 = vrot.slane %v16272_v51, %v27201_v48 }
0x106c   :  { %v16275_v62 = vsub.f32 %v16273_v6, %v16274_v47  ;;  %16284 = vrot.lane.b32.xlu1 %v16280_v25, %s27214_s24  ;;  %16281 = vrot.lane.b32.xlu0 %v16280_v25, %s27215_s30  ;;  %v22504_v6 = vld [vmem:[%s27212_s14 + $0x80] ss:$28 sps:$4 sm:$0xff]  }
0x106e   :  { %v16314_v33 = vrot.slane %v16275_v62, %v27201_v48 }
0x1070   :  { %16287 = vrot.lane.b32.xlu0 %v16280_v25, %s27216_s7  ;;  %16315 = vrot.lane.b32.xlu1 %v16314_v33, %s27215_s30 }
0x1074   :  { %16290 = vrot.lane.b32.xlu0 %v16280_v25, %s22691_s17  ;;  %16318 = vrot.lane.b32.xlu1 %v16314_v33, %s27214_s24 }
0x1078   :  { %16293 = vrot.lane.b32.xlu0 %v16280_v25, %s22695_s15  ;;  %16321 = vrot.lane.b32.xlu1 %v16314_v33, %s27216_s7 }
0x107c   :  { %16296 = vrot.lane.b32.xlu0 %v16280_v25, %s22696_s28  ;;  %16324 = vrot.lane.b32.xlu1 %v16314_v33, %s22691_s17 }
0x1080   :  { %16327 = vrot.lane.b32.xlu0 %v16314_v33, %s22695_s15  ;;  %16330 = vrot.lane.b32.xlu1 %v16314_v33, %s22696_s28  ;;  %v16378_v33 = vld [vmem:[%s27212_s14 + $0xc0] sm:$0xf] }
0x1081   :  { %v16427_v21 = vunpack.c.l.bf16 %v16378_v33 }
0x10de   :  { %v16285_v59 = vpop.permute.xlu1 %16284  ;;  %v16282_v11 = vpop.permute.xlu0 %16281 }
0x10df   :  { %v16300_v22 = vsel %vm16299_vm13, %v16272_v51, %v16282_v11  ;;  %v16377_v51 = vld [vmem:[%s27212_s14 + $0xb8] sm:$0xff]  ;;  %v22526_v11 = vld [vmem:[%s27217_s20 + $0x64] ss:$16 sps:$4 sm:$0xff]  }
0x10e0   :  { %v16302_v29 = vsel %vm16301_vm14, %v16300_v22, %v16285_v59  ;;  %v16426_v47 = vunpack.c.h.bf16 %v16377_v51  ;;  %v16425_v25 = vunpack.c.l.bf16 %v16377_v51  ;;  %v22522_v59 = vld [vmem:[%s27217_s20 + $0x40] ss:$16 sps:$4 sm:$0xff]   ;;  %v16741_v51 = vld [vmem:[%s27218_s26 + $0x8] sm:$0xff] }
0x10e1   :  { %21774 = vmatpush1.bf16.msra.mxu0 %v22522_v59  ;;  %v22540_v22 = vld [vmem:[%s27217_s20 + $0xa0] ss:$16 sps:$4 sm:$0xff]  }
0x10e2   :  { %v16288_v37 = vpop.permute.xlu0 %16287  ;;  %v16316_v32 = vpop.permute.xlu1 %16315  ;;  %21776 = vmatprep.subr.bf16.mxu0 %v22526_v11 }
0x10e3   :  { %v16304_v34 = vsel %vm16303_vm15, %v16302_v29, %v16288_v37  ;;  %v16333_v42 = vsel %vm16299_vm13, %v16275_v62, %v16316_v32  ;;  %v22507_v62 = vld [vmem:[%s27212_s14 + $0x88] ss:$28 sps:$4 sm:$0xff]   ;;  %v22528_v37 = vld [vmem:[%s27217_s20 + $0x60] ss:$16 sps:$4 sm:$0xff]  }
0x10e4   :  { %v22532_v32 = vld [vmem:[%s27217_s20 + $0x84] ss:$16 sps:$4 sm:$0xff]  }
0x10e5   :  { %21778 = vmatpush1.bf16.msra.mxu0 %v22528_v37  ;;  %v22550_v29 = vld [vmem:[%s27217_s20 + $0xe4] ss:$16 sps:$4 sm:$0xff]  }
0x10e6   :  { %v16291_v1 = vpop.permute.xlu0 %16290  ;;  %v16319_v0 = vpop.permute.xlu1 %16318  ;;  %21780 = vmatprep.subr.bf16.mxu0 %v22532_v32  ;;  %v16742_v32 = vld [vmem:[%s27218_s26 + $0x10] sm:$0xff] }
0x10e7   :  { %v16305_v52 = vsel %vm9288_vm5, %v16304_v34, %v16291_v1  ;;  %v16334_v35 = vsel %vm16301_vm14, %v16333_v42, %v16319_v0  ;;  %v22534_v1 = vld [vmem:[%s27217_s20 + $0x80] ss:$16 sps:$4 sm:$0xff]   ;;  %v22538_v0 = vld [vmem:[%s27217_s20 + $0xa4] ss:$16 sps:$4 sm:$0xff]  }
0x10e8   :  { %v22552_v34 = vld [vmem:[%s27217_s20 + $0xe0] ss:$16 sps:$4 sm:$0xff]   ;;  %v22568_v42 = vld [vmem:[%s27217_s20 + $0x144] ss:$16 sps:$4 sm:$0xff]  }
0x10e9   :  { %21782 = vmatpush1.bf16.msra.mxu0 %v22534_v1 }
0x10ea   :  { %v16294_v58 = vpop.permute.xlu0 %16293  ;;  %v16322_v39 = vpop.permute.xlu1 %16321  ;;  %21784 = vmatprep.subr.bf16.mxu0 %v22538_v0  ;;  %v16752_v0 = vunpack.c.l.bf16 %v16742_v32 }
0x10eb   :  { %v16307_v57 = vsel %vm16306_vm0, %v16305_v52, %v16294_v58  ;;  %v16335_v53 = vsel %vm16303_vm15, %v16334_v35, %v16322_v39  ;;  %v22544_v58 = vld [vmem:[%s27217_s20 + $0xc4] ss:$16 sps:$4 sm:$0xff]   ;;  %v22546_v39 = vld [vmem:[%s27217_s20 + $0xc0] ss:$16 sps:$4 sm:$0xff]  }
0x10ec   :  { %v22556_v52 = vld [vmem:[%s27217_s20 + $0x104] ss:$16 sps:$4 sm:$0xff]  }
0x10ed   :  { %21786 = vmatpush1.bf16.msra.mxu0 %v22540_v22  ;;  %v22574_v35 = vld [vmem:[%s27217_s20 + $0x164] ss:$16 sps:$4 sm:$0xff]   ;;  %v16753_v22 = vunpack.c.h.bf16 %v16742_v32  ;;  %v22589_v32 = vld [vmem:[%s27217_s20 + $0x1ac] ss:$16 sps:$4 sm:$0xff]  }
0x10ee   :  { %v16297_v45 = vpop.permute.xlu0 %16296  ;;  %v16325_v12 = vpop.permute.xlu1 %16324  ;;  %21788 = vmatprep.subr.bf16.mxu0 %v22544_v58  ;;  %v16746_v58 = vld [vmem:[%s27218_s26 + $0x2c] sm:$0x77] }
0x10ef   :  { %v16309_v49 = vsel %vm16308_vm1, %v16307_v57, %v16297_v45  ;;  %v16336_v13 = vsel %vm9288_vm5, %v16335_v53, %v16325_v12  ;;  %v22558_v57 = vld [vmem:[%s27217_s20 + $0x100] ss:$16 sps:$4 sm:$0xff]   ;;  %v22562_v45 = vld [vmem:[%s27217_s20 + $0x124] ss:$16 sps:$4 sm:$0xff]  }
0x10f0   :  { %v16342_v7 = vrot.slane %v16309_v49, %v27201_v48  ;;  %v22564_v12 = vld [vmem:[%s27217_s20 + $0x120] ss:$16 sps:$4 sm:$0xff]   ;;  %v22580_v53 = vld [vmem:[%s27217_s20 + $0x184] ss:$16 sps:$4 sm:$0xff]  }
0x10f1   :  { %21790 = vmatpush1.bf16.msra.mxu0 %v22546_v39  ;;  %v22570_v49 = vld [vmem:[%s27217_s20 + $0x140] ss:$16 sps:$4 sm:$0xff]  }
0x10f2   :  { %v16328_v27 = vpop.permute.xlu0 %16327  ;;  %v16331_v63 = vpop.permute.xlu1 %16330  ;;  %v16343_v54 = vmul.f32 %v16342_v7, %v26749_v28  ;;  %v16344_v26 = vmul.f32 %v16342_v7, %v26753_v40  ;;  %v22493_v28 = vld [vmem:[%s27212_s14 + $0x7c] ss:$28 sps:$4 sm:$0xff]   ;;  %v16424_v40 = vunpack.c.h.bf16 %v16376_v30  ;;  %21792 = vmatprep.subr.bf16.mxu0 %v22550_v29  ;;  %v22576_v7 = vld [vmem:[%s27217_s20 + $0x160] ss:$16 sps:$4 sm:$0xff]  }
0x10f3   :  { %v16337_v5 = vsel %vm16306_vm0, %v16336_v13, %v16328_v27  ;;  %v22582_v13 = vld [vmem:[%s27217_s20 + $0x180] ss:$16 sps:$4 sm:$0xff]   ;;  %v22586_v27 = vld [vmem:[%s27217_s20 + $0x1a4] ss:$16 sps:$4 sm:$0xff]  }
0x10f4   :  { %v16338_v14 = vsel %vm16308_vm1, %v16337_v5, %v16331_v63  ;;  %v22588_v63 = vld [vmem:[%s27217_s20 + $0x1a0] ss:$16 sps:$4 sm:$0xff]   ;;  %v22592_v5 = vld [vmem:[%s27217_s20 + $0x1c4] ss:$16 sps:$4 sm:$0xff]  }
0x10f5   :  { %v16348_v9 = vrot.slane %v16338_v14, %v27201_v48  ;;  %21794 = vmatpush1.bf16.msra.mxu0 %v22552_v34  ;;  %v22594_v14 = vld [vmem:[%s27217_s20 + $0x1c0] ss:$16 sps:$4 sm:$0xff]  }
0x10f6   :  { %21796 = vmatprep.subr.bf16.mxu0 %v22556_v52  ;;  %v16759_v52 = vunpack.c.l.bf16 %v16746_v58 }
0x10f7   :  { %v16349_v55 = vadd.f32 %v16348_v9, %v16343_v54  ;;  %v16350_v16 = vadd.f32 %v16348_v9, %v16344_v26  ;;  %v22598_v54 = vld [vmem:[%s27217_s20 + $0x1e4] ss:$16 sps:$4 sm:$0xff]   ;;  %v22600_v9 = vld [vmem:[%s27217_s20 + $0x1e0] ss:$16 sps:$4 sm:$0xff]  }
0x10f8   :  { %v16744_v26 = vld [vmem:[%s27218_s26 + $0x1c] sm:$0x77] }
0x10f9   :  { %17911 = vmatmul.mubr.msk.f32.vlgmr.msra.gmra.mrb[140].mxu1 %vm16136_vm11, %v16349_v55  ;;  %21798 = vmatpush1.bf16.msra.mxu0 %v22558_v57  ;;  %v16755_v30 = vunpack.c.l.bf16 %v16744_v26 }
0x10fa   :  { %21726 = vmatpush1.bf16.msra.mxu1 %v22489_v56  ;;  %16504 = vmatprep.mubr.f32.mxu1 %v27205_v3  ;;  %v16740_v56 = vld [vmem:[%s27218_s26] sm:$0xff] }
0x10fb   :  { %21728 = vmatprep.subr.bf16.mxu1 %v22490_v18  ;;  %21800 = vmatprep.subr.bf16.mxu0 %v22562_v45  ;;  %v16749_v18 = vunpack.c.h.bf16 %v16740_v56  ;;  %v16760_v45 = vunpack.c.h.bf16 %v16746_v58  ;;  %v22601_v58 = vld [vmem:[%s27217_s20 + $0x1ec] ss:$16 sps:$4 sm:$0xff]  }
0x10fd   :  { %17912 = vmatmul.mubr.msk.f32.gmra.mrb[142].mxu1 %vm16136_vm11, %v16350_v16  ;;  %21802 = vmatpush1.bf16.msra.mxu0 %v22564_v12 }
0x10fe   :  { %21730 = vmatpush1.bf16.msra.mxu1 %v22492_v41  ;;  %16575 = vmatprep.mubr.f32.mxu1 %v27205_v3 }
0x10ff   :  { %21732 = vmatprep.subr.bf16.mxu1 %v22493_v28  ;;  %21804 = vmatprep.subr.bf16.mxu0 %v22568_v42 }
0x1101   :  { %21806 = vmatpush1.bf16.msra.mxu0 %v22570_v49 }
0x1102   :  { %21734 = vmatpush1.bf16.msra.mxu1 %v22495_v2  ;;  %21808 = vmatprep.subr.bf16.mxu0 %v22574_v35 }
0x1103   :  { %16523 = vmatprep.subr.mxu1 %v16424_v40  ;;  %v16756_v40 = vunpack.c.h.bf16 %v16744_v26 }
0x1105   :  { %21810 = vmatpush1.bf16.msra.mxu0 %v22576_v7 }
0x1106   :  { %16524 = vmatpush1.msra.mxu1 %v16423_v36  ;;  %21812 = vmatprep.subr.bf16.mxu0 %v22580_v53 }
0x1107   :  { %17913 = vmatmul.mubr.msk.f32.vlgmr.msra.gmra.mrb[144].mxu1 %vm16136_vm11, %v16349_v55  ;;  %21736 = vmatprep.subr.bf16.mxu1 %v22496_v61 }
0x1108   :  { %21738 = vmatpush1.bf16.msra.mxu1 %v22498_v50  ;;  %16581 = vmatprep.mubr.f32.mxu1 %v27205_v3 }
0x1109   :  { %21740 = vmatprep.subr.bf16.mxu1 %v22499_v60  ;;  %21814 = vmatpush1.bf16.msra.mxu0 %v22582_v13 }
0x110a   :  { %21816 = vmatprep.subr.bf16.mxu0 %v22586_v27  ;;  %v16747_v27 = vld [vmem:[%s27218_s26 + $0x34] sm:$0x7] }
0x110b   :  { %17914 = vmatmul.mubr.msk.f32.gmra.mrb[146].mxu1 %vm16136_vm11, %v16350_v16 }
0x110c   :  { %21742 = vmatpush1.bf16.msra.mxu1 %v22501_v44  ;;  %16652 = vmatprep.mubr.f32.mxu1 %v27205_v3 }
0x110d   :  { %21744 = vmatprep.subr.bf16.mxu1 %v22502_v8  ;;  %21818 = vmatpush1.bf16.msra.mxu0 %v22588_v63 }
0x110e   :  { %21820 = vmatprep.subr.bf16.mxu0 %v22592_v5  ;;  %v16743_v5 = vld [vmem:[%s27218_s26 + $0x18] sm:$0xf] }
0x1110   :  { %21746 = vmatpush1.bf16.msra.mxu1 %v22504_v6  ;;  %v16750_v6 = vunpack.c.l.bf16 %v16741_v51 }
0x1111   :  { %16600 = vmatprep.subr.mxu1 %v16426_v47  ;;  %21822 = vmatpush1.bf16.msra.mxu0 %v22594_v14  ;;  %v16751_v47 = vunpack.c.h.bf16 %v16741_v51  ;;  %v16761_v14 = vunpack.c.l.bf16 %v16747_v27  ;;  %v22537_v51 = vld [vmem:[%s27217_s20 + $0x88] ss:$16 sps:$4 sm:$0xff]   ;;  %v17067_v27 = vld [vmem:[%s22839_s16] sm:$0xf] }
0x1112   :  { %21824 = vmatprep.subr.bf16.mxu0 %v22598_v54  ;;  %v16754_v54 = vunpack.c.l.bf16 %v16743_v5  ;;  %v17076_v5 = vrot.slane %v17067_v27, %v27203_v46 }
0x1114   :  { %16601 = vmatpush1.msra.mxu1 %v16425_v25  ;;  %v16745_v25 = vld [vmem:[%s27218_s26 + $0x24] sm:$0x77] }
0x1115   :  { %17915 = vmatmul.mubr.msk.f32.vlgmr.msra.gmra.mrb[148].mxu1 %vm16136_vm11, %v16349_v55  ;;  %21748 = vmatprep.subr.bf16.mxu1 %v22505_v20  ;;  %v16757_v33 = vunpack.c.l.bf16 %v16745_v25  ;;  %v16758_v15 = vunpack.c.h.bf16 %v16745_v25  ;;  %v22547_v25 = vld [vmem:[%s27217_s20 + $0xcc] ss:$16 sps:$4 sm:$0xff]  }
0x1116   :  { %21750 = vmatpush3.bf16.msra.mxu1 %v22505_v20  ;;  %16658 = vmatprep.mubr.f32.mxu1 %v27205_v3 }
0x1117   :  { %21752 = vmatprep.subr.bf16.mxu1 %v22506_v24  ;;  %21826 = vmatpush1.bf16.msra.mxu0 %v22600_v9 }
0x1118   :  { %21891 = vmatprep.subr.bf16.mxu0 %v27195_v31 }
0x1119   :  { %17916 = vmatmul.mubr.msk.f32.gmra.mrb[150].mxu1 %vm16136_vm11, %v16350_v16 }
0x111a   :  { %21754 = vmatpush3.bf16.msra.mxu1 %v22506_v24  ;;  %19419 = vmatprep.mubr.msk.f32.mxu1 %vm16136_vm11, %v16349_v55  ;;  %v16748_v55 = vunpack.c.l.bf16 %v16740_v56 }
0x111b   :  { %21756 = vmatprep.subr.bf16.mxu1 %v22507_v62 }
0x111e   :  { %21758 = vmatpush3.bf16.msra.mxu1 %v22507_v62 }
0x111f   :  { %19417 = vmatprep.subr.mxu1 %v16427_v21 }
0x1122   :  { %19418 = vmatpush3.msra.mxu1 %v16427_v21 }
0x1123   :  { %19420 = vmatmul.mubr.msk.f32.vlgmr.msra.gmra.mrb[152].mxu1 %vm16136_vm11, %v16350_v16  ;;  %21759 = vmatprep.subr.bf16.mxu1 %v27195_v31 }
0x1124   :  { %19426 = vmatprep.mubr.msk.f32.mxu1 %vm22694_vm10, %v27205_v3 }
0x11cc   :  { %v16500_v41 = vpop.f32.mrb[140].mxu1 }
0x11cd   :  { %v16762_v16 = vmul.f32 %v16748_v55, %v16500_v41  ;;  %v16502_v28 = vpop.f32.mrb[141].mxu1 }
0x11ce   :  { %v16763_v2 = vmul.f32 %v16749_v18, %v16502_v28  ;;  %v22511_v28 = vld [vmem:[%s27217_s20 + $0xc] ss:$16 sps:$4 sm:$0xff]  }
0x11d0   :  { %v16776_v36 = vadd.f32 %v16763_v2, %v16762_v16  ;;  %v16506_v61 = vpop.f32.mrb[142].mxu1  ;;  %v16788_v16 = vld [vmem:[%s27219_s27] sm:$0x1] }
0x11d1   :  { %v16769_v50 = vmul.f32 %v16755_v30, %v16506_v61  ;;  %v16508_v60 = vpop.f32.mrb[143].mxu1  ;;  %v16789_v2 = vunpack.c.l.bf16 %v16788_v16  ;;  %v22519_v61 = vld [vmem:[%s27217_s20 + $0x28] ss:$16 sps:$4 sm:$0xff]   ;;  %v17084_v16 = vrot.slane %v17067_v27, %v27204_v43 }
0x11d2   :  { %v16770_v44 = vmul.f32 %v16756_v40, %v16508_v60  ;;  %v22513_v40 = vld [vmem:[%s27217_s20 + $0x8] ss:$16 sps:$4 sm:$0xff]  }
0x11d3   :  { %v22525_v60 = vld [vmem:[%s27217_s20 + $0x48] ss:$16 sps:$4 sm:$0xff]  }
0x11d4   :  { %v16777_v8 = vadd.f32 %v16770_v44, %v16769_v50  ;;  %v22523_v50 = vld [vmem:[%s27217_s20 + $0x4c] ss:$16 sps:$4 sm:$0xff]   ;;  %v22531_v44 = vld [vmem:[%s27217_s20 + $0x68] ss:$16 sps:$4 sm:$0xff]  }
0x11da   :  { %v16577_v20 = vpop.f32.mrb[144].mxu1 }
0x11db   :  { %v16764_v24 = vmul.f32 %v16750_v6, %v16577_v20  ;;  %v16579_v62 = vpop.f32.mrb[145].mxu1  ;;  %v22541_v6 = vld [vmem:[%s27217_s20 + $0xac] ss:$16 sps:$4 sm:$0xff]   ;;  %v22549_v20 = vld [vmem:[%s27217_s20 + $0xc8] ss:$16 sps:$4 sm:$0xff]  }
0x11dc   :  { %v16765_v21 = vmul.f32 %v16751_v47, %v16579_v62  ;;  %v22543_v47 = vld [vmem:[%s27217_s20 + $0xa8] ss:$16 sps:$4 sm:$0xff]  }
0x11dd   :  { %v16778_v17 = vadd.f32 %v16776_v36, %v16764_v24  ;;  %v22517_v36 = vld [vmem:[%s27217_s20 + $0x2c] ss:$16 sps:$4 sm:$0xff]   ;;  %v22555_v62 = vld [vmem:[%s27217_s20 + $0xe8] ss:$16 sps:$4 sm:$0xff]  }
0x11de   :  { %v16583_v23 = vpop.f32.mrb[146].mxu1  ;;  %v22553_v24 = vld [vmem:[%s27217_s20 + $0xec] ss:$16 sps:$4 sm:$0xff]  }
0x11df   :  { %v16780_v38 = vadd.f32 %v16778_v17, %v16765_v21  ;;  %v16771_v4 = vmul.f32 %v16757_v33, %v16583_v23  ;;  %v16585_v59 = vpop.f32.mrb[147].mxu1  ;;  %v22559_v33 = vld [vmem:[%s27217_s20 + $0x10c] ss:$16 sps:$4 sm:$0xff]   ;;  %v22561_v21 = vld [vmem:[%s27217_s20 + $0x108] ss:$16 sps:$4 sm:$0xff]  }
0x11e0   :  { %v16772_v11 = vmul.f32 %v16758_v15, %v16585_v59  ;;  %v22565_v15 = vld [vmem:[%s27217_s20 + $0x12c] ss:$16 sps:$4 sm:$0xff]   ;;  %v22567_v17 = vld [vmem:[%s27217_s20 + $0x128] ss:$16 sps:$4 sm:$0xff]  }
0x11e1   :  { %v16779_v37 = vadd.f32 %v16777_v8, %v16771_v4  ;;  %v22535_v8 = vld [vmem:[%s27217_s20 + $0x8c] ss:$16 sps:$4 sm:$0xff]   ;;  %v22579_v59 = vld [vmem:[%s27217_s20 + $0x168] ss:$16 sps:$4 sm:$0xff]  }
0x11e2   :  { %v22571_v23 = vld [vmem:[%s27217_s20 + $0x14c] ss:$16 sps:$4 sm:$0xff]  }
0x11e3   :  { %v16781_v1 = vadd.f32 %v16779_v37, %v16772_v11  ;;  %v22577_v4 = vld [vmem:[%s27217_s20 + $0x16c] ss:$16 sps:$4 sm:$0xff]   ;;  %v22585_v37 = vld [vmem:[%s27217_s20 + $0x188] ss:$16 sps:$4 sm:$0xff]  }
0x11e4   :  { %v22583_v11 = vld [vmem:[%s27217_s20 + $0x18c] ss:$16 sps:$4 sm:$0xff]  }
0x11e8   :  { %v16654_v39 = vpop.f32.mrb[148].mxu1 }
0x11e9   :  { %v16766_v29 = vmul.f32 %v16752_v0, %v16654_v39  ;;  %v16656_v34 = vpop.f32.mrb[149].mxu1  ;;  %v22595_v0 = vld [vmem:[%s27217_s20 + $0x1cc] ss:$16 sps:$4 sm:$0xff]   ;;  %v22603_v39 = vld [vmem:[%s27217_s20 + $0x1e8] ss:$16 sps:$4 sm:$0xff]  }
0x11ea   :  { %v16767_v57 = vmul.f32 %v16753_v22, %v16656_v34  ;;  %v22597_v22 = vld [vmem:[%s27217_s20 + $0x1c8] ss:$16 sps:$4 sm:$0xff]   ;;  %v17919_v34 = vld [vmem:[%s27221_s1] ss:$0 sm:$0xff] }
0x11eb   :  { %v16782_v12 = vadd.f32 %v16780_v38, %v16766_v29  ;;  %v22573_v38 = vld [vmem:[%s27217_s20 + $0x148] ss:$16 sps:$4 sm:$0xff]   ;;  %v16874_v29 = vld [vmem:[%s27220_s22] sm:$0x3] }
0x11ec   :  { %v16660_v42 = vpop.f32.mrb[150].mxu1  ;;  %17153 = vmatprep.mubr.f32.mxu0 %v16874_v29 }
0x11ed   :  { %v16784_v49 = vadd.f32 %v16782_v12, %v16767_v57  ;;  %v16773_v35 = vmul.f32 %v16759_v52, %v16660_v42  ;;  %v16662_v7 = vpop.f32.mrb[151].mxu1  ;;  %v18752_v12 = vld [vmem:[%s22844_s11] sm:$0xff]   ;;  %v18982_v42 = vld [vmem:[%s22844_s11 + $0x8] sm:$0xff]  }
0x11ee   :  { %v16774_v53 = vmul.f32 %v16760_v45, %v16662_v7  ;;  %v18986_v7 = vld [vmem:[%s22844_s11 + $0x28] sm:$0xff]  }
0x11ef   :  { %v16783_v13 = vadd.f32 %v16781_v1, %v16773_v35  ;;  %v22591_v1 = vld [vmem:[%s27217_s20 + $0x1a8] ss:$16 sps:$4 sm:$0xff]  }
0x11f0   :  { %v18984_v35 = vld [vmem:[%s22844_s11 + $0x18] sm:$0xff]  }
0x11f1   :  { %v16785_v63 = vadd.f32 %v16783_v13, %v16774_v53  ;;  %v18987_v53 = vld [vmem:[%s22844_s11 + $0x30] sm:$0xff]   ;;  %v18988_v13 = vld [vmem:[%s22844_s11 + $0x38] sm:$0xff]  }
0x11f6   :  { %v19421_v9 = vpop.f32.mrb[152].mxu1 }
0x11f7   :  { %v16775_v56 = vmul.f32 %v19421_v9, %v16761_v14  ;;  %v16731_v55 = vpop.f32.mrb[153].mxu1 }
0x11f8   :  { %v16768_v18 = vmul.f32 %v16754_v54, %v16731_v55 }
0x11f9   :  { %v16787_v26 = vadd.f32 %v16785_v63, %v16775_v56  ;;  %v17072_v63 = vrot.slane %v17067_v27, %v27201_v48 }
0x11fa   :  { %v16786_v41 = vadd.f32 %v16784_v49, %v16768_v18  ;;  %v18983_v49 = vld [vmem:[%s22844_s11 + $0x10] sm:$0xff]  }
0x11fc   :  { %v21760_v30 = vpack.c.bf16 %v16787_v26, %v16786_v41 }
0x11fe   :  { %21762 = vmatpush3.bf16.msk.msra.mxu1 %vm25732_vm7, %v21760_v30 }
0x11ff   :  { %21828 = vmatprep.subr.bf16.mxu1 %v22511_v28  ;;  %v17080_v28 = vrot.slane %v17067_v27, %v27202_v10 }
0x1201   :  { %19427 = vmatmul.mubr.msk.f32.vlgmr.msra.gmra.mrb[154].mxu1 %vm16797_vm2, %v16789_v2 }
0x1202   :  { %21830 = vmatpush1.bf16.msra.mxu1 %v22513_v40  ;;  %17224 = vmatprep.mubr.f32.mxu1 %v16874_v29 }
0x1203   :  { %21832 = vmatprep.subr.bf16.mxu1 %v22517_v36 }
0x1206   :  { %21834 = vmatpush1.bf16.msra.mxu1 %v22519_v61 }
0x1207   :  { %21836 = vmatprep.subr.bf16.mxu1 %v22523_v50 }
0x120a   :  { %21838 = vmatpush1.bf16.msra.mxu1 %v22525_v60  ;;  %v17250_v60 = vld [vmem:[%s27222_s6] sm:$0x3] }
0x120b   :  { %21840 = vmatprep.subr.bf16.mxu1 %v22529_v19 }
0x120e   :  { %21842 = vmatpush1.bf16.msra.mxu1 %v22531_v44 }
0x120f   :  { %21844 = vmatprep.subr.bf16.mxu1 %v22535_v8 }
0x1212   :  { %21846 = vmatpush1.bf16.msra.mxu1 %v22537_v51 }
0x1213   :  { %21848 = vmatprep.subr.bf16.mxu1 %v22541_v6 }
0x1216   :  { %21850 = vmatpush1.bf16.msra.mxu1 %v22543_v47 }
0x1217   :  { %21852 = vmatprep.subr.bf16.mxu1 %v22547_v25 }
0x121a   :  { %21854 = vmatpush1.bf16.msra.mxu1 %v22549_v20 }
0x121b   :  { %21856 = vmatprep.subr.bf16.mxu1 %v22553_v24  ;;  %v22697_v24 = vmov 1983009808  }
0x121e   :  { %21858 = vmatpush1.bf16.msra.mxu1 %v22555_v62  ;;  %v17370_v62 = vunpack.c.l.s4 %v22697_v24 }
0x121f   :  { %21860 = vmatprep.subr.bf16.mxu1 %v22559_v33 }
0x1220   :  { %v17371_v33 = vunpack.c.0.s8 %v17370_v62 }
0x1222   :  { %21862 = vmatpush1.bf16.msra.mxu1 %v22561_v21  ;;  %v17925_v21 = vld [vmem:[%s22849_s2] ss:$0 sm:$0xff] }
0x1223   :  { %21864 = vmatprep.subr.bf16.mxu1 %v22565_v15  ;;  %v27223_v15 = vld [vmem:[#allocation18_spill] sm:$0xff] }
0x1226   :  { %21866 = vmatpush1.bf16.msra.mxu1 %v22567_v17  ;;  %v17374_v17 = vsub.s32 %v17371_v33, %v27223_v15 }
0x1227   :  { %21868 = vmatprep.subr.bf16.mxu1 %v22571_v23 }
0x122a   :  { %21870 = vmatpush1.bf16.msra.mxu1 %v22573_v38 }
0x122b   :  { %21872 = vmatprep.subr.bf16.mxu1 %v22577_v4 }
0x122e   :  { %21874 = vmatpush1.bf16.msra.mxu1 %v22579_v59 }
0x122f   :  { %21876 = vmatprep.subr.bf16.mxu1 %v22583_v11 }
0x1232   :  { %21878 = vmatpush1.bf16.msra.mxu1 %v22585_v37 }
0x1233   :  { %21880 = vmatprep.subr.bf16.mxu1 %v22589_v32 }
0x1236   :  { %21882 = vmatpush1.bf16.msra.mxu1 %v22591_v1 }
0x1237   :  { %21884 = vmatprep.subr.bf16.mxu1 %v22595_v0 }
0x123a   :  { %21886 = vmatpush1.bf16.msra.mxu1 %v22597_v22 }
0x123b   :  { %21888 = vmatprep.subr.bf16.mxu1 %v22601_v58 }
0x123e   :  { %21890 = vmatpush1.bf16.msra.mxu1 %v22603_v39 }
0x12d4   :  { %v16870_v52 = vpop.f32.mrb[154].mxu1 }
0x12d5   :  { %v16871_v57 = vadd.f32 %v17919_v34, %v16870_v52  ;;  %v19428_v45 = vpop.f32.mrb[155].mxu1 }
0x12d7   :  { %17154 = vmatmul.mubr.f32.vlgmr.msra.gmra.mrb[122].mxu0 %v16871_v57  ;;  %17225 = vmatmul.mubr.f32.vlgmr.msra.gmra.mrb[156].mxu1 %v16871_v57 }
0x12d8   :  { %19461 = vmatprep.mubr.msk.f32.mxu0 %vm22694_vm10, %v27205_v3  ;;  %21893 = vmatpush3.bf16.msra.mxu0 %v18752_v12  ;;  %v18985_v3 = vld [vmem:[%s22844_s11 + $0x20] sm:$0xff]  }
0x12d9   :  { %21894 = vmatprep.subr.bf16.mxu0 %v27195_v31 }
0x12dc   :  { %21896 = vmatpush3.bf16.msra.mxu0 %v18982_v42 }
0x12dd   :  { %21897 = vmatprep.subr.bf16.mxu0 %v27195_v31 }
0x12e0   :  { %21899 = vmatpush3.bf16.msra.mxu0 %v18983_v49 }
0x12e1   :  { %21900 = vmatprep.subr.bf16.mxu0 %v27195_v31 }
0x12e4   :  { %21902 = vmatpush3.bf16.msra.mxu0 %v18984_v35 }
0x12e5   :  { %21903 = vmatprep.subr.bf16.mxu0 %v27195_v31 }
0x12e8   :  { %21905 = vmatpush3.bf16.msra.mxu0 %v18985_v3 }
0x12e9   :  { %21906 = vmatprep.subr.bf16.mxu0 %v27195_v31 }
0x12ec   :  { %21908 = vmatpush3.bf16.msra.mxu0 %v18986_v7 }
0x12ed   :  { %21909 = vmatprep.subr.bf16.mxu0 %v27195_v31 }
0x12f0   :  { %21911 = vmatpush3.bf16.msra.mxu0 %v18987_v53 }
0x12f1   :  { %21912 = vmatprep.subr.bf16.mxu0 %v27195_v31 }
0x12f4   :  { %21914 = vmatpush3.bf16.msra.mxu0 %v18988_v13 }
0x13aa   :  { %v17155_v14 = vpop.f32.mrb[122].mxu0  ;;  %v17226_v54 = vpop.f32.mrb[156].mxu1 }
0x13ab   :  { %v17156_v9 = vadd.f32 %v17155_v14, %v17072_v63  ;;  %v17157_v56 = vpop.f32.mrb[123].mxu0  ;;  %v17228_v55 = vpop.f32.mrb[157].mxu1  ;;  %v17227_v48 = vadd.f32 %v17226_v54, %v17080_v28 }
0x13ac   :  { %v17158_v18 = vadd.f32 %v17157_v56, %v17076_v5  ;;  %v17229_v31 = vadd.f32 %v17228_v55, %v17084_v16 }
0x13ad   :  { %v17922_v26 = vmul.f32 -1.442695, %v17156_v9 }
0x13ae   :  { %v17923_v41 = vmul.f32 -1.442695, %v17158_v18  ;;  %v17924_v30 = vmul.f32 -1.442695, %v17229_v31 }
0x13af   :  { %22608 = vpow2.f32 %v17922_v26 }
0x13b0   :  { %22610 = vpow2.f32 %v17923_v41 }
0x13b1   :  { %22612 = vpow2.f32 %v17924_v30 }
0x13b2   :  { %22614 = vtanh.f32 %v17227_v48 }
0x13b9   :  { %v22609_v2 = vpop.eup %22608 }
0x13ba   :  { %v22611_v46 = vpop.eup %22610  ;;  %v17234_v40 = vadd.f32 1.0, %v22609_v2 }
0x13bb   :  { %v17240_v36 = vadd.f32 1.0, %v22611_v46  ;;  %v22613_v61 = vpop.eup %22612 }
0x13bc   :  { %22616 = vrcp.f32 %v17234_v40  ;;  %v22615_v50 = vpop.eup %22614  ;;  %v17247_v8 = vadd.f32 1.0, %v22613_v61 }
0x13bd   :  { %22618 = vrcp.f32 %v17240_v36 }
0x13be   :  { %22620 = vrcp.f32 %v17247_v8 }
0x13c6   :  { %v22617_v43 = vpop.eup %22616 }
0x13c7   :  { %v22619_v19 = vpop.eup %22618  ;;  %v17252_v44 = vmul.f32 %v22617_v43, %v22615_v50 }
0x13c8   :  { %v17251_v51 = vmul.f32 %v22619_v19, %v17250_v60  ;;  %v22621_v6 = vpop.eup %22620 }
0x13ca   :  { %v17253_v10 = vadd.f32 %v17252_v44, %v17251_v51 }
0x13cc   :  { %22622 = vtanh.f32 %v17253_v10 }
0x13d6   :  { %v22623_v47 = vpop.eup %22622 }
0x13d7   :  { %v17255_v25 = vmul.f32 %v22623_v47, %v22621_v6 }
0x13d9   :  { %19462 = vmatmul.mubr.f32.vlgmr.msra.gmra.mrb[124].mxu0 %v17255_v25  ;;  %v17368_v20 = vcombine.low %v17255_v25, %v17253_v10 }
0x13db   :  { %v17375_v59 = vrot.slane %v17368_v20, %v17374_v17 }
0x14ac   :  { %v17361_v23 = vpop.f32.mrb[124].mxu0 }
0x14ad   :  { %v17362_v38 = vadd.f32 %v17925_v21, %v17361_v23  ;;  %v19463_v4 = vpop.f32.mrb[125].mxu0 }
0x14af   :  { %v17382_v11 = vrot.slane %v17362_v38, %v17374_v17 }
0x14b1   :  { %v17383_v37 = vcombine.low %v17375_v59, %v17382_v11 }
0x14b3   :  { %17385 = vst [vmem:[%s22854_s10] sm:$0x3f] %v17383_v37 }
0x14b4   :  { %17390 = vsyncmov [#allocation3] }
0x14b7   :  { %s17391_s11 = vpop.sfrf %17390 }
0x14b8   :  { %p17926_p2 = scmp.ne.s32.totalorder %s17391_s11, 0 }
0x14ba   :  { %17395 = shalt.err (%p17926_p2)  }

</bundles_post_ra>
